<compile_context>
chip_gen: v7x
topology: tpu7x:2x2x1
jax: 0.10.0
libtpu: 0.0.40
codegen_flags: <defaults>
</compile_context>

<pallas_src>
from functools import partial

import numpy as np
import jax
import jax.numpy as jnp
from jax.experimental import pallas as pl
from jax.experimental.pallas import tpu as pltpu

EPS = 1e-5  # PyTorch InstanceNorm3d default (affine=False, biased variance)

# 3x3x3 tap order shared by the kernel loop, the mask table and weight stacking.
_TAPS = tuple((dd, dh, dw) for dd in (-1, 0, 1) for dh in (-1, 0, 1) for dw in (-1, 0, 1))


def _scale_focus_kernel(x_ref, w1_ref, w2_ref, wf_ref, bf_ref, mask_ref, o_ref,
                        *, H, W, S, NB, C):
    """Fused ScaleFocus forward for one grid step.

    x_ref:    (1, Cin_pad, NB*S)  flat input; NB volumes folded onto lanes
    w1_ref:   (27*C, Cin_pad)     conv1 per-tap weights stacked on rows (bf16)
    w2_ref:   (27*C, C)           conv2 per-tap weights (bf16)
    wf_ref:   (Cf, C)             final 1x1x1 conv weight (bf16)
    bf_ref:   (Cf, 1)             final conv bias (f32)
    mask_ref: (27*C, NB*S)        pre-rolled zero-padding masks (f32)
    o_ref:    (1, NB, Cf, S)
    Conv biases are intentionally omitted: they cancel under InstanceNorm
    (affine=False) mean subtraction, which happens before the ReLU.
    """
    ST = NB * S
    inv_s = 1.0 / S

    def conv3_in_relu(x, w_ref):
        # One MXU matmul for all 27 taps at once (bf16 in, f32 accumulate).
        z = jnp.dot(w_ref[...], x.astype(jnp.bfloat16),
                    preferred_element_type=jnp.float32)               # (27*C, ST)
        # Shift-and-accumulate: static (C, ST) slices, mask (pre-rolled), roll, add.
        acc = None
        for k, (dd, dh, dw) in enumerate(_TAPS):
            off = dd * H * W + dh * W + dw
            zk = z[k * C:(k + 1) * C, :]                               # (C, ST)
            if off == 0:
                piece = zk                                             # center tap: mask == 1
            else:
                zk = zk * mask_ref[pl.ds(k * C, C), :]                 # mask BEFORE roll
                piece = pltpu.roll(zk, shift=(-off) % ST, axis=1)      # piece[s] = zk[s+off]
            acc = piece if acc is None else acc + piece
        # InstanceNorm3d (biased var, two-pass) per volume segment, then ReLU.
        segs = []
        for b in range(NB):
            seg = acc[:, b * S:(b + 1) * S]
            mean = jnp.sum(seg, axis=1, keepdims=True) * inv_s
            d = seg - mean
            var = jnp.sum(d * d, axis=1, keepdims=True) * inv_s
            segs.append(jnp.maximum(d * jax.lax.rsqrt(var + EPS), 0.0))
        return segs[0] if NB == 1 else jnp.concatenate(segs, axis=1)

    x = x_ref[0]                                                       # (Cin_pad, ST)
    y = conv3_in_relu(x, w1_ref)
    y = conv3_in_relu(y, w2_ref)
    # Final Conv3d(kernel_size=1): per-voxel channel matmul + bias.
    out = jnp.dot(wf_ref[...], y.astype(jnp.bfloat16),
                  preferred_element_type=jnp.float32) + bf_ref[...]    # (Cf, ST)
    for b in range(NB):
        o_ref[0, b, :, :] = out[:, b * S:(b + 1) * S]


def _make_premasks(D, H, W, C, NB):
    """(27*C, NB*D*H*W) f32 mask table.

    Row block k (C identical rows) is the validity mask of tap k under zero
    padding, PRE-ROLLED by the tap's flat offset so it can be applied to Z
    before the lane roll, and tiled across the NB volumes folded onto lanes
    (this also zeroes every roll that would leak across a volume seam)."""
    S = D * H * W
    d = np.arange(D)[:, None, None]
    h = np.arange(H)[None, :, None]
    w = np.arange(W)[None, None, :]
    rows = []
    for dd, dh, dw in _TAPS:
        valid = ((0 <= d + dd) & (d + dd < D) &
                 (0 <= h + dh) & (h + dh < H) &
                 (0 <= w + dw) & (w + dw < W)).reshape(-1)
        off = dd * H * W + dh * W + dw
        pre = np.tile(np.roll(valid, off), NB)
        rows.append(np.broadcast_to(pre, (C, NB * S)))
    return jnp.asarray(np.concatenate(rows, axis=0).astype(np.float32))


def _stack_conv_weight(w, cin_pad):
    """(Cout, Cin, 3, 3, 3) PyTorch layout -> (27*Cout, cin_pad) bf16,
    rows ordered (kd, kh, kw, cout) to match the kernel's tap/row layout."""
    co, ci = w.shape[0], w.shape[1]
    ws = jnp.transpose(w, (2, 3, 4, 0, 1)).reshape(27 * co, ci)
    if cin_pad > ci:
        ws = jnp.pad(ws, ((0, 0), (0, cin_pad - ci)))
    return ws.astype(jnp.bfloat16)


def _multi_tensorcore_device() -> bool:
    """True on chips where one JAX device spans >1 TensorCore (v7x; v4/v5p)."""
    try:
        kind = jax.devices()[0].device_kind.lower()
    except Exception:
        return False
    return any(tag in kind for tag in ("v7", "7x", "v4", "v5p"))


@partial(jax.jit, static_argnums=(2,))
def _scale_focus_impl(x_ncdhw, params, batch_in_lanes):
    N, Cin, D, H, W = x_ncdhw.shape
    S = D * H * W
    Cpad = ((Cin + 7) // 8) * 8            # pad tiny channel dim to full sublane group
    C = params["w2"].shape[0]              # num_filters
    Cf = params["wf"].shape[0]             # final conv out channels (=3)

    x_flat = x_ncdhw.reshape(N, Cin, S).astype(jnp.float32)
    if Cpad > Cin:
        x_flat = jnp.pad(x_flat, ((0, 0), (0, Cpad - Cin), (0, 0)))

    if batch_in_lanes:                     # single-TC chips: fold batch onto lanes
        G, NB = 1, N
        x_in = jnp.transpose(x_flat, (1, 0, 2)).reshape(1, Cpad, N * S)
    else:                                  # multi-TC chips: one batch element per core
        G, NB = N, 1
        x_in = x_flat

    masks = _make_premasks(D, H, W, C, NB)
    w1 = _stack_conv_weight(params["w1"], Cpad)
    w2 = _stack_conv_weight(params["w2"], C)
    wf = params["wf"].astype(jnp.bfloat16)
    bf = params["bf"].reshape(-1, 1).astype(jnp.float32)

    out = pl.pallas_call(
        partial(_scale_focus_kernel, H=H, W=W, S=S, NB=NB, C=C),
        out_shape=jax.ShapeDtypeStruct((G, NB, Cf, S), jnp.float32),
        grid=(G,),
        in_specs=[
            pl.BlockSpec((1, Cpad, NB * S), lambda n: (n, 0, 0)),
            # Grid-invariant operands: constant index maps -> fetched once,
            # never re-copied across grid steps.
            pl.BlockSpec(w1.shape, lambda n: (0, 0)),
            pl.BlockSpec(w2.shape, lambda n: (0, 0)),
            pl.BlockSpec(wf.shape, lambda n: (0, 0)),
            pl.BlockSpec(bf.shape, lambda n: (0, 0)),
            pl.BlockSpec(masks.shape, lambda n: (0, 0)),
        ],
        out_specs=pl.BlockSpec((1, NB, Cf, S), lambda n: (n, 0, 0, 0)),
        compiler_params=pltpu.CompilerParams(dimension_semantics=("parallel",)),
    )(x_in, w1, w2, wf, bf, masks)

    return out.reshape(N, Cf, D, H, W)     # free metadata reshape back to NCDHW


def scale_focus_forward(x_ncdhw, params, batch_in_lanes=None):
    if batch_in_lanes is None:
        # v5e/v6e: merge batch onto lanes (halves serial grid work on 1 TC);
        # v7x / megacore: keep grid=(N,) parallel so both cores are used.
        batch_in_lanes = not _multi_tensorcore_device()
    return _scale_focus_impl(x_ncdhw, params, bool(batch_in_lanes))


def init_params(key, num_filters=8):
    """Deterministic synthetic parameters (shapes from ScaleFocus.__init__)."""
    ks = jax.random.split(key, 6)
    w1 = 0.1 * jax.random.normal(ks[0], (num_filters, 4, 3, 3, 3), jnp.float32)
    b1 = 0.1 * jax.random.normal(ks[1], (num_filters,), jnp.float32)
    w2 = 0.1 * jax.random.normal(ks[2], (num_filters, num_filters, 3, 3, 3), jnp.float32)
    b2 = 0.1 * jax.random.normal(ks[3], (num_filters,), jnp.float32)
    wf = 0.1 * jax.random.normal(ks[4], (3, num_filters), jnp.float32)
    bf = 0.1 * jax.random.normal(ks[5], (3,), jnp.float32)
    # NOTE: self.pools, self.weights, and pad_to_match() exist in the PyTorch
    # module but are never used in forward(); intentionally omitted.
    return dict(w1=w1, b1=b1, w2=w2, b2=b2, wf=wf, bf=bf)


def reference_forward(x_ncdhw, params):
    """Pure-JAX reference of the same forward pass (includes the conv biases,
    which must cancel under InstanceNorm — validates the kernel's omission)."""
    x = jnp.transpose(x_ncdhw, (0, 2, 3, 4, 1)).astype(jnp.float32)  # NDHWC
    for w, b in ((params["w1"], params["b1"]), (params["w2"], params["b2"])):
        w5 = jnp.transpose(w, (2, 3, 4, 1, 0))                       # DHWIO
        y = jax.lax.conv_general_dilated(
            x, w5, window_strides=(1, 1, 1), padding="SAME",
            dimension_numbers=("NDHWC", "DHWIO", "NDHWC"))
        y = y + b.reshape(1, 1, 1, 1, -1)
        mean = jnp.mean(y, axis=(1, 2, 3), keepdims=True)
        var = jnp.var(y, axis=(1, 2, 3), keepdims=True)
        x = jnp.maximum((y - mean) * jax.lax.rsqrt(var + EPS), 0.0)
    y = jnp.einsum("ndhwc,oc->ndhwo", x, params["wf"]) + params["bf"].reshape(1, 1, 1, 1, -1)
    return jnp.transpose(y, (0, 4, 1, 2, 3))                         # NCDHW


if __name__ == "__main__":
    key = jax.random.PRNGKey(0)
    kx, kp = jax.random.split(key)
    # PyTorch Conv3d input is 5D NCDHW: (batch=2, channels=4, D=H=W=8)
    x = jax.random.normal(kx, (2, 4, 8, 8, 8), jnp.float32)
    params = init_params(kp)

    out = jax.block_until_ready(scale_focus_forward(x, params))
    assert out.shape == (2, 3, 8, 8, 8), out.shape

    ref = reference_forward(x, params)
    err = float(jnp.max(jnp.abs(out - ref)))
    assert err < 5e-2, f"max abs err {err}"

    print("KERNEL_OK")
</pallas_src>

<mosaic_0001>
module attributes {stable_mosaic.version = 11 : i64} {
  func.func @_scale_focus_kernel(%arg0: i32, %arg1: memref<1x8x1024xf32, #tpu.memory_space<vmem>>, %arg2: memref<216x8xbf16, #tpu.memory_space<vmem>>, %arg3: memref<216x8xbf16, #tpu.memory_space<vmem>>, %arg4: memref<3x8xbf16, #tpu.memory_space<vmem>>, %arg5: memref<3x1xf32, #tpu.memory_space<vmem>>, %arg6: memref<216x1024xf32, #tpu.memory_space<vmem>>, %arg7: memref<1x2x3x512xf32, #tpu.memory_space<vmem>>) attributes {dimension_semantics = [#tpu.dimension_semantics<parallel>], iteration_bounds = array<i64: 1>, scalar_prefetch = 0 : i64, scratch_operands = 0 : i64, tpu.core_type = #tpu.core_type<tc>, window_params = [{transform_indices = @transform_0, window_bounds = array<i64: 1, 8, 1024>}, {pipeline_mode = #tpu.pipeline_mode<synchronous>, transform_indices = @transform_1, window_bounds = array<i64: 216, 8>}, {pipeline_mode = #tpu.pipeline_mode<synchronous>, transform_indices = @transform_2, window_bounds = array<i64: 216, 8>}, {pipeline_mode = #tpu.pipeline_mode<synchronous>, transform_indices = @transform_3, window_bounds = array<i64: 3, 8>}, {pipeline_mode = #tpu.pipeline_mode<synchronous>, transform_indices = @transform_4, window_bounds = array<i64: 3, 1>}, {pipeline_mode = #tpu.pipeline_mode<synchronous>, transform_indices = @transform_5, window_bounds = array<i64: 216, 1024>}, {transform_indices = @transform_6, window_bounds = array<i64: 1, 2, 3, 512>}]} {
    %c0 = arith.constant 0 : index
    %c0_0 = arith.constant 0 : index
    %c0_1 = arith.constant 0 : index
    %0 = vector.load %arg1[%c0, %c0_0, %c0_1] : memref<1x8x1024xf32, #tpu.memory_space<vmem>>, vector<1x8x1024xf32>
    %1 = vector.shape_cast %0 : vector<1x8x1024xf32> to vector<8x1024xf32>
    %c0_2 = arith.constant 0 : index
    %c0_3 = arith.constant 0 : index
    %2 = vector.load %arg2[%c0_2, %c0_3] : memref<216x8xbf16, #tpu.memory_space<vmem>>, vector<216x8xbf16>
    %3 = arith.truncf %1 : vector<8x1024xf32> to vector<8x1024xbf16>
    %cst = arith.constant dense<0.000000e+00> : vector<216x1024xf32>
    %4 = tpu.matmul %2, %3, %cst {dimension_numbers = #tpu.dot_dimension_numbers<[1], [0], [0], [1], [0, 0, 1, 1], [], []>} : vector<216x8xbf16>, vector<8x1024xbf16>, vector<216x1024xf32> -> vector<216x1024xf32>
    %5 = vector.extract_strided_slice %4 {offsets = [0, 0], sizes = [8, 1024], strides = [1, 1]} : vector<216x1024xf32> to vector<8x1024xf32>
    %c0_4 = arith.constant 0 : index
    %c0_5 = arith.constant 0 : index
    %6 = vector.load %arg6[%c0_4, %c0_5] : memref<216x1024xf32, #tpu.memory_space<vmem>>, vector<8x1024xf32>
    %7 = arith.mulf %5, %6 : vector<8x1024xf32>
    %c73_i32 = arith.constant 73 : i32
    %8 = tpu.dynamic_rotate %7 by %c73_i32 dim 1 : vector<8x1024xf32>, i32 -> vector<8x1024xf32>
    %9 = vector.extract_strided_slice %4 {offsets = [8, 0], sizes = [8, 1024], strides = [1, 1]} : vector<216x1024xf32> to vector<8x1024xf32>
    %c8 = arith.constant 8 : index
    %c0_6 = arith.constant 0 : index
    %10 = vector.load %arg6[%c8, %c0_6] : memref<216x1024xf32, #tpu.memory_space<vmem>>, vector<8x1024xf32>
    %11 = arith.mulf %9, %10 : vector<8x1024xf32>
    %c72_i32 = arith.constant 72 : i32
    %12 = tpu.dynamic_rotate %11 by %c72_i32 dim 1 : vector<8x1024xf32>, i32 -> vector<8x1024xf32>
    %13 = arith.addf %8, %12 : vector<8x1024xf32>
    %14 = vector.extract_strided_slice %4 {offsets = [16, 0], sizes = [8, 1024], strides = [1, 1]} : vector<216x1024xf32> to vector<8x1024xf32>
    %c16 = arith.constant 16 : index
    %c0_7 = arith.constant 0 : index
    %15 = vector.load %arg6[%c16, %c0_7] : memref<216x1024xf32, #tpu.memory_space<vmem>>, vector<8x1024xf32>
    %16 = arith.mulf %14, %15 : vector<8x1024xf32>
    %c71_i32 = arith.constant 71 : i32
    %17 = tpu.dynamic_rotate %16 by %c71_i32 dim 1 : vector<8x1024xf32>, i32 -> vector<8x1024xf32>
    %18 = arith.addf %13, %17 : vector<8x1024xf32>
    %19 = vector.extract_strided_slice %4 {offsets = [24, 0], sizes = [8, 1024], strides = [1, 1]} : vector<216x1024xf32> to vector<8x1024xf32>
    %c24 = arith.constant 24 : index
    %c0_8 = arith.constant 0 : index
    %20 = vector.load %arg6[%c24, %c0_8] : memref<216x1024xf32, #tpu.memory_space<vmem>>, vector<8x1024xf32>
    %21 = arith.mulf %19, %20 : vector<8x1024xf32>
    %c65_i32 = arith.constant 65 : i32
    %22 = tpu.dynamic_rotate %21 by %c65_i32 dim 1 : vector<8x1024xf32>, i32 -> vector<8x1024xf32>
    %23 = arith.addf %18, %22 : vector<8x1024xf32>
    %24 = vector.extract_strided_slice %4 {offsets = [32, 0], sizes = [8, 1024], strides = [1, 1]} : vector<216x1024xf32> to vector<8x1024xf32>
    %c32 = arith.constant 32 : index
    %c0_9 = arith.constant 0 : index
    %25 = vector.load %arg6[%c32, %c0_9] : memref<216x1024xf32, #tpu.memory_space<vmem>>, vector<8x1024xf32>
    %26 = arith.mulf %24, %25 : vector<8x1024xf32>
    %c64_i32 = arith.constant 64 : i32
    %27 = tpu.dynamic_rotate %26 by %c64_i32 dim 1 : vector<8x1024xf32>, i32 -> vector<8x1024xf32>
    %28 = arith.addf %23, %27 : vector<8x1024xf32>
    %29 = vector.extract_strided_slice %4 {offsets = [40, 0], sizes = [8, 1024], strides = [1, 1]} : vector<216x1024xf32> to vector<8x1024xf32>
    %c40 = arith.constant 40 : index
    %c0_10 = arith.constant 0 : index
    %30 = vector.load %arg6[%c40, %c0_10] : memref<216x1024xf32, #tpu.memory_space<vmem>>, vector<8x1024xf32>
    %31 = arith.mulf %29, %30 : vector<8x1024xf32>
    %c63_i32 = arith.constant 63 : i32
    %32 = tpu.dynamic_rotate %31 by %c63_i32 dim 1 : vector<8x1024xf32>, i32 -> vector<8x1024xf32>
    %33 = arith.addf %28, %32 : vector<8x1024xf32>
    %34 = vector.extract_strided_slice %4 {offsets = [48, 0], sizes = [8, 1024], strides = [1, 1]} : vector<216x1024xf32> to vector<8x1024xf32>
    %c48 = arith.constant 48 : index
    %c0_11 = arith.constant 0 : index
    %35 = vector.load %arg6[%c48, %c0_11] : memref<216x1024xf32, #tpu.memory_space<vmem>>, vector<8x1024xf32>
    %36 = arith.mulf %34, %35 : vector<8x1024xf32>
    %c57_i32 = arith.constant 57 : i32
    %37 = tpu.dynamic_rotate %36 by %c57_i32 dim 1 : vector<8x1024xf32>, i32 -> vector<8x1024xf32>
    %38 = arith.addf %33, %37 : vector<8x1024xf32>
    %39 = vector.extract_strided_slice %4 {offsets = [56, 0], sizes = [8, 1024], strides = [1, 1]} : vector<216x1024xf32> to vector<8x1024xf32>
    %c56 = arith.constant 56 : index
    %c0_12 = arith.constant 0 : index
    %40 = vector.load %arg6[%c56, %c0_12] : memref<216x1024xf32, #tpu.memory_space<vmem>>, vector<8x1024xf32>
    %41 = arith.mulf %39, %40 : vector<8x1024xf32>
    %c56_i32 = arith.constant 56 : i32
    %42 = tpu.dynamic_rotate %41 by %c56_i32 dim 1 : vector<8x1024xf32>, i32 -> vector<8x1024xf32>
    %43 = arith.addf %38, %42 : vector<8x1024xf32>
    %44 = vector.extract_strided_slice %4 {offsets = [64, 0], sizes = [8, 1024], strides = [1, 1]} : vector<216x1024xf32> to vector<8x1024xf32>
    %c64 = arith.constant 64 : index
    %c0_13 = arith.constant 0 : index
    %45 = vector.load %arg6[%c64, %c0_13] : memref<216x1024xf32, #tpu.memory_space<vmem>>, vector<8x1024xf32>
    %46 = arith.mulf %44, %45 : vector<8x1024xf32>
    %c55_i32 = arith.constant 55 : i32
    %47 = tpu.dynamic_rotate %46 by %c55_i32 dim 1 : vector<8x1024xf32>, i32 -> vector<8x1024xf32>
    %48 = arith.addf %43, %47 : vector<8x1024xf32>
    %49 = vector.extract_strided_slice %4 {offsets = [72, 0], sizes = [8, 1024], strides = [1, 1]} : vector<216x1024xf32> to vector<8x1024xf32>
    %c72 = arith.constant 72 : index
    %c0_14 = arith.constant 0 : index
    %50 = vector.load %arg6[%c72, %c0_14] : memref<216x1024xf32, #tpu.memory_space<vmem>>, vector<8x1024xf32>
    %51 = arith.mulf %49, %50 : vector<8x1024xf32>
    %c9_i32 = arith.constant 9 : i32
    %52 = tpu.dynamic_rotate %51 by %c9_i32 dim 1 : vector<8x1024xf32>, i32 -> vector<8x1024xf32>
    %53 = arith.addf %48, %52 : vector<8x1024xf32>
    %54 = vector.extract_strided_slice %4 {offsets = [80, 0], sizes = [8, 1024], strides = [1, 1]} : vector<216x1024xf32> to vector<8x1024xf32>
    %c80 = arith.constant 80 : index
    %c0_15 = arith.constant 0 : index
    %55 = vector.load %arg6[%c80, %c0_15] : memref<216x1024xf32, #tpu.memory_space<vmem>>, vector<8x1024xf32>
    %56 = arith.mulf %54, %55 : vector<8x1024xf32>
    %c8_i32 = arith.constant 8 : i32
    %57 = tpu.dynamic_rotate %56 by %c8_i32 dim 1 : vector<8x1024xf32>, i32 -> vector<8x1024xf32>
    %58 = arith.addf %53, %57 : vector<8x1024xf32>
    %59 = vector.extract_strided_slice %4 {offsets = [88, 0], sizes = [8, 1024], strides = [1, 1]} : vector<216x1024xf32> to vector<8x1024xf32>
    %c88 = arith.constant 88 : index
    %c0_16 = arith.constant 0 : index
    %60 = vector.load %arg6[%c88, %c0_16] : memref<216x1024xf32, #tpu.memory_space<vmem>>, vector<8x1024xf32>
    %61 = arith.mulf %59, %60 : vector<8x1024xf32>
    %c7_i32 = arith.constant 7 : i32
    %62 = tpu.dynamic_rotate %61 by %c7_i32 dim 1 : vector<8x1024xf32>, i32 -> vector<8x1024xf32>
    %63 = arith.addf %58, %62 : vector<8x1024xf32>
    %64 = vector.extract_strided_slice %4 {offsets = [96, 0], sizes = [8, 1024], strides = [1, 1]} : vector<216x1024xf32> to vector<8x1024xf32>
    %c96 = arith.constant 96 : index
    %c0_17 = arith.constant 0 : index
    %65 = vector.load %arg6[%c96, %c0_17] : memref<216x1024xf32, #tpu.memory_space<vmem>>, vector<8x1024xf32>
    %66 = arith.mulf %64, %65 : vector<8x1024xf32>
    %c1_i32 = arith.constant 1 : i32
    %67 = tpu.dynamic_rotate %66 by %c1_i32 dim 1 : vector<8x1024xf32>, i32 -> vector<8x1024xf32>
    %68 = arith.addf %63, %67 : vector<8x1024xf32>
    %69 = vector.extract_strided_slice %4 {offsets = [104, 0], sizes = [8, 1024], strides = [1, 1]} : vector<216x1024xf32> to vector<8x1024xf32>
    %70 = arith.addf %68, %69 : vector<8x1024xf32>
    %71 = vector.extract_strided_slice %4 {offsets = [112, 0], sizes = [8, 1024], strides = [1, 1]} : vector<216x1024xf32> to vector<8x1024xf32>
    %c112 = arith.constant 112 : index
    %c0_18 = arith.constant 0 : index
    %72 = vector.load %arg6[%c112, %c0_18] : memref<216x1024xf32, #tpu.memory_space<vmem>>, vector<8x1024xf32>
    %73 = arith.mulf %71, %72 : vector<8x1024xf32>
    %c1023_i32 = arith.constant 1023 : i32
    %74 = tpu.dynamic_rotate %73 by %c1023_i32 dim 1 : vector<8x1024xf32>, i32 -> vector<8x1024xf32>
    %75 = arith.addf %70, %74 : vector<8x1024xf32>
    %76 = vector.extract_strided_slice %4 {offsets = [120, 0], sizes = [8, 1024], strides = [1, 1]} : vector<216x1024xf32> to vector<8x1024xf32>
    %c120 = arith.constant 120 : index
    %c0_19 = arith.constant 0 : index
    %77 = vector.load %arg6[%c120, %c0_19] : memref<216x1024xf32, #tpu.memory_space<vmem>>, vector<8x1024xf32>
    %78 = arith.mulf %76, %77 : vector<8x1024xf32>
    %c1017_i32 = arith.constant 1017 : i32
    %79 = tpu.dynamic_rotate %78 by %c1017_i32 dim 1 : vector<8x1024xf32>, i32 -> vector<8x1024xf32>
    %80 = arith.addf %75, %79 : vector<8x1024xf32>
    %81 = vector.extract_strided_slice %4 {offsets = [128, 0], sizes = [8, 1024], strides = [1, 1]} : vector<216x1024xf32> to vector<8x1024xf32>
    %c128 = arith.constant 128 : index
    %c0_20 = arith.constant 0 : index
    %82 = vector.load %arg6[%c128, %c0_20] : memref<216x1024xf32, #tpu.memory_space<vmem>>, vector<8x1024xf32>
    %83 = arith.mulf %81, %82 : vector<8x1024xf32>
    %c1016_i32 = arith.constant 1016 : i32
    %84 = tpu.dynamic_rotate %83 by %c1016_i32 dim 1 : vector<8x1024xf32>, i32 -> vector<8x1024xf32>
    %85 = arith.addf %80, %84 : vector<8x1024xf32>
    %86 = vector.extract_strided_slice %4 {offsets = [136, 0], sizes = [8, 1024], strides = [1, 1]} : vector<216x1024xf32> to vector<8x1024xf32>
    %c136 = arith.constant 136 : index
    %c0_21 = arith.constant 0 : index
    %87 = vector.load %arg6[%c136, %c0_21] : memref<216x1024xf32, #tpu.memory_space<vmem>>, vector<8x1024xf32>
    %88 = arith.mulf %86, %87 : vector<8x1024xf32>
    %c1015_i32 = arith.constant 1015 : i32
    %89 = tpu.dynamic_rotate %88 by %c1015_i32 dim 1 : vector<8x1024xf32>, i32 -> vector<8x1024xf32>
    %90 = arith.addf %85, %89 : vector<8x1024xf32>
    %91 = vector.extract_strided_slice %4 {offsets = [144, 0], sizes = [8, 1024], strides = [1, 1]} : vector<216x1024xf32> to vector<8x1024xf32>
    %c144 = arith.constant 144 : index
    %c0_22 = arith.constant 0 : index
    %92 = vector.load %arg6[%c144, %c0_22] : memref<216x1024xf32, #tpu.memory_space<vmem>>, vector<8x1024xf32>
    %93 = arith.mulf %91, %92 : vector<8x1024xf32>
    %c969_i32 = arith.constant 969 : i32
    %94 = tpu.dynamic_rotate %93 by %c969_i32 dim 1 : vector<8x1024xf32>, i32 -> vector<8x1024xf32>
    %95 = arith.addf %90, %94 : vector<8x1024xf32>
    %96 = vector.extract_strided_slice %4 {offsets = [152, 0], sizes = [8, 1024], strides = [1, 1]} : vector<216x1024xf32> to vector<8x1024xf32>
    %c152 = arith.constant 152 : index
    %c0_23 = arith.constant 0 : index
    %97 = vector.load %arg6[%c152, %c0_23] : memref<216x1024xf32, #tpu.memory_space<vmem>>, vector<8x1024xf32>
    %98 = arith.mulf %96, %97 : vector<8x1024xf32>
    %c968_i32 = arith.constant 968 : i32
    %99 = tpu.dynamic_rotate %98 by %c968_i32 dim 1 : vector<8x1024xf32>, i32 -> vector<8x1024xf32>
    %100 = arith.addf %95, %99 : vector<8x1024xf32>
    %101 = vector.extract_strided_slice %4 {offsets = [160, 0], sizes = [8, 1024], strides = [1, 1]} : vector<216x1024xf32> to vector<8x1024xf32>
    %c160 = arith.constant 160 : index
    %c0_24 = arith.constant 0 : index
    %102 = vector.load %arg6[%c160, %c0_24] : memref<216x1024xf32, #tpu.memory_space<vmem>>, vector<8x1024xf32>
    %103 = arith.mulf %101, %102 : vector<8x1024xf32>
    %c967_i32 = arith.constant 967 : i32
    %104 = tpu.dynamic_rotate %103 by %c967_i32 dim 1 : vector<8x1024xf32>, i32 -> vector<8x1024xf32>
    %105 = arith.addf %100, %104 : vector<8x1024xf32>
    %106 = vector.extract_strided_slice %4 {offsets = [168, 0], sizes = [8, 1024], strides = [1, 1]} : vector<216x1024xf32> to vector<8x1024xf32>
    %c168 = arith.constant 168 : index
    %c0_25 = arith.constant 0 : index
    %107 = vector.load %arg6[%c168, %c0_25] : memref<216x1024xf32, #tpu.memory_space<vmem>>, vector<8x1024xf32>
    %108 = arith.mulf %106, %107 : vector<8x1024xf32>
    %c961_i32 = arith.constant 961 : i32
    %109 = tpu.dynamic_rotate %108 by %c961_i32 dim 1 : vector<8x1024xf32>, i32 -> vector<8x1024xf32>
    %110 = arith.addf %105, %109 : vector<8x1024xf32>
    %111 = vector.extract_strided_slice %4 {offsets = [176, 0], sizes = [8, 1024], strides = [1, 1]} : vector<216x1024xf32> to vector<8x1024xf32>
    %c176 = arith.constant 176 : index
    %c0_26 = arith.constant 0 : index
    %112 = vector.load %arg6[%c176, %c0_26] : memref<216x1024xf32, #tpu.memory_space<vmem>>, vector<8x1024xf32>
    %113 = arith.mulf %111, %112 : vector<8x1024xf32>
    %c960_i32 = arith.constant 960 : i32
    %114 = tpu.dynamic_rotate %113 by %c960_i32 dim 1 : vector<8x1024xf32>, i32 -> vector<8x1024xf32>
    %115 = arith.addf %110, %114 : vector<8x1024xf32>
    %116 = vector.extract_strided_slice %4 {offsets = [184, 0], sizes = [8, 1024], strides = [1, 1]} : vector<216x1024xf32> to vector<8x1024xf32>
    %c184 = arith.constant 184 : index
    %c0_27 = arith.constant 0 : index
    %117 = vector.load %arg6[%c184, %c0_27] : memref<216x1024xf32, #tpu.memory_space<vmem>>, vector<8x1024xf32>
    %118 = arith.mulf %116, %117 : vector<8x1024xf32>
    %c959_i32 = arith.constant 959 : i32
    %119 = tpu.dynamic_rotate %118 by %c959_i32 dim 1 : vector<8x1024xf32>, i32 -> vector<8x1024xf32>
    %120 = arith.addf %115, %119 : vector<8x1024xf32>
    %121 = vector.extract_strided_slice %4 {offsets = [192, 0], sizes = [8, 1024], strides = [1, 1]} : vector<216x1024xf32> to vector<8x1024xf32>
    %c192 = arith.constant 192 : index
    %c0_28 = arith.constant 0 : index
    %122 = vector.load %arg6[%c192, %c0_28] : memref<216x1024xf32, #tpu.memory_space<vmem>>, vector<8x1024xf32>
    %123 = arith.mulf %121, %122 : vector<8x1024xf32>
    %c953_i32 = arith.constant 953 : i32
    %124 = tpu.dynamic_rotate %123 by %c953_i32 dim 1 : vector<8x1024xf32>, i32 -> vector<8x1024xf32>
    %125 = arith.addf %120, %124 : vector<8x1024xf32>
    %126 = vector.extract_strided_slice %4 {offsets = [200, 0], sizes = [8, 1024], strides = [1, 1]} : vector<216x1024xf32> to vector<8x1024xf32>
    %c200 = arith.constant 200 : index
    %c0_29 = arith.constant 0 : index
    %127 = vector.load %arg6[%c200, %c0_29] : memref<216x1024xf32, #tpu.memory_space<vmem>>, vector<8x1024xf32>
    %128 = arith.mulf %126, %127 : vector<8x1024xf32>
    %c952_i32 = arith.constant 952 : i32
    %129 = tpu.dynamic_rotate %128 by %c952_i32 dim 1 : vector<8x1024xf32>, i32 -> vector<8x1024xf32>
    %130 = arith.addf %125, %129 : vector<8x1024xf32>
    %131 = vector.extract_strided_slice %4 {offsets = [208, 0], sizes = [8, 1024], strides = [1, 1]} : vector<216x1024xf32> to vector<8x1024xf32>
    %c208 = arith.constant 208 : index
    %c0_30 = arith.constant 0 : index
    %132 = vector.load %arg6[%c208, %c0_30] : memref<216x1024xf32, #tpu.memory_space<vmem>>, vector<8x1024xf32>
    %133 = arith.mulf %131, %132 : vector<8x1024xf32>
    %c951_i32 = arith.constant 951 : i32
    %134 = tpu.dynamic_rotate %133 by %c951_i32 dim 1 : vector<8x1024xf32>, i32 -> vector<8x1024xf32>
    %135 = arith.addf %130, %134 : vector<8x1024xf32>
    %136 = vector.extract_strided_slice %135 {offsets = [0, 0], sizes = [8, 512], strides = [1, 1]} : vector<8x1024xf32> to vector<8x512xf32>
    %cst_31 = arith.constant dense<0.000000e+00> : vector<8xf32>
    %137 = vector.multi_reduction <add>, %136, %cst_31 [1] : vector<8x512xf32> to vector<8xf32>
    %138 = vector.shape_cast %137 : vector<8xf32> to vector<8x1xf32>
    %cst_32 = arith.constant 0.001953125 : f32
    %139 = vector.broadcast %cst_32 : f32 to vector<8x1xf32>
    %140 = arith.mulf %138, %139 : vector<8x1xf32>
    %141 = vector.broadcast %140 : vector<8x1xf32> to vector<8x512xf32>
    %142 = arith.subf %136, %141 : vector<8x512xf32>
    %143 = arith.mulf %142, %142 : vector<8x512xf32>
    %cst_33 = arith.constant dense<0.000000e+00> : vector<8xf32>
    %144 = vector.multi_reduction <add>, %143, %cst_33 [1] : vector<8x512xf32> to vector<8xf32>
    %145 = vector.shape_cast %144 : vector<8xf32> to vector<8x1xf32>
    %cst_34 = arith.constant 0.001953125 : f32
    %146 = vector.broadcast %cst_34 : f32 to vector<8x1xf32>
    %147 = arith.mulf %145, %146 : vector<8x1xf32>
    %cst_35 = arith.constant 9.99999974E-6 : f32
    %148 = vector.broadcast %cst_35 : f32 to vector<8x1xf32>
    %149 = arith.addf %147, %148 : vector<8x1xf32>
    %150 = math.rsqrt %149 : vector<8x1xf32>
    %151 = vector.broadcast %150 : vector<8x1xf32> to vector<8x512xf32>
    %152 = arith.mulf %142, %151 : vector<8x512xf32>
    %cst_36 = arith.constant 0.000000e+00 : f32
    %153 = vector.broadcast %cst_36 : f32 to vector<8x512xf32>
    %154 = arith.maximumf %152, %153 : vector<8x512xf32>
    %155 = vector.extract_strided_slice %135 {offsets = [0, 512], sizes = [8, 512], strides = [1, 1]} : vector<8x1024xf32> to vector<8x512xf32>
    %cst_37 = arith.constant dense<0.000000e+00> : vector<8xf32>
    %156 = vector.multi_reduction <add>, %155, %cst_37 [1] : vector<8x512xf32> to vector<8xf32>
    %157 = vector.shape_cast %156 : vector<8xf32> to vector<8x1xf32>
    %cst_38 = arith.constant 0.001953125 : f32
    %158 = vector.broadcast %cst_38 : f32 to vector<8x1xf32>
    %159 = arith.mulf %157, %158 : vector<8x1xf32>
    %160 = vector.broadcast %159 : vector<8x1xf32> to vector<8x512xf32>
    %161 = arith.subf %155, %160 : vector<8x512xf32>
    %162 = arith.mulf %161, %161 : vector<8x512xf32>
    %cst_39 = arith.constant dense<0.000000e+00> : vector<8xf32>
    %163 = vector.multi_reduction <add>, %162, %cst_39 [1] : vector<8x512xf32> to vector<8xf32>
    %164 = vector.shape_cast %163 : vector<8xf32> to vector<8x1xf32>
    %cst_40 = arith.constant 0.001953125 : f32
    %165 = vector.broadcast %cst_40 : f32 to vector<8x1xf32>
    %166 = arith.mulf %164, %165 : vector<8x1xf32>
    %cst_41 = arith.constant 9.99999974E-6 : f32
    %167 = vector.broadcast %cst_41 : f32 to vector<8x1xf32>
    %168 = arith.addf %166, %167 : vector<8x1xf32>
    %169 = math.rsqrt %168 : vector<8x1xf32>
    %170 = vector.broadcast %169 : vector<8x1xf32> to vector<8x512xf32>
    %171 = arith.mulf %161, %170 : vector<8x512xf32>
    %cst_42 = arith.constant 0.000000e+00 : f32
    %172 = vector.broadcast %cst_42 : f32 to vector<8x512xf32>
    %173 = arith.maximumf %171, %172 : vector<8x512xf32>
    %174 = tpu.concatenate %154, %173 in 1 : vector<8x512xf32>, vector<8x512xf32> -> vector<8x1024xf32>
    %c0_43 = arith.constant 0 : index
    %c0_44 = arith.constant 0 : index
    %175 = vector.load %arg3[%c0_43, %c0_44] : memref<216x8xbf16, #tpu.memory_space<vmem>>, vector<216x8xbf16>
    %176 = arith.truncf %174 : vector<8x1024xf32> to vector<8x1024xbf16>
    %cst_45 = arith.constant dense<0.000000e+00> : vector<216x1024xf32>
    %177 = tpu.matmul %175, %176, %cst_45 {dimension_numbers = #tpu.dot_dimension_numbers<[1], [0], [0], [1], [0, 0, 1, 1], [], []>} : vector<216x8xbf16>, vector<8x1024xbf16>, vector<216x1024xf32> -> vector<216x1024xf32>
    %178 = vector.extract_strided_slice %177 {offsets = [0, 0], sizes = [8, 1024], strides = [1, 1]} : vector<216x1024xf32> to vector<8x1024xf32>
    %c0_46 = arith.constant 0 : index
    %c0_47 = arith.constant 0 : index
    %179 = vector.load %arg6[%c0_46, %c0_47] : memref<216x1024xf32, #tpu.memory_space<vmem>>, vector<8x1024xf32>
    %180 = arith.mulf %178, %179 : vector<8x1024xf32>
    %c73_i32_48 = arith.constant 73 : i32
    %181 = tpu.dynamic_rotate %180 by %c73_i32_48 dim 1 : vector<8x1024xf32>, i32 -> vector<8x1024xf32>
    %182 = vector.extract_strided_slice %177 {offsets = [8, 0], sizes = [8, 1024], strides = [1, 1]} : vector<216x1024xf32> to vector<8x1024xf32>
    %c8_49 = arith.constant 8 : index
    %c0_50 = arith.constant 0 : index
    %183 = vector.load %arg6[%c8_49, %c0_50] : memref<216x1024xf32, #tpu.memory_space<vmem>>, vector<8x1024xf32>
    %184 = arith.mulf %182, %183 : vector<8x1024xf32>
    %c72_i32_51 = arith.constant 72 : i32
    %185 = tpu.dynamic_rotate %184 by %c72_i32_51 dim 1 : vector<8x1024xf32>, i32 -> vector<8x1024xf32>
    %186 = arith.addf %181, %185 : vector<8x1024xf32>
    %187 = vector.extract_strided_slice %177 {offsets = [16, 0], sizes = [8, 1024], strides = [1, 1]} : vector<216x1024xf32> to vector<8x1024xf32>
    %c16_52 = arith.constant 16 : index
    %c0_53 = arith.constant 0 : index
    %188 = vector.load %arg6[%c16_52, %c0_53] : memref<216x1024xf32, #tpu.memory_space<vmem>>, vector<8x1024xf32>
    %189 = arith.mulf %187, %188 : vector<8x1024xf32>
    %c71_i32_54 = arith.constant 71 : i32
    %190 = tpu.dynamic_rotate %189 by %c71_i32_54 dim 1 : vector<8x1024xf32>, i32 -> vector<8x1024xf32>
    %191 = arith.addf %186, %190 : vector<8x1024xf32>
    %192 = vector.extract_strided_slice %177 {offsets = [24, 0], sizes = [8, 1024], strides = [1, 1]} : vector<216x1024xf32> to vector<8x1024xf32>
    %c24_55 = arith.constant 24 : index
    %c0_56 = arith.constant 0 : index
    %193 = vector.load %arg6[%c24_55, %c0_56] : memref<216x1024xf32, #tpu.memory_space<vmem>>, vector<8x1024xf32>
    %194 = arith.mulf %192, %193 : vector<8x1024xf32>
    %c65_i32_57 = arith.constant 65 : i32
    %195 = tpu.dynamic_rotate %194 by %c65_i32_57 dim 1 : vector<8x1024xf32>, i32 -> vector<8x1024xf32>
    %196 = arith.addf %191, %195 : vector<8x1024xf32>
    %197 = vector.extract_strided_slice %177 {offsets = [32, 0], sizes = [8, 1024], strides = [1, 1]} : vector<216x1024xf32> to vector<8x1024xf32>
    %c32_58 = arith.constant 32 : index
    %c0_59 = arith.constant 0 : index
    %198 = vector.load %arg6[%c32_58, %c0_59] : memref<216x1024xf32, #tpu.memory_space<vmem>>, vector<8x1024xf32>
    %199 = arith.mulf %197, %198 : vector<8x1024xf32>
    %c64_i32_60 = arith.constant 64 : i32
    %200 = tpu.dynamic_rotate %199 by %c64_i32_60 dim 1 : vector<8x1024xf32>, i32 -> vector<8x1024xf32>
    %201 = arith.addf %196, %200 : vector<8x1024xf32>
    %202 = vector.extract_strided_slice %177 {offsets = [40, 0], sizes = [8, 1024], strides = [1, 1]} : vector<216x1024xf32> to vector<8x1024xf32>
    %c40_61 = arith.constant 40 : index
    %c0_62 = arith.constant 0 : index
    %203 = vector.load %arg6[%c40_61, %c0_62] : memref<216x1024xf32, #tpu.memory_space<vmem>>, vector<8x1024xf32>
    %204 = arith.mulf %202, %203 : vector<8x1024xf32>
    %c63_i32_63 = arith.constant 63 : i32
    %205 = tpu.dynamic_rotate %204 by %c63_i32_63 dim 1 : vector<8x1024xf32>, i32 -> vector<8x1024xf32>
    %206 = arith.addf %201, %205 : vector<8x1024xf32>
    %207 = vector.extract_strided_slice %177 {offsets = [48, 0], sizes = [8, 1024], strides = [1, 1]} : vector<216x1024xf32> to vector<8x1024xf32>
    %c48_64 = arith.constant 48 : index
    %c0_65 = arith.constant 0 : index
    %208 = vector.load %arg6[%c48_64, %c0_65] : memref<216x1024xf32, #tpu.memory_space<vmem>>, vector<8x1024xf32>
    %209 = arith.mulf %207, %208 : vector<8x1024xf32>
    %c57_i32_66 = arith.constant 57 : i32
    %210 = tpu.dynamic_rotate %209 by %c57_i32_66 dim 1 : vector<8x1024xf32>, i32 -> vector<8x1024xf32>
    %211 = arith.addf %206, %210 : vector<8x1024xf32>
    %212 = vector.extract_strided_slice %177 {offsets = [56, 0], sizes = [8, 1024], strides = [1, 1]} : vector<216x1024xf32> to vector<8x1024xf32>
    %c56_67 = arith.constant 56 : index
    %c0_68 = arith.constant 0 : index
    %213 = vector.load %arg6[%c56_67, %c0_68] : memref<216x1024xf32, #tpu.memory_space<vmem>>, vector<8x1024xf32>
    %214 = arith.mulf %212, %213 : vector<8x1024xf32>
    %c56_i32_69 = arith.constant 56 : i32
    %215 = tpu.dynamic_rotate %214 by %c56_i32_69 dim 1 : vector<8x1024xf32>, i32 -> vector<8x1024xf32>
    %216 = arith.addf %211, %215 : vector<8x1024xf32>
    %217 = vector.extract_strided_slice %177 {offsets = [64, 0], sizes = [8, 1024], strides = [1, 1]} : vector<216x1024xf32> to vector<8x1024xf32>
    %c64_70 = arith.constant 64 : index
    %c0_71 = arith.constant 0 : index
    %218 = vector.load %arg6[%c64_70, %c0_71] : memref<216x1024xf32, #tpu.memory_space<vmem>>, vector<8x1024xf32>
    %219 = arith.mulf %217, %218 : vector<8x1024xf32>
    %c55_i32_72 = arith.constant 55 : i32
    %220 = tpu.dynamic_rotate %219 by %c55_i32_72 dim 1 : vector<8x1024xf32>, i32 -> vector<8x1024xf32>
    %221 = arith.addf %216, %220 : vector<8x1024xf32>
    %222 = vector.extract_strided_slice %177 {offsets = [72, 0], sizes = [8, 1024], strides = [1, 1]} : vector<216x1024xf32> to vector<8x1024xf32>
    %c72_73 = arith.constant 72 : index
    %c0_74 = arith.constant 0 : index
    %223 = vector.load %arg6[%c72_73, %c0_74] : memref<216x1024xf32, #tpu.memory_space<vmem>>, vector<8x1024xf32>
    %224 = arith.mulf %222, %223 : vector<8x1024xf32>
    %c9_i32_75 = arith.constant 9 : i32
    %225 = tpu.dynamic_rotate %224 by %c9_i32_75 dim 1 : vector<8x1024xf32>, i32 -> vector<8x1024xf32>
    %226 = arith.addf %221, %225 : vector<8x1024xf32>
    %227 = vector.extract_strided_slice %177 {offsets = [80, 0], sizes = [8, 1024], strides = [1, 1]} : vector<216x1024xf32> to vector<8x1024xf32>
    %c80_76 = arith.constant 80 : index
    %c0_77 = arith.constant 0 : index
    %228 = vector.load %arg6[%c80_76, %c0_77] : memref<216x1024xf32, #tpu.memory_space<vmem>>, vector<8x1024xf32>
    %229 = arith.mulf %227, %228 : vector<8x1024xf32>
    %c8_i32_78 = arith.constant 8 : i32
    %230 = tpu.dynamic_rotate %229 by %c8_i32_78 dim 1 : vector<8x1024xf32>, i32 -> vector<8x1024xf32>
    %231 = arith.addf %226, %230 : vector<8x1024xf32>
    %232 = vector.extract_strided_slice %177 {offsets = [88, 0], sizes = [8, 1024], strides = [1, 1]} : vector<216x1024xf32> to vector<8x1024xf32>
    %c88_79 = arith.constant 88 : index
    %c0_80 = arith.constant 0 : index
    %233 = vector.load %arg6[%c88_79, %c0_80] : memref<216x1024xf32, #tpu.memory_space<vmem>>, vector<8x1024xf32>
    %234 = arith.mulf %232, %233 : vector<8x1024xf32>
    %c7_i32_81 = arith.constant 7 : i32
    %235 = tpu.dynamic_rotate %234 by %c7_i32_81 dim 1 : vector<8x1024xf32>, i32 -> vector<8x1024xf32>
    %236 = arith.addf %231, %235 : vector<8x1024xf32>
    %237 = vector.extract_strided_slice %177 {offsets = [96, 0], sizes = [8, 1024], strides = [1, 1]} : vector<216x1024xf32> to vector<8x1024xf32>
    %c96_82 = arith.constant 96 : index
    %c0_83 = arith.constant 0 : index
    %238 = vector.load %arg6[%c96_82, %c0_83] : memref<216x1024xf32, #tpu.memory_space<vmem>>, vector<8x1024xf32>
    %239 = arith.mulf %237, %238 : vector<8x1024xf32>
    %c1_i32_84 = arith.constant 1 : i32
    %240 = tpu.dynamic_rotate %239 by %c1_i32_84 dim 1 : vector<8x1024xf32>, i32 -> vector<8x1024xf32>
    %241 = arith.addf %236, %240 : vector<8x1024xf32>
    %242 = vector.extract_strided_slice %177 {offsets = [104, 0], sizes = [8, 1024], strides = [1, 1]} : vector<216x1024xf32> to vector<8x1024xf32>
    %243 = arith.addf %241, %242 : vector<8x1024xf32>
    %244 = vector.extract_strided_slice %177 {offsets = [112, 0], sizes = [8, 1024], strides = [1, 1]} : vector<216x1024xf32> to vector<8x1024xf32>
    %c112_85 = arith.constant 112 : index
    %c0_86 = arith.constant 0 : index
    %245 = vector.load %arg6[%c112_85, %c0_86] : memref<216x1024xf32, #tpu.memory_space<vmem>>, vector<8x1024xf32>
    %246 = arith.mulf %244, %245 : vector<8x1024xf32>
    %c1023_i32_87 = arith.constant 1023 : i32
    %247 = tpu.dynamic_rotate %246 by %c1023_i32_87 dim 1 : vector<8x1024xf32>, i32 -> vector<8x1024xf32>
    %248 = arith.addf %243, %247 : vector<8x1024xf32>
    %249 = vector.extract_strided_slice %177 {offsets = [120, 0], sizes = [8, 1024], strides = [1, 1]} : vector<216x1024xf32> to vector<8x1024xf32>
    %c120_88 = arith.constant 120 : index
    %c0_89 = arith.constant 0 : index
    %250 = vector.load %arg6[%c120_88, %c0_89] : memref<216x1024xf32, #tpu.memory_space<vmem>>, vector<8x1024xf32>
    %251 = arith.mulf %249, %250 : vector<8x1024xf32>
    %c1017_i32_90 = arith.constant 1017 : i32
    %252 = tpu.dynamic_rotate %251 by %c1017_i32_90 dim 1 : vector<8x1024xf32>, i32 -> vector<8x1024xf32>
    %253 = arith.addf %248, %252 : vector<8x1024xf32>
    %254 = vector.extract_strided_slice %177 {offsets = [128, 0], sizes = [8, 1024], strides = [1, 1]} : vector<216x1024xf32> to vector<8x1024xf32>
    %c128_91 = arith.constant 128 : index
    %c0_92 = arith.constant 0 : index
    %255 = vector.load %arg6[%c128_91, %c0_92] : memref<216x1024xf32, #tpu.memory_space<vmem>>, vector<8x1024xf32>
    %256 = arith.mulf %254, %255 : vector<8x1024xf32>
    %c1016_i32_93 = arith.constant 1016 : i32
    %257 = tpu.dynamic_rotate %256 by %c1016_i32_93 dim 1 : vector<8x1024xf32>, i32 -> vector<8x1024xf32>
    %258 = arith.addf %253, %257 : vector<8x1024xf32>
    %259 = vector.extract_strided_slice %177 {offsets = [136, 0], sizes = [8, 1024], strides = [1, 1]} : vector<216x1024xf32> to vector<8x1024xf32>
    %c136_94 = arith.constant 136 : index
    %c0_95 = arith.constant 0 : index
    %260 = vector.load %arg6[%c136_94, %c0_95] : memref<216x1024xf32, #tpu.memory_space<vmem>>, vector<8x1024xf32>
    %261 = arith.mulf %259, %260 : vector<8x1024xf32>
    %c1015_i32_96 = arith.constant 1015 : i32
    %262 = tpu.dynamic_rotate %261 by %c1015_i32_96 dim 1 : vector<8x1024xf32>, i32 -> vector<8x1024xf32>
    %263 = arith.addf %258, %262 : vector<8x1024xf32>
    %264 = vector.extract_strided_slice %177 {offsets = [144, 0], sizes = [8, 1024], strides = [1, 1]} : vector<216x1024xf32> to vector<8x1024xf32>
    %c144_97 = arith.constant 144 : index
    %c0_98 = arith.constant 0 : index
    %265 = vector.load %arg6[%c144_97, %c0_98] : memref<216x1024xf32, #tpu.memory_space<vmem>>, vector<8x1024xf32>
    %266 = arith.mulf %264, %265 : vector<8x1024xf32>
    %c969_i32_99 = arith.constant 969 : i32
    %267 = tpu.dynamic_rotate %266 by %c969_i32_99 dim 1 : vector<8x1024xf32>, i32 -> vector<8x1024xf32>
    %268 = arith.addf %263, %267 : vector<8x1024xf32>
    %269 = vector.extract_strided_slice %177 {offsets = [152, 0], sizes = [8, 1024], strides = [1, 1]} : vector<216x1024xf32> to vector<8x1024xf32>
    %c152_100 = arith.constant 152 : index
    %c0_101 = arith.constant 0 : index
    %270 = vector.load %arg6[%c152_100, %c0_101] : memref<216x1024xf32, #tpu.memory_space<vmem>>, vector<8x1024xf32>
    %271 = arith.mulf %269, %270 : vector<8x1024xf32>
    %c968_i32_102 = arith.constant 968 : i32
    %272 = tpu.dynamic_rotate %271 by %c968_i32_102 dim 1 : vector<8x1024xf32>, i32 -> vector<8x1024xf32>
    %273 = arith.addf %268, %272 : vector<8x1024xf32>
    %274 = vector.extract_strided_slice %177 {offsets = [160, 0], sizes = [8, 1024], strides = [1, 1]} : vector<216x1024xf32> to vector<8x1024xf32>
    %c160_103 = arith.constant 160 : index
    %c0_104 = arith.constant 0 : index
    %275 = vector.load %arg6[%c160_103, %c0_104] : memref<216x1024xf32, #tpu.memory_space<vmem>>, vector<8x1024xf32>
    %276 = arith.mulf %274, %275 : vector<8x1024xf32>
    %c967_i32_105 = arith.constant 967 : i32
    %277 = tpu.dynamic_rotate %276 by %c967_i32_105 dim 1 : vector<8x1024xf32>, i32 -> vector<8x1024xf32>
    %278 = arith.addf %273, %277 : vector<8x1024xf32>
    %279 = vector.extract_strided_slice %177 {offsets = [168, 0], sizes = [8, 1024], strides = [1, 1]} : vector<216x1024xf32> to vector<8x1024xf32>
    %c168_106 = arith.constant 168 : index
    %c0_107 = arith.constant 0 : index
    %280 = vector.load %arg6[%c168_106, %c0_107] : memref<216x1024xf32, #tpu.memory_space<vmem>>, vector<8x1024xf32>
    %281 = arith.mulf %279, %280 : vector<8x1024xf32>
    %c961_i32_108 = arith.constant 961 : i32
    %282 = tpu.dynamic_rotate %281 by %c961_i32_108 dim 1 : vector<8x1024xf32>, i32 -> vector<8x1024xf32>
    %283 = arith.addf %278, %282 : vector<8x1024xf32>
    %284 = vector.extract_strided_slice %177 {offsets = [176, 0], sizes = [8, 1024], strides = [1, 1]} : vector<216x1024xf32> to vector<8x1024xf32>
    %c176_109 = arith.constant 176 : index
    %c0_110 = arith.constant 0 : index
    %285 = vector.load %arg6[%c176_109, %c0_110] : memref<216x1024xf32, #tpu.memory_space<vmem>>, vector<8x1024xf32>
    %286 = arith.mulf %284, %285 : vector<8x1024xf32>
    %c960_i32_111 = arith.constant 960 : i32
    %287 = tpu.dynamic_rotate %286 by %c960_i32_111 dim 1 : vector<8x1024xf32>, i32 -> vector<8x1024xf32>
    %288 = arith.addf %283, %287 : vector<8x1024xf32>
    %289 = vector.extract_strided_slice %177 {offsets = [184, 0], sizes = [8, 1024], strides = [1, 1]} : vector<216x1024xf32> to vector<8x1024xf32>
    %c184_112 = arith.constant 184 : index
    %c0_113 = arith.constant 0 : index
    %290 = vector.load %arg6[%c184_112, %c0_113] : memref<216x1024xf32, #tpu.memory_space<vmem>>, vector<8x1024xf32>
    %291 = arith.mulf %289, %290 : vector<8x1024xf32>
    %c959_i32_114 = arith.constant 959 : i32
    %292 = tpu.dynamic_rotate %291 by %c959_i32_114 dim 1 : vector<8x1024xf32>, i32 -> vector<8x1024xf32>
    %293 = arith.addf %288, %292 : vector<8x1024xf32>
    %294 = vector.extract_strided_slice %177 {offsets = [192, 0], sizes = [8, 1024], strides = [1, 1]} : vector<216x1024xf32> to vector<8x1024xf32>
    %c192_115 = arith.constant 192 : index
    %c0_116 = arith.constant 0 : index
    %295 = vector.load %arg6[%c192_115, %c0_116] : memref<216x1024xf32, #tpu.memory_space<vmem>>, vector<8x1024xf32>
    %296 = arith.mulf %294, %295 : vector<8x1024xf32>
    %c953_i32_117 = arith.constant 953 : i32
    %297 = tpu.dynamic_rotate %296 by %c953_i32_117 dim 1 : vector<8x1024xf32>, i32 -> vector<8x1024xf32>
    %298 = arith.addf %293, %297 : vector<8x1024xf32>
    %299 = vector.extract_strided_slice %177 {offsets = [200, 0], sizes = [8, 1024], strides = [1, 1]} : vector<216x1024xf32> to vector<8x1024xf32>
    %c200_118 = arith.constant 200 : index
    %c0_119 = arith.constant 0 : index
    %300 = vector.load %arg6[%c200_118, %c0_119] : memref<216x1024xf32, #tpu.memory_space<vmem>>, vector<8x1024xf32>
    %301 = arith.mulf %299, %300 : vector<8x1024xf32>
    %c952_i32_120 = arith.constant 952 : i32
    %302 = tpu.dynamic_rotate %301 by %c952_i32_120 dim 1 : vector<8x1024xf32>, i32 -> vector<8x1024xf32>
    %303 = arith.addf %298, %302 : vector<8x1024xf32>
    %304 = vector.extract_strided_slice %177 {offsets = [208, 0], sizes = [8, 1024], strides = [1, 1]} : vector<216x1024xf32> to vector<8x1024xf32>
    %c208_121 = arith.constant 208 : index
    %c0_122 = arith.constant 0 : index
    %305 = vector.load %arg6[%c208_121, %c0_122] : memref<216x1024xf32, #tpu.memory_space<vmem>>, vector<8x1024xf32>
    %306 = arith.mulf %304, %305 : vector<8x1024xf32>
    %c951_i32_123 = arith.constant 951 : i32
    %307 = tpu.dynamic_rotate %306 by %c951_i32_123 dim 1 : vector<8x1024xf32>, i32 -> vector<8x1024xf32>
    %308 = arith.addf %303, %307 : vector<8x1024xf32>
    %309 = vector.extract_strided_slice %308 {offsets = [0, 0], sizes = [8, 512], strides = [1, 1]} : vector<8x1024xf32> to vector<8x512xf32>
    %cst_124 = arith.constant dense<0.000000e+00> : vector<8xf32>
    %310 = vector.multi_reduction <add>, %309, %cst_124 [1] : vector<8x512xf32> to vector<8xf32>
    %311 = vector.shape_cast %310 : vector<8xf32> to vector<8x1xf32>
    %cst_125 = arith.constant 0.001953125 : f32
    %312 = vector.broadcast %cst_125 : f32 to vector<8x1xf32>
    %313 = arith.mulf %311, %312 : vector<8x1xf32>
    %314 = vector.broadcast %313 : vector<8x1xf32> to vector<8x512xf32>
    %315 = arith.subf %309, %314 : vector<8x512xf32>
    %316 = arith.mulf %315, %315 : vector<8x512xf32>
    %cst_126 = arith.constant dense<0.000000e+00> : vector<8xf32>
    %317 = vector.multi_reduction <add>, %316, %cst_126 [1] : vector<8x512xf32> to vector<8xf32>
    %318 = vector.shape_cast %317 : vector<8xf32> to vector<8x1xf32>
    %cst_127 = arith.constant 0.001953125 : f32
    %319 = vector.broadcast %cst_127 : f32 to vector<8x1xf32>
    %320 = arith.mulf %318, %319 : vector<8x1xf32>
    %cst_128 = arith.constant 9.99999974E-6 : f32
    %321 = vector.broadcast %cst_128 : f32 to vector<8x1xf32>
    %322 = arith.addf %320, %321 : vector<8x1xf32>
    %323 = math.rsqrt %322 : vector<8x1xf32>
    %324 = vector.broadcast %323 : vector<8x1xf32> to vector<8x512xf32>
    %325 = arith.mulf %315, %324 : vector<8x512xf32>
    %cst_129 = arith.constant 0.000000e+00 : f32
    %326 = vector.broadcast %cst_129 : f32 to vector<8x512xf32>
    %327 = arith.maximumf %325, %326 : vector<8x512xf32>
    %328 = vector.extract_strided_slice %308 {offsets = [0, 512], sizes = [8, 512], strides = [1, 1]} : vector<8x1024xf32> to vector<8x512xf32>
    %cst_130 = arith.constant dense<0.000000e+00> : vector<8xf32>
    %329 = vector.multi_reduction <add>, %328, %cst_130 [1] : vector<8x512xf32> to vector<8xf32>
    %330 = vector.shape_cast %329 : vector<8xf32> to vector<8x1xf32>
    %cst_131 = arith.constant 0.001953125 : f32
    %331 = vector.broadcast %cst_131 : f32 to vector<8x1xf32>
    %332 = arith.mulf %330, %331 : vector<8x1xf32>
    %333 = vector.broadcast %332 : vector<8x1xf32> to vector<8x512xf32>
    %334 = arith.subf %328, %333 : vector<8x512xf32>
    %335 = arith.mulf %334, %334 : vector<8x512xf32>
    %cst_132 = arith.constant dense<0.000000e+00> : vector<8xf32>
    %336 = vector.multi_reduction <add>, %335, %cst_132 [1] : vector<8x512xf32> to vector<8xf32>
    %337 = vector.shape_cast %336 : vector<8xf32> to vector<8x1xf32>
    %cst_133 = arith.constant 0.001953125 : f32
    %338 = vector.broadcast %cst_133 : f32 to vector<8x1xf32>
    %339 = arith.mulf %337, %338 : vector<8x1xf32>
    %cst_134 = arith.constant 9.99999974E-6 : f32
    %340 = vector.broadcast %cst_134 : f32 to vector<8x1xf32>
    %341 = arith.addf %339, %340 : vector<8x1xf32>
    %342 = math.rsqrt %341 : vector<8x1xf32>
    %343 = vector.broadcast %342 : vector<8x1xf32> to vector<8x512xf32>
    %344 = arith.mulf %334, %343 : vector<8x512xf32>
    %cst_135 = arith.constant 0.000000e+00 : f32
    %345 = vector.broadcast %cst_135 : f32 to vector<8x512xf32>
    %346 = arith.maximumf %344, %345 : vector<8x512xf32>
    %347 = tpu.concatenate %327, %346 in 1 : vector<8x512xf32>, vector<8x512xf32> -> vector<8x1024xf32>
    %c0_136 = arith.constant 0 : index
    %c0_137 = arith.constant 0 : index
    %348 = vector.load %arg4[%c0_136, %c0_137] : memref<3x8xbf16, #tpu.memory_space<vmem>>, vector<3x8xbf16>
    %349 = arith.truncf %347 : vector<8x1024xf32> to vector<8x1024xbf16>
    %cst_138 = arith.constant dense<0.000000e+00> : vector<3x1024xf32>
    %350 = tpu.matmul %348, %349, %cst_138 {dimension_numbers = #tpu.dot_dimension_numbers<[1], [0], [0], [1], [0, 0, 1, 1], [], []>} : vector<3x8xbf16>, vector<8x1024xbf16>, vector<3x1024xf32> -> vector<3x1024xf32>
    %c0_139 = arith.constant 0 : index
    %c0_140 = arith.constant 0 : index
    %351 = vector.load %arg5[%c0_139, %c0_140] : memref<3x1xf32, #tpu.memory_space<vmem>>, vector<3x1xf32>
    %352 = vector.broadcast %351 : vector<3x1xf32> to vector<3x1024xf32>
    %353 = arith.addf %350, %352 : vector<3x1024xf32>
    %354 = vector.extract_strided_slice %353 {offsets = [0, 0], sizes = [3, 512], strides = [1, 1]} : vector<3x1024xf32> to vector<3x512xf32>
    %c0_141 = arith.constant 0 : index
    %c0_142 = arith.constant 0 : index
    %c0_143 = arith.constant 0 : index
    %c0_144 = arith.constant 0 : index
    %355 = vector.load %arg7[%c0_141, %c0_142, %c0_143, %c0_144] : memref<1x2x3x512xf32, #tpu.memory_space<vmem>>, vector<1x1x3x512xf32>
    %356 = vector.shape_cast %355 : vector<1x1x3x512xf32> to vector<3x512xf32>
    %357 = vector.shape_cast %354 : vector<3x512xf32> to vector<1x1x3x512xf32>
    tpu.vector_store %arg7[%c0_141, %c0_142, %c0_143, %c0_144], %357 {strides = array<i32>} : memref<1x2x3x512xf32, #tpu.memory_space<vmem>>, vector<1x1x3x512xf32>,
    %358 = vector.extract_strided_slice %353 {offsets = [0, 512], sizes = [3, 512], strides = [1, 1]} : vector<3x1024xf32> to vector<3x512xf32>
    %c0_145 = arith.constant 0 : index
    %c1 = arith.constant 1 : index
    %c0_146 = arith.constant 0 : index
    %c0_147 = arith.constant 0 : index
    %359 = vector.load %arg7[%c0_145, %c1, %c0_146, %c0_147] : memref<1x2x3x512xf32, #tpu.memory_space<vmem>>, vector<1x1x3x512xf32>
    %360 = vector.shape_cast %359 : vector<1x1x3x512xf32> to vector<3x512xf32>
    %361 = vector.shape_cast %358 : vector<3x512xf32> to vector<1x1x3x512xf32>
    tpu.vector_store %arg7[%c0_145, %c1, %c0_146, %c0_147], %361 {strides = array<i32>} : memref<1x2x3x512xf32, #tpu.memory_space<vmem>>, vector<1x1x3x512xf32>,
    return
  }
  func.func @transform_0(%arg0: i32) -> (i32, i32, i32) {
    %c0_i32 = arith.constant 0 : i32
    %c0_i32_0 = arith.constant 0 : i32
    %c0_i32_1 = arith.constant 0 : i32
    return %arg0, %c0_i32, %c0_i32_0 : i32, i32, i32
  }
  func.func @transform_1(%arg0: i32) -> (i32, i32) {
    %c0_i32 = arith.constant 0 : i32
    %c0_i32_0 = arith.constant 0 : i32
    %c0_i32_1 = arith.constant 0 : i32
    return %c0_i32, %c0_i32_0 : i32, i32
  }
  func.func @transform_2(%arg0: i32) -> (i32, i32) {
    %c0_i32 = arith.constant 0 : i32
    %c0_i32_0 = arith.constant 0 : i32
    %c0_i32_1 = arith.constant 0 : i32
    return %c0_i32, %c0_i32_0 : i32, i32
  }
  func.func @transform_3(%arg0: i32) -> (i32, i32) {
    %c0_i32 = arith.constant 0 : i32
    %c0_i32_0 = arith.constant 0 : i32
    %c0_i32_1 = arith.constant 0 : i32
    return %c0_i32, %c0_i32_0 : i32, i32
  }
  func.func @transform_4(%arg0: i32) -> (i32, i32) {
    %c0_i32 = arith.constant 0 : i32
    %c0_i32_0 = arith.constant 0 : i32
    %c0_i32_1 = arith.constant 0 : i32
    return %c0_i32, %c0_i32_0 : i32, i32
  }
  func.func @transform_5(%arg0: i32) -> (i32, i32) {
    %c0_i32 = arith.constant 0 : i32
    %c0_i32_0 = arith.constant 0 : i32
    %c0_i32_1 = arith.constant 0 : i32
    return %c0_i32, %c0_i32_0 : i32, i32
  }
  func.func @transform_6(%arg0: i32) -> (i32, i32, i32, i32) {
    %c0_i32 = arith.constant 0 : i32
    %c0_i32_0 = arith.constant 0 : i32
    %c0_i32_1 = arith.constant 0 : i32
    %c0_i32_2 = arith.constant 0 : i32
    return %arg0, %c0_i32, %c0_i32_0, %c0_i32_1 : i32, i32, i32, i32
  }
}

</mosaic_0001>

<bundles_post_ra>
// kernel: _scale_focus_impl.1
= control target key start
LH: loop header
LB: loop body
LE: loop exit
PB: predicated region body
PF: predicated region fallthrough
CT: control target
= control target key end

     0   :  { %11 = vsyncpa [#allocation3], 0  ;;  %s4860_s21 = smov [#allocation2]   ;;  %s9390_s0 = inlined_call_operand.vmem [shape: f32[1,8,1024], index: 0, kind: input, shape index: {}]   ;;  %s9391_s1 = inlined_call_operand.vmem [shape: bf16[216,8], index: 1, kind: input, shape index: {}]   ;;  %s9392_s2 = inlined_call_operand.vmem [shape: bf16[216,8], index: 2, kind: input, shape index: {}]   ;;  %s9393_s3 = inlined_call_operand.vmem [shape: bf16[3,8], index: 3, kind: input, shape index: {}]   ;;  %s9394_s4 = inlined_call_operand.vmem [shape: f32[3,1], index: 4, kind: input, shape index: {}]   ;;  %s9395_s5 = inlined_call_operand.hbm [shape: f32[216,1024], index: 5, kind: input, shape index: {}]   ;;  %s9396_s6 = inlined_call_operand.vmem [shape: f32[1,2,3,512], index: 6, kind: output, shape index: {}]  }
   0x1   :  { %s27_s22 = sshll.u32 %s4860_s21, 4  ;;  %s4836_s25 = scalar_lea.hbm %s9395_s5, 27648  ;;  %s28_s22 = int_to_ptr.vmem [resolvable:$true] %s27_s22 }
   0x2   :  { %p4837_p0 = scmp.ne.s32.totalorder %s9395_s5, %s4836_s25  ;;  %p4840_p1 = scmp.lt.u32.totalorder %s4836_s25, %s9395_s5 }
   0x4   :  { %p4842_p2 = pnand %p4840_p1, %p4837_p0 }
   0x6   :  { %4845 = shalt.err (!%p4842_p2)
}
   0x7   :  { %s4846_s30 = scalar_lea.vmem %s28_s22, 27648  ;;  %p4851_p4 = scmp.lt.s32.totalorder %s28_s22, %s28_s22 }
   0x8   :  { %p4847_p3 = scmp.ne.s32.totalorder %s28_s22, %s4846_s30  ;;  %p4852_p5 = scmp.lt.s32.totalorder %s4846_s30, %s4846_s30 }
   0xa   :  { %p4853_p6 = por %p4852_p5, %p4851_p4 }
   0xc   :  { %p4854_p7 = pnand %p4853_p6, %p4847_p3 }
   0xe   :  { %4857 = shalt.err (!%p4854_p7)
}
   0xf   :  { %s4861_s7 = smov 1024   ;;  %s4862_s8 = smov 64  }
  0x10   :  { %33 = dma.hbm_to_vmem [thread:$0]  %s9395_s5, 27648, %s28_s22, [#allocation3], %s4861_s7, %s4861_s7, %s4862_s8  }
  0x11   :  { %4858 = dma.done.wait [#allocation3], 27648  }
  0x12   :  { %4859 = vsyncadd [#allocation3], 4294939648  ;;  %v9397_v0 = vmov 0   ;;  %v39_v1 = vld [vmem:[%s9390_s0 + $0x8] sm:$0xff]  ;;  %vm9517_vm0 = vcmask 1043456   ;;  %v41_v2 = vld [vmem:[%s9390_s0 + $0x18] sm:$0xff] }
  0x13   :  { %249 = vmatprep.mubr.bf16.mxu0 %v9397_v0  ;;  %420 = vmatprep.mubr.bf16.mxu1 %v9397_v0  ;;  %v38_v3 = vld [vmem:[%s9390_s0] sm:$0xff]  ;;  %v74_v4 = vpack.c.bf16 %v39_v1, %v39_v1  ;;  %v76_v5 = vpack.c.bf16 %v41_v2, %v41_v2  ;;  %v40_v7 = vld [vmem:[%s9390_s0 + $0x10] sm:$0xff]  ;;  %vm9516_vm1 = vcmask 64512   ;;  %v4961_v12 = vld [vmem:[%s9391_s1 + $0x8] sm:$0xff]   ;;  %s4865_s29 = smov 72   ;;  %s4866_s30 = smov 71  }
  0x14   :  { %4591 = vset.pattern.permute.xlu0 %v9397_v0  ;;  %v73_v6 = vpack.c.bf16 %v38_v3, %v38_v3  ;;  %v75_v8 = vpack.c.bf16 %v40_v7, %v40_v7  ;;  %v4949_v10 = vld [vmem:[%s9391_s1] sm:$0xff]   ;;  %v43_v13 = vld [vmem:[%s9390_s0 + $0x28] sm:$0xff]  ;;  %v45_v15 = vld [vmem:[%s9390_s0 + $0x38] sm:$0xff]  ;;  %s4867_s7 = smov 65   ;;  %s4869_s9 = smov 57  }
  0x15   :  { %4427 = vmatprep.subr.msk.bf16.mxu0 %vm9517_vm0, %v74_v4  ;;  %4442 = vmatprep.subr.msk.bf16.mxu1 %vm9517_vm0, %v76_v5  ;;  %v42_v14 = vld [vmem:[%s9390_s0 + $0x20] sm:$0xff]  ;;  %v78_v16 = vpack.c.bf16 %v43_v13, %v43_v13  ;;  %v80_v18 = vpack.c.bf16 %v45_v15, %v45_v15  ;;  %v44_v19 = vld [vmem:[%s9390_s0 + $0x30] sm:$0xff]  ;;  %v4999_v24 = vld [vmem:[%s9391_s1 + $0x18] sm:$0xff]   ;;  %s4868_s0 = smov 63   ;;  %s4870_s10 = smov 56  }
  0x16   :  { %v194_v9 = vsel %vm9517_vm0, %v73_v6, 0  ;;  %v200_v11 = vsel %vm9517_vm0, %v75_v8, 0  ;;  %v77_v17 = vpack.c.bf16 %v42_v14, %v42_v14  ;;  %v79_v20 = vpack.c.bf16 %v44_v19, %v44_v19  ;;  %v4987_v22 = vld [vmem:[%s9391_s1 + $0x10] sm:$0xff]   ;;  %v5010_v25 = vld [vmem:[%s9391_s1 + $0x20] sm:$0xff]   ;;  %v5021_v26 = vld [vmem:[%s9391_s1 + $0x28] sm:$0xff]   ;;  %s4871_s11 = smov 55  }
  0x17   :  { %218 = vmatpush1.bf16.msra.mxu0 %v194_v9  ;;  %389 = vmatpush1.bf16.msra.mxu1 %v200_v11  ;;  %v5032_v27 = vld [vmem:[%s9391_s1 + $0x30] sm:$0xff]   ;;  %v5043_v28 = vld [vmem:[%s9391_s1 + $0x38] sm:$0xff]   ;;  %v5054_v29 = vld [vmem:[%s9391_s1 + $0x40] sm:$0xff]   ;;  %s4872_s12 = smov 9   ;;  %s4873_s13 = smov 8  }
  0x18   :  { %4457 = vmatprep.subr.msk.bf16.mxu0 %vm9517_vm0, %v78_v16  ;;  %v206_v21 = vsel %vm9517_vm0, %v77_v17, 0  ;;  %4472 = vmatprep.subr.msk.bf16.mxu1 %vm9517_vm0, %v80_v18  ;;  %v212_v23 = vsel %vm9517_vm0, %v79_v20, 0  ;;  %v5065_v30 = vld [vmem:[%s9391_s1 + $0x48] sm:$0xff]   ;;  %v4602_v31 = vld [vmem:[%s9391_s1 + $0x50] sm:$0xff]   ;;  %v4603_v32 = vld [vmem:[%s9391_s1 + $0x58] sm:$0xff]   ;;  %s4874_s14 = smov 7  }
  0x19   :  { %v4604_v33 = vld [vmem:[%s9391_s1 + $0x60] sm:$0xff]   ;;  %v5097_v34 = vld [vmem:[%s9391_s1 + $0x68] ss:$0 sps:$4 sm:$0xff]   ;;  %v903_v37 = vld [vmem:[#allocation2 + $0x10] sm:$0xff]  ;;  %s4864_s1 = smov 73   ;;  %s4875_s15 = smov 1  }
  0x1a   :  { %4428 = vmatmul.mubr.msk.bf16.vlgmr.msra.gmra.mrb[0].mxu0 %vm9516_vm1, %v4949_v10  ;;  %4443 = vmatmul.mubr.msk.bf16.vlgmr.msra.gmra.mrb[0].mxu1 %vm9516_vm1, %v4949_v10  ;;  %v901_v35 = vld [vmem:[#allocation2] sm:$0xff]  ;;  %v904_v38 = vld [vmem:[#allocation2 + $0x18] sm:$0xff]  ;;  %v902_v50 = vld [vmem:[#allocation2 + $0x8] sm:$0xff]  ;;  %s4876_s5 = smov 127   ;;  %s4877_s16 = smov 121  }
  0x1b   :  { %259 = vmatprep.mubr.bf16.mxu0 %v9397_v0  ;;  %430 = vmatprep.mubr.bf16.mxu1 %v9397_v0  ;;  %v944_v48 = vld [vmem:[#allocation2 + $0x40] sm:$0xff]  ;;  %v946_v52 = vld [vmem:[#allocation2 + $0x50] sm:$0xff]  ;;  %v945_v57 = vld [vmem:[#allocation2 + $0x48] sm:$0xff]  ;;  %s4878_s17 = smov 120   ;;  %s4879_s18 = smov 119  }
  0x1c   :  { %560 = vmatpush1.bf16.msra.mxu0 %v206_v21  ;;  %731 = vmatpush1.bf16.msra.mxu1 %v212_v23  ;;  %v995_v58 = vld [vmem:[#allocation2 + $0x90] sm:$0xff]  ;;  %v947_v4 = vld [vmem:[#allocation2 + $0x58] sm:$0xff]  ;;  %v994_v5 = vld [vmem:[#allocation2 + $0x88] sm:$0xff] }
  0x1d   :  { %v993_v6 = vld [vmem:[#allocation2 + $0x80] sm:$0xff]  ;;  %v996_v17 = vld [vmem:[#allocation2 + $0x98] sm:$0xff]  ;;  %v1043_v21 = vld [vmem:[#allocation2 + $0xc8] sm:$0xff] }
  0x1e   :  { %v1042_v19 = vld [vmem:[#allocation2 + $0xc0] sm:$0xff] }
  0x22   :  { %4429 = vmatmul.mubr.msk.bf16.gmra.mrb[4].mxu0 %vm9516_vm1, %v4961_v12  ;;  %4444 = vmatmul.mubr.msk.bf16.gmra.mrb[4].mxu1 %vm9516_vm1, %v4961_v12 }
  0x23   :  { %269 = vmatprep.mubr.bf16.mxu0 %v9397_v0  ;;  %440 = vmatprep.mubr.bf16.mxu1 %v9397_v0 }
  0x2a   :  { %4430 = vmatmul.mubr.msk.bf16.gmra.mrb[8].mxu0 %vm9516_vm1, %v4987_v22  ;;  %4445 = vmatmul.mubr.msk.bf16.gmra.mrb[8].mxu1 %vm9516_vm1, %v4987_v22 }
  0x2b   :  { %279 = vmatprep.mubr.bf16.mxu0 %v9397_v0  ;;  %450 = vmatprep.mubr.bf16.mxu1 %v9397_v0 }
  0x32   :  { %4431 = vmatmul.mubr.msk.bf16.gmra.mrb[12].mxu0 %vm9516_vm1, %v4999_v24  ;;  %4446 = vmatmul.mubr.msk.bf16.gmra.mrb[12].mxu1 %vm9516_vm1, %v4999_v24 }
  0x33   :  { %289 = vmatprep.mubr.bf16.mxu0 %v9397_v0  ;;  %460 = vmatprep.mubr.bf16.mxu1 %v9397_v0 }
  0x3a   :  { %4432 = vmatmul.mubr.msk.bf16.gmra.mrb[16].mxu0 %vm9516_vm1, %v5010_v25  ;;  %4447 = vmatmul.mubr.msk.bf16.gmra.mrb[16].mxu1 %vm9516_vm1, %v5010_v25 }
  0x3b   :  { %299 = vmatprep.mubr.bf16.mxu0 %v9397_v0  ;;  %470 = vmatprep.mubr.bf16.mxu1 %v9397_v0 }
  0x42   :  { %4433 = vmatmul.mubr.msk.bf16.gmra.mrb[20].mxu0 %vm9516_vm1, %v5021_v26  ;;  %4448 = vmatmul.mubr.msk.bf16.gmra.mrb[20].mxu1 %vm9516_vm1, %v5021_v26 }
  0x43   :  { %309 = vmatprep.mubr.bf16.mxu0 %v9397_v0  ;;  %480 = vmatprep.mubr.bf16.mxu1 %v9397_v0 }
  0x4a   :  { %4434 = vmatmul.mubr.msk.bf16.gmra.mrb[24].mxu0 %vm9516_vm1, %v5032_v27  ;;  %4449 = vmatmul.mubr.msk.bf16.gmra.mrb[24].mxu1 %vm9516_vm1, %v5032_v27 }
  0x4b   :  { %319 = vmatprep.mubr.bf16.mxu0 %v9397_v0  ;;  %490 = vmatprep.mubr.bf16.mxu1 %v9397_v0 }
  0x52   :  { %4435 = vmatmul.mubr.msk.bf16.gmra.mrb[28].mxu0 %vm9516_vm1, %v5043_v28  ;;  %4450 = vmatmul.mubr.msk.bf16.gmra.mrb[28].mxu1 %vm9516_vm1, %v5043_v28 }
  0x53   :  { %329 = vmatprep.mubr.bf16.mxu0 %v9397_v0  ;;  %500 = vmatprep.mubr.bf16.mxu1 %v9397_v0 }
  0x5a   :  { %4436 = vmatmul.mubr.msk.bf16.gmra.mrb[32].mxu0 %vm9516_vm1, %v5054_v29  ;;  %4451 = vmatmul.mubr.msk.bf16.gmra.mrb[32].mxu1 %vm9516_vm1, %v5054_v29 }
  0x5b   :  { %339 = vmatprep.mubr.bf16.mxu0 %v9397_v0  ;;  %510 = vmatprep.mubr.bf16.mxu1 %v9397_v0 }
  0x62   :  { %4437 = vmatmul.mubr.msk.bf16.gmra.mrb[36].mxu0 %vm9516_vm1, %v5065_v30  ;;  %4452 = vmatmul.mubr.msk.bf16.gmra.mrb[36].mxu1 %vm9516_vm1, %v5065_v30 }
  0x63   :  { %349 = vmatprep.mubr.bf16.mxu0 %v9397_v0  ;;  %520 = vmatprep.mubr.bf16.mxu1 %v9397_v0 }
  0x6a   :  { %4438 = vmatmul.mubr.msk.bf16.gmra.mrb[40].mxu0 %vm9516_vm1, %v4602_v31  ;;  %4453 = vmatmul.mubr.msk.bf16.gmra.mrb[40].mxu1 %vm9516_vm1, %v4602_v31 }
  0x6b   :  { %359 = vmatprep.mubr.bf16.mxu0 %v9397_v0  ;;  %530 = vmatprep.mubr.bf16.mxu1 %v9397_v0 }
  0x72   :  { %4439 = vmatmul.mubr.msk.bf16.gmra.mrb[44].mxu0 %vm9516_vm1, %v4603_v32  ;;  %4454 = vmatmul.mubr.msk.bf16.gmra.mrb[44].mxu1 %vm9516_vm1, %v4603_v32 }
  0x73   :  { %369 = vmatprep.mubr.bf16.mxu0 %v9397_v0  ;;  %540 = vmatprep.mubr.bf16.mxu1 %v9397_v0 }
  0x7a   :  { %4440 = vmatmul.mubr.msk.bf16.gmra.mrb[48].mxu0 %vm9516_vm1, %v4604_v33  ;;  %4455 = vmatmul.mubr.msk.bf16.gmra.mrb[48].mxu1 %vm9516_vm1, %v4604_v33 }
  0x7b   :  { %379 = vmatprep.mubr.bf16.mxu0 %v9397_v0  ;;  %550 = vmatprep.mubr.bf16.mxu1 %v9397_v0 }
  0x82   :  { %4441 = vmatmul.mubr.msk.bf16.gmra.mrb[52].mxu0 %vm9516_vm1, %v5097_v34  ;;  %4456 = vmatmul.mubr.msk.bf16.gmra.mrb[52].mxu1 %vm9516_vm1, %v5097_v34 }
  0x83   :  { %591 = vmatprep.mubr.bf16.mxu0 %v9397_v0  ;;  %762 = vmatprep.mubr.bf16.mxu1 %v9397_v0 }
  0x8a   :  { %4458 = vmatmul.mubr.msk.bf16.vlgmr.msra.gmra.mrb[56].mxu0 %vm9516_vm1, %v4949_v10  ;;  %4473 = vmatmul.mubr.msk.bf16.vlgmr.msra.gmra.mrb[56].mxu1 %vm9516_vm1, %v4949_v10 }
  0x8b   :  { %601 = vmatprep.mubr.bf16.mxu0 %v9397_v0  ;;  %772 = vmatprep.mubr.bf16.mxu1 %v9397_v0 }
  0x92   :  { %4459 = vmatmul.mubr.msk.bf16.gmra.mrb[60].mxu0 %vm9516_vm1, %v4961_v12  ;;  %4474 = vmatmul.mubr.msk.bf16.gmra.mrb[60].mxu1 %vm9516_vm1, %v4961_v12 }
  0x93   :  { %611 = vmatprep.mubr.bf16.mxu0 %v9397_v0  ;;  %782 = vmatprep.mubr.bf16.mxu1 %v9397_v0 }
  0x9a   :  { %4460 = vmatmul.mubr.msk.bf16.gmra.mrb[64].mxu0 %vm9516_vm1, %v4987_v22  ;;  %4475 = vmatmul.mubr.msk.bf16.gmra.mrb[64].mxu1 %vm9516_vm1, %v4987_v22 }
  0x9b   :  { %621 = vmatprep.mubr.bf16.mxu0 %v9397_v0  ;;  %792 = vmatprep.mubr.bf16.mxu1 %v9397_v0 }
  0xa2   :  { %4461 = vmatmul.mubr.msk.bf16.gmra.mrb[68].mxu0 %vm9516_vm1, %v4999_v24  ;;  %4476 = vmatmul.mubr.msk.bf16.gmra.mrb[68].mxu1 %vm9516_vm1, %v4999_v24 }
  0xa3   :  { %631 = vmatprep.mubr.bf16.mxu0 %v9397_v0  ;;  %802 = vmatprep.mubr.bf16.mxu1 %v9397_v0 }
  0xaa   :  { %4462 = vmatmul.mubr.msk.bf16.gmra.mrb[72].mxu0 %vm9516_vm1, %v5010_v25  ;;  %4477 = vmatmul.mubr.msk.bf16.gmra.mrb[72].mxu1 %vm9516_vm1, %v5010_v25 }
  0xab   :  { %641 = vmatprep.mubr.bf16.mxu0 %v9397_v0  ;;  %812 = vmatprep.mubr.bf16.mxu1 %v9397_v0 }
  0xb2   :  { %4463 = vmatmul.mubr.msk.bf16.gmra.mrb[76].mxu0 %vm9516_vm1, %v5021_v26  ;;  %4478 = vmatmul.mubr.msk.bf16.gmra.mrb[76].mxu1 %vm9516_vm1, %v5021_v26  ;;  %v1044_v26 = vld [vmem:[#allocation2 + $0xd0] sm:$0xff] }
  0xb3   :  { %651 = vmatprep.mubr.bf16.mxu0 %v9397_v0  ;;  %822 = vmatprep.mubr.bf16.mxu1 %v9397_v0 }
  0xba   :  { %4464 = vmatmul.mubr.msk.bf16.gmra.mrb[80].mxu0 %vm9516_vm1, %v5032_v27  ;;  %4479 = vmatmul.mubr.msk.bf16.gmra.mrb[80].mxu1 %vm9516_vm1, %v5032_v27  ;;  %v1091_v27 = vld [vmem:[#allocation2 + $0x100] sm:$0xff] }
  0xbb   :  { %661 = vmatprep.mubr.bf16.mxu0 %v9397_v0  ;;  %832 = vmatprep.mubr.bf16.mxu1 %v9397_v0 }
  0xc2   :  { %4465 = vmatmul.mubr.msk.bf16.gmra.mrb[84].mxu0 %vm9516_vm1, %v5043_v28  ;;  %4480 = vmatmul.mubr.msk.bf16.gmra.mrb[84].mxu1 %vm9516_vm1, %v5043_v28 }
  0xc3   :  { %671 = vmatprep.mubr.bf16.mxu0 %v9397_v0  ;;  %842 = vmatprep.mubr.bf16.mxu1 %v9397_v0 }
  0xca   :  { %4466 = vmatmul.mubr.msk.bf16.gmra.mrb[88].mxu0 %vm9516_vm1, %v5054_v29  ;;  %4481 = vmatmul.mubr.msk.bf16.gmra.mrb[88].mxu1 %vm9516_vm1, %v5054_v29 }
  0xcb   :  { %681 = vmatprep.mubr.bf16.mxu0 %v9397_v0  ;;  %852 = vmatprep.mubr.bf16.mxu1 %v9397_v0 }
  0xd2   :  { %4467 = vmatmul.mubr.msk.bf16.gmra.mrb[92].mxu0 %vm9516_vm1, %v5065_v30  ;;  %4482 = vmatmul.mubr.msk.bf16.gmra.mrb[92].mxu1 %vm9516_vm1, %v5065_v30 }
  0xd3   :  { %691 = vmatprep.mubr.bf16.mxu0 %v9397_v0  ;;  %862 = vmatprep.mubr.bf16.mxu1 %v9397_v0 }
  0xda   :  { %4468 = vmatmul.mubr.msk.bf16.gmra.mrb[96].mxu0 %vm9516_vm1, %v4602_v31  ;;  %4483 = vmatmul.mubr.msk.bf16.gmra.mrb[96].mxu1 %vm9516_vm1, %v4602_v31 }
  0xdb   :  { %701 = vmatprep.mubr.bf16.mxu0 %v9397_v0  ;;  %872 = vmatprep.mubr.bf16.mxu1 %v9397_v0 }
  0xe2   :  { %4469 = vmatmul.mubr.msk.bf16.gmra.mrb[100].mxu0 %vm9516_vm1, %v4603_v32  ;;  %4484 = vmatmul.mubr.msk.bf16.gmra.mrb[100].mxu1 %vm9516_vm1, %v4603_v32 }
  0xe3   :  { %711 = vmatprep.mubr.bf16.mxu0 %v9397_v0  ;;  %882 = vmatprep.mubr.bf16.mxu1 %v9397_v0 }
  0xea   :  { %4470 = vmatmul.mubr.msk.bf16.gmra.mrb[104].mxu0 %vm9516_vm1, %v4604_v33  ;;  %4485 = vmatmul.mubr.msk.bf16.gmra.mrb[104].mxu1 %vm9516_vm1, %v4604_v33 }
  0xeb   :  { %721 = vmatprep.mubr.bf16.mxu0 %v9397_v0  ;;  %892 = vmatprep.mubr.bf16.mxu1 %v9397_v0 }
  0xed   :  { %v251_v36 = vpop.f32.mrb[0].mxu0  ;;  %v422_v40 = vpop.f32.mrb[0].mxu1 }
  0xee   :  { %v909_v39 = vmul.f32 %v901_v35, %v251_v36  ;;  %v253_v41 = vpop.f32.mrb[1].mxu0  ;;  %v424_v42 = vpop.f32.mrb[1].mxu1  ;;  %v911_v44 = vmul.f32 %v903_v37, %v422_v40  ;;  %v1045_v36 = vld [vmem:[#allocation2 + $0xd8] sm:$0xff]  ;;  %v1093_v37 = vld [vmem:[#allocation2 + $0x110] sm:$0xff] }
  0xef   :  { %v255_v43 = vpop.f32.mrb[2].mxu0  ;;  %v912_v45 = vmul.f32 %v904_v38, %v424_v42  ;;  %v426_v46 = vpop.f32.mrb[2].mxu1  ;;  %v910_v54 = vmul.f32 %v902_v50, %v253_v41 }
  0xf0   :  { %917 = vrot.lane.b32.xlu0 %v909_v39, %s4864_s1  ;;  %v257_v47 = vpop.f32.mrb[3].mxu0  ;;  %v428_v49 = vpop.f32.mrb[3].mxu1  ;;  %v952_v51 = vmul.f32 %v944_v48, %v255_v43  ;;  %v954_v61 = vmul.f32 %v946_v52, %v426_v46  ;;  %v1092_v43 = vld [vmem:[#allocation2 + $0x108] sm:$0xff]  ;;  %v1140_v52 = vld [vmem:[#allocation2 + $0x140] sm:$0xff] }
  0xf1   :  { %923 = vrot.lane.b32.xlu1 %v912_v45, %s4864_s1  ;;  %v953_v2 = vmul.f32 %v945_v57, %v257_v47  ;;  %v955_v8 = vmul.f32 %v947_v4, %v428_v49 }
  0xf2   :  { %4471 = vmatmul.mubr.msk.bf16.gmra.mrb[108].mxu0 %vm9516_vm1, %v5097_v34  ;;  %4486 = vmatmul.mubr.msk.bf16.gmra.mrb[108].mxu1 %vm9516_vm1, %v5097_v34 }
  0xf3   :  { %2429 = vmatprep.mubr.bf16.mxu0 %v9397_v0  ;;  %2600 = vmatprep.mubr.bf16.mxu1 %v9397_v0 }
  0xf4   :  { %921 = vrot.lane.b32.xlu0 %v911_v44, %s4864_s1  ;;  %v1094_v44 = vld [vmem:[#allocation2 + $0x118] sm:$0xff] }
  0xf5   :  { %v261_v53 = vpop.f32.mrb[4].mxu0  ;;  %960 = vrot.lane.b32.xlu1 %v952_v51, %s4865_s29  ;;  %v432_v55 = vpop.f32.mrb[4].mxu1 }
  0xf6   :  { %v263_v56 = vpop.f32.mrb[5].mxu0  ;;  %v434_v59 = vpop.f32.mrb[5].mxu1  ;;  %v1003_v3 = vmul.f32 %v995_v58, %v432_v55  ;;  %v1001_v14 = vmul.f32 %v993_v6, %v261_v53  ;;  %v1141_v53 = vld [vmem:[#allocation2 + $0x148] sm:$0xff]  ;;  %v1142_v58 = vld [vmem:[#allocation2 + $0x150] sm:$0xff] }
  0xf7   :  { %v265_v60 = vpop.f32.mrb[6].mxu0  ;;  %v436_v62 = vpop.f32.mrb[6].mxu1  ;;  %v1002_v9 = vmul.f32 %v994_v5, %v263_v56  ;;  %v1004_v20 = vmul.f32 %v996_v17, %v434_v59  ;;  %v1189_v59 = vld [vmem:[#allocation2 + $0x180] sm:$0xff]  ;;  %v1143_v5 = vld [vmem:[#allocation2 + $0x158] sm:$0xff]  ;;  %v1191_v6 = vld [vmem:[#allocation2 + $0x190] sm:$0xff] }
  0xf8   :  { %919 = vrot.lane.b32.xlu0 %v910_v54, %s4864_s1  ;;  %v267_v63 = vpop.f32.mrb[7].mxu0  ;;  %v438_v1 = vpop.f32.mrb[7].mxu1  ;;  %v1050_v23 = vmul.f32 %v1042_v19, %v265_v60  ;;  %v1052_v34 = vmul.f32 %v1044_v26, %v436_v62 }
  0xf9   :  { %964 = vrot.lane.b32.xlu1 %v954_v61, %s4865_s29  ;;  %v1051_v30 = vmul.f32 %v1043_v21, %v267_v63  ;;  %v1053_v39 = vmul.f32 %v1045_v36, %v438_v1  ;;  %v1238_v21 = vld [vmem:[#allocation2 + $0x1c0] sm:$0xff] }
  0xfc   :  { %962 = vrot.lane.b32.xlu0 %v953_v2, %s4865_s29 }
  0xfd   :  { %v271_v7 = vpop.f32.mrb[8].mxu0  ;;  %1013 = vrot.lane.b32.xlu1 %v1003_v3, %s4866_s30  ;;  %v442_v11 = vpop.f32.mrb[8].mxu1 }
  0xfe   :  { %v273_v10 = vpop.f32.mrb[9].mxu0  ;;  %v444_v13 = vpop.f32.mrb[9].mxu1  ;;  %v1099_v35 = vmul.f32 %v1091_v27, %v271_v7  ;;  %v1101_v40 = vmul.f32 %v1093_v37, %v442_v11 }
  0xff   :  { %v275_v12 = vpop.f32.mrb[10].mxu0  ;;  %v5192_v16 = vpop.f32.mrb[10].mxu1  ;;  %v1100_v50 = vmul.f32 %v1092_v43, %v273_v10  ;;  %v1102_v51 = vmul.f32 %v1094_v44, %v444_v13  ;;  %v1192_v13 = vld [vmem:[#allocation2 + $0x198] sm:$0xff]  ;;  %v1289_v44 = vld [vmem:[#allocation2 + $0x210] sm:$0xff] }
 0x100   :  { %966 = vrot.lane.b32.xlu0 %v955_v8, %s4865_s29  ;;  %v277_v15 = vpop.f32.mrb[11].mxu0  ;;  %v5194_v18 = vpop.f32.mrb[11].mxu1  ;;  %v1148_v55 = vmul.f32 %v1140_v52, %v275_v12  ;;  %v1150_v3 = vmul.f32 %v1142_v58, %v5192_v16  ;;  %v1190_v12 = vld [vmem:[#allocation2 + $0x188] sm:$0xff]  ;;  %v1241_v43 = vld [vmem:[#allocation2 + $0x1d8] sm:$0xff] }
 0x101   :  { %1011 = vrot.lane.b32.xlu1 %v1002_v9, %s4866_s30  ;;  %v1149_v62 = vmul.f32 %v1141_v53, %v277_v15  ;;  %v1151_v8 = vmul.f32 %v1143_v5, %v5194_v18  ;;  %v1288_v53 = vld [vmem:[#allocation2 + $0x208] sm:$0xff] }
 0x102   :  { %v1337_v5 = vld [vmem:[#allocation2 + $0x248] sm:$0xff] }
 0x104   :  { %1009 = vrot.lane.b32.xlu0 %v1001_v14, %s4866_s30 }
 0x105   :  { %v281_v22 = vpop.f32.mrb[12].mxu0  ;;  %1015 = vrot.lane.b32.xlu1 %v1004_v20, %s4866_s30  ;;  %v452_v25 = vpop.f32.mrb[12].mxu1 }
 0x106   :  { %v5199_v24 = vpop.f32.mrb[13].mxu0  ;;  %v5203_v29 = vpop.f32.mrb[13].mxu1  ;;  %v1197_v4 = vmul.f32 %v1189_v59, %v281_v22  ;;  %v1199_v9 = vmul.f32 %v1191_v6, %v452_v25  ;;  %v1239_v22 = vld [vmem:[#allocation2 + $0x1c8] sm:$0xff] }
 0x107   :  { %v5201_v28 = vpop.f32.mrb[14].mxu0  ;;  %v5208_v32 = vpop.f32.mrb[14].mxu1  ;;  %v1198_v19 = vmul.f32 %v1190_v12, %v5199_v24  ;;  %v1200_v20 = vmul.f32 %v1192_v13, %v5203_v29  ;;  %v1287_v24 = vld [vmem:[#allocation2 + $0x200] sm:$0xff]  ;;  %v1338_v13 = vld [vmem:[#allocation2 + $0x250] sm:$0xff] }
 0x108   :  { %1058 = vrot.lane.b32.xlu0 %v1050_v23, %s4867_s7  ;;  %v5206_v31 = vpop.f32.mrb[15].mxu0  ;;  %v5210_v33 = vpop.f32.mrb[15].mxu1  ;;  %v1246_v25 = vmul.f32 %v1238_v21, %v5201_v28 }
 0x109   :  { %1060 = vrot.lane.b32.xlu1 %v1051_v30, %s4867_s7  ;;  %v1240_v30 = vld [vmem:[#allocation2 + $0x1d0] sm:$0xff] }
 0x10c   :  { %1062 = vrot.lane.b32.xlu0 %v1052_v34, %s4867_s7 }
 0x10d   :  { %v5214_v38 = vpop.f32.mrb[16].mxu0  ;;  %1107 = vrot.lane.b32.xlu1 %v1099_v35, %s4862_s8  ;;  %v5219_v42 = vpop.f32.mrb[16].mxu1  ;;  %v1247_v35 = vmul.f32 %v1239_v22, %v5206_v31 }
 0x10e   :  { %v5217_v41 = vpop.f32.mrb[17].mxu0  ;;  %v5223_v46 = vpop.f32.mrb[17].mxu1 }
 0x10f   :  { %v5221_v45 = vpop.f32.mrb[18].mxu0  ;;  %v5228_v48 = vpop.f32.mrb[18].mxu1 }
 0x110   :  { %1064 = vrot.lane.b32.xlu0 %v1053_v39, %s4867_s7  ;;  %v5226_v47 = vpop.f32.mrb[19].mxu0  ;;  %v5230_v49 = vpop.f32.mrb[19].mxu1  ;;  %v1248_v39 = vmul.f32 %v1240_v30, %v5208_v32 }
 0x111   :  { %1111 = vrot.lane.b32.xlu1 %v1101_v40, %s4862_s8  ;;  %v1295_v40 = vmul.f32 %v1287_v24, %v5214_v38  ;;  %v1339_v24 = vld [vmem:[#allocation2 + $0x258] sm:$0xff] }
 0x114   :  { %1109 = vrot.lane.b32.xlu0 %v1100_v50, %s4862_s8  ;;  %v1249_v50 = vmul.f32 %v1241_v43, %v5210_v33 }
 0x115   :  { %v5234_v54 = vpop.f32.mrb[20].mxu0  ;;  %1113 = vrot.lane.b32.xlu1 %v1102_v51, %s4862_s8  ;;  %v5239_v57 = vpop.f32.mrb[20].mxu1  ;;  %v1297_v51 = vmul.f32 %v1289_v44, %v5219_v42  ;;  %v1296_v42 = vmul.f32 %v1288_v53, %v5217_v41  ;;  %v1385_v41 = vld [vmem:[#allocation2 + $0x280] sm:$0xff]  ;;  %v1386_v44 = vld [vmem:[#allocation2 + $0x288] sm:$0xff] }
 0x116   :  { %v5237_v56 = vpop.f32.mrb[21].mxu0  ;;  %v5243_v61 = vpop.f32.mrb[21].mxu1  ;;  %v1393_v30 = vmul.f32 %v1385_v41, %v5234_v54 }
 0x117   :  { %v5241_v60 = vpop.f32.mrb[22].mxu0  ;;  %v5248_v1 = vpop.f32.mrb[22].mxu1 }
 0x118   :  { %1156 = vrot.lane.b32.xlu0 %v1148_v55, %s4868_s0  ;;  %v5246_v63 = vpop.f32.mrb[23].mxu0  ;;  %v5250_v2 = vpop.f32.mrb[23].mxu1  ;;  %v1290_v55 = vld [vmem:[#allocation2 + $0x218] sm:$0xff] }
 0x119   :  { %1158 = vrot.lane.b32.xlu1 %v1149_v62, %s4868_s0 }
 0x11c   :  { %1160 = vrot.lane.b32.xlu0 %v1150_v3, %s4868_s0  ;;  %v1298_v3 = vmul.f32 %v1290_v55, %v5223_v46 }
 0x11d   :  { %v5255_v7 = vpop.f32.mrb[24].mxu0  ;;  %1205 = vrot.lane.b32.xlu1 %v1197_v4, %s4869_s9  ;;  %v5261_v11 = vpop.f32.mrb[24].mxu1  ;;  %v1336_v4 = vld [vmem:[#allocation2 + $0x240] sm:$0xff] }
 0x11e   :  { %v5259_v10 = vpop.f32.mrb[25].mxu0  ;;  %v5265_v15 = vpop.f32.mrb[25].mxu1 }
 0x11f   :  { %v5263_v14 = vpop.f32.mrb[26].mxu0  ;;  %v5270_v17 = vpop.f32.mrb[26].mxu1 }
 0x120   :  { %9659 = vst [vmem:[#allocation5_spill] sm:$0xff] %v5263_v14  ;;  %1162 = vrot.lane.b32.xlu0 %v1151_v8, %s4868_s0  ;;  %v5268_v16 = vpop.f32.mrb[27].mxu0  ;;  %9661 = vst [vmem:[#allocation7_spill] sm:$0xff] %v5270_v17  ;;  %v5272_v18 = vpop.f32.mrb[27].mxu1  ;;  %v1344_v8 = vmul.f32 %v1336_v4, %v5221_v45  ;;  %v1435_v4 = vld [vmem:[#allocation2 + $0x2c8] sm:$0xff]  ;;  %v1589_v14 = vld [vmem:[#allocation2 + $0x3c0] sm:$0xff] }
 0x121   :  { %9660 = vst [vmem:[#allocation6_spill] sm:$0xff] %v5268_v16  ;;  %9662 = vst [vmem:[#allocation8_spill] sm:$0xff] %v5272_v18  ;;  %1209 = vrot.lane.b32.xlu1 %v1199_v9, %s4869_s9  ;;  %v1639_v16 = vld [vmem:[#allocation2 + $0x408] sm:$0xff] }
 0x124   :  { %1207 = vrot.lane.b32.xlu0 %v1198_v19, %s4869_s9 }
 0x125   :  { %v5278_v23 = vpop.f32.mrb[28].mxu0  ;;  %1211 = vrot.lane.b32.xlu1 %v1200_v20, %s4869_s9  ;;  %v5284_v27 = vpop.f32.mrb[28].mxu1  ;;  %v1345_v20 = vmul.f32 %v1337_v5, %v5226_v47 }
 0x126   :  { %v5282_v26 = vpop.f32.mrb[29].mxu0  ;;  %v5288_v29 = vpop.f32.mrb[29].mxu1 }
 0x127   :  { %v5286_v34 = vpop.f32.mrb[30].mxu0  ;;  %v5294_v28 = vpop.f32.mrb[30].mxu1 }
 0x128   :  { %1254 = vrot.lane.b32.xlu0 %v1246_v25, %s4870_s10  ;;  %v5292_v36 = vpop.f32.mrb[31].mxu0  ;;  %v5296_v37 = vpop.f32.mrb[31].mxu1  ;;  %v1346_v25 = vmul.f32 %v1338_v13, %v5228_v48 }
 0x129   :  { %1256 = vrot.lane.b32.xlu1 %v1247_v35, %s4870_s10  ;;  %v1387_v35 = vld [vmem:[#allocation2 + $0x290] sm:$0xff] }
 0x12c   :  { %1258 = vrot.lane.b32.xlu0 %v1248_v39, %s4870_s10  ;;  %v1347_v39 = vmul.f32 %v1339_v24, %v5230_v49 }
 0x12d   :  { %v5302_v31 = vpop.f32.mrb[32].mxu0  ;;  %1303 = vrot.lane.b32.xlu1 %v1295_v40, %s4871_s11  ;;  %v5309_v32 = vpop.f32.mrb[32].mxu1  ;;  %v1395_v40 = vmul.f32 %v1387_v35, %v5239_v57  ;;  %v1394_v57 = vmul.f32 %v1386_v44, %v5237_v56  ;;  %v1483_v56 = vld [vmem:[#allocation2 + $0x300] sm:$0xff]  ;;  %v1437_v44 = vld [vmem:[#allocation2 + $0x2d8] sm:$0xff] }
 0x12e   :  { %v5307_v52 = vpop.f32.mrb[33].mxu0  ;;  %v5313_v58 = vpop.f32.mrb[33].mxu1 }
 0x12f   :  { %v5311_v38 = vpop.f32.mrb[34].mxu0  ;;  %v5318_v33 = vpop.f32.mrb[34].mxu1 }
 0x130   :  { %1260 = vrot.lane.b32.xlu0 %v1249_v50, %s4870_s10  ;;  %v5316_v59 = vpop.f32.mrb[35].mxu0  ;;  %v5320_v62 = vpop.f32.mrb[35].mxu1  ;;  %v1388_v50 = vld [vmem:[#allocation2 + $0x298] sm:$0xff] }
 0x131   :  { %1307 = vrot.lane.b32.xlu1 %v1297_v51, %s4871_s11 }
 0x134   :  { %1305 = vrot.lane.b32.xlu0 %v1296_v42, %s4871_s11  ;;  %v1396_v42 = vmul.f32 %v1388_v50, %v5243_v61  ;;  %v1485_v50 = vld [vmem:[#allocation2 + $0x310] sm:$0xff] }
 0x135   :  { %v5326_v6 = vpop.f32.mrb[36].mxu0  ;;  %1309 = vrot.lane.b32.xlu1 %v1298_v3, %s4871_s11  ;;  %v5332_v12 = vpop.f32.mrb[36].mxu1  ;;  %v1434_v3 = vld [vmem:[#allocation2 + $0x2c0] sm:$0xff] }
 0x136   :  { %v5330_v9 = vpop.f32.mrb[37].mxu0  ;;  %v5336_v46 = vpop.f32.mrb[37].mxu1 }
 0x137   :  { %v5334_v19 = vpop.f32.mrb[38].mxu0  ;;  %v5342_v45 = vpop.f32.mrb[38].mxu1 }
 0x138   :  { %1352 = vrot.lane.b32.xlu0 %v1344_v8, %s4872_s12  ;;  %v5340_v21 = vpop.f32.mrb[39].mxu0  ;;  %v5344_v22 = vpop.f32.mrb[39].mxu1  ;;  %v1442_v8 = vmul.f32 %v1434_v3, %v5241_v60 }
 0x139   :  { %1354 = vrot.lane.b32.xlu1 %v1345_v20, %s4872_s12  ;;  %v1436_v20 = vld [vmem:[#allocation2 + $0x2d0] sm:$0xff] }
 0x13c   :  { %1356 = vrot.lane.b32.xlu0 %v1346_v25, %s4872_s12 }
 0x13d   :  { %v5350_v47 = vpop.f32.mrb[40].mxu0  ;;  %1401 = vrot.lane.b32.xlu1 %v1393_v30, %s4873_s13  ;;  %v5357_v48 = vpop.f32.mrb[40].mxu1  ;;  %v1443_v30 = vmul.f32 %v1435_v4, %v5246_v63  ;;  %v1484_v4 = vld [vmem:[#allocation2 + $0x308] sm:$0xff] }
 0x13e   :  { %v5355_v43 = vpop.f32.mrb[41].mxu0  ;;  %v5361_v51 = vpop.f32.mrb[41].mxu1 }
 0x13f   :  { %v5359_v54 = vpop.f32.mrb[42].mxu0  ;;  %v5366_v49 = vpop.f32.mrb[42].mxu1 }
 0x140   :  { %1358 = vrot.lane.b32.xlu0 %v1347_v39, %s4872_s12  ;;  %v5364_v53 = vpop.f32.mrb[43].mxu0  ;;  %v5368_v55 = vpop.f32.mrb[43].mxu1  ;;  %v1444_v39 = vmul.f32 %v1436_v20, %v5248_v1 }
 0x141   :  { %1405 = vrot.lane.b32.xlu1 %v1395_v40, %s4873_s13  ;;  %v1491_v40 = vmul.f32 %v1483_v56, %v5255_v7 }
 0x144   :  { %1403 = vrot.lane.b32.xlu0 %v1394_v57, %s4873_s13  ;;  %v1445_v57 = vmul.f32 %v1437_v44, %v5250_v2  ;;  %v1542_v44 = vld [vmem:[#allocation2 + $0x390] sm:$0xff] }
 0x145   :  { %v5374_v5 = vpop.f32.mrb[44].mxu0  ;;  %1407 = vrot.lane.b32.xlu1 %v1396_v42, %s4873_s13  ;;  %v5380_v41 = vpop.f32.mrb[44].mxu1  ;;  %v1493_v42 = vmul.f32 %v1485_v50, %v5261_v11  ;;  %v1492_v11 = vmul.f32 %v1484_v4, %v5259_v10  ;;  %v1550_v0 = vmul.f32 %v1542_v44, %v5284_v27  ;;  %v1597_v27 = vmul.f32 %v1589_v14, %v5286_v34 }
 0x146   :  { %v5378_v13 = vpop.f32.mrb[45].mxu0  ;;  %v5384_v61 = vpop.f32.mrb[45].mxu1 }
 0x147   :  { %v5382_v25 = vpop.f32.mrb[46].mxu0  ;;  %v5390_v60 = vpop.f32.mrb[46].mxu1 }
 0x148   :  { %1450 = vrot.lane.b32.xlu0 %v1442_v8, %s4874_s14  ;;  %v5388_v24 = vpop.f32.mrb[47].mxu0  ;;  %v5392_v35 = vpop.f32.mrb[47].mxu1  ;;  %v1540_v8 = vld [vmem:[#allocation2 + $0x380] sm:$0xff] }
 0x149   :  { %1452 = vrot.lane.b32.xlu1 %v1443_v30, %s4874_s14 }
 0x14c   :  { %1454 = vrot.lane.b32.xlu0 %v1444_v39, %s4874_s14  ;;  %v1548_v39 = vmul.f32 %v1540_v8, %v5278_v23 }
 0x14d   :  { %v5398_v63 = vpop.f32.mrb[48].mxu0  ;;  %1499 = vrot.lane.b32.xlu1 %v1491_v40, %s4875_s15  ;;  %v5405_v1 = vpop.f32.mrb[48].mxu1  ;;  %v1486_v40 = vld [vmem:[#allocation2 + $0x318] sm:$0xff] }
 0x14e   :  { %v5403_v3 = vpop.f32.mrb[49].mxu0  ;;  %v5409_v20 = vpop.f32.mrb[49].mxu1 }
 0x14f   :  { %v5407_v7 = vpop.f32.mrb[50].mxu0  ;;  %v5414_v2 = vpop.f32.mrb[50].mxu1 }
 0x150   :  { %1456 = vrot.lane.b32.xlu0 %v1445_v57, %s4874_s14  ;;  %v5412_v56 = vpop.f32.mrb[51].mxu0  ;;  %v5416_v30 = vpop.f32.mrb[51].mxu1  ;;  %v1494_v57 = vmul.f32 %v1486_v40, %v5265_v15  ;;  %v1591_v40 = vld [vmem:[#allocation2 + $0x3d0] sm:$0xff] }
 0x151   :  { %1503 = vrot.lane.b32.xlu1 %v1493_v42, %s4875_s15  ;;  %v1541_v42 = vld [vmem:[#allocation2 + $0x388] sm:$0xff]  ;;  %v1599_v14 = vmul.f32 %v1591_v40, %v5294_v28 }
 0x152   :  { %v1549_v15 = vmul.f32 %v1541_v42, %v5282_v26  ;;  %v1590_v26 = vld [vmem:[#allocation2 + $0x3c8] sm:$0xff] }
 0x154   :  { %1501 = vrot.lane.b32.xlu0 %v1492_v11, %s4875_s15 }
 0x155   :  { %v5422_v50 = vpop.f32.mrb[52].mxu0  ;;  %1556 = vrot.lane.b32.xlu1 %v1548_v39, %s4876_s5  ;;  %v5429_v10 = vpop.f32.mrb[52].mxu1  ;;  %v1543_v39 = vld [vmem:[#allocation2 + $0x398] sm:$0xff] }
 0x156   :  { %v5427_v18 = vpop.f32.mrb[53].mxu0  ;;  %v5431_v23 = vpop.f32.mrb[53].mxu1 }
 0x157   :  { %v385_v4 = vpop.f32.mrb[54].mxu0  ;;  %v556_v11 = vpop.f32.mrb[54].mxu1 }
 0x158   :  { %1505 = vrot.lane.b32.xlu0 %v1494_v57, %s4875_s15  ;;  %v386_v8 = vpop.f32.mrb[55].mxu0  ;;  %v557_v17 = vpop.f32.mrb[55].mxu1  ;;  %v1551_v4 = vmul.f32 %v1543_v39, %v5288_v29  ;;  %v1592_v29 = vld [vmem:[#allocation2 + $0x3d8] sm:$0xff]  ;;  %v1638_v11 = vld [vmem:[#allocation2 + $0x400] sm:$0xff]  ;;  %v1598_v39 = vmul.f32 %v1590_v26, %v5292_v36 }
 0x159   :  { %1560 = vrot.lane.b32.xlu1 %v1550_v0, %s4876_s5  ;;  %v1646_v28 = vmul.f32 %v1638_v11, %v5302_v31 }
 0x15c   :  { %1558 = vrot.lane.b32.xlu0 %v1549_v15, %s4876_s5 }
 0x15d   :  { %v5438_v44 = vpop.f32.mrb[56].mxu0  ;;  %1605 = vrot.lane.b32.xlu1 %v1597_v27, %s4877_s16  ;;  %v5444_v17 = vpop.f32.mrb[56].mxu1 }
 0x15e   :  { %v5442_v57 = vpop.f32.mrb[57].mxu0  ;;  %v5448_v0 = vpop.f32.mrb[57].mxu1 }
 0x15f   :  { %v5446_v42 = vpop.f32.mrb[58].mxu0  ;;  %v5454_v8 = vpop.f32.mrb[58].mxu1 }
 0x160   :  { %9663 = vst [vmem:[#allocation9_spill] sm:$0xff] %v5446_v42  ;;  %1562 = vrot.lane.b32.xlu0 %v1551_v4, %s4876_s5  ;;  %v5452_v34 = vpop.f32.mrb[59].mxu0  ;;  %v5456_v15 = vpop.f32.mrb[59].mxu1  ;;  %v1600_v42 = vmul.f32 %v1592_v29, %v5296_v37  ;;  %v1640_v4 = vld [vmem:[#allocation2 + $0x410] sm:$0xff] }
 0x161   :  { %9664 = vst [vmem:[#allocation10_spill] sm:$0xff] %v5452_v34  ;;  %9665 = vst [vmem:[#allocation11_spill] sm:$0xff] %v5456_v15  ;;  %1609 = vrot.lane.b32.xlu1 %v1599_v14, %s4877_s16  ;;  %v1647_v15 = vmul.f32 %v1639_v16, %v5307_v52  ;;  %v1648_v31 = vmul.f32 %v1640_v4, %v5309_v32  ;;  %v1687_v16 = vld [vmem:[#allocation2 + $0x440] sm:$0xff] }
 0x162   :  { %v5460_v27 = vpop.permute.xlu0 %917  ;;  %v1695_v32 = vmul.f32 %v1687_v16, %v5311_v38 }
 0x163   :  { %9666 = vst [vmem:[#allocation12_spill] sm:$0xff] %v5460_v27  ;;  %v5464_v40 = vpop.permute.xlu1 %923  ;;  %v1641_v27 = vld [vmem:[#allocation2 + $0x418] sm:$0xff] }
 0x164   :  { %9667 = vst [vmem:[#allocation13_spill] sm:$0xff] %v5464_v40  ;;  %1607 = vrot.lane.b32.xlu0 %v1598_v39, %s4877_s16 }
 0x165   :  { %v5467_v34 = vpop.f32.mrb[60].mxu0  ;;  %1611 = vrot.lane.b32.xlu1 %v1600_v42, %s4877_s16  ;;  %v5477_v37 = vpop.f32.mrb[60].mxu1 }
 0x166   :  { %v5471_v36 = vpop.permute.xlu0 %921  ;;  %v5473_v26 = vpop.f32.mrb[61].mxu0 }
 0x167   :  { %9668 = vst [vmem:[#allocation14_spill] sm:$0xff] %v5471_v36  ;;  %v5475_v14 = vpop.f32.mrb[62].mxu0  ;;  %v5480_v29 = vpop.permute.xlu1 %960 }
 0x168   :  { %9669 = vst [vmem:[#allocation15_spill] sm:$0xff] %v5480_v29  ;;  %1654 = vrot.lane.b32.xlu0 %v1646_v28, %s4878_s17  ;;  %v5483_v11 = vpop.f32.mrb[63].mxu0  ;;  %v5485_v52 = vpop.f32.mrb[61].mxu1  ;;  %v1689_v28 = vld [vmem:[#allocation2 + $0x450] sm:$0xff]  ;;  %v1649_v29 = vmul.f32 %v1641_v27, %v5313_v58  ;;  %v1690_v58 = vld [vmem:[#allocation2 + $0x458] sm:$0xff]  ;;  %v1736_v27 = vld [vmem:[#allocation2 + $0x480] sm:$0xff] }
 0x169   :  { %9670 = vst [vmem:[#allocation16_spill] sm:$0xff] %v5483_v11  ;;  %1656 = vrot.lane.b32.xlu1 %v1647_v15, %s4878_s17  ;;  %v5490_v39 = vpop.f32.mrb[62].mxu1  ;;  %v1688_v11 = vld [vmem:[#allocation2 + $0x448] sm:$0xff]  ;;  %v1697_v16 = vmul.f32 %v1689_v28, %v5318_v33  ;;  %v1698_v28 = vmul.f32 %v1690_v58, %v5320_v62 }
 0x16a   :  { %v5488_v42 = vpop.permute.xlu0 %919  ;;  %v5492_v36 = vpop.f32.mrb[63].mxu1 }
 0x16b   :  { %9671 = vst [vmem:[#allocation17_spill] sm:$0xff] %v5488_v42  ;;  %9672 = vst [vmem:[#allocation18_spill] sm:$0xff] %v5492_v36  ;;  %v5495_v4 = vpop.permute.xlu1 %964 }
 0x16c   :  { %9673 = vst [vmem:[#allocation19_spill] sm:$0xff] %v5495_v4  ;;  %1658 = vrot.lane.b32.xlu0 %v1648_v31, %s4878_s17 }
 0x16d   :  { %v5498_v40 = vpop.f32.mrb[64].mxu0  ;;  %1703 = vrot.lane.b32.xlu1 %v1695_v32, %s4879_s18  ;;  %v5508_v38 = vpop.f32.mrb[64].mxu1 }
 0x16e   :  { %9674 = vst [vmem:[#allocation20_spill] sm:$0xff] %v5498_v40  ;;  %v5502_v15 = vpop.permute.xlu0 %962  ;;  %v5504_v42 = vpop.f32.mrb[65].mxu0  ;;  %9678 = vst [vmem:[#allocation24_spill] sm:$0xff] %v5508_v38  ;;  %v1737_v38 = vld [vmem:[#allocation2 + $0x488] sm:$0xff] }
 0x16f   :  { %9675 = vst [vmem:[#allocation21_spill] sm:$0xff] %v5502_v15  ;;  %9676 = vst [vmem:[#allocation22_spill] sm:$0xff] %v5504_v42  ;;  %v5506_v36 = vpop.f32.mrb[66].mxu0  ;;  %v5511_v31 = vpop.permute.xlu1 %1013  ;;  %v1696_v15 = vmul.f32 %v1688_v11, %v5316_v59  ;;  %v1745_v59 = vmul.f32 %v1737_v38, %v5330_v9 }
 0x170   :  { %9677 = vst [vmem:[#allocation23_spill] sm:$0xff] %v5506_v36  ;;  %9679 = vst [vmem:[#allocation25_spill] sm:$0xff] %v5511_v31  ;;  %1660 = vrot.lane.b32.xlu0 %v1649_v29, %s4878_s17  ;;  %v5514_v4 = vpop.f32.mrb[67].mxu0  ;;  %v5516_v32 = vpop.f32.mrb[65].mxu1  ;;  %v1744_v29 = vmul.f32 %v1736_v27, %v5326_v6  ;;  %v1784_v27 = vld [vmem:[#allocation2 + $0x4c0] sm:$0xff] }
 0x171   :  { %9680 = vst [vmem:[#allocation26_spill] sm:$0xff] %v5514_v4  ;;  %1707 = vrot.lane.b32.xlu1 %v1697_v16, %s4879_s18  ;;  %v5522_v36 = vpop.f32.mrb[66].mxu1  ;;  %v1738_v4 = vld [vmem:[#allocation2 + $0x490] sm:$0xff] }
 0x172   :  { %v5520_v42 = vpop.permute.xlu0 %966  ;;  %v5524_v33 = vpop.f32.mrb[67].mxu1  ;;  %v1746_v6 = vmul.f32 %v1738_v4, %v5332_v12  ;;  %v1792_v12 = vmul.f32 %v1784_v27, %v5334_v19 }
 0x173   :  { %9681 = vst [vmem:[#allocation27_spill] sm:$0xff] %v5520_v42  ;;  %v5528_v31 = vpop.permute.xlu1 %1011 }
 0x174   :  { %9682 = vst [vmem:[#allocation28_spill] sm:$0xff] %v5528_v31  ;;  %1705 = vrot.lane.b32.xlu0 %v1696_v15, %s4879_s18  ;;  %v1739_v31 = vld [vmem:[#allocation2 + $0x498] sm:$0xff] }
 0x175   :  { %v5531_v40 = vpop.f32.mrb[68].mxu0  ;;  %1709 = vrot.lane.b32.xlu1 %v1698_v28, %s4879_s18  ;;  %v5541_v62 = vpop.f32.mrb[68].mxu1 }
 0x176   :  { %v5535_v11 = vpop.permute.xlu0 %1009  ;;  %v5537_v16 = vpop.f32.mrb[69].mxu0 }
 0x177   :  { %9683 = vst [vmem:[#allocation29_spill] sm:$0xff] %v5535_v11  ;;  %v5539_v42 = vpop.f32.mrb[70].mxu0  ;;  %v5544_v58 = vpop.permute.xlu1 %1015 }
 0x178   :  { %9684 = vst [vmem:[#allocation30_spill] sm:$0xff] %v5539_v42  ;;  %9685 = vst [vmem:[#allocation31_spill] sm:$0xff] %v5544_v58  ;;  %1752 = vrot.lane.b32.xlu0 %v1744_v29, %s4864_s1  ;;  %v5547_v15 = vpop.f32.mrb[71].mxu0  ;;  %v5549_v9 = vpop.f32.mrb[69].mxu1  ;;  %v1786_v29 = vld [vmem:[#allocation2 + $0x4d0] sm:$0xff] }
 0x179   :  { %9686 = vst [vmem:[#allocation32_spill] sm:$0xff] %v5547_v15  ;;  %1754 = vrot.lane.b32.xlu1 %v1745_v59, %s4864_s1  ;;  %v5554_v28 = vpop.f32.mrb[70].mxu1  ;;  %v1747_v15 = vmul.f32 %v1739_v31, %v5336_v46  ;;  %v1794_v19 = vmul.f32 %v1786_v29, %v5342_v45  ;;  %v1787_v46 = vld [vmem:[#allocation2 + $0x4d8] sm:$0xff]  ;;  %v1832_v31 = vld [vmem:[#allocation2 + $0x500] sm:$0xff] }
 0x17a   :  { %v5552_v38 = vpop.permute.xlu0 %1058  ;;  %9688 = vst [vmem:[#allocation34_spill] sm:$0xff] %v5554_v28  ;;  %v5556_v11 = vpop.f32.mrb[71].mxu1  ;;  %v1785_v28 = vld [vmem:[#allocation2 + $0x4c8] sm:$0xff]  ;;  %v1795_v29 = vmul.f32 %v1787_v46, %v5344_v22 }
 0x17b   :  { %9687 = vst [vmem:[#allocation33_spill] sm:$0xff] %v5552_v38  ;;  %9689 = vst [vmem:[#allocation35_spill] sm:$0xff] %v5556_v11  ;;  %v5559_v4 = vpop.permute.xlu1 %1060 }
 0x17c   :  { %9690 = vst [vmem:[#allocation36_spill] sm:$0xff] %v5559_v4  ;;  %1756 = vrot.lane.b32.xlu0 %v1746_v6, %s4864_s1 }
 0x17d   :  { %v5562_v58 = vpop.f32.mrb[72].mxu0  ;;  %1800 = vrot.lane.b32.xlu1 %v1792_v12, %s4865_s29  ;;  %v5572_v11 = vpop.f32.mrb[72].mxu1 }
 0x17e   :  { %9691 = vst [vmem:[#allocation37_spill] sm:$0xff] %v5562_v58  ;;  %v5566_v59 = vpop.permute.xlu0 %1062  ;;  %v5568_v38 = vpop.f32.mrb[73].mxu0  ;;  %9694 = vst [vmem:[#allocation40_spill] sm:$0xff] %v5572_v11  ;;  %v1833_v11 = vld [vmem:[#allocation2 + $0x508] sm:$0xff] }
 0x17f   :  { %9692 = vst [vmem:[#allocation38_spill] sm:$0xff] %v5566_v59  ;;  %v5570_v42 = vpop.f32.mrb[74].mxu0  ;;  %v5575_v27 = vpop.permute.xlu1 %1107  ;;  %v1793_v59 = vmul.f32 %v1785_v28, %v5340_v21  ;;  %v1841_v21 = vmul.f32 %v1833_v11, %v5355_v43 }
 0x180   :  { %9693 = vst [vmem:[#allocation39_spill] sm:$0xff] %v5570_v42  ;;  %9695 = vst [vmem:[#allocation41_spill] sm:$0xff] %v5575_v27  ;;  %1758 = vrot.lane.b32.xlu0 %v1747_v15, %s4864_s1  ;;  %v5578_v6 = vpop.f32.mrb[75].mxu0  ;;  %v5580_v12 = vpop.f32.mrb[73].mxu1  ;;  %v1840_v15 = vmul.f32 %v1832_v31, %v5350_v47  ;;  %v1880_v31 = vld [vmem:[#allocation2 + $0x540] sm:$0xff] }
 0x181   :  { %9696 = vst [vmem:[#allocation42_spill] sm:$0xff] %v5578_v6  ;;  %1804 = vrot.lane.b32.xlu1 %v1794_v19, %s4865_s29  ;;  %v5586_v58 = vpop.f32.mrb[74].mxu1  ;;  %v1834_v6 = vld [vmem:[#allocation2 + $0x510] sm:$0xff] }
 0x182   :  { %v5584_v4 = vpop.permute.xlu0 %1064  ;;  %v5588_v45 = vpop.f32.mrb[75].mxu1  ;;  %v1842_v47 = vmul.f32 %v1834_v6, %v5357_v48  ;;  %v1888_v48 = vmul.f32 %v1880_v31, %v5359_v54 }
 0x183   :  { %9697 = vst [vmem:[#allocation43_spill] sm:$0xff] %v5584_v4  ;;  %v5592_v27 = vpop.permute.xlu1 %1111 }
 0x184   :  { %9698 = vst [vmem:[#allocation44_spill] sm:$0xff] %v5592_v27  ;;  %1802 = vrot.lane.b32.xlu0 %v1793_v59, %s4865_s29 }
 0x185   :  { %v5595_v42 = vpop.f32.mrb[76].mxu0  ;;  %1806 = vrot.lane.b32.xlu1 %v1795_v29, %s4865_s29  ;;  %v5605_v22 = vpop.f32.mrb[76].mxu1 }
 0x186   :  { %9699 = vst [vmem:[#allocation45_spill] sm:$0xff] %v5595_v42  ;;  %v5599_v28 = vpop.permute.xlu0 %1109  ;;  %v5601_v19 = vpop.f32.mrb[77].mxu0  ;;  %9701 = vst [vmem:[#allocation47_spill] sm:$0xff] %v5605_v22  ;;  %v1881_v22 = vld [vmem:[#allocation2 + $0x548] sm:$0xff] }
 0x187   :  { %9700 = vst [vmem:[#allocation46_spill] sm:$0xff] %v5599_v28  ;;  %v5603_v4 = vpop.f32.mrb[78].mxu0  ;;  %v5608_v46 = vpop.permute.xlu1 %1113  ;;  %v1835_v28 = vld [vmem:[#allocation2 + $0x518] sm:$0xff] }
 0x188   :  { %9702 = vst [vmem:[#allocation48_spill] sm:$0xff] %v5608_v46  ;;  %1848 = vrot.lane.b32.xlu0 %v1840_v15, %s4866_s30  ;;  %v5611_v59 = vpop.f32.mrb[79].mxu0  ;;  %v5613_v43 = vpop.f32.mrb[77].mxu1  ;;  %v1882_v15 = vld [vmem:[#allocation2 + $0x550] sm:$0xff] }
 0x189   :  { %9703 = vst [vmem:[#allocation49_spill] sm:$0xff] %v5611_v59  ;;  %1850 = vrot.lane.b32.xlu1 %v1841_v21, %s4866_s30  ;;  %v5618_v29 = vpop.f32.mrb[78].mxu1  ;;  %v1843_v59 = vmul.f32 %v1835_v28, %v5361_v51  ;;  %v1890_v54 = vmul.f32 %v1882_v15, %v5366_v49  ;;  %v1883_v51 = vld [vmem:[#allocation2 + $0x558] sm:$0xff] }
 0x18a   :  { %v5616_v11 = vpop.permute.xlu0 %1156  ;;  %9705 = vst [vmem:[#allocation51_spill] sm:$0xff] %v5618_v29  ;;  %v5620_v27 = vpop.f32.mrb[79].mxu1  ;;  %v1891_v49 = vmul.f32 %v1883_v51, %v5368_v55 }
 0x18b   :  { %9704 = vst [vmem:[#allocation50_spill] sm:$0xff] %v5616_v11  ;;  %v5623_v6 = vpop.permute.xlu1 %1158 }
 0x18c   :  { %9706 = vst [vmem:[#allocation52_spill] sm:$0xff] %v5623_v6  ;;  %1852 = vrot.lane.b32.xlu0 %v1842_v47, %s4866_s30  ;;  %v1928_v6 = vld [vmem:[#allocation2 + $0x580] sm:$0xff] }
 0x18d   :  { %v5626_v46 = vpop.f32.mrb[80].mxu0  ;;  %1896 = vrot.lane.b32.xlu1 %v1888_v48, %s4867_s7  ;;  %v5636_v29 = vpop.f32.mrb[80].mxu1  ;;  %v1889_v48 = vmul.f32 %v1881_v22, %v5364_v53  ;;  %v1936_v53 = vmul.f32 %v1928_v6, %v5374_v5  ;;  %v1931_v6 = vld [vmem:[#allocation2 + $0x598] sm:$0xff] }
 0x18e   :  { %v5630_v21 = vpop.permute.xlu0 %1160  ;;  %v5632_v11 = vpop.f32.mrb[81].mxu0  ;;  %9709 = vst [vmem:[#allocation55_spill] sm:$0xff] %v5636_v29 }
 0x18f   :  { %9707 = vst [vmem:[#allocation53_spill] sm:$0xff] %v5630_v21  ;;  %v5634_v42 = vpop.f32.mrb[82].mxu0  ;;  %v5639_v31 = vpop.permute.xlu1 %1205 }
 0x190   :  { %9708 = vst [vmem:[#allocation54_spill] sm:$0xff] %v5634_v42  ;;  %9710 = vst [vmem:[#allocation56_spill] sm:$0xff] %v5639_v31  ;;  %1854 = vrot.lane.b32.xlu0 %v1843_v59, %s4866_s30  ;;  %v5642_v47 = vpop.f32.mrb[83].mxu0  ;;  %v5644_v28 = vpop.f32.mrb[81].mxu1  ;;  %v1929_v59 = vld [vmem:[#allocation2 + $0x588] sm:$0xff] }
 0x191   :  { %9711 = vst [vmem:[#allocation57_spill] sm:$0xff] %v5642_v47  ;;  %1900 = vrot.lane.b32.xlu1 %v1890_v54, %s4867_s7  ;;  %v5650_v42 = vpop.f32.mrb[82].mxu1  ;;  %v1930_v47 = vld [vmem:[#allocation2 + $0x590] sm:$0xff]  ;;  %v1937_v55 = vmul.f32 %v1929_v59, %v5378_v13 }
 0x192   :  { %v5648_v21 = vpop.permute.xlu0 %1162  ;;  %9713 = vst [vmem:[#allocation59_spill] sm:$0xff] %v5650_v42  ;;  %v5652_v29 = vpop.f32.mrb[83].mxu1  ;;  %v1938_v51 = vmul.f32 %v1930_v47, %v5380_v41  ;;  %v1978_v13 = vld [vmem:[#allocation2 + $0x5d0] sm:$0xff]  ;;  %v1939_v47 = vmul.f32 %v1931_v6, %v5384_v61 }
 0x193   :  { %9712 = vst [vmem:[#allocation58_spill] sm:$0xff] %v5648_v21  ;;  %9714 = vst [vmem:[#allocation60_spill] sm:$0xff] %v5652_v29  ;;  %v5655_v15 = vpop.permute.xlu1 %1209  ;;  %v1976_v21 = vld [vmem:[#allocation2 + $0x5c0] sm:$0xff] }
 0x194   :  { %9715 = vst [vmem:[#allocation61_spill] sm:$0xff] %v5655_v15  ;;  %1898 = vrot.lane.b32.xlu0 %v1889_v48, %s4867_s7 }
 0x195   :  { %v5658_v31 = vpop.f32.mrb[84].mxu0  ;;  %1902 = vrot.lane.b32.xlu1 %v1891_v49, %s4867_s7  ;;  %v1984_v49 = vmul.f32 %v1976_v21, %v5382_v25  ;;  %v1986_v25 = vmul.f32 %v1978_v13, %v5390_v60 }
 0x196   :  { %v5662_v22 = vpop.permute.xlu0 %1207  ;;  %v5664_v54 = vpop.f32.mrb[85].mxu0 }
 0x197   :  { %9716 = vst [vmem:[#allocation62_spill] sm:$0xff] %v5662_v22  ;;  %v5666_v42 = vpop.f32.mrb[86].mxu0  ;;  %v5670_v29 = vpop.permute.xlu1 %1211  ;;  %v2026_v22 = vld [vmem:[#allocation2 + $0x610] sm:$0xff] }
 0x198   :  { %9717 = vst [vmem:[#allocation63_spill] sm:$0xff] %v5670_v29  ;;  %1944 = vrot.lane.b32.xlu0 %v1936_v53, %s4862_s8  ;;  %v5673_v48 = vpop.f32.mrb[87].mxu0 }
 0x199   :  { %9718 = vst [vmem:[#allocation64_spill] sm:$0xff] %v5673_v48  ;;  %1946 = vrot.lane.b32.xlu1 %v1937_v55, %s4862_s8  ;;  %v1977_v55 = vld [vmem:[#allocation2 + $0x5c8] sm:$0xff] }
 0x19a   :  { %v5676_v5 = vpop.permute.xlu0 %1254  ;;  %v1985_v61 = vmul.f32 %v1977_v55, %v5388_v24 }
 0x19b   :  { %9719 = vst [vmem:[#allocation65_spill] sm:$0xff] %v5676_v5  ;;  %v5679_v15 = vpop.permute.xlu1 %1256  ;;  %v1979_v5 = vld [vmem:[#allocation2 + $0x5d8] sm:$0xff] }
 0x19c   :  { %9720 = vst [vmem:[#allocation66_spill] sm:$0xff] %v5679_v15  ;;  %1948 = vrot.lane.b32.xlu0 %v1938_v51, %s4862_s8  ;;  %v5698_v15 = vpop.f32.mrb[84].mxu1  ;;  %v1987_v60 = vmul.f32 %v1979_v5, %v5392_v35 }
 0x19d   :  { %v5682_v41 = vpop.f32.mrb[88].mxu0  ;;  %1992 = vrot.lane.b32.xlu1 %v1984_v49, %s4868_s0  ;;  %v5704_v49 = vpop.f32.mrb[85].mxu1 }
 0x19e   :  { %v5686_v59 = vpop.permute.xlu0 %1258  ;;  %v5688_v53 = vpop.f32.mrb[89].mxu0 }
 0x19f   :  { %9721 = vst [vmem:[#allocation67_spill] sm:$0xff] %v5686_v59  ;;  %v5690_v29 = vpop.f32.mrb[90].mxu0  ;;  %v5693_v21 = vpop.permute.xlu1 %1303  ;;  %v2024_v59 = vld [vmem:[#allocation2 + $0x600] sm:$0xff] }
 0x1a0   :  { %9722 = vst [vmem:[#allocation68_spill] sm:$0xff] %v5693_v21  ;;  %1950 = vrot.lane.b32.xlu0 %v1939_v47, %s4862_s8  ;;  %v5696_v51 = vpop.f32.mrb[91].mxu0  ;;  %v5710_v47 = vpop.f32.mrb[86].mxu1  ;;  %v2025_v21 = vld [vmem:[#allocation2 + $0x608] sm:$0xff]  ;;  %v2032_v55 = vmul.f32 %v2024_v59, %v5398_v63  ;;  %v2027_v59 = vld [vmem:[#allocation2 + $0x618] sm:$0xff] }
 0x1a1   :  { %9723 = vst [vmem:[#allocation69_spill] sm:$0xff] %v5696_v51  ;;  %1996 = vrot.lane.b32.xlu1 %v1986_v25, %s4868_s0  ;;  %v5714_v24 = vpop.f32.mrb[87].mxu1  ;;  %v2033_v5 = vmul.f32 %v2025_v21, %v5403_v3  ;;  %v2074_v3 = vld [vmem:[#allocation2 + $0x650] sm:$0xff] }
 0x1a2   :  { %v5702_v6 = vpop.permute.xlu0 %1260  ;;  %9726 = vst [vmem:[#allocation72_spill] sm:$0xff] %v5714_v24  ;;  %v2072_v24 = vld [vmem:[#allocation2 + $0x640] sm:$0xff] }
 0x1a3   :  { %9724 = vst [vmem:[#allocation70_spill] sm:$0xff] %v5702_v6  ;;  %v5707_v13 = vpop.permute.xlu1 %1307 }
 0x1a4   :  { %9725 = vst [vmem:[#allocation71_spill] sm:$0xff] %v5707_v13  ;;  %1994 = vrot.lane.b32.xlu0 %v1985_v61, %s4868_s0  ;;  %v2034_v61 = vmul.f32 %v2026_v22, %v5405_v1  ;;  %v2035_v22 = vmul.f32 %v2027_v59, %v5409_v20 }
 0x1a5   :  { %v5712_v51 = vpop.f32.mrb[92].mxu0  ;;  %1998 = vrot.lane.b32.xlu1 %v1987_v60, %s4868_s0  ;;  %v2080_v60 = vmul.f32 %v2072_v24, %v5407_v7  ;;  %v2082_v7 = vmul.f32 %v2074_v3, %v5414_v2  ;;  %v5762_v2 = vpop.f32.mrb[88].mxu1  ;;  %v2121_v3 = vld [vmem:[#allocation2 + $0x688] sm:$0xff] }
 0x1a6   :  { %v5718_v25 = vpop.permute.xlu0 %1305  ;;  %v5720_v6 = vpop.f32.mrb[93].mxu0  ;;  %9737 = vst [vmem:[#allocation83_spill] sm:$0xff] %v5762_v2 }
 0x1a7   :  { %9727 = vst [vmem:[#allocation73_spill] sm:$0xff] %v5718_v25  ;;  %v5722_v35 = vpop.f32.mrb[94].mxu0  ;;  %v5726_v13 = vpop.permute.xlu1 %1309 }
 0x1a8   :  { %9728 = vst [vmem:[#allocation74_spill] sm:$0xff] %v5726_v13  ;;  %2040 = vrot.lane.b32.xlu0 %v2032_v55, %s4869_s9  ;;  %v5729_v48 = vpop.f32.mrb[95].mxu0 }
 0x1a9   :  { %9729 = vst [vmem:[#allocation75_spill] sm:$0xff] %v5729_v48  ;;  %2042 = vrot.lane.b32.xlu1 %v2033_v5, %s4869_s9  ;;  %v2073_v5 = vld [vmem:[#allocation2 + $0x648] sm:$0xff]  ;;  %v2123_v48 = vld [vmem:[#allocation2 + $0x698] sm:$0xff] }
 0x1aa   :  { %v5732_v63 = vpop.permute.xlu0 %1352  ;;  %v2081_v20 = vmul.f32 %v2073_v5, %v5412_v56 }
 0x1ab   :  { %9730 = vst [vmem:[#allocation76_spill] sm:$0xff] %v5732_v63  ;;  %v5735_v25 = vpop.permute.xlu1 %1354  ;;  %v2075_v63 = vld [vmem:[#allocation2 + $0x658] sm:$0xff] }
 0x1ac   :  { %9731 = vst [vmem:[#allocation77_spill] sm:$0xff] %v5735_v25  ;;  %2044 = vrot.lane.b32.xlu0 %v2034_v61, %s4869_s9 }
 0x1ad   :  { %v5738_v1 = vpop.f32.mrb[96].mxu0  ;;  %2088 = vrot.lane.b32.xlu1 %v2080_v60, %s4870_s10  ;;  %v2120_v60 = vld [vmem:[#allocation2 + $0x680] sm:$0xff] }
 0x1ae   :  { %v5742_v21 = vpop.permute.xlu0 %1356  ;;  %v5744_v55 = vpop.f32.mrb[97].mxu0 }
 0x1af   :  { %9732 = vst [vmem:[#allocation78_spill] sm:$0xff] %v5742_v21  ;;  %v5746_v13 = vpop.f32.mrb[98].mxu0  ;;  %v5749_v24 = vpop.permute.xlu1 %1401  ;;  %v2083_v21 = vmul.f32 %v2075_v63, %v5416_v30 }
 0x1b0   :  { %9733 = vst [vmem:[#allocation79_spill] sm:$0xff] %v5749_v24  ;;  %2046 = vrot.lane.b32.xlu0 %v2035_v22, %s4869_s9  ;;  %v5752_v61 = vpop.f32.mrb[99].mxu0  ;;  %v5774_v63 = vpop.f32.mrb[89].mxu1 }
 0x1b1   :  { %9734 = vst [vmem:[#allocation80_spill] sm:$0xff] %v5752_v61  ;;  %2092 = vrot.lane.b32.xlu1 %v2082_v7, %s4870_s10  ;;  %v2128_v61 = vmul.f32 %v2120_v60, %v5422_v50  ;;  %v2122_v7 = vld [vmem:[#allocation2 + $0x690] sm:$0xff] }
 0x1b2   :  { %v5756_v59 = vpop.permute.xlu0 %1358  ;;  %v2130_v50 = vmul.f32 %v2122_v7, %v5429_v10 }
 0x1b3   :  { %9735 = vst [vmem:[#allocation81_spill] sm:$0xff] %v5756_v59  ;;  %v5759_v25 = vpop.permute.xlu1 %1405  ;;  %v908_v59 = vld [vmem:[#allocation2 + $0x38] sm:$0xff] }
 0x1b4   :  { %9736 = vst [vmem:[#allocation82_spill] sm:$0xff] %v5759_v25  ;;  %2090 = vrot.lane.b32.xlu0 %v2081_v20, %s4870_s10  ;;  %v2129_v20 = vmul.f32 %v2121_v3, %v5427_v18  ;;  %v906_v18 = vld [vmem:[#allocation2 + $0x28] sm:$0xff] }
 0x1b5   :  { %v5764_v22 = vpop.f32.mrb[100].mxu0  ;;  %2094 = vrot.lane.b32.xlu1 %v2083_v21, %s4870_s10  ;;  %v916_v21 = vmul.f32 %v908_v59, %v5448_v0  ;;  %v905_v0 = vld [vmem:[#allocation2 + $0x20] sm:$0xff] }
 0x1b6   :  { %v5768_v56 = vpop.permute.xlu0 %1403  ;;  %v5770_v5 = vpop.f32.mrb[101].mxu0 }
 0x1b7   :  { %9738 = vst [vmem:[#allocation84_spill] sm:$0xff] %v5768_v56  ;;  %v5772_v30 = vpop.f32.mrb[102].mxu0  ;;  %v5777_v25 = vpop.permute.xlu1 %1407 }
 0x1b8   :  { %9739 = vst [vmem:[#allocation85_spill] sm:$0xff] %v5777_v25  ;;  %2136 = vrot.lane.b32.xlu0 %v2128_v61, %s4871_s11  ;;  %v5780_v24 = vpop.f32.mrb[103].mxu0  ;;  %v5787_v56 = vpop.f32.mrb[90].mxu1  ;;  %v2131_v61 = vmul.f32 %v2123_v48, %v5431_v23  ;;  %v950_v25 = vld [vmem:[#allocation2 + $0x70] sm:$0xff]  ;;  %v913_v23 = vmul.f32 %v905_v0, %v5438_v44 }
 0x1b9   :  { %9740 = vst [vmem:[#allocation86_spill] sm:$0xff] %v5780_v24  ;;  %2138 = vrot.lane.b32.xlu1 %v2129_v20, %s4871_s11  ;;  %v914_v20 = vmul.f32 %v906_v18, %v5442_v57  ;;  %v958_v57 = vmul.f32 %v950_v25, %v5454_v8  ;;  %v9753_v8 = vld [vmem:[#allocation11_spill] sm:$0xff] }
 0x1ba   :  { %v5785_v60 = vpop.permute.xlu0 %1450 }
 0x1bb   :  { %9741 = vst [vmem:[#allocation87_spill] sm:$0xff] %v5785_v60  ;;  %v5789_v2 = vpop.permute.xlu1 %1452  ;;  %v5808_v60 = vpop.f32.mrb[91].mxu1 }
 0x1bc   :  { %9742 = vst [vmem:[#allocation88_spill] sm:$0xff] %v5789_v2  ;;  %2140 = vrot.lane.b32.xlu0 %v2130_v50, %s4871_s11  ;;  %9747 = vst [vmem:[#allocation93_spill] sm:$0xff] %v5808_v60  ;;  %v949_v60 = vld [vmem:[#allocation2 + $0x68] sm:$0xff] }
 0x1bd   :  { %v5792_v3 = vpop.f32.mrb[104].mxu0  ;;  %931 = vrot.lane.b32.xlu1 %v916_v21, %s4864_s1  ;;  %v5814_v21 = vpop.f32.mrb[92].mxu1 }
 0x1be   :  { %v5796_v10 = vpop.permute.xlu0 %1454  ;;  %v5798_v7 = vpop.f32.mrb[105].mxu0  ;;  %9749 = vst [vmem:[#allocation95_spill] sm:$0xff] %v5814_v21 }
 0x1bf   :  { %9743 = vst [vmem:[#allocation89_spill] sm:$0xff] %v5796_v10  ;;  %9744 = vst [vmem:[#allocation90_spill] sm:$0xff] %v5798_v7  ;;  %v5800_v59 = vpop.f32.mrb[106].mxu0  ;;  %v5803_v24 = vpop.permute.xlu1 %1499  ;;  %v907_v10 = vld [vmem:[#allocation2 + $0x30] sm:$0xff]  ;;  %v9755_v7 = vld [vmem:[#allocation9_spill] sm:$0xff] }
 0x1c0   :  { %9745 = vst [vmem:[#allocation91_spill] sm:$0xff] %v5803_v24  ;;  %2142 = vrot.lane.b32.xlu0 %v2131_v61, %s4871_s11  ;;  %v5806_v50 = vpop.f32.mrb[107].mxu0  ;;  %v5816_v2 = vpop.f32.mrb[93].mxu1  ;;  %v951_v61 = vld [vmem:[#allocation2 + $0x78] sm:$0xff]  ;;  %v915_v44 = vmul.f32 %v907_v10, %v5444_v17 }
 0x1c1   :  { %9746 = vst [vmem:[#allocation92_spill] sm:$0xff] %v5806_v50  ;;  %927 = vrot.lane.b32.xlu1 %v914_v20, %s4864_s1  ;;  %v5830_v21 = vpop.f32.mrb[94].mxu1  ;;  %v959_v25 = vmul.f32 %v951_v61, %v9753_v8  ;;  %v998_v61 = vld [vmem:[#allocation2 + $0xa8] sm:$0xff] }
 0x1c2   :  { %v5812_v48 = vpop.permute.xlu0 %1456  ;;  %v5844_v8 = vpop.f32.mrb[95].mxu1 }
 0x1c3   :  { %9748 = vst [vmem:[#allocation94_spill] sm:$0xff] %v5812_v48  ;;  %v5819_v18 = vpop.permute.xlu1 %1503  ;;  %v948_v48 = vld [vmem:[#allocation2 + $0x60] sm:$0xff] }
 0x1c4   :  { %9750 = vst [vmem:[#allocation96_spill] sm:$0xff] %v5819_v18  ;;  %925 = vrot.lane.b32.xlu0 %v913_v23, %s4864_s1  ;;  %v956_v17 = vmul.f32 %v948_v48, %v9755_v7  ;;  %v5850_v7 = vpop.f32.mrb[96].mxu1  ;;  %v999_v48 = vld [vmem:[#allocation2 + $0xb0] sm:$0xff] }
 0x1c5   :  { %v5822_v50 = vpop.f32.mrb[108].mxu0  ;;  %972 = vrot.lane.b32.xlu1 %v958_v57, %s4865_s29  ;;  %v997_v57 = vld [vmem:[#allocation2 + $0xa0] sm:$0xff] }
 0x1c6   :  { %v5826_v0 = vpop.permute.xlu0 %1501  ;;  %v5828_v20 = vpop.f32.mrb[109].mxu0 }
 0x1c7   :  { %9751 = vst [vmem:[#allocation97_spill] sm:$0xff] %v5826_v0  ;;  %9752 = vst [vmem:[#allocation98_spill] sm:$0xff] %v5828_v20  ;;  %v727_v24 = vpop.f32.mrb[110].mxu0  ;;  %v5833_v18 = vpop.permute.xlu1 %1556  ;;  %v9756_v20 = vld [vmem:[#allocation10_spill] sm:$0xff] }
 0x1c8   :  { %9754 = vst [vmem:[#allocation11_spill] sm:$0xff] %v5833_v18  ;;  %929 = vrot.lane.b32.xlu0 %v915_v44, %s4864_s1  ;;  %v728_v23 = vpop.f32.mrb[111].mxu0  ;;  %v957_v0 = vmul.f32 %v949_v60, %v9756_v20  ;;  %v1005_v44 = vmul.f32 %v997_v57, %v5467_v34  ;;  %v1006_v60 = vmul.f32 %v998_v61, %v5473_v26  ;;  %v1000_v57 = vld [vmem:[#allocation2 + $0xb8] sm:$0xff] }
 0x1c9   :  { %974 = vrot.lane.b32.xlu1 %v959_v25, %s4865_s29  ;;  %v5852_v25 = vpop.f32.mrb[97].mxu1  ;;  %v1007_v18 = vmul.f32 %v999_v48, %v5477_v37  ;;  %v1098_v26 = vld [vmem:[#allocation2 + $0x138] sm:$0xff]  ;;  %v1008_v61 = vmul.f32 %v1000_v57, %v5485_v52  ;;  %v1048_v37 = vld [vmem:[#allocation2 + $0xf0] sm:$0xff] }
 0x1ca   :  { %v5838_v10 = vpop.permute.xlu0 %1505  ;;  %v1106_v48 = vmul.f32 %v1098_v26, %v5516_v32 }
 0x1cb   :  { %v5841_v24 = vpop.permute.xlu1 %1560 }
 0x1cc   :  { %9757 = vst [vmem:[#allocation9_spill] sm:$0xff] %v5841_v24  ;;  %968 = vrot.lane.b32.xlu0 %v956_v17, %s4865_s29  ;;  %v1046_v17 = vld [vmem:[#allocation2 + $0xe0] sm:$0xff] }
 0x1cd   :  { %970 = vrot.lane.b32.xlu1 %v957_v0, %s4865_s29  ;;  %v5862_v0 = vpop.f32.mrb[98].mxu1 }
 0x1ce   :  { %v5848_v23 = vpop.permute.xlu0 %1558 }
 0x1cf   :  { %9758 = vst [vmem:[#allocation10_spill] sm:$0xff] %v5848_v23  ;;  %v5855_v20 = vpop.permute.xlu1 %1605  ;;  %v1054_v23 = vmul.f32 %v1046_v17, %v5475_v14  ;;  %v5876_v14 = vpop.f32.mrb[99].mxu1  ;;  %v1056_v17 = vmul.f32 %v1048_v37, %v5490_v39 }
 0x1d0   :  { %9759 = vst [vmem:[#allocation99_spill] sm:$0xff] %v5855_v20  ;;  %1017 = vrot.lane.b32.xlu0 %v1005_v44, %s4866_s30  ;;  %v1195_v20 = vld [vmem:[#allocation2 + $0x1b0] sm:$0xff]  ;;  %v5882_v52 = vpop.f32.mrb[100].mxu1 }
 0x1d1   :  { %1019 = vrot.lane.b32.xlu1 %v1006_v60, %s4866_s30  ;;  %v5884_v57 = vpop.f32.mrb[101].mxu1  ;;  %v1203_v32 = vmul.f32 %v1195_v20, %v5541_v62  ;;  %v1294_v62 = vld [vmem:[#allocation2 + $0x238] sm:$0xff] }
 0x1d2   :  { %v5860_v34 = vpop.permute.xlu0 %1562  ;;  %v5894_v37 = vpop.f32.mrb[102].mxu1  ;;  %v9768_v20 = vld [vmem:[#allocation16_spill] sm:$0xff] }
 0x1d3   :  { %v5865_v24 = vpop.permute.xlu1 %1609 }
 0x1d4   :  { %9760 = vst [vmem:[#allocation100_spill] sm:$0xff] %v5865_v24  ;;  %1021 = vrot.lane.b32.xlu0 %v1007_v18, %s4866_s30 }
 0x1d5   :  { %1066 = vrot.lane.b32.xlu1 %v1054_v23, %s4867_s7  ;;  %v1049_v23 = vld [vmem:[#allocation2 + $0xf8] sm:$0xff] }
 0x1d6   :  { %v5870_v44 = vpop.permute.xlu0 %1607 }
 0x1d7   :  { %9761 = vst [vmem:[#allocation101_spill] sm:$0xff] %v5870_v44  ;;  %v5873_v60 = vpop.permute.xlu1 %1611 }
 0x1d8   :  { %9762 = vst [vmem:[#allocation102_spill] sm:$0xff] %v5873_v60  ;;  %1023 = vrot.lane.b32.xlu0 %v1008_v61, %s4866_s30  ;;  %v1196_v61 = vld [vmem:[#allocation2 + $0x1b8] sm:$0xff]  ;;  %v9765_v60 = vld [vmem:[#allocation18_spill] sm:$0xff] }
 0x1d9   :  { %1121 = vrot.lane.b32.xlu1 %v1106_v48, %s4862_s8  ;;  %v1057_v44 = vmul.f32 %v1049_v23, %v9765_v60  ;;  %v1047_v48 = vld [vmem:[#allocation2 + $0xe8] sm:$0xff]  ;;  %v1095_v60 = vld [vmem:[#allocation2 + $0x120] sm:$0xff]  ;;  %v1302_v23 = vmul.f32 %v1294_v62, %v5580_v12  ;;  %v9772_v12 = vld [vmem:[#allocation24_spill] sm:$0xff] }
 0x1da   :  { %v5880_v18 = vpop.permute.xlu0 %1654 }
 0x1db   :  { %9763 = vst [vmem:[#allocation103_spill] sm:$0xff] %v5880_v18  ;;  %v5887_v26 = vpop.permute.xlu1 %1656  ;;  %v1204_v18 = vmul.f32 %v1196_v61, %v5549_v9  ;;  %v9770_v9 = vld [vmem:[#allocation20_spill] sm:$0xff] }
 0x1dc   :  { %9764 = vst [vmem:[#allocation104_spill] sm:$0xff] %v5887_v26  ;;  %1070 = vrot.lane.b32.xlu0 %v1056_v17, %s4867_s7  ;;  %v1055_v26 = vmul.f32 %v1047_v48, %v9768_v20  ;;  %v1103_v61 = vmul.f32 %v1095_v60, %v9770_v9  ;;  %v1490_v48 = vld [vmem:[#allocation2 + $0x338] sm:$0xff]  ;;  %v1096_v60 = vld [vmem:[#allocation2 + $0x128] sm:$0xff]  ;;  %v1593_v9 = vld [vmem:[#allocation2 + $0x3e0] sm:$0xff] }
 0x1dd   :  { %1217 = vrot.lane.b32.xlu1 %v1203_v32, %s4869_s9 }
 0x1de   :  { %v5892_v39 = vpop.permute.xlu0 %1658 }
 0x1df   :  { %9766 = vst [vmem:[#allocation18_spill] sm:$0xff] %v5892_v39  ;;  %v5897_v24 = vpop.permute.xlu1 %1703  ;;  %v1392_v39 = vld [vmem:[#allocation2 + $0x2b8] sm:$0xff] }
 0x1e0   :  { %9767 = vst [vmem:[#allocation105_spill] sm:$0xff] %v5897_v24  ;;  %1072 = vrot.lane.b32.xlu0 %v1057_v44, %s4867_s7  ;;  %v1097_v24 = vld [vmem:[#allocation2 + $0x130] sm:$0xff] }
 0x1e1   :  { %1219 = vrot.lane.b32.xlu1 %v1204_v18, %s4869_s9  ;;  %v1400_v18 = vmul.f32 %v1392_v39, %v5613_v43  ;;  %v1105_v62 = vmul.f32 %v1097_v24, %v9772_v12  ;;  %v1601_v24 = vmul.f32 %v1593_v9, %v5666_v42 }
 0x1e2   :  { %v5902_v17 = vpop.permute.xlu0 %1660 }
 0x1e3   :  { %v5905_v32 = vpop.permute.xlu1 %1707 }
 0x1e4   :  { %9769 = vst [vmem:[#allocation16_spill] sm:$0xff] %v5905_v32  ;;  %1068 = vrot.lane.b32.xlu0 %v1055_v26, %s4867_s7  ;;  %v1498_v26 = vmul.f32 %v1490_v48, %v5644_v28  ;;  %v1691_v28 = vld [vmem:[#allocation2 + $0x460] sm:$0xff]  ;;  %v9776_v48 = vld [vmem:[#allocation23_spill] sm:$0xff] }
 0x1e5   :  { %1317 = vrot.lane.b32.xlu1 %v1302_v23, %s4871_s11 }
 0x1e6   :  { %v5910_v44 = vpop.permute.xlu0 %1705 }
 0x1e7   :  { %9771 = vst [vmem:[#allocation20_spill] sm:$0xff] %v5910_v44  ;;  %v5913_v20 = vpop.permute.xlu1 %1709  ;;  %v9774_v44 = vld [vmem:[#allocation22_spill] sm:$0xff] }
 0x1e8   :  { %1115 = vrot.lane.b32.xlu0 %v1103_v61, %s4862_s8  ;;  %v1104_v43 = vmul.f32 %v1096_v60, %v9774_v44  ;;  %v1144_v61 = vld [vmem:[#allocation2 + $0x160] sm:$0xff]  ;;  %v1699_v44 = vmul.f32 %v1691_v28, %v5690_v29 }
 0x1e9   :  { %1415 = vrot.lane.b32.xlu1 %v1400_v18, %s4873_s13  ;;  %v1152_v12 = vmul.f32 %v1144_v61, %v9776_v48  ;;  %v1788_v60 = vld [vmem:[#allocation2 + $0x4e0] sm:$0xff] }
 0x1ea   :  { %v5919_v32 = vpop.permute.xlu0 %1752  ;;  %v1796_v61 = vmul.f32 %v1788_v60, %v5722_v35  ;;  %v1884_v48 = vld [vmem:[#allocation2 + $0x560] sm:$0xff]  ;;  %v9778_v35 = vld [vmem:[#allocation26_spill] sm:$0xff] }
 0x1eb   :  { %9773 = vst [vmem:[#allocation24_spill] sm:$0xff] %v5919_v32  ;;  %v5921_v23 = vpop.permute.xlu1 %1754  ;;  %v1146_v32 = vld [vmem:[#allocation2 + $0x170] sm:$0xff] }
 0x1ec   :  { %1119 = vrot.lane.b32.xlu0 %v1105_v62, %s4862_s8  ;;  %v1154_v42 = vmul.f32 %v1146_v32, %v5522_v36  ;;  %v1980_v36 = vld [vmem:[#allocation2 + $0x5e0] sm:$0xff]  ;;  %v1892_v32 = vmul.f32 %v1884_v48, %v5746_v13  ;;  %v1292_v13 = vld [vmem:[#allocation2 + $0x228] sm:$0xff] }
 0x1ed   :  { %1513 = vrot.lane.b32.xlu1 %v1498_v26, %s4875_s15 }
 0x1ee   :  { %v5926_v39 = vpop.permute.xlu0 %1756 }
 0x1ef   :  { %v5929_v18 = vpop.permute.xlu1 %1800 }
 0x1f0   :  { %9775 = vst [vmem:[#allocation22_spill] sm:$0xff] %v5929_v18  ;;  %1117 = vrot.lane.b32.xlu0 %v1104_v43, %s4862_s8  ;;  %v1147_v43 = vld [vmem:[#allocation2 + $0x178] sm:$0xff] }
 0x1f1   :  { %1613 = vrot.lane.b32.xlu1 %v1601_v24, %s4877_s16  ;;  %v1155_v29 = vmul.f32 %v1147_v43, %v5524_v33  ;;  %v1988_v33 = vmul.f32 %v1980_v36, %v5772_v30  ;;  %v1193_v43 = vld [vmem:[#allocation2 + $0x1a0] sm:$0xff] }
 0x1f2   :  { %v5934_v62 = vpop.permute.xlu0 %1758  ;;  %v1201_v48 = vmul.f32 %v1193_v43, %v5531_v40  ;;  %v1340_v30 = vld [vmem:[#allocation2 + $0x260] sm:$0xff]  ;;  %v9782_v40 = vld [vmem:[#allocation39_spill] sm:$0xff] }
 0x1f3   :  { %v5937_v26 = vpop.permute.xlu1 %1804  ;;  %v1348_v43 = vmul.f32 %v1340_v30, %v9782_v40  ;;  %v1441_v40 = vld [vmem:[#allocation2 + $0x2f8] sm:$0xff] }
 0x1f4   :  { %1164 = vrot.lane.b32.xlu0 %v1152_v12, %s4868_s0  ;;  %v1145_v12 = vld [vmem:[#allocation2 + $0x168] sm:$0xff] }
 0x1f5   :  { %1711 = vrot.lane.b32.xlu1 %v1699_v44, %s4879_s18  ;;  %v1153_v60 = vmul.f32 %v1145_v12, %v9778_v35  ;;  %v1194_v12 = vld [vmem:[#allocation2 + $0x1a8] sm:$0xff] }
 0x1f6   :  { %v5942_v9 = vpop.permute.xlu0 %1802  ;;  %v1202_v36 = vmul.f32 %v1194_v12, %v5537_v16 }
 0x1f7   :  { %v5945_v24 = vpop.permute.xlu1 %1806 }
 0x1f8   :  { %1168 = vrot.lane.b32.xlu0 %v1154_v42, %s4868_s0 }
 0x1f9   :  { %1808 = vrot.lane.b32.xlu1 %v1796_v61, %s4865_s29 }
 0x1fa   :  { %v5950_v28 = vpop.permute.xlu0 %1848 }
 0x1fb   :  { %9777 = vst [vmem:[#allocation23_spill] sm:$0xff] %v5950_v28  ;;  %v5953_v44 = vpop.permute.xlu1 %1850  ;;  %v5964_v28 = vpop.f32.mrb[103].mxu1 }
 0x1fc   :  { %1170 = vrot.lane.b32.xlu0 %v1155_v29, %s4868_s0 }
 0x1fd   :  { %1904 = vrot.lane.b32.xlu1 %v1892_v32, %s4867_s7  ;;  %v1300_v32 = vmul.f32 %v1292_v13, %v5568_v38  ;;  %v9783_v38 = vld [vmem:[#allocation35_spill] sm:$0xff] }
 0x1fe   :  { %v5958_v42 = vpop.permute.xlu0 %1852 }
 0x1ff   :  { %v5961_v61 = vpop.permute.xlu1 %1896 }
 0x200   :  { %9779 = vst [vmem:[#allocation26_spill] sm:$0xff] %v5961_v61  ;;  %1166 = vrot.lane.b32.xlu0 %v1153_v60, %s4868_s0  ;;  %v1245_v61 = vld [vmem:[#allocation2 + $0x1f8] sm:$0xff] }
 0x201   :  { %2000 = vrot.lane.b32.xlu1 %v1988_v33, %s4868_s0  ;;  %v1253_v13 = vmul.f32 %v1245_v61, %v9783_v38  ;;  %v1438_v38 = vld [vmem:[#allocation2 + $0x2e0] sm:$0xff] }
 0x202   :  { %v5968_v29 = vpop.permute.xlu0 %1854 }
 0x203   :  { %9780 = vst [vmem:[#allocation106_spill] sm:$0xff] %v5968_v29  ;;  %v5971_v35 = vpop.permute.xlu1 %1900  ;;  %v1342_v29 = vld [vmem:[#allocation2 + $0x270] sm:$0xff] }
 0x204   :  { %9781 = vst [vmem:[#allocation107_spill] sm:$0xff] %v5971_v35  ;;  %1213 = vrot.lane.b32.xlu0 %v1201_v48, %s4869_s9  ;;  %v1343_v35 = vld [vmem:[#allocation2 + $0x278] sm:$0xff]  ;;  %v1350_v16 = vmul.f32 %v1342_v29, %v5586_v58  ;;  %v1449_v58 = vmul.f32 %v1441_v40, %v5620_v27  ;;  %v1243_v27 = vld [vmem:[#allocation2 + $0x1e8] sm:$0xff]  ;;  %v9790_v40 = vld [vmem:[#allocation51_spill] sm:$0xff] }
 0x205   :  { %1313 = vrot.lane.b32.xlu1 %v1300_v32, %s4871_s11  ;;  %v1390_v32 = vld [vmem:[#allocation2 + $0x2a8] sm:$0xff]  ;;  %v1351_v30 = vmul.f32 %v1343_v35, %v5588_v45  ;;  %v1446_v45 = vmul.f32 %v1438_v38, %v5603_v4  ;;  %v9792_v38 = vld [vmem:[#allocation32_spill] sm:$0xff] }
 0x206   :  { %v5976_v60 = vpop.permute.xlu0 %1898  ;;  %v1398_v61 = vmul.f32 %v1390_v32, %v5601_v19  ;;  %v9788_v19 = vld [vmem:[#allocation30_spill] sm:$0xff] }
 0x207   :  { %v5979_v33 = vpop.permute.xlu1 %1902  ;;  %v1488_v4 = vld [vmem:[#allocation2 + $0x328] sm:$0xff] }
 0x208   :  { %1215 = vrot.lane.b32.xlu0 %v1202_v36, %s4869_s9 }
 0x209   :  { %1360 = vrot.lane.b32.xlu1 %v1348_v43, %s4872_s12 }
 0x20a   :  { %v5984_v48 = vpop.permute.xlu0 %1944 }
 0x20b   :  { %9784 = vst [vmem:[#allocation39_spill] sm:$0xff] %v5984_v48  ;;  %v5987_v12 = vpop.permute.xlu1 %1946 }
 0x20c   :  { %1268 = vrot.lane.b32.xlu0 %v1253_v13, %s4870_s10  ;;  %v1242_v13 = vld [vmem:[#allocation2 + $0x1e0] sm:$0xff] }
 0x20d   :  { %1364 = vrot.lane.b32.xlu1 %v1350_v16, %s4872_s12  ;;  %v1440_v16 = vld [vmem:[#allocation2 + $0x2f0] sm:$0xff]  ;;  %v1250_v32 = vmul.f32 %v1242_v13, %v9788_v19  ;;  %v1544_v13 = vld [vmem:[#allocation2 + $0x3a0] sm:$0xff] }
 0x20e   :  { %v5992_v36 = vpop.permute.xlu0 %1948 }
 0x20f   :  { %v5995_v43 = vpop.permute.xlu1 %1992 }
 0x210   :  { %9785 = vst [vmem:[#allocation35_spill] sm:$0xff] %v5995_v43  ;;  %1366 = vrot.lane.b32.xlu0 %v1351_v30, %s4872_s12  ;;  %v6010_v43 = vpop.f32.mrb[104].mxu1 }
 0x211   :  { %1411 = vrot.lane.b32.xlu1 %v1398_v61, %s4873_s13  ;;  %v1448_v61 = vmul.f32 %v1440_v16, %v9790_v40  ;;  %v1545_v16 = vld [vmem:[#allocation2 + $0x3a8] sm:$0xff] }
 0x212   :  { %v6000_v29 = vpop.permute.xlu0 %1950 }
 0x213   :  { %9786 = vst [vmem:[#allocation108_spill] sm:$0xff] %v6000_v29  ;;  %v6003_v35 = vpop.permute.xlu1 %1996 }
 0x214   :  { %9787 = vst [vmem:[#allocation109_spill] sm:$0xff] %v6003_v35  ;;  %1464 = vrot.lane.b32.xlu0 %v1449_v58, %s4874_s14  ;;  %v1251_v35 = vmul.f32 %v1243_v27, %v9792_v38  ;;  %v1642_v38 = vld [vmem:[#allocation2 + $0x420] sm:$0xff] }
 0x215   :  { %1458 = vrot.lane.b32.xlu1 %v1446_v45, %s4874_s14  ;;  %v1496_v45 = vmul.f32 %v1488_v4, %v5632_v11  ;;  %v1553_v11 = vmul.f32 %v1545_v16, %v5664_v54 }
 0x216   :  { %v6008_v30 = vpop.permute.xlu0 %1994 }
 0x217   :  { %9789 = vst [vmem:[#allocation30_spill] sm:$0xff] %v6008_v30  ;;  %v6013_v29 = vpop.permute.xlu1 %1998  ;;  %v6024_v30 = vpop.f32.mrb[105].mxu1 }
 0x218   :  { %9791 = vst [vmem:[#allocation51_spill] sm:$0xff] %v6013_v29  ;;  %1262 = vrot.lane.b32.xlu0 %v1250_v32, %s4870_s10  ;;  %9794 = vst [vmem:[#allocation110_spill] sm:$0xff] %v6024_v30  ;;  %v6026_v40 = vpop.f32.mrb[106].mxu1  ;;  %v1552_v32 = vmul.f32 %v1544_v13, %v5658_v31  ;;  %v1595_v30 = vld [vmem:[#allocation2 + $0x3f0] sm:$0xff]  ;;  %v9863_v29 = vld [vmem:[#allocation36_spill] sm:$0xff] }
 0x219   :  { %1462 = vrot.lane.b32.xlu1 %v1448_v61, %s4874_s14  ;;  %9795 = vst [vmem:[#allocation111_spill] sm:$0xff] %v6026_v40  ;;  %v6032_v61 = vpop.f32.mrb[107].mxu1 }
 0x21a   :  { %v6018_v58 = vpop.permute.xlu0 %2040 }
 0x21b   :  { %9793 = vst [vmem:[#allocation32_spill] sm:$0xff] %v6018_v58  ;;  %v6021_v19 = vpop.permute.xlu1 %2042  ;;  %v1547_v58 = vld [vmem:[#allocation2 + $0x3b8] sm:$0xff] }
 0x21c   :  { %1264 = vrot.lane.b32.xlu0 %v1251_v35, %s4870_s10  ;;  %v1650_v35 = vmul.f32 %v1642_v38, %v5682_v41  ;;  %v1555_v31 = vmul.f32 %v1547_v58, %v5704_v49  ;;  %v1603_v41 = vmul.f32 %v1595_v30, %v5710_v47  ;;  %v1643_v49 = vld [vmem:[#allocation2 + $0x428] sm:$0xff] }
 0x21d   :  { %1509 = vrot.lane.b32.xlu1 %v1496_v45, %s4875_s15  ;;  %v1740_v45 = vld [vmem:[#allocation2 + $0x4a0] sm:$0xff] }
 0x21e   :  { %v6030_v27 = vpop.permute.xlu0 %2044  ;;  %v1748_v54 = vmul.f32 %v1740_v45, %v5712_v51  ;;  %v2076_v51 = vld [vmem:[#allocation2 + $0x660] sm:$0xff] }
 0x21f   :  { %v6035_v4 = vpop.permute.xlu1 %2088  ;;  %v2084_v30 = vmul.f32 %v2076_v51, %v5800_v59  ;;  %v1645_v59 = vld [vmem:[#allocation2 + $0x438] sm:$0xff]  ;;  %v9807_v51 = vld [vmem:[#allocation34_spill] sm:$0xff] }
 0x220   :  { %9796 = vst [vmem:[#allocation112_spill] sm:$0xff] %v6035_v4  ;;  %1564 = vrot.lane.b32.xlu0 %v1552_v32, %s4876_s5  ;;  %v1836_v32 = vld [vmem:[#allocation2 + $0x520] sm:$0xff] }
 0x221   :  { %1566 = vrot.lane.b32.xlu1 %v1553_v11, %s4876_s5  ;;  %v1844_v58 = vmul.f32 %v1836_v32, %v5738_v1  ;;  %v2028_v1 = vld [vmem:[#allocation2 + $0x620] sm:$0xff] }
 0x222   :  { %v6041_v13 = vpop.permute.xlu0 %2046  ;;  %v2124_v32 = vld [vmem:[#allocation2 + $0x6a0] sm:$0xff] }
 0x223   :  { %9797 = vst [vmem:[#allocation113_spill] sm:$0xff] %v6041_v13  ;;  %v6043_v40 = vpop.permute.xlu1 %2092 }
 0x224   :  { %9798 = vst [vmem:[#allocation114_spill] sm:$0xff] %v6043_v40  ;;  %1662 = vrot.lane.b32.xlu0 %v1650_v35, %s4878_s17  ;;  %v1932_v35 = vld [vmem:[#allocation2 + $0x5a0] sm:$0xff] }
 0x225   :  { %1570 = vrot.lane.b32.xlu1 %v1555_v31, %s4876_s5  ;;  %v1651_v31 = vmul.f32 %v1643_v49, %v5688_v53  ;;  %v1940_v47 = vmul.f32 %v1932_v35, %v5764_v22  ;;  %v2036_v53 = vmul.f32 %v2028_v1, %v5792_v3  ;;  %v2132_v22 = vmul.f32 %v2124_v32, %v5822_v50  ;;  %v1291_v3 = vld [vmem:[#allocation2 + $0x220] sm:$0xff] }
 0x226   :  { %v6048_v16 = vpop.permute.xlu0 %2090  ;;  %v9810_v50 = vld [vmem:[#allocation37_spill] sm:$0xff] }
 0x227   :  { %9799 = vst [vmem:[#allocation115_spill] sm:$0xff] %v6048_v16  ;;  %v6051_v38 = vpop.permute.xlu1 %2094  ;;  %v1299_v32 = vmul.f32 %v1291_v3, %v9810_v50  ;;  %v1743_v3 = vld [vmem:[#allocation2 + $0x4b8] sm:$0xff]  ;;  %v9861_v16 = vld [vmem:[#allocation31_spill] sm:$0xff] }
 0x228   :  { %9800 = vst [vmem:[#allocation116_spill] sm:$0xff] %v6051_v38  ;;  %1760 = vrot.lane.b32.xlu0 %v1748_v54, %s4864_s1 }
 0x229   :  { %1617 = vrot.lane.b32.xlu1 %v1603_v41, %s4877_s16 }
 0x22a   :  { %v6056_v11 = vpop.permute.xlu0 %2136 }
 0x22b   :  { %9801 = vst [vmem:[#allocation117_spill] sm:$0xff] %v6056_v11  ;;  %v6059_v45 = vpop.permute.xlu1 %2138 }
 0x22c   :  { %9802 = vst [vmem:[#allocation118_spill] sm:$0xff] %v6059_v45  ;;  %1856 = vrot.lane.b32.xlu0 %v1844_v58, %s4866_s30  ;;  %v1244_v58 = vld [vmem:[#allocation2 + $0x1f0] sm:$0xff]  ;;  %v9858_v45 = vld [vmem:[#allocation25_spill] sm:$0xff] }
 0x22d   :  { %1664 = vrot.lane.b32.xlu1 %v1651_v31, %s4878_s17  ;;  %v1252_v31 = vmul.f32 %v1244_v58, %v9807_v51  ;;  %v1293_v58 = vld [vmem:[#allocation2 + $0x230] sm:$0xff] }
 0x22e   :  { %v6065_v54 = vpop.permute.xlu0 %2140 }
 0x22f   :  { %9803 = vst [vmem:[#allocation119_spill] sm:$0xff] %v6065_v54  ;;  %v6067_v41 = vpop.permute.xlu1 %931  ;;  %v9859_v54 = vld [vmem:[#allocation28_spill] sm:$0xff] }
 0x230   :  { %9804 = vst [vmem:[#allocation120_spill] sm:$0xff] %v6067_v41  ;;  %1952 = vrot.lane.b32.xlu0 %v1940_v47, %s4862_s8  ;;  %v1653_v47 = vmul.f32 %v1645_v59, %v5774_v63  ;;  %v1741_v63 = vld [vmem:[#allocation2 + $0x4a8] sm:$0xff]  ;;  %v9813_v59 = vld [vmem:[#allocation40_spill] sm:$0xff] }
 0x231   :  { %2096 = vrot.lane.b32.xlu1 %v2084_v30, %s4870_s10  ;;  %v1693_v30 = vld [vmem:[#allocation2 + $0x470] sm:$0xff]  ;;  %v1301_v51 = vmul.f32 %v1293_v58, %v9813_v59  ;;  %v1389_v58 = vld [vmem:[#allocation2 + $0x2a0] sm:$0xff] }
 0x232   :  { %v6072_v49 = vpop.permute.xlu0 %2142 }
 0x233   :  { %9805 = vst [vmem:[#allocation121_spill] sm:$0xff] %v6072_v49  ;;  %v6075_v35 = vpop.permute.xlu1 %927 }
 0x234   :  { %9806 = vst [vmem:[#allocation122_spill] sm:$0xff] %v6075_v35  ;;  %2048 = vrot.lane.b32.xlu0 %v2036_v53, %s4869_s9  ;;  %v1701_v53 = vmul.f32 %v1693_v30, %v5787_v56  ;;  %v9816_v56 = vld [vmem:[#allocation42_spill] sm:$0xff] }
 0x235   :  { %2144 = vrot.lane.b32.xlu1 %v2132_v22, %s4871_s11 }
 0x236   :  { %v6081_v11 = vpop.permute.xlu0 %925 }
 0x237   :  { %9808 = vst [vmem:[#allocation34_spill] sm:$0xff] %v6081_v11  ;;  %v6083_v1 = vpop.permute.xlu1 %972  ;;  %v9819_v11 = vld [vmem:[#allocation45_spill] sm:$0xff] }
 0x238   :  { %9809 = vst [vmem:[#allocation123_spill] sm:$0xff] %v6083_v1  ;;  %1266 = vrot.lane.b32.xlu0 %v1252_v31, %s4870_s10  ;;  %v1341_v31 = vld [vmem:[#allocation2 + $0x268] sm:$0xff] }
 0x239   :  { %1668 = vrot.lane.b32.xlu1 %v1653_v47, %s4878_s17  ;;  %v1749_v47 = vmul.f32 %v1741_v63, %v5720_v6  ;;  %v1349_v30 = vmul.f32 %v1341_v31, %v9816_v56  ;;  %v1397_v6 = vmul.f32 %v1389_v58, %v9819_v11  ;;  %v1391_v31 = vld [vmem:[#allocation2 + $0x2b0] sm:$0xff]  ;;  %v1839_v11 = vld [vmem:[#allocation2 + $0x538] sm:$0xff] }
 0x23a   :  { %v6089_v35 = vpop.permute.xlu0 %929 }
 0x23b   :  { %9811 = vst [vmem:[#allocation37_spill] sm:$0xff] %v6089_v35  ;;  %v6091_v22 = vpop.permute.xlu1 %974 }
 0x23c   :  { %9812 = vst [vmem:[#allocation124_spill] sm:$0xff] %v6091_v22  ;;  %1311 = vrot.lane.b32.xlu0 %v1299_v32, %s4871_s11  ;;  %v1751_v32 = vmul.f32 %v1743_v3, %v5816_v2  ;;  %v1837_v2 = vld [vmem:[#allocation2 + $0x528] sm:$0xff]  ;;  %v9822_v3 = vld [vmem:[#allocation47_spill] sm:$0xff] }
 0x23d   :  { %1715 = vrot.lane.b32.xlu1 %v1701_v53, %s4879_s18  ;;  %v1790_v53 = vld [vmem:[#allocation2 + $0x4f0] sm:$0xff]  ;;  %v1399_v56 = vmul.f32 %v1391_v31, %v9822_v3  ;;  %v1487_v31 = vld [vmem:[#allocation2 + $0x320] sm:$0xff] }
 0x23e   :  { %v6096_v1 = vpop.permute.xlu0 %968  ;;  %v1798_v63 = vmul.f32 %v1790_v53, %v5830_v21  ;;  %v9825_v21 = vld [vmem:[#allocation49_spill] sm:$0xff] }
 0x23f   :  { %9814 = vst [vmem:[#allocation40_spill] sm:$0xff] %v6096_v1  ;;  %v6099_v50 = vpop.permute.xlu1 %970 }
 0x240   :  { %9815 = vst [vmem:[#allocation125_spill] sm:$0xff] %v6099_v50  ;;  %1315 = vrot.lane.b32.xlu0 %v1301_v51, %s4871_s11 }
 0x241   :  { %1762 = vrot.lane.b32.xlu1 %v1749_v47, %s4864_s1 }
 0x242   :  { %v6105_v35 = vpop.permute.xlu0 %1017 }
 0x243   :  { %9817 = vst [vmem:[#allocation42_spill] sm:$0xff] %v6105_v35  ;;  %v6107_v59 = vpop.permute.xlu1 %1019 }
 0x244   :  { %9818 = vst [vmem:[#allocation126_spill] sm:$0xff] %v6107_v59  ;;  %1362 = vrot.lane.b32.xlu0 %v1349_v30, %s4872_s12  ;;  %v1439_v30 = vld [vmem:[#allocation2 + $0x2e8] sm:$0xff] }
 0x245   :  { %1766 = vrot.lane.b32.xlu1 %v1751_v32, %s4864_s1  ;;  %v1845_v32 = vmul.f32 %v1837_v2, %v5744_v55  ;;  %v1447_v53 = vmul.f32 %v1439_v30, %v9825_v21  ;;  %v1495_v55 = vmul.f32 %v1487_v31, %v5626_v46  ;;  %v1489_v30 = vld [vmem:[#allocation2 + $0x330] sm:$0xff] }
 0x246   :  { %v6113_v51 = vpop.permute.xlu0 %1021  ;;  %v9831_v21 = vld [vmem:[#allocation55_spill] sm:$0xff] }
 0x247   :  { %9820 = vst [vmem:[#allocation45_spill] sm:$0xff] %v6113_v51  ;;  %v6115_v47 = vpop.permute.xlu1 %1066  ;;  %v1546_v46 = vld [vmem:[#allocation2 + $0x3b0] sm:$0xff] }
 0x248   :  { %9821 = vst [vmem:[#allocation127_spill] sm:$0xff] %v6115_v47  ;;  %1409 = vrot.lane.b32.xlu0 %v1397_v6, %s4873_s13  ;;  %v1847_v6 = vmul.f32 %v1839_v11, %v5852_v25  ;;  %v6142_v25 = vpop.f32.mrb[108].mxu1  ;;  %v1933_v11 = vld [vmem:[#allocation2 + $0x5a8] sm:$0xff] }
 0x249   :  { %1812 = vrot.lane.b32.xlu1 %v1798_v63, %s4865_s29  ;;  %v1886_v63 = vld [vmem:[#allocation2 + $0x570] sm:$0xff]  ;;  %9830 = vst [vmem:[#allocation132_spill] sm:$0xff] %v6142_v25  ;;  %v9869_v25 = vld [vmem:[#allocation41_spill] sm:$0xff] }
 0x24a   :  { %v6120_v59 = vpop.permute.xlu0 %1023  ;;  %v1894_v2 = vmul.f32 %v1886_v63, %v5862_v0  ;;  %v1941_v0 = vmul.f32 %v1933_v11, %v5770_v5  ;;  %v6152_v63 = vpop.f32.mrb[109].mxu1  ;;  %v9835_v5 = vld [vmem:[#allocation64_spill] sm:$0xff] }
 0x24b   :  { %9823 = vst [vmem:[#allocation47_spill] sm:$0xff] %v6120_v59  ;;  %v6123_v58 = vpop.permute.xlu1 %1121  ;;  %9833 = vst [vmem:[#allocation133_spill] sm:$0xff] %v6152_v63 }
 0x24c   :  { %9824 = vst [vmem:[#allocation128_spill] sm:$0xff] %v6123_v58  ;;  %1413 = vrot.lane.b32.xlu0 %v1399_v56, %s4873_s13 }
 0x24d   :  { %1858 = vrot.lane.b32.xlu1 %v1845_v32, %s4866_s30 }
 0x24e   :  { %v6129_v50 = vpop.permute.xlu0 %1070 }
 0x24f   :  { %9826 = vst [vmem:[#allocation49_spill] sm:$0xff] %v6129_v50  ;;  %v6131_v3 = vpop.permute.xlu1 %1217  ;;  %v1982_v50 = vld [vmem:[#allocation2 + $0x5f0] sm:$0xff] }
 0x250   :  { %9827 = vst [vmem:[#allocation129_spill] sm:$0xff] %v6131_v3  ;;  %1460 = vrot.lane.b32.xlu0 %v1447_v53, %s4874_s14  ;;  %v1497_v3 = vmul.f32 %v1489_v30, %v9831_v21 }
 0x251   :  { %1862 = vrot.lane.b32.xlu1 %v1847_v6, %s4866_s30  ;;  %v1935_v6 = vld [vmem:[#allocation2 + $0x5b8] sm:$0xff] }
 0x252   :  { %v6137_v56 = vpop.permute.xlu0 %1072  ;;  %v1943_v30 = vmul.f32 %v1935_v6, %v5884_v57  ;;  %v2029_v6 = vld [vmem:[#allocation2 + $0x628] sm:$0xff] }
 0x253   :  { %9828 = vst [vmem:[#allocation130_spill] sm:$0xff] %v6137_v56  ;;  %v6139_v32 = vpop.permute.xlu1 %1219 }
 0x254   :  { %9829 = vst [vmem:[#allocation131_spill] sm:$0xff] %v6139_v32  ;;  %1507 = vrot.lane.b32.xlu0 %v1495_v55, %s4875_s15  ;;  %v1554_v55 = vmul.f32 %v1546_v46, %v5698_v15  ;;  %v1990_v15 = vmul.f32 %v1982_v50, %v5894_v37  ;;  %v1596_v46 = vld [vmem:[#allocation2 + $0x3f8] sm:$0xff]  ;;  %v9841_v37 = vld [vmem:[#allocation83_spill] sm:$0xff] }
 0x255   :  { %1908 = vrot.lane.b32.xlu1 %v1894_v2, %s4867_s7  ;;  %v898_v2 = vpop.f32.mrb[110].mxu1 }
 0x256   :  { %v6146_v53 = vpop.permute.xlu0 %1068  ;;  %v899_v51 = vpop.f32.mrb[111].mxu1 }
 0x257   :  { %9832 = vst [vmem:[#allocation55_spill] sm:$0xff] %v6146_v53  ;;  %v6149_v31 = vpop.permute.xlu1 %1317  ;;  %v1594_v53 = vld [vmem:[#allocation2 + $0x3e8] sm:$0xff] }
 0x258   :  { %1511 = vrot.lane.b32.xlu0 %v1497_v3, %s4875_s15  ;;  %v1602_v3 = vmul.f32 %v1594_v53, %v9835_v5  ;;  %v1644_v53 = vld [vmem:[#allocation2 + $0x430] sm:$0xff]  ;;  %v9840_v5 = vld [vmem:[#allocation90_spill] sm:$0xff] }
 0x259   :  { %1954 = vrot.lane.b32.xlu1 %v1941_v0, %s4862_s8  ;;  %v9838_v0 = vld [vmem:[#allocation72_spill] sm:$0xff]  ;;  %v1652_v50 = vmul.f32 %v1644_v53, %v9841_v37  ;;  %v9847_v53 = vld [vmem:[#allocation15_spill] sm:$0xff]  ;;  %v9849_v37 = vld [vmem:[#allocation14_spill] sm:$0xff] }
 0x25a   :  { %v6157_v21 = vpop.permute.xlu0 %1115  ;;  %v1604_v51 = vmul.f32 %v1596_v46, %v9838_v0  ;;  %v1692_v46 = vld [vmem:[#allocation2 + $0x468] sm:$0xff]  ;;  %v9844_v0 = vld [vmem:[#allocation69_spill] sm:$0xff] }
 0x25b   :  { %9834 = vst [vmem:[#allocation134_spill] sm:$0xff] %v6157_v21  ;;  %v6159_v47 = vpop.permute.xlu1 %1415 }
 0x25c   :  { %1568 = vrot.lane.b32.xlu0 %v1554_v55, %s4876_s5  ;;  %v933_v55 = vlaneseq }
 0x25d   :  { %1958 = vrot.lane.b32.xlu1 %v1943_v30, %s4862_s8  ;;  %v2037_v30 = vmul.f32 %v2029_v6, %v9840_v5 }
 0x25e   :  { %v6165_v11 = vpop.permute.xlu0 %1119 }
 0x25f   :  { %9836 = vst [vmem:[#allocation64_spill] sm:$0xff] %v6165_v11  ;;  %v6167_v57 = vpop.permute.xlu1 %1513  ;;  %v6182_v11 = vand.u32 127, %v933_v55 }
 0x260   :  { %9837 = vst [vmem:[#allocation135_spill] sm:$0xff] %v6167_v57  ;;  %1615 = vrot.lane.b32.xlu0 %v1602_v3, %s4877_s16 }
 0x261   :  { %2004 = vrot.lane.b32.xlu1 %v1990_v15, %s4868_s0  ;;  %9843 = vst [vmem:[#allocation83_spill] sm:$0xff] %v6182_v11  ;;  %vm935_vm2 = vcmp.lt.s32.totalorder %v6182_v11, 73  ;;  %vm976_vm3 = vcmp.lt.s32.totalorder %v6182_v11, 72  ;;  %vm1025_vm4 = vcmp.lt.s32.totalorder %v6182_v11, 71  ;;  %vm1074_vm5 = vcmp.lt.s32.totalorder %v6182_v11, 65 }
 0x262   :  { %v6172_v2 = vpop.permute.xlu0 %1117  ;;  %vm1123_vm6 = vcmp.lt.s32.totalorder %v6182_v11, 64  ;;  %vm9547_vm7 = vcmp.lt.s32.totalorder %v6182_v11, 63  ;;  %vm1221_vm8 = vcmp.lt.s32.totalorder %v6182_v11, 57  ;;  %v984_v5 = vsel %vm976_vm3, %v6091_v22, %v9847_v53  ;;  %v9854_v22 = vld [vmem:[#allocation17_spill] sm:$0xff] }
 0x263   :  { %9839 = vst [vmem:[#allocation72_spill] sm:$0xff] %v6172_v2  ;;  %v6175_v21 = vpop.permute.xlu1 %1613  ;;  %v1700_v2 = vmul.f32 %v1692_v46, %v9844_v0  ;;  %v9850_v46 = vld [vmem:[#allocation19_spill] sm:$0xff]  ;;  %v9851_v0 = vld [vmem:[#allocation21_spill] sm:$0xff]  ;;  %v941_v63 = vsel %vm935_vm2, %v9854_v22, %v9849_v37  ;;  %vm1270_vm9 = vcmp.lt.s32.totalorder %v6182_v11, 56  ;;  %vm1319_vm10 = vcmp.lt.s32.totalorder %v6182_v11, 55 }
 0x264   :  { %1619 = vrot.lane.b32.xlu0 %v1604_v51, %s4877_s16  ;;  %v1694_v51 = vld [vmem:[#allocation2 + $0x478] sm:$0xff]  ;;  %vm1368_vm11 = vcmp.lt.s32.totalorder %v6182_v11, 9  ;;  %vm9548_vm12 = vcmp.lt.s32.totalorder %v6182_v11, 8  ;;  %vm1466_vm13 = vcmp.lt.s32.totalorder %v6182_v11, 7  ;;  %vm9518_vm14 = vcmp.lt.s32.totalorder %v6182_v11, 1 }
 0x265   :  { %2050 = vrot.lane.b32.xlu1 %v2037_v30, %s4869_s9  ;;  %v9848_v30 = vld [vmem:[#allocation13_spill] sm:$0xff]  ;;  %vm9552_vm15 = vcmp.lt.s32.totalorder %v6182_v11, 127  ;;  %vm9551_vm1 = vcmp.lt.s32.totalorder %v6182_v11, 121  ;;  %vm9550_vm0 = vcmp.lt.s32.totalorder %v6182_v11, 120 }
 0x266   :  { %v6180_v3 = vpop.permute.xlu0 %1164 }
 0x267   :  { %9842 = vst [vmem:[#allocation90_spill] sm:$0xff] %v6180_v3  ;;  %v6184_v15 = vpop.permute.xlu1 %1711  ;;  %v9852_v3 = vld [vmem:[#allocation93_spill] sm:$0xff] }
 0x268   :  { %1666 = vrot.lane.b32.xlu0 %v1652_v50, %s4878_s17  ;;  %v940_v50 = vsel %vm935_vm2, %v9849_v37, %v9848_v30  ;;  %v1702_v35 = vmul.f32 %v1694_v51, %v9852_v3  ;;  %v9855_v30 = vld [vmem:[#allocation12_spill] sm:$0xff]  ;;  %v9857_v51 = vld [vmem:[#allocation27_spill] sm:$0xff] }
 0x269   :  { %v942_v49 = vsel %vm935_vm2, %v9855_v30, %v9854_v22  ;;  %v943_v38 = vsel %vm935_vm2, %v6067_v41, %v9855_v30  ;;  %v981_v37 = vsel %vm976_vm3, %v9850_v46, %v9857_v51  ;;  %v1031_v22 = vsel %vm1025_vm4, %v9859_v54, %v9858_v45  ;;  %v9862_v51 = vld [vmem:[#allocation33_spill] sm:$0xff] }
 0x26a   :  { %v6188_v6 = vpop.permute.xlu0 %1168  ;;  %v985_v41 = vadd.f32 %v984_v5, %v943_v38  ;;  %v1082_v40 = vsel %vm1074_vm5, %v6137_v56, %v9862_v51  ;;  %v1081_v38 = vsel %vm1074_vm5, %v9862_v51, %v9863_v29  ;;  %v1789_v56 = vld [vmem:[#allocation2 + $0x4e8] sm:$0xff] }
 0x26b   :  { %9845 = vst [vmem:[#allocation69_spill] sm:$0xff] %v6188_v6  ;;  %v6194_v55 = vpop.permute.xlu1 %1808  ;;  %v983_v6 = vsel %vm976_vm3, %v9847_v53, %v9851_v0  ;;  %v1742_v53 = vld [vmem:[#allocation2 + $0x4b0] sm:$0xff] }
 0x26c   :  { %9846 = vst [vmem:[#allocation136_spill] sm:$0xff] %v6194_v55  ;;  %1713 = vrot.lane.b32.xlu0 %v1700_v2, %s4879_s18  ;;  %v982_v2 = vsel %vm976_vm3, %v9851_v0, %v9850_v46  ;;  %v9856_v0 = vld [vmem:[#allocation29_spill] sm:$0xff]  ;;  %v1030_v46 = vsel %vm1025_vm4, %v9858_v45, %v9861_v16  ;;  %v988_v45 = vadd.f32 %v981_v37, %v940_v50  ;;  %v9867_v16 = vld [vmem:[#allocation44_spill] sm:$0xff] }
 0x26d   :  { %v1033_v3 = vsel %vm1025_vm4, %v6120_v59, %v9856_v0  ;;  %v1032_v30 = vsel %vm1025_vm4, %v9856_v0, %v9859_v54  ;;  %v986_v59 = vadd.f32 %v983_v6, %v942_v49  ;;  %v987_v13 = vadd.f32 %v982_v2, %v941_v63  ;;  %v9864_v54 = vld [vmem:[#allocation38_spill] sm:$0xff] }
 0x26e   :  { %v6217_v1 = vpop.permute.xlu0 %1170  ;;  %v1080_v49 = vsel %vm1074_vm5, %v9863_v29, %v9864_v54  ;;  %v1034_v6 = vadd.f32 %v1033_v3, %v985_v41  ;;  %v9871_v3 = vld [vmem:[#allocation43_spill] sm:$0xff] }
 0x26f   :  { %9853 = vst [vmem:[#allocation15_spill] sm:$0xff] %v6217_v1  ;;  %v6247_v4 = vpop.permute.xlu1 %1904  ;;  %v1036_v2 = vadd.f32 %v1031_v22, %v987_v13  ;;  %v1035_v0 = vadd.f32 %v1032_v30, %v986_v59  ;;  %v1037_v13 = vadd.f32 %v1030_v46, %v988_v45  ;;  %v1079_v37 = vsel %vm1074_vm5, %v9864_v54, %v9871_v3  ;;  %v9872_v22 = vld [vmem:[#allocation52_spill] sm:$0xff]  ;;  %v9873_v30 = vld [vmem:[#allocation50_spill] sm:$0xff]  ;;  %v9875_v46 = vld [vmem:[#allocation75_spill] sm:$0xff] }
 0x270   :  { %9860 = vst [vmem:[#allocation14_spill] sm:$0xff] %v6247_v4  ;;  %1717 = vrot.lane.b32.xlu0 %v1702_v35, %s4879_s18  ;;  %v9865_v35 = vld [vmem:[#allocation95_spill] sm:$0xff]  ;;  %v9868_v4 = vld [vmem:[#allocation46_spill] sm:$0xff]  ;;  %v1083_v41 = vadd.f32 %v1082_v40, %v1034_v6  ;;  %v9874_v40 = vld [vmem:[#allocation53_spill] sm:$0xff]  ;;  %v1131_v54 = vsel %vm1123_vm6, %v6123_v58, %v9869_v25 }
 0x271   :  { %v1750_v63 = vmul.f32 %v1742_v53, %v9865_v35  ;;  %v1129_v51 = vsel %vm1123_vm6, %v9868_v4, %v9867_v16  ;;  %v1130_v29 = vsel %vm1123_vm6, %v9869_v25, %v9868_v4  ;;  %v1084_v59 = vadd.f32 %v1081_v38, %v1035_v0  ;;  %v1791_v45 = vld [vmem:[#allocation2 + $0x4f8] sm:$0xff]  ;;  %v9883_v58 = vld [vmem:[#allocation66_spill] sm:$0xff] }
 0x272   :  { %v6267_v5 = vpop.permute.xlu0 %1166  ;;  %v1085_v50 = vadd.f32 %v1080_v49, %v1036_v2  ;;  %v1179_v4 = vsel %vm9547_vm7, %v9873_v30, %v9872_v22  ;;  %v1178_v35 = vsel %vm9547_vm7, %v9872_v22, %v9874_v40  ;;  %v1797_v38 = vmul.f32 %v1789_v56, %v9875_v46  ;;  %v9877_v0 = vld [vmem:[#allocation48_spill] sm:$0xff]  ;;  %v9878_v22 = vld [vmem:[#allocation62_spill] sm:$0xff] }
 0x273   :  { %9866 = vst [vmem:[#allocation19_spill] sm:$0xff] %v6267_v5  ;;  %v6279_v53 = vpop.permute.xlu1 %2000  ;;  %v1180_v2 = vsel %vm9547_vm7, %v6217_v1, %v9873_v30  ;;  %v1128_v56 = vsel %vm1123_vm6, %v9867_v16, %v9877_v0  ;;  %v9879_v46 = vld [vmem:[#allocation56_spill] sm:$0xff]  ;;  %v9881_v5 = vld [vmem:[#allocation61_spill] sm:$0xff]  ;;  %v9882_v1 = vld [vmem:[#allocation58_spill] sm:$0xff] }
 0x274   :  { %9870 = vst [vmem:[#allocation21_spill] sm:$0xff] %v6279_v53  ;;  %1764 = vrot.lane.b32.xlu0 %v1750_v63, %s4864_s1  ;;  %v1133_v63 = vadd.f32 %v1130_v29, %v1084_v59  ;;  %v1134_v6 = vadd.f32 %v1129_v51, %v1085_v50  ;;  %v1228_v51 = vsel %vm1221_vm8, %v9879_v46, %v9878_v22  ;;  %v9884_v0 = vld [vmem:[#allocation65_spill] sm:$0xff] }
 0x275   :  { %v1132_v29 = vadd.f32 %v1131_v54, %v1083_v41  ;;  %v1086_v59 = vadd.f32 %v1079_v37, %v1037_v13  ;;  %v1227_v16 = vsel %vm1221_vm8, %v9878_v22, %v9881_v5  ;;  %v1277_v41 = vsel %vm1270_vm9, %v9884_v0, %v9883_v58  ;;  %v9887_v22 = vld [vmem:[#allocation63_spill] sm:$0xff] }
 0x276   :  { %v6296_v49 = vpop.permute.xlu0 %1213  ;;  %v1182_v50 = vadd.f32 %v1179_v4, %v1133_v63  ;;  %v1183_v30 = vadd.f32 %v1178_v35, %v1134_v6  ;;  %v9886_v63 = vld [vmem:[#allocation67_spill] sm:$0xff] }
 0x277   :  { %9876 = vst [vmem:[#allocation93_spill] sm:$0xff] %v6296_v49  ;;  %v6315_v25 = vpop.permute.xlu1 %1313  ;;  %v1177_v49 = vsel %vm9547_vm7, %v9874_v40, %v9882_v1  ;;  %v1181_v13 = vadd.f32 %v1180_v2, %v1132_v29  ;;  %v1135_v4 = vadd.f32 %v1128_v56, %v1086_v59  ;;  %v1276_v6 = vsel %vm1270_vm9, %v9883_v58, %v9886_v63  ;;  %v1838_v40 = vld [vmem:[#allocation2 + $0x530] sm:$0xff] }
 0x278   :  { %9880 = vst [vmem:[#allocation17_spill] sm:$0xff] %v6315_v25  ;;  %1810 = vrot.lane.b32.xlu0 %v1797_v38, %s4865_s29  ;;  %v1799_v38 = vmul.f32 %v1791_v45, %v5844_v8  ;;  %v1231_v35 = vadd.f32 %v1228_v51, %v1182_v50  ;;  %v1232_v54 = vadd.f32 %v1227_v16, %v1183_v30  ;;  %v9888_v8 = vld [vmem:[#allocation73_spill] sm:$0xff]  ;;  %v9889_v45 = vld [vmem:[#allocation68_spill] sm:$0xff]  ;;  %v9891_v29 = vld [vmem:[#allocation71_spill] sm:$0xff] }
 0x279   :  { %v1226_v25 = vsel %vm1221_vm8, %v9881_v5, %v9887_v22  ;;  %v1326_v2 = vsel %vm1319_vm10, %v9889_v45, %v9888_v8  ;;  %v1184_v58 = vadd.f32 %v1177_v49, %v1135_v4  ;;  %v1325_v59 = vsel %vm1319_vm10, %v9888_v8, %v9891_v29  ;;  %v9892_v30 = vld [vmem:[#allocation77_spill] sm:$0xff]  ;;  %v9893_v16 = vld [vmem:[#allocation76_spill] sm:$0xff]  ;;  %v1885_v22 = vld [vmem:[#allocation2 + $0x568] sm:$0xff] }
 0x27a   :  { %v6331_v37 = vpop.permute.xlu0 %1215  ;;  %v1280_v51 = vadd.f32 %v1277_v41, %v1231_v35  ;;  %v1229_v5 = vsel %vm1221_vm8, %v6139_v32, %v9879_v46  ;;  %v1281_v50 = vadd.f32 %v1276_v6, %v1232_v54  ;;  %v9896_v6 = vld [vmem:[#allocation70_spill] sm:$0xff] }
 0x27b   :  { %9885 = vst [vmem:[#allocation12_spill] sm:$0xff] %v6331_v37  ;;  %v6347_v56 = vpop.permute.xlu1 %1360  ;;  %v1375_v37 = vsel %vm1368_vm11, %v9893_v16, %v9892_v30  ;;  %v1230_v49 = vadd.f32 %v1229_v5, %v1181_v13  ;;  %v1233_v4 = vadd.f32 %v1226_v25, %v1184_v58  ;;  %v9898_v25 = vld [vmem:[#allocation79_spill] sm:$0xff] }
 0x27c   :  { %9890 = vst [vmem:[#allocation29_spill] sm:$0xff] %v6347_v56  ;;  %1814 = vrot.lane.b32.xlu0 %v1799_v38, %s4865_s29  ;;  %v1846_v38 = vmul.f32 %v1838_v40, %v5850_v7  ;;  %v1329_v35 = vadd.f32 %v1326_v2, %v1280_v51  ;;  %v9895_v56 = vld [vmem:[#allocation78_spill] sm:$0xff]  ;;  %v1275_v7 = vsel %vm1270_vm9, %v9886_v63, %v9896_v6  ;;  %v9897_v40 = vld [vmem:[#allocation84_spill] sm:$0xff] }
 0x27d   :  { %v1374_v8 = vsel %vm1368_vm11, %v9892_v30, %v9895_v56  ;;  %v1330_v13 = vadd.f32 %v1325_v59, %v1281_v50  ;;  %v1424_v54 = vsel %vm9548_vm12, %v9898_v25, %v9897_v40  ;;  %v9900_v51 = vld [vmem:[#allocation74_spill] sm:$0xff]  ;;  %v1327_v59 = vsel %vm1319_vm10, %v6149_v31, %v9889_v45  ;;  %v1887_v6 = vld [vmem:[#allocation2 + $0x578] sm:$0xff] }
 0x27e   :  { %v6363_v41 = vpop.permute.xlu0 %1268  ;;  %v1378_v5 = vadd.f32 %v1375_v37, %v1329_v35  ;;  %v9901_v30 = vld [vmem:[#allocation82_spill] sm:$0xff]  ;;  %v1282_v35 = vadd.f32 %v1275_v7, %v1233_v4  ;;  %v9908_v4 = vld [vmem:[#allocation91_spill] sm:$0xff] }
 0x27f   :  { %9894 = vst [vmem:[#allocation25_spill] sm:$0xff] %v6363_v41  ;;  %v1278_v46 = vsel %vm1270_vm9, %v6363_v41, %v9884_v0  ;;  %v6381_v58 = vpop.permute.xlu1 %1364  ;;  %v1324_v0 = vsel %vm1319_vm10, %v9891_v29, %v9900_v51  ;;  %v1423_v63 = vsel %vm9548_vm12, %v9897_v40, %v9901_v30  ;;  %v1379_v50 = vadd.f32 %v1374_v8, %v1330_v13  ;;  %v9905_v51 = vld [vmem:[#allocation89_spill] sm:$0xff] }
 0x280   :  { %v1279_v2 = vadd.f32 %v1278_v46, %v1230_v49  ;;  %9899 = vst [vmem:[#allocation28_spill] sm:$0xff] %v6381_v58  ;;  %1860 = vrot.lane.b32.xlu0 %v1846_v38, %s4866_s30  ;;  %v9902_v49 = vld [vmem:[#allocation88_spill] sm:$0xff]  ;;  %v9903_v46 = vld [vmem:[#allocation87_spill] sm:$0xff]  ;;  %v1427_v32 = vadd.f32 %v1424_v54, %v1378_v5  ;;  %v9906_v8 = vld [vmem:[#allocation81_spill] sm:$0xff]  ;;  %v1331_v5 = vadd.f32 %v1324_v0, %v1282_v35 }
 0x281   :  { %v1473_v38 = vsel %vm1466_vm13, %v9903_v46, %v9902_v49  ;;  %v9904_v58 = vld [vmem:[#allocation80_spill] sm:$0xff]  ;;  %v1472_v40 = vsel %vm1466_vm13, %v9902_v49, %v9905_v51  ;;  %v1428_v13 = vadd.f32 %v1423_v63, %v1379_v50  ;;  %v9911_v63 = vld [vmem:[#allocation85_spill] sm:$0xff] }
 0x282   :  { %v1893_v41 = vmul.f32 %v1885_v22, %v9904_v58  ;;  %v1328_v29 = vadd.f32 %v1327_v59, %v1279_v2  ;;  %v6401_v37 = vpop.permute.xlu0 %1366  ;;  %v1373_v22 = vsel %vm1368_vm11, %v9895_v56, %v9906_v8  ;;  %v9907_v2 = vld [vmem:[#allocation97_spill] sm:$0xff]  ;;  %v1476_v59 = vadd.f32 %v1473_v38, %v1427_v32  ;;  %v9910_v49 = vld [vmem:[#allocation96_spill] sm:$0xff] }
 0x283   :  { %v1376_v45 = vsel %vm1368_vm11, %v6401_v37, %v9893_v16  ;;  %v1522_v7 = vsel %vm9518_vm14, %v9908_v4, %v9907_v2  ;;  %v6419_v58 = vpop.permute.xlu1 %1411  ;;  %v1521_v16 = vsel %vm9518_vm14, %v9907_v2, %v9910_v49  ;;  %v1425_v56 = vsel %vm9548_vm12, %v6159_v47, %v9898_v25  ;;  %v9913_v2 = vld [vmem:[#allocation94_spill] sm:$0xff] }
 0x284   :  { %v1377_v54 = vadd.f32 %v1376_v45, %v1328_v29  ;;  %9909 = vst [vmem:[#allocation33_spill] sm:$0xff] %v6419_v58  ;;  %1906 = vrot.lane.b32.xlu0 %v1893_v41, %s4867_s7  ;;  %v1422_v50 = vsel %vm9548_vm12, %v9901_v30, %v9911_v63  ;;  %v1477_v29 = vadd.f32 %v1472_v40, %v1428_v13  ;;  %v1934_v45 = vld [vmem:[#allocation2 + $0x5b0] sm:$0xff]  ;;  %v9924_v58 = vld [vmem:[#allocation18_spill] sm:$0xff] }
 0x285   :  { %v1895_v41 = vmul.f32 %v1887_v6, %v5876_v14  ;;  %v1380_v38 = vadd.f32 %v1373_v22, %v1331_v5  ;;  %v1525_v35 = vadd.f32 %v1522_v7, %v1476_v59  ;;  %v1471_v30 = vsel %vm1466_vm13, %v9905_v51, %v9913_v2  ;;  %v9914_v51 = vld [vmem:[#allocation9_spill] sm:$0xff]  ;;  %v9915_v7 = vld [vmem:[#allocation10_spill] sm:$0xff] }
 0x286   :  { %v1426_v0 = vadd.f32 %v1425_v56, %v1377_v54  ;;  %v6435_v32 = vpop.permute.xlu0 %1464  ;;  %v1526_v40 = vadd.f32 %v1521_v16, %v1477_v29  ;;  %v1523_v13 = vsel %vm9518_vm14, %v6167_v57, %v9908_v4  ;;  %v1578_v54 = vsel %vm9552_vm15, %v9915_v7, %v9914_v51  ;;  %v9925_v57 = vld [vmem:[#allocation104_spill] sm:$0xff] }
 0x287   :  { %9912 = vst [vmem:[#allocation36_spill] sm:$0xff] %v6435_v32  ;;  %v1474_v25 = vsel %vm1466_vm13, %v6435_v32, %v9903_v46  ;;  %v6446_v6 = vpop.permute.xlu1 %1458  ;;  %v1429_v22 = vadd.f32 %v1422_v50, %v1380_v38  ;;  %v1520_v46 = vsel %vm9518_vm14, %v9910_v49, %v5838_v10  ;;  %v1942_v5 = vmul.f32 %v1934_v45, %v5882_v52  ;;  %v9916_v50 = vld [vmem:[#allocation6_spill] sm:$0xff]  ;;  %v9918_v38 = vld [vmem:[#allocation100_spill] sm:$0xff]  ;;  %v9920_v45 = vld [vmem:[#allocation5_spill] sm:$0xff] }
 0x288   :  { %v1475_v14 = vadd.f32 %v1474_v25, %v1426_v0  ;;  %1910 = vrot.lane.b32.xlu0 %v1895_v41, %s4867_s7  ;;  %v1533_v29 = vadd.f32 %v1525_v35, %v9916_v50  ;;  %v1577_v4 = vsel %vm9552_vm15, %v9914_v51, %v5860_v34  ;;  %v1981_v49 = vld [vmem:[#allocation2 + $0x5e8] sm:$0xff]  ;;  %v9917_v41 = vld [vmem:[#allocation7_spill] sm:$0xff]  ;;  %v9919_v25 = vld [vmem:[#allocation101_spill] sm:$0xff]  ;;  %vm9549_vm14 = vcmp.lt.s32.totalorder %v6182_v11, 119 }
 0x289   :  { %v1478_v56 = vadd.f32 %v1471_v30, %v1429_v22  ;;  %v1534_v0 = vadd.f32 %v1526_v40, %v9917_v41  ;;  %v1627_v52 = vsel %vm9551_vm1, %v9919_v25, %v9918_v38  ;;  %v9922_v22 = vld [vmem:[#allocation11_spill] sm:$0xff]  ;;  %v9923_v51 = vld [vmem:[#allocation102_spill] sm:$0xff] }
 0x28a   :  { %v1524_v59 = vadd.f32 %v1523_v13, %v1475_v14  ;;  %v6463_v16 = vpop.permute.xlu0 %1262  ;;  %v1579_v13 = vsel %vm9552_vm15, %v9922_v22, %v9915_v7  ;;  %v1582_v40 = vadd.f32 %v1578_v54, %v1533_v29  ;;  %v1626_v50 = vsel %vm9551_vm1, %v9918_v38, %v9923_v51  ;;  %v9928_v38 = vld [vmem:[#allocation16_spill] sm:$0xff] }
 0x28b   :  { %v6478_v35 = vpop.permute.xlu1 %1462  ;;  %v1527_v14 = vadd.f32 %v1520_v46, %v1478_v56  ;;  %v1583_v41 = vadd.f32 %v1577_v4, %v1534_v0  ;;  %v1675_v29 = vsel %vm9550_vm0, %v9924_v58, %v5902_v17  ;;  %v1983_v4 = vld [vmem:[#allocation2 + $0x5f8] sm:$0xff] }
 0x28c   :  { %v1532_v30 = vadd.f32 %v1524_v59, %v9920_v45  ;;  %9921 = vst [vmem:[#allocation38_spill] sm:$0xff] %v6478_v35  ;;  %1956 = vrot.lane.b32.xlu0 %v1942_v5, %s4862_s8  ;;  %v1676_v59 = vsel %vm9550_vm0, %v9925_v57, %v9924_v58  ;;  %v9926_v45 = vld [vmem:[#allocation86_spill] sm:$0xff]  ;;  %v9927_v35 = vld [vmem:[#allocation99_spill] sm:$0xff]  ;;  %v1631_v54 = vadd.f32 %v1627_v52, %v1582_v40  ;;  %v9929_v22 = vld [vmem:[#allocation20_spill] sm:$0xff] }
 0x28d   :  { %v1989_v5 = vmul.f32 %v1981_v49, %v9926_v45  ;;  %v1628_v7 = vsel %vm9551_vm1, %v9927_v35, %v9919_v25  ;;  %v1632_v0 = vadd.f32 %v1626_v50, %v1583_v41  ;;  %v1725_v49 = vsel %vm9549_vm14, %v9929_v22, %v9928_v38  ;;  %v9931_v25 = vld [vmem:[#allocation103_spill] sm:$0xff]  ;;  %v9932_v50 = vld [vmem:[#allocation8_spill] sm:$0xff] }
 0x28e   :  { %v1581_v46 = vadd.f32 %v1579_v13, %v1532_v30  ;;  %v6494_v56 = vpop.permute.xlu0 %1264  ;;  %v1677_v52 = vsel %vm9550_vm0, %v9931_v25, %v9925_v57  ;;  %v1680_v40 = vadd.f32 %v1676_v59, %v1631_v54  ;;  %v1724_v58 = vsel %vm9549_vm14, %v9928_v38, %v5913_v20  ;;  %v2030_v45 = vld [vmem:[#allocation2 + $0x630] sm:$0xff]  ;;  %v9934_v38 = vld [vmem:[#allocation24_spill] sm:$0xff] }
 0x28f   :  { %v6508_v13 = vpop.permute.xlu1 %1509  ;;  %v1535_v41 = vadd.f32 %v1527_v14, %v9932_v50  ;;  %v1681_v35 = vadd.f32 %v1675_v29, %v1632_v0  ;;  %v1773_v59 = vsel %vm935_vm2, %v5921_v23, %v5926_v39  ;;  %v1772_v14 = vsel %vm935_vm2, %v5926_v39, %v5934_v62  ;;  %v9935_v50 = vld [vmem:[#allocation106_spill] sm:$0xff] }
 0x290   :  { %v1630_v30 = vadd.f32 %v1628_v7, %v1581_v46  ;;  %9930 = vst [vmem:[#allocation95_spill] sm:$0xff] %v6508_v13  ;;  %2002 = vrot.lane.b32.xlu0 %v1989_v5, %s4868_s0  ;;  %v9933_v46 = vld [vmem:[#allocation105_spill] sm:$0xff]  ;;  %v1991_v7 = vmul.f32 %v1983_v4, %v5964_v28  ;;  %v1729_v57 = vadd.f32 %v1725_v49, %v1680_v40 }
 0x291   :  { %v1726_v5 = vsel %vm9549_vm14, %v9933_v46, %v9929_v22  ;;  %v1730_v28 = vadd.f32 %v1724_v58, %v1681_v35  ;;  %v2038_v0 = vmul.f32 %v2030_v45, %v6010_v43  ;;  %v1774_v49 = vsel %vm935_vm2, %v9934_v38, %v5921_v23  ;;  %v9991_v38 = vld [vmem:[#allocation134_spill] sm:$0xff]  ;;  %v9997_v46 = vld [vmem:[#allocation128_spill] sm:$0xff] }
 0x292   :  { %v1679_v13 = vadd.f32 %v1677_v52, %v1630_v30  ;;  %v6525_v32 = vpop.permute.xlu0 %1564  ;;  %v1821_v39 = vsel %vm976_vm3, %v5942_v9, %v5937_v26  ;;  %v1625_v43 = vsel %vm9551_vm1, %v9923_v51, %v6175_v21  ;;  %v1777_v35 = vadd.f32 %v1773_v59, %v1729_v57  ;;  %v9936_v59 = vld [vmem:[#allocation23_spill] sm:$0xff] }
 0x293   :  { %v1576_v22 = vsel %vm9552_vm15, %v5860_v34, %v6525_v32  ;;  %v6539_v4 = vpop.permute.xlu1 %1566  ;;  %v1820_v34 = vsel %vm976_vm3, %v5937_v26, %v5945_v24  ;;  %v1778_v30 = vadd.f32 %v1772_v14, %v1730_v28  ;;  %v1822_v58 = vsel %vm976_vm3, %v5929_v18, %v5942_v9  ;;  %v9938_v28 = vld [vmem:[#allocation92_spill] sm:$0xff] }
 0x294   :  { %v1728_v54 = vadd.f32 %v1726_v5, %v1679_v13  ;;  %v1584_v29 = vadd.f32 %v1576_v22, %v1535_v41  ;;  %2006 = vrot.lane.b32.xlu0 %v1991_v7, %s4868_s0  ;;  %v2077_v13 = vld [vmem:[#allocation2 + $0x668] sm:$0xff]  ;;  %v1869_v26 = vsel %vm1025_vm4, %v5953_v44, %v5958_v42  ;;  %v1868_v51 = vsel %vm1025_vm4, %v5958_v42, %v9935_v50  ;;  %v9937_v22 = vld [vmem:[#allocation107_spill] sm:$0xff] }
 0x295   :  { %v1825_v45 = vadd.f32 %v1821_v39, %v1777_v35  ;;  %v1826_v5 = vadd.f32 %v1820_v34, %v1778_v30  ;;  %v1870_v14 = vsel %vm1025_vm4, %v9936_v59, %v5953_v44  ;;  %v1917_v42 = vsel %vm1074_vm5, %v5976_v60, %v9937_v22  ;;  %v9940_v44 = vld [vmem:[#allocation26_spill] sm:$0xff] }
 0x296   :  { %v1776_v52 = vadd.f32 %v1774_v49, %v1728_v54  ;;  %v1633_v23 = vadd.f32 %v1625_v43, %v1584_v29  ;;  %v6559_v40 = vpop.permute.xlu0 %1662  ;;  %v1723_v54 = vsel %vm9549_vm14, %v5913_v20, %v6184_v15  ;;  %v2079_v29 = vld [vmem:[#allocation2 + $0x678] sm:$0xff]  ;;  %v1918_v35 = vsel %vm1074_vm5, %v9940_v44, %v5976_v60 }
 0x297   :  { %v1674_v41 = vsel %vm9550_vm0, %v5902_v17, %v6559_v40  ;;  %v6577_v9 = vpop.permute.xlu1 %1570  ;;  %v2085_v17 = vmul.f32 %v2077_v13, %v9938_v28  ;;  %v1873_v49 = vadd.f32 %v1869_v26, %v1825_v45  ;;  %v1916_v30 = vsel %vm1074_vm5, %v9937_v22, %v5979_v33  ;;  %v9942_v45 = vld [vmem:[#allocation30_spill] sm:$0xff]  ;;  %v9944_v28 = vld [vmem:[#allocation108_spill] sm:$0xff] }
 0x298   :  { %v1824_v7 = vadd.f32 %v1822_v58, %v1776_v52  ;;  %v1682_v57 = vadd.f32 %v1674_v41, %v1633_v23  ;;  %2052 = vrot.lane.b32.xlu0 %v2038_v0, %s4869_s9  ;;  %v1874_v0 = vadd.f32 %v1868_v51, %v1826_v5  ;;  %v1965_v20 = vsel %vm1123_vm6, %v5987_v12, %v5992_v36  ;;  %v9941_v41 = vld [vmem:[#allocation109_spill] sm:$0xff]  ;;  %v9983_v44 = vld [vmem:[#allocation120_spill] sm:$0xff] }
 0x299   :  { %v1921_v52 = vadd.f32 %v1917_v42, %v1873_v49  ;;  %v2087_v60 = vmul.f32 %v2079_v29, %v6032_v61  ;;  %v1966_v51 = vsel %vm1123_vm6, %v5984_v48, %v5987_v12  ;;  %v2013_v5 = vsel %vm9547_vm7, %v9942_v45, %v9941_v41 }
 0x29a   :  { %v1731_v39 = vadd.f32 %v1723_v54, %v1682_v57  ;;  %v6593_v34 = vpop.permute.xlu0 %1760  ;;  %v1872_v43 = vadd.f32 %v1870_v14, %v1824_v7  ;;  %v2126_v7 = vld [vmem:[#allocation2 + $0x6b0] sm:$0xff]  ;;  %v1922_v57 = vadd.f32 %v1916_v30, %v1874_v0  ;;  %v1964_v12 = vsel %vm1123_vm6, %v5992_v36, %v9944_v28 }
 0x29b   :  { %9939 = vst [vmem:[#allocation44_spill] sm:$0xff] %v6593_v34  ;;  %v1771_v13 = vsel %vm935_vm2, %v5934_v62, %v6593_v34  ;;  %v6611_v58 = vpop.permute.xlu1 %1617  ;;  %v1819_v62 = vsel %vm976_vm3, %v5945_v24, %v6194_v55  ;;  %v1969_v14 = vadd.f32 %v1965_v20, %v1921_v52  ;;  %v2061_v24 = vsel %vm1221_vm8, %v6021_v19, %v6030_v27  ;;  %v9947_v30 = vld [vmem:[#allocation51_spill] sm:$0xff]  ;;  %v9993_v55 = vld [vmem:[#allocation130_spill] sm:$0xff] }
 0x29c   :  { %v1779_v23 = vadd.f32 %v1771_v13, %v1731_v39  ;;  %2098 = vrot.lane.b32.xlu0 %v2085_v17, %s4870_s10  ;;  %v1920_v26 = vadd.f32 %v1918_v35, %v1872_v43  ;;  %v9945_v17 = vld [vmem:[#allocation35_spill] sm:$0xff]  ;;  %v9946_v43 = vld [vmem:[#allocation132_spill] sm:$0xff]  ;;  %v2012_v20 = vsel %vm9547_vm7, %v9941_v41, %v9947_v30 }
 0x29d   :  { %v2014_v54 = vsel %vm9547_vm7, %v9945_v17, %v9942_v45  ;;  %v2017_v49 = vadd.f32 %v2013_v5, %v1969_v14  ;;  %v2134_v35 = vmul.f32 %v2126_v7, %v9946_v43  ;;  %v9948_v13 = vld [vmem:[#allocation32_spill] sm:$0xff]  ;;  %v1970_v45 = vadd.f32 %v1964_v12, %v1922_v57  ;;  %v9953_v14 = vld [vmem:[#allocation113_spill] sm:$0xff] }
 0x29e   :  { %v1827_v61 = vadd.f32 %v1819_v62, %v1779_v23  ;;  %v6627_v22 = vpop.permute.xlu0 %1856  ;;  %v1968_v42 = vadd.f32 %v1966_v51, %v1920_v26  ;;  %v2062_v52 = vsel %vm1221_vm8, %v9948_v13, %v6021_v19  ;;  %v9950_v23 = vld [vmem:[#allocation115_spill] sm:$0xff]  ;;  %v9951_v51 = vld [vmem:[#allocation14_spill] sm:$0xff]  ;;  %v2060_v19 = vsel %vm1221_vm8, %v6030_v27, %v9953_v14 }
 0x29f   :  { %9943 = vst [vmem:[#allocation46_spill] sm:$0xff] %v6627_v22  ;;  %v1867_v29 = vsel %vm1025_vm4, %v9935_v50, %v6627_v22  ;;  %v6645_v39 = vpop.permute.xlu1 %1664  ;;  %v9949_v50 = vld [vmem:[#allocation114_spill] sm:$0xff]  ;;  %v2065_v5 = vadd.f32 %v2061_v24, %v2017_v49  ;;  %v2018_v12 = vadd.f32 %v2012_v20, %v1970_v45 }
 0x2a0   :  { %v1875_v0 = vadd.f32 %v1867_v29, %v1827_v61  ;;  %2102 = vrot.lane.b32.xlu0 %v2087_v60, %s4870_s10  ;;  %v2016_v36 = vadd.f32 %v2014_v54, %v1968_v42  ;;  %v2109_v26 = vsel %vm1270_vm9, %v9950_v23, %v9949_v50  ;;  %v1915_v60 = vsel %vm1074_vm5, %v5979_v33, %v9951_v51  ;;  %v9954_v61 = vld [vmem:[#allocation112_spill] sm:$0xff]  ;;  %v9955_v54 = vld [vmem:[#allocation119_spill] sm:$0xff]  ;;  %v9956_v29 = vld [vmem:[#allocation118_spill] sm:$0xff] }
 0x2a1   :  { %v2110_v42 = vsel %vm1270_vm9, %v9954_v61, %v9950_v23  ;;  %v2157_v33 = vsel %vm1319_vm10, %v9956_v29, %v9955_v54  ;;  %v2113_v24 = vadd.f32 %v2109_v26, %v2065_v5  ;;  %v2066_v20 = vadd.f32 %v2060_v19, %v2018_v12  ;;  %v9963_v5 = vld [vmem:[#allocation121_spill] sm:$0xff]  ;;  %v9977_v61 = vld [vmem:[#allocation27_spill] sm:$0xff]  ;;  %v9978_v13 = vld [vmem:[#allocation34_spill] sm:$0xff] }
 0x2a2   :  { %v1923_v62 = vadd.f32 %v1915_v60, %v1875_v0  ;;  %v6665_v7 = vpop.permute.xlu0 %1952  ;;  %v2064_v41 = vadd.f32 %v2062_v52, %v2016_v36  ;;  %v9958_v36 = vld [vmem:[#allocation116_spill] sm:$0xff]  ;;  %v9959_v52 = vld [vmem:[#allocation117_spill] sm:$0xff]  ;;  %v9987_v51 = vld [vmem:[#allocation127_spill] sm:$0xff] }
 0x2a3   :  { %9952 = vst [vmem:[#allocation41_spill] sm:$0xff] %v6665_v7  ;;  %v1963_v57 = vsel %vm1123_vm6, %v9944_v28, %v6665_v7  ;;  %v6683_v0 = vpop.permute.xlu1 %2096  ;;  %v2108_v43 = vsel %vm1270_vm9, %v9949_v50, %v9958_v36  ;;  %v2158_v23 = vsel %vm1319_vm10, %v9959_v52, %v9956_v29  ;;  %v2011_v28 = vsel %vm9547_vm7, %v9947_v30, %v6279_v53  ;;  %v9976_v52 = vld [vmem:[#allocation40_spill] sm:$0xff] }
 0x2a4   :  { %v1971_v49 = vadd.f32 %v1963_v57, %v1923_v62  ;;  %9957 = vst [vmem:[#allocation43_spill] sm:$0xff] %v6683_v0  ;;  %v2112_v27 = vadd.f32 %v2110_v42, %v2064_v41  ;;  %2148 = vrot.lane.b32.xlu0 %v2134_v35, %s4871_s11  ;;  %v6698_v26 = vadd.f32 %v2157_v33, %v2113_v24  ;;  %v9985_v7 = vld [vmem:[#allocation124_spill] sm:$0xff] }
 0x2a5   :  { %v2156_v50 = vsel %vm1319_vm10, %v9955_v54, %v9963_v5  ;;  %v2114_v41 = vadd.f32 %v2108_v43, %v2066_v20  ;;  %v2107_v29 = vsel %vm1270_vm9, %v9958_v36, %v6683_v0  ;;  %v9979_v0 = vld [vmem:[#allocation13_spill] sm:$0xff] }
 0x2a6   :  { %9960 = vst [vmem:[#allocation52_spill] sm:$0xff] %v6698_v26  ;;  %v2019_v60 = vadd.f32 %v2011_v28, %v1971_v49  ;;  %v6700_v35 = vpop.permute.xlu0 %2048  ;;  %v6702_v45 = vadd.f32 %v2158_v23, %v2112_v27  ;;  %v2031_v23 = vld [vmem:[#allocation2 + $0x638] sm:$0xff]  ;;  %v9967_v28 = vld [vmem:[#allocation110_spill] sm:$0xff]  ;;  %v939_v17 = vsel %vm935_vm2, %v9979_v0, %v9978_v13  ;;  %v1078_v0 = vsel %vm1074_vm5, %v9871_v3, %v9987_v51 }
 0x2a7   :  { %9961 = vst [vmem:[#allocation50_spill] sm:$0xff] %v6700_v35  ;;  %v2059_v62 = vsel %vm1221_vm8, %v9953_v14, %v6700_v35  ;;  %v6712_v19 = vpop.permute.xlu1 %2144  ;;  %v6720_v33 = vadd.f32 %v2156_v50, %v2114_v41  ;;  %v2039_v20 = vmul.f32 %v2031_v23, %v9967_v28  ;;  %v2125_v41 = vld [vmem:[#allocation2 + $0x6a8] sm:$0xff]  ;;  %v9984_v35 = vld [vmem:[#allocation37_spill] sm:$0xff] }
 0x2a8   :  { %9962 = vst [vmem:[#allocation53_spill] sm:$0xff] %v6702_v45  ;;  %v2067_v30 = vadd.f32 %v2059_v62, %v2019_v60  ;;  %9964 = vst [vmem:[#allocation75_spill] sm:$0xff] %v6712_v19  ;;  %v2168_v42 = vadd.f32 %v6698_v26, %v6702_v45  ;;  %v2155_v14 = vsel %vm1319_vm10, %v9963_v5, %v6712_v19  ;;  %v2078_v60 = vld [vmem:[#allocation2 + $0x670] sm:$0xff] }
 0x2a9   :  { %9965 = vst [vmem:[#allocation62_spill] sm:$0xff] %v6720_v33  ;;  %v9968_v5 = vld [vmem:[#allocation111_spill] sm:$0xff]  ;;  %v980_v19 = vsel %vm976_vm3, %v9977_v61, %v9976_v52  ;;  %v936_v48 = vsel %vm935_vm2, %v9984_v35, %v9983_v44  ;;  %v9992_v44 = vld [vmem:[#allocation48_spill] sm:$0xff] }
 0x2aa   :  { %v2115_v54 = vadd.f32 %v2107_v29, %v2067_v30  ;;  %v6722_v57 = vpop.permute.xlu0 %1266  ;;  %v2169_v24 = vadd.f32 %v2168_v42, %v6720_v33  ;;  %v2086_v62 = vmul.f32 %v2078_v60, %v9968_v5  ;;  %v2127_v42 = vld [vmem:[#allocation2 + $0x6b8] sm:$0xff]  ;;  %v9969_v29 = vld [vmem:[#allocation98_spill] sm:$0xff]  ;;  %v9981_v33 = vld [vmem:[#allocation31_spill] sm:$0xff]  ;;  %v989_v45 = vadd.f32 %v980_v19, %v939_v17 }
 0x2ab   :  { %v9986_v61 = vld [vmem:[#allocation123_spill] sm:$0xff]  ;;  %v9990_v19 = vld [vmem:[#allocation45_spill] sm:$0xff] }
 0x2ac   :  { %v6728_v12 = vadd.f32 %v2155_v14, %v2115_v54  ;;  %v2133_v54 = vmul.f32 %v2125_v41, %v9969_v29  ;;  %v9970_v14 = vld [vmem:[#allocation133_spill] sm:$0xff]  ;;  %v6766_v29 = vpop.permute.xlu1 %1668  ;;  %v977_v59 = vsel %vm976_vm3, %v9986_v61, %v9985_v7  ;;  %v9989_v17 = vld [vmem:[#allocation47_spill] sm:$0xff] }
 0x2ad   :  { %v1026_v22 = vsel %vm1025_vm4, %v9990_v19, %v9989_v17 }
 0x2ae   :  { %9966 = vst [vmem:[#allocation56_spill] sm:$0xff] %v6728_v12  ;;  %v6731_v49 = vpop.permute.xlu0 %1311  ;;  %v2170_v27 = vadd.f32 %v2169_v24, %v6728_v12  ;;  %v2135_v24 = vmul.f32 %v2127_v42, %v9970_v14  ;;  %v9980_v12 = vld [vmem:[#allocation42_spill] sm:$0xff] }
 0x2af   :  { %v1029_v26 = vsel %vm1025_vm4, %v9981_v33, %v9980_v12 }
 0x2b0   :  { %2171 = vadd.xlane.f32.xlu1 %v2170_v27  ;;  %v1038_v18 = vadd.f32 %v1029_v26, %v989_v45  ;;  %v9995_v26 = vld [vmem:[#allocation90_spill] sm:$0xff] }
 0x2b1   :  { %v1176_v45 = vsel %vm9547_vm7, %v9882_v1, %v9995_v26  ;;  %v10003_v1 = vld [vmem:[#allocation69_spill] sm:$0xff] }
 0x2b2   :  { %v6734_v36 = vpop.permute.xlu0 %1315  ;;  %v1087_v7 = vadd.f32 %v1078_v0, %v1038_v18  ;;  %v9999_v18 = vld [vmem:[#allocation93_spill] sm:$0xff] }
 0x2b6   :  { %v6736_v43 = vpop.permute.xlu0 %1362 }
 0x2ba   :  { %v6739_v50 = vpop.permute.xlu0 %1409 }
 0x2be   :  { %v6743_v30 = vpop.permute.xlu0 %1413 }
 0x2c1   :  { %2054 = vrot.lane.b32.xlu1 %v2039_v20, %s4869_s9 }
 0x2c2   :  { %v6749_v27 = vpop.permute.xlu0 %1460 }
 0x2c5   :  { %2100 = vrot.lane.b32.xlu1 %v2086_v62, %s4870_s10 }
 0x2c6   :  { %v6752_v23 = vpop.permute.xlu0 %1507 }
 0x2c9   :  { %2146 = vrot.lane.b32.xlu1 %v2133_v54, %s4871_s11  ;;  %v6770_v54 = vpop.permute.xlu1 %1715 }
 0x2ca   :  { %v6754_v28 = vpop.permute.xlu0 %1511  ;;  %9973 = vst [vmem:[#allocation66_spill] sm:$0xff] %v6770_v54  ;;  %v992_v54 = vadd.f32 %v977_v59, %v936_v48  ;;  %v10000_v59 = vld [vmem:[#allocation63_spill] sm:$0xff] }
 0x2cb   :  { %v1225_v0 = vsel %vm1221_vm8, %v10000_v59, %v9999_v18 }
 0x2cd   :  { %2150 = vrot.lane.b32.xlu1 %v2135_v24, %s4871_s11  ;;  %v6774_v24 = vpop.permute.xlu1 %1762 }
 0x2ce   :  { %v6756_v20 = vpop.permute.xlu0 %1568  ;;  %9975 = vst [vmem:[#allocation67_spill] sm:$0xff] %v6774_v24  ;;  %v10002_v24 = vld [vmem:[#allocation15_spill] sm:$0xff] }
 0x2d1   :  { %v6802_v33 = vpop.permute.xlu1 %1766 }
 0x2d2   :  { %v6758_v60 = vpop.permute.xlu0 %1615  ;;  %9988 = vst [vmem:[#allocation68_spill] sm:$0xff] %v6802_v33  ;;  %v1041_v33 = vadd.f32 %v1026_v22, %v992_v54  ;;  %v1173_v22 = vsel %vm9547_vm7, %v10003_v1, %v10002_v24  ;;  %v10004_v54 = vld [vmem:[#allocation70_spill] sm:$0xff] }
 0x2d5   :  { %v6830_v34 = vpop.permute.xlu1 %1812 }
 0x2d6   :  { %v6760_v5 = vpop.permute.xlu0 %1619  ;;  %10001 = vst [vmem:[#allocation77_spill] sm:$0xff] %v6830_v34  ;;  %v10007_v34 = vld [vmem:[#allocation122_spill] sm:$0xff] }
 0x2da   :  { %v6762_v62 = vpop.permute.xlu0 %1666 }
 0x2db   :  { %9971 = vst [vmem:[#allocation61_spill] sm:$0xff] %v6762_v62  ;;  %v9998_v62 = vld [vmem:[#allocation64_spill] sm:$0xff] }
 0x2dc   :  { %v1124_v48 = vsel %vm1123_vm6, %v9998_v62, %v9997_v46 }
 0x2de   :  { %v6764_v41 = vpop.permute.xlu0 %1713 }
 0x2e2   :  { %v6768_v42 = vpop.permute.xlu0 %1717 }
 0x2e3   :  { %9972 = vst [vmem:[#allocation58_spill] sm:$0xff] %v6768_v42 }
 0x2e6   :  { %v6772_v14 = vpop.permute.xlu0 %1764 }
 0x2e7   :  { %9974 = vst [vmem:[#allocation65_spill] sm:$0xff] %v6772_v14  ;;  %v1127_v14 = vsel %vm1123_vm6, %v9992_v44, %v9991_v38 }
 0x2e8   :  { %v1136_v42 = vadd.f32 %v1127_v14, %v1087_v7  ;;  %v1274_v14 = vsel %vm1270_vm9, %v10004_v54, %v6463_v16 }
 0x2ea   :  { %v6788_v53 = vpop.permute.xlu0 %1810  ;;  %v1185_v44 = vadd.f32 %v1176_v45, %v1136_v42  ;;  %v10006_v42 = vld [vmem:[#allocation74_spill] sm:$0xff] }
 0x2eb   :  { %9982 = vst [vmem:[#allocation73_spill] sm:$0xff] %v6788_v53  ;;  %v9994_v53 = vld [vmem:[#allocation49_spill] sm:$0xff] }
 0x2ec   :  { %v1075_v3 = vsel %vm1074_vm5, %v9994_v53, %v9993_v55  ;;  %v1234_v7 = vadd.f32 %v1225_v0, %v1185_v44  ;;  %v938_v44 = vsel %vm935_vm2, %v9978_v13, %v10007_v34 }
 0x2ed   :  { %v1090_v55 = vadd.f32 %v1075_v3, %v1041_v33  ;;  %v1323_v3 = vsel %vm1319_vm10, %v10006_v42, %v6731_v49 }
 0x2ee   :  { %v6820_v17 = vpop.permute.xlu0 %1814  ;;  %v1283_v59 = vadd.f32 %v1274_v14, %v1234_v7  ;;  %v6866_v14 = vpop.permute.xlu1 %1858 }
 0x2ef   :  { %9996 = vst [vmem:[#allocation71_spill] sm:$0xff] %v6820_v17  ;;  %v1139_v46 = vadd.f32 %v1124_v48, %v1090_v55  ;;  %v10005_v17 = vld [vmem:[#allocation125_spill] sm:$0xff]  ;;  %v937_v48 = vsel %vm935_vm2, %v10007_v34, %v9984_v35 }
 0x2f0   :  { %v978_v33 = vsel %vm976_vm3, %v10005_v17, %v9986_v61  ;;  %v979_v0 = vsel %vm976_vm3, %v9976_v52, %v10005_v17  ;;  %v10008_v61 = vld [vmem:[#allocation126_spill] sm:$0xff]  ;;  %v1332_v54 = vadd.f32 %v1323_v3, %v1283_v59  ;;  %v10009_v52 = vld [vmem:[#allocation131_spill] sm:$0xff]  ;;  %v10010_v17 = vld [vmem:[#allocation129_spill] sm:$0xff] }
 0x2f1   :  { %v1188_v45 = vadd.f32 %v1173_v22, %v1139_v46  ;;  %v1027_v55 = vsel %vm1025_vm4, %v10008_v61, %v9990_v19  ;;  %v991_v22 = vadd.f32 %v978_v33, %v937_v48  ;;  %v1028_v35 = vsel %vm1025_vm4, %v9980_v12, %v10008_v61  ;;  %v10011_v19 = vld [vmem:[#allocation55_spill] sm:$0xff]  ;;  %v10012_v34 = vld [vmem:[#allocation25_spill] sm:$0xff]  ;;  %v10013_v59 = vld [vmem:[#allocation72_spill] sm:$0xff] }
 0x2f2   :  { %v6848_v24 = vpop.permute.xlu0 %1860  ;;  %v1222_v46 = vsel %vm1221_vm8, %v10010_v17, %v10009_v52  ;;  %v1076_v7 = vsel %vm1074_vm5, %v10011_v19, %v9994_v53  ;;  %v1271_v13 = vsel %vm1270_vm9, %v6722_v57, %v10012_v34  ;;  %v990_v33 = vadd.f32 %v979_v0, %v938_v44  ;;  %v10014_v61 = vld [vmem:[#allocation29_spill] sm:$0xff]  ;;  %v10015_v52 = vld [vmem:[#allocation19_spill] sm:$0xff] }
 0x2f3   :  { %v1040_v42 = vadd.f32 %v1027_v55, %v991_v22  ;;  %v1077_v12 = vsel %vm1074_vm5, %v9987_v51, %v10011_v19  ;;  %v1237_v3 = vadd.f32 %v1222_v46, %v1188_v45  ;;  %v1125_v48 = vsel %vm1123_vm6, %v10013_v59, %v9998_v62 }
 0x2f4   :  { %v1372_v53 = vsel %vm1368_vm11, %v9906_v8, %v10014_v61  ;;  %v1320_v0 = vsel %vm1319_vm10, %v6734_v36, %v6149_v31  ;;  %v1421_v51 = vsel %vm9548_vm12, %v9911_v63, %v6739_v50  ;;  %v1039_v45 = vadd.f32 %v1028_v35, %v990_v33  ;;  %v6914_v35 = vpop.permute.xlu1 %1862 }
 0x2f5   :  { %v1089_v55 = vadd.f32 %v1076_v7, %v1040_v42  ;;  %v1286_v44 = vadd.f32 %v1271_v13, %v1237_v3  ;;  %v1381_v22 = vadd.f32 %v1372_v53, %v1332_v54  ;;  %v1126_v8 = vsel %vm1123_vm6, %v9991_v38, %v10013_v59  ;;  %v10016_v38 = vld [vmem:[#allocation12_spill] sm:$0xff] }
 0x2f6   :  { %v6904_v62 = vpop.permute.xlu0 %1906  ;;  %v1174_v31 = vsel %vm9547_vm7, %v10015_v52, %v10003_v1  ;;  %v1088_v46 = vadd.f32 %v1077_v12, %v1039_v45  ;;  %v1175_v54 = vsel %vm9547_vm7, %v9995_v26, %v10015_v52  ;;  %v1223_v33 = vsel %vm1221_vm8, %v10016_v38, %v10010_v17  ;;  %v10017_v42 = vld [vmem:[#allocation28_spill] sm:$0xff]  ;;  %v10021_v52 = vld [vmem:[#allocation38_spill] sm:$0xff] }
 0x2f7   :  { %v1138_v19 = vadd.f32 %v1125_v48, %v1089_v55  ;;  %v1335_v34 = vadd.f32 %v1320_v0, %v1286_v44  ;;  %v1430_v63 = vadd.f32 %v1421_v51, %v1381_v22  ;;  %v1224_v1 = vsel %vm1221_vm8, %v9999_v18, %v10016_v38  ;;  %v10019_v51 = vld [vmem:[#allocation17_spill] sm:$0xff] }
 0x2f8   :  { %v1137_v7 = vadd.f32 %v1126_v8, %v1088_v46  ;;  %v1369_v12 = vsel %vm1368_vm11, %v10017_v42, %v6401_v37  ;;  %v1470_v26 = vsel %vm1466_vm13, %v9913_v2, %v6446_v6  ;;  %v1418_v17 = vsel %vm9548_vm12, %v6743_v30, %v6159_v47  ;;  %v6958_v44 = vpop.permute.xlu1 %1908 }
 0x2f9   :  { %v1187_v13 = vadd.f32 %v1174_v31, %v1138_v19  ;;  %vm10018_vm7 = vcmp.lt.s32.totalorder %v6182_v11, 1  ;;  %v1272_v37 = vsel %vm1270_vm9, %v6494_v56, %v6722_v57  ;;  %v1384_v59 = vadd.f32 %v1369_v12, %v1335_v34  ;;  %v10022_v19 = vld [vmem:[#allocation135_spill] sm:$0xff] }
 0x2fa   :  { %v1519_v18 = vsel %vm10018_vm7, %v5838_v10, %v6752_v23  ;;  %v1186_v3 = vadd.f32 %v1175_v54, %v1137_v7  ;;  %v1479_v48 = vadd.f32 %v1470_v26, %v1430_v63  ;;  %v6948_v53 = vpop.permute.xlu0 %1910  ;;  %v1273_v47 = vsel %vm1270_vm9, %v6463_v16, %v6494_v56  ;;  %v10020_v56 = vld [vmem:[#allocation36_spill] sm:$0xff]  ;;  %v10023_v63 = vld [vmem:[#allocation33_spill] sm:$0xff]  ;;  %v10024_v7 = vld [vmem:[#allocation54_spill] sm:$0xff] }
 0x2fb   :  { %v1236_v2 = vadd.f32 %v1223_v33, %v1187_v13  ;;  %v1321_v10 = vsel %vm1319_vm10, %v10019_v51, %v6734_v36  ;;  %v1433_v45 = vadd.f32 %v1418_v17, %v1384_v59  ;;  %v1322_v22 = vsel %vm1319_vm10, %v6731_v49, %v10019_v51 }
 0x2fc   :  { %v1235_v0 = vadd.f32 %v1224_v1, %v1186_v3  ;;  %v1528_v55 = vadd.f32 %v1519_v18, %v1479_v48  ;;  %v1370_v16 = vsel %vm1368_vm11, %v6736_v43, %v10017_v42  ;;  %v1467_v36 = vsel %vm1466_vm13, %v10021_v52, %v10020_v56  ;;  %v6995_v26 = vpop.permute.xlu1 %1954 }
 0x2fd   :  { %v1285_v57 = vadd.f32 %v1272_v37, %v1236_v2  ;;  %v1371_v46 = vsel %vm1368_vm11, %v10014_v61, %v6736_v43  ;;  %v1516_v49 = vsel %vm10018_vm7, %v6754_v28, %v10022_v19  ;;  %v1419_v54 = vsel %vm9548_vm12, %v10023_v63, %v6743_v30  ;;  %v10025_v37 = vld [vmem:[#allocation95_spill] sm:$0xff] }
 0x2fe   :  { %v1284_v8 = vadd.f32 %v1273_v47, %v1235_v0  ;;  %v1536_v13 = vadd.f32 %v1528_v55, %v10024_v7  ;;  %v1482_v38 = vadd.f32 %v1467_v36, %v1433_v45  ;;  %v6985_v33 = vpop.permute.xlu0 %1956  ;;  %v1420_v43 = vsel %vm9548_vm12, %v6739_v50, %v10023_v63  ;;  %vm10026_vm12 = vmmov %vm10018_vm7  ;;  %v10028_v55 = vld [vmem:[#allocation11_spill] sm:$0xff]  ;;  %v10033_v7 = vld [vmem:[#allocation44_spill] sm:$0xff] }
 0x2ff   :  { %v1334_v31 = vadd.f32 %v1321_v10, %v1285_v57  ;;  %v1468_v42 = vsel %vm1466_vm13, %v6749_v27, %v10021_v52  ;;  %v1575_v30 = vsel %vm9552_vm15, %v6525_v32, %v6539_v4  ;;  %v1469_v50 = vsel %vm1466_vm13, %v6446_v6, %v6749_v27  ;;  %v10027_v6 = vld [vmem:[#allocation60_spill] sm:$0xff]  ;;  %v10029_v57 = vld [vmem:[#allocation99_spill] sm:$0xff] }
 0x300   :  { %v1333_v34 = vadd.f32 %v1322_v22, %v1284_v8  ;;  %v1531_v12 = vadd.f32 %v1516_v49, %v1482_v38  ;;  %v1624_v18 = vsel %vm9551_vm1, %v6175_v21, %v6758_v60  ;;  %v1517_v59 = vsel %vm10018_vm7, %v10025_v37, %v6754_v28  ;;  %v7020_v45 = vpop.permute.xlu1 %1958  ;;  %v10030_v52 = vld [vmem:[#allocation59_spill] sm:$0xff] }
 0x301   :  { %v1383_v1 = vadd.f32 %v1370_v16, %v1334_v31  ;;  %v1585_v48 = vadd.f32 %v1575_v30, %v1536_v13  ;;  %v1518_v32 = vsel %vm10026_vm12, %v6752_v23, %v10025_v37  ;;  %v1580_v28 = vsel %vm9552_vm15, %v6577_v9, %v10028_v55  ;;  %v10038_v30 = vld [vmem:[#allocation136_spill] sm:$0xff] }
 0x302   :  { %v1382_v61 = vadd.f32 %v1371_v46, %v1333_v34  ;;  %v1539_v27 = vadd.f32 %v1531_v12, %v10027_v6  ;;  %v7018_v51 = vpop.permute.xlu0 %2002  ;;  %v1673_v23 = vsel %vm9550_vm0, %v6559_v40, %v6645_v39  ;;  %v1629_v22 = vsel %vm9551_vm1, %v6760_v5, %v10029_v57  ;;  %v10031_v40 = vld [vmem:[#allocation57_spill] sm:$0xff] }
 0x303   :  { %v1432_v17 = vadd.f32 %v1419_v54, %v1383_v1  ;;  %v1634_v0 = vadd.f32 %v1624_v18, %v1585_v48  ;;  %v1722_v8 = vsel %vm9549_vm14, %v6184_v15, %v6764_v41  ;;  %v1574_v31 = vsel %vm9552_vm15, %v6539_v4, %v6756_v20  ;;  %v10032_v54 = vld [vmem:[#allocation67_spill] sm:$0xff]  ;;  %v10037_v12 = vld [vmem:[#allocation73_spill] sm:$0xff] }
 0x304   :  { %v1431_v3 = vadd.f32 %v1420_v43, %v1382_v61  ;;  %v1588_v16 = vadd.f32 %v1580_v28, %v1539_v27  ;;  %v1573_v19 = vsel %vm9552_vm15, %v6756_v20, %v6577_v9  ;;  %v1623_v15 = vsel %vm9551_vm1, %v6758_v60, %v6611_v58  ;;  %v7062_v20 = vpop.permute.xlu1 %2004  ;;  %v10034_v60 = vld [vmem:[#allocation61_spill] sm:$0xff]  ;;  %v10036_v61 = vld [vmem:[#allocation58_spill] sm:$0xff] }
 0x305   :  { %v1481_v2 = vadd.f32 %v1468_v42, %v1432_v17  ;;  %v1683_v56 = vadd.f32 %v1673_v23, %v1634_v0  ;;  %v1678_v4 = vsel %vm9550_vm0, %v6766_v29, %v9931_v25  ;;  %v1770_v13 = vsel %vm935_vm2, %v10033_v7, %v10032_v54  ;;  %v10035_v25 = vld [vmem:[#allocation105_spill] sm:$0xff]  ;;  %v10041_v0 = vld [vmem:[#allocation24_spill] sm:$0xff] }
 0x306   :  { %v1480_v47 = vadd.f32 %v1469_v50, %v1431_v3  ;;  %v1637_v49 = vadd.f32 %v1629_v22, %v1588_v16  ;;  %v7048_v63 = vpop.permute.xlu0 %2006  ;;  %v1622_v38 = vsel %vm9551_vm1, %v6611_v58, %v6760_v5  ;;  %v1672_v43 = vsel %vm9550_vm0, %v6645_v39, %v10034_v60  ;;  %v10039_v39 = vld [vmem:[#allocation66_spill] sm:$0xff] }
 0x307   :  { %v1530_v21 = vadd.f32 %v1517_v59, %v1481_v2  ;;  %v1732_v34 = vadd.f32 %v1722_v8, %v1683_v56  ;;  %v1727_v42 = vsel %vm9549_vm14, %v10036_v61, %v10035_v25  ;;  %v1818_v17 = vsel %vm976_vm3, %v10038_v30, %v10037_v12  ;;  %v10044_v8 = vld [vmem:[#allocation77_spill] sm:$0xff]  ;;  %v10045_v56 = vld [vmem:[#allocation22_spill] sm:$0xff] }
 0x308   :  { %v1529_v10 = vadd.f32 %v1518_v32, %v1480_v47  ;;  %v1671_v58 = vsel %vm9550_vm0, %v10034_v60, %v6766_v29  ;;  %v1686_v5 = vadd.f32 %v1678_v4, %v1637_v49  ;;  %v1721_v37 = vsel %vm9549_vm14, %v6764_v41, %v10039_v39  ;;  %v10040_v29 = vld [vmem:[#allocation65_spill] sm:$0xff]  ;;  %v2051_v28 = vpop.permute.xlu1 %2050 }
 0x309   :  { %v1538_v36 = vadd.f32 %v1530_v21, %v10030_v52  ;;  %v1780_v18 = vadd.f32 %v1770_v13, %v1732_v34  ;;  %v1720_v48 = vsel %vm9549_vm14, %v10039_v39, %v10036_v61  ;;  %v1769_v27 = vsel %vm935_vm2, %v10032_v54, %v10040_v29  ;;  %v10042_v21 = vld [vmem:[#allocation68_spill] sm:$0xff]  ;;  %v10046_v52 = vld [vmem:[#allocation71_spill] sm:$0xff]  ;;  %v10049_v54 = vld [vmem:[#allocation41_spill] sm:$0xff] }
 0x30a   :  { %v1537_v46 = vadd.f32 %v1529_v10, %v10031_v40  ;;  %v1735_v2 = vadd.f32 %v1727_v42, %v1686_v5  ;;  %v7092_v47 = vpop.permute.xlu0 %2052  ;;  %v1775_v41 = vsel %vm935_vm2, %v10042_v21, %v10041_v0  ;;  %v10043_v10 = vld [vmem:[#allocation46_spill] sm:$0xff]  ;;  %v1768_v57 = vsel %vm935_vm2, %v10040_v29, %v10042_v21 }
 0x30b   :  { %v1587_v1 = vadd.f32 %v1573_v19, %v1538_v36  ;;  %v1828_v32 = vadd.f32 %v1818_v17, %v1780_v18  ;;  %v1866_v55 = vsel %vm1025_vm4, %v10043_v10, %v6866_v14  ;;  %v1817_v16 = vsel %vm976_vm3, %v10037_v12, %v10044_v8  ;;  %v10051_v12 = vld [vmem:[#allocation50_spill] sm:$0xff] }
 0x30c   :  { %v1586_v9 = vadd.f32 %v1574_v31, %v1537_v46  ;;  %v1823_v36 = vsel %vm976_vm3, %v10046_v52, %v10045_v56  ;;  %v10047_v31 = vld [vmem:[#allocation14_spill] sm:$0xff]  ;;  %v1783_v19 = vadd.f32 %v1775_v41, %v1735_v2  ;;  %v1816_v49 = vsel %vm976_vm3, %v10044_v8, %v10046_v52  ;;  %v10059_v41 = vld [vmem:[#allocation56_spill] sm:$0xff] }
 0x30d   :  { %v1636_v3 = vadd.f32 %v1622_v38, %v1587_v1  ;;  %v1914_v40 = vsel %vm1074_vm5, %v10047_v31, %v6904_v62  ;;  %v1876_v34 = vadd.f32 %v1866_v55, %v1828_v32  ;;  %v1962_v7 = vsel %vm1123_vm6, %v10049_v54, %v6995_v26  ;;  %v10050_v38 = vld [vmem:[#allocation39_spill] sm:$0xff]  ;;  %v10052_v18 = vld [vmem:[#allocation26_spill] sm:$0xff] }
 0x30e   :  { %v1635_v50 = vadd.f32 %v1623_v15, %v1586_v9  ;;  %v10048_v15 = vld [vmem:[#allocation23_spill] sm:$0xff]  ;;  %v1865_v9 = vsel %vm1025_vm4, %v6866_v14, %v6848_v24  ;;  %v1967_v1 = vsel %vm1123_vm6, %v7020_v45, %v10050_v38  ;;  %v2099_v61 = vpop.permute.xlu0 %2098  ;;  %v2058_v30 = vsel %vm1221_vm8, %v10051_v12, %v2051_v28  ;;  %v10057_v2 = vld [vmem:[#allocation62_spill] sm:$0xff] }
 0x30f   :  { %v1685_v6 = vadd.f32 %v1671_v58, %v1636_v3  ;;  %v1871_v4 = vsel %vm1025_vm4, %v6914_v35, %v10048_v15  ;;  %v1924_v25 = vadd.f32 %v1914_v40, %v1876_v34  ;;  %v1913_v14 = vsel %vm1074_vm5, %v6904_v62, %v6958_v44 }
 0x310   :  { %v1684_v59 = vadd.f32 %v1672_v43, %v1635_v50  ;;  %v1831_v43 = vadd.f32 %v1823_v36, %v1783_v19  ;;  %v1864_v58 = vsel %vm1025_vm4, %v6848_v24, %v6914_v35  ;;  %v1919_v3 = vsel %vm1074_vm5, %v6948_v53, %v10052_v18  ;;  %v10056_v24 = vld [vmem:[#allocation52_spill] sm:$0xff]  ;;  %v10062_v19 = vld [vmem:[#allocation43_spill] sm:$0xff] }
 0x311   :  { %v1734_v22 = vadd.f32 %v1720_v48, %v1685_v6  ;;  %v1961_v39 = vsel %vm1123_vm6, %v6995_v26, %v6985_v33  ;;  %vm10054_vm12 = vcmp.lt.s32.totalorder %v6182_v11, 63  ;;  %v1912_v26 = vsel %vm1074_vm5, %v6958_v44, %v6948_v53 }
 0x312   :  { %v1733_v23 = vadd.f32 %v1721_v37, %v1684_v59  ;;  %v10053_v37 = vld [vmem:[#allocation21_spill] sm:$0xff]  ;;  %v1879_v29 = vadd.f32 %v1871_v4, %v1831_v43  ;;  %vm10058_vm7 = vmmov %vm10054_vm12  ;;  %v2103_v44 = vpop.permute.xlu0 %2102  ;;  %vm10071_vm1 = vcmask 64512  }
 0x313   :  { %v1782_v13 = vadd.f32 %v1768_v57, %v1734_v22  ;;  %v2010_v62 = vsel %vm10054_vm12, %v10053_v37, %v7018_v51  ;;  %v10055_v59 = vld [vmem:[#allocation53_spill] sm:$0xff]  ;;  %v2009_v21 = vsel %vm10058_vm7, %v7018_v51, %v7062_v20  ;;  %v2057_v51 = vsel %vm1221_vm8, %v2051_v28, %v7092_v47  ;;  %vm10060_vm12 = vmmov %vm10058_vm7 }
 0x314   :  { %v1781_v46 = vadd.f32 %v1769_v27, %v1733_v23  ;;  %v1972_v27 = vadd.f32 %v1962_v7, %v1924_v25  ;;  %v1927_v22 = vadd.f32 %v1919_v3, %v1879_v29  ;;  %v2008_v40 = vsel %vm10060_vm12, %v7062_v20, %v7048_v63 }
 0x315   :  { %v1830_v17 = vadd.f32 %v1816_v49, %v1782_v13  ;;  %v2106_v28 = vsel %vm1270_vm9, %v10062_v19, %v2099_v61  ;;  %vm10067_vm12 = vcmask 1043456  }
 0x316   :  { %v1829_v60 = vadd.f32 %v1817_v16, %v1781_v46  ;;  %v2020_v53 = vadd.f32 %v2010_v62, %v1972_v27  ;;  %v1960_v16 = vsel %vm1123_vm6, %v6985_v33, %v7020_v45  ;;  %v10061_v46 = vld [vmem:[#allocation35_spill] sm:$0xff]  ;;  %v1975_v54 = vadd.f32 %v1967_v1, %v1927_v22  ;;  %v2149_v13 = vpop.permute.xlu0 %2148 }
 0x317   :  { %v1878_v57 = vadd.f32 %v1864_v58, %v1830_v17  ;;  %v2015_v33 = vsel %vm10058_vm7, %v7048_v63, %v10061_v46  ;;  %v10064_v17 = vld [vmem:[#allocation75_spill] sm:$0xff]  ;;  %vm10068_vm7 = vmmov %vm10067_vm12 }
 0x318   :  { %v1877_v5 = vadd.f32 %v1865_v9, %v1829_v60  ;;  %v2068_v7 = vadd.f32 %v2058_v30, %v2020_v53  ;;  %v10063_v9 = vld [vmem:[#allocation32_spill] sm:$0xff]  ;;  %v2023_v25 = vadd.f32 %v2015_v33, %v1975_v54  ;;  %vm10069_vm14 = vmmov %vm10068_vm7 }
 0x319   :  { %v1926_v36 = vadd.f32 %v1912_v26, %v1878_v57  ;;  %vm10070_vm0 = vmmov %vm10068_vm7 }
 0x31a   :  { %v1925_v6 = vadd.f32 %v1913_v14, %v1877_v5 }
 0x31b   :  { %v1974_v4 = vadd.f32 %v1960_v16, %v1926_v36 }
 0x31c   :  { %v1973_v8 = vadd.f32 %v1961_v39, %v1925_v6  ;;  %v10065_v39 = vld [vmem:[#allocation112_spill] sm:$0xff] }
 0x31d   :  { %v2022_v43 = vadd.f32 %v2008_v40, %v1974_v4  ;;  %v2111_v37 = vsel %vm1270_vm9, %v2103_v44, %v10065_v39 }
 0x31e   :  { %v2021_v31 = vadd.f32 %v2009_v21, %v1973_v8 }
 0x320   :  { %v2069_v20 = vadd.f32 %v2057_v51, %v2021_v31 }
 0x33d   :  { %v2172_v42 = vpop.xlane.xlu1 %2171 }
 0x33e   :  { %v2173_v50 = vmul.f32 0.001953125, %v2172_v42 }
 0x340   :  { %v7166_v48 = vsub.f32 %v10055_v59, %v2173_v50  ;;  %v7169_v35 = vsub.f32 %v10056_v24, %v2173_v50  ;;  %v7172_v32 = vsub.f32 %v10057_v2, %v2173_v50  ;;  %v7183_v10 = vsub.f32 %v10059_v41, %v2173_v50  ;;  %v10066_v59 = vld [vmem:[#allocation117_spill] sm:$0xff] }
 0x341   :  { %v2055_v0 = vpop.permute.xlu1 %2054 }
 0x342   :  { %v2178_v55 = vmul.f32 %v7166_v48, %v7166_v48  ;;  %v2179_v23 = vmul.f32 %v7169_v35, %v7169_v35  ;;  %v2180_v56 = vmul.f32 %v7172_v32, %v7172_v32  ;;  %v2181_v34 = vmul.f32 %v7183_v10, %v7183_v10 }
 0x343   :  { %v2056_v63 = vsel %vm1221_vm8, %v7092_v47, %v2055_v0  ;;  %v2063_v38 = vsel %vm1221_vm8, %v2055_v0, %v10063_v9  ;;  %v7283_v9 = vld [vmem:[%s9392_s2 + $0x10] sm:$0xff]  }
 0x344   :  { %v2182_v52 = vadd.f32 %v2179_v23, %v2178_v55  ;;  %v2070_v14 = vadd.f32 %v2056_v63, %v2022_v43  ;;  %v2071_v50 = vadd.f32 %v2063_v38, %v2023_v25  ;;  %v7272_v63 = vld [vmem:[%s9392_s2 + $0x8] sm:$0xff]   ;;  %v7294_v38 = vld [vmem:[%s9392_s2 + $0x18] sm:$0xff]   ;;  %v7327_v25 = vld [vmem:[%s9392_s2 + $0x30] sm:$0xff]  }
 0x345   :  { %v2101_v45 = vpop.permute.xlu1 %2100  ;;  %v7316_v43 = vld [vmem:[%s9392_s2 + $0x28] sm:$0xff]  }
 0x346   :  { %v2105_v49 = vsel %vm1270_vm9, %v2099_v61, %v2101_v45  ;;  %v2183_v15 = vadd.f32 %v2182_v52, %v2180_v56  ;;  %v2116_v61 = vadd.f32 %v2106_v28, %v2068_v7  ;;  %v2104_v1 = vsel %vm1270_vm9, %v2101_v45, %v2103_v44 }
 0x347   :  { %v2117_v42 = vadd.f32 %v2105_v49, %v2069_v20  ;;  %v2118_v18 = vadd.f32 %v2104_v1, %v2070_v14  ;;  %v2119_v6 = vadd.f32 %v2111_v37, %v2071_v50  ;;  %v7261_v20 = vld [vmem:[%s9392_s2] sm:$0xff]   ;;  %v7371_v1 = vld [vmem:[%s9392_s2 + $0x50] sm:$0xff]  }
 0x348   :  { %v2184_v60 = vadd.f32 %v2183_v15, %v2181_v34 }
 0x349   :  { %v2147_v12 = vpop.permute.xlu1 %2146 }
 0x34a   :  { %v2153_v30 = vsel %vm1319_vm10, %v2147_v12, %v2149_v13  ;;  %v2154_v47 = vsel %vm1319_vm10, %v10064_v17, %v2147_v12  ;;  %2185 = vadd.xlane.f32.xlu0 %v2184_v60  ;;  %v7305_v60 = vld [vmem:[%s9392_s2 + $0x20] sm:$0xff]   ;;  %v7360_v12 = vld [vmem:[%s9392_s2 + $0x48] sm:$0xff]  }
 0x34b   :  { %v2164_v58 = vadd.f32 %v2154_v47, %v2116_v61  ;;  %v2165_v5 = vadd.f32 %v2153_v30, %v2117_v42  ;;  %v7338_v61 = vld [vmem:[%s9392_s2 + $0x38] sm:$0xff]   ;;  %v7349_v42 = vld [vmem:[%s9392_s2 + $0x40] sm:$0xff]   ;;  %v7404_v47 = vld [vmem:[%s9392_s2 + $0x68] ss:$0 sps:$4 sm:$0xff]  }
 0x34c   :  { %v7382_v30 = vld [vmem:[%s9392_s2 + $0x58] sm:$0xff]   ;;  %v7393_v17 = vld [vmem:[%s9392_s2 + $0x60] sm:$0xff]  }
 0x34d   :  { %v2151_v3 = vpop.permute.xlu1 %2150  ;;  %v2198_v2 = vadd.f32 %v2165_v5, %v2164_v58 }
 0x34e   :  { %v2152_v62 = vsel %vm1319_vm10, %v2149_v13, %v2151_v3  ;;  %v2159_v24 = vsel %vm1319_vm10, %v2151_v3, %v10066_v59  ;;  %v10073_v13 = vmov 0  }
 0x34f   :  { %v2166_v29 = vadd.f32 %v2152_v62, %v2118_v18  ;;  %v2167_v26 = vadd.f32 %v2159_v24, %v2119_v6 }
 0x351   :  { %v2199_v27 = vadd.f32 %v2198_v2, %v2166_v29 }
 0x353   :  { %v2200_v0 = vadd.f32 %v2199_v27, %v2167_v26 }
 0x355   :  { %2201 = vadd.xlane.f32.xlu1 %v2200_v0 }
 0x3d7   :  { %v2186_v21 = vpop.xlane.xlu0 %2185 }
 0x3d8   :  { %v2187_v41 = vmul.f32 0.001953125, %v2186_v21 }
 0x3da   :  { %v2188_v55 = vadd.f32 1e-05, %v2187_v41 }
 0x3dc   :  { %4620 = vrsqrt.f32 %v2188_v55 }
 0x3e2   :  { %v2202_v23 = vpop.xlane.xlu1 %2201 }
 0x3e3   :  { %v2203_v57 = vmul.f32 0.001953125, %v2202_v23  ;;  %v4628_v23 = vld [vmem:[#allocation2] sm:$0xff] }
 0x3e5   :  { %v7234_v22 = vsub.f32 %v2164_v58, %v2203_v57  ;;  %v7236_v8 = vsub.f32 %v2165_v5, %v2203_v57  ;;  %v7238_v44 = vsub.f32 %v2166_v29, %v2203_v57  ;;  %v7244_v36 = vsub.f32 %v2167_v26, %v2203_v57 }
 0x3e6   :  { %v4621_v53 = vpop.eup %4620 }
 0x3e7   :  { %v2191_v16 = vmul.f32 %v4621_v53, %v7169_v35  ;;  %v2193_v51 = vmul.f32 %v4621_v53, %v7183_v10  ;;  %v2190_v56 = vmul.f32 %v4621_v53, %v7166_v48  ;;  %v2192_v52 = vmul.f32 %v4621_v53, %v7172_v32 }
 0x3e8   :  { %v2208_v31 = vmul.f32 %v7234_v22, %v7234_v22  ;;  %v2209_v40 = vmul.f32 %v7236_v8, %v7236_v8  ;;  %v2210_v35 = vmul.f32 %v7238_v44, %v7238_v44  ;;  %v2211_v34 = vmul.f32 %v7244_v36, %v7244_v36 }
 0x3e9   :  { %v2195_v46 = vmax.f32 %v2191_v16, 0.0  ;;  %v2197_v33 = vmax.f32 %v2193_v51, 0.0  ;;  %v2194_v45 = vmax.f32 %v2190_v56, 0.0  ;;  %v2196_v19 = vmax.f32 %v2192_v52, 0.0 }
 0x3ea   :  { %v2212_v10 = vadd.f32 %v2209_v40, %v2208_v31  ;;  %v4631_v40 = vld [vmem:[#allocation2 + $0x18] sm:$0xff] }
 0x3eb   :  { %v2256_v28 = vpack.c.bf16 %v2195_v46, %v2195_v46  ;;  %v2258_v48 = vpack.c.bf16 %v2197_v33, %v2197_v33  ;;  %v2255_v49 = vpack.c.bf16 %v2194_v45, %v2194_v45  ;;  %v2257_v32 = vpack.c.bf16 %v2196_v19, %v2196_v19  ;;  %v4632_v19 = vld [vmem:[#allocation2 + $0x40] sm:$0xff] }
 0x3ec   :  { %v2213_v15 = vadd.f32 %v2212_v10, %v2210_v35  ;;  %v4633_v10 = vld [vmem:[#allocation2 + $0x48] sm:$0xff] }
 0x3ed   :  { %4501 = vmatprep.subr.msk.bf16.mxu0 %vm10067_vm12, %v2256_v28  ;;  %4516 = vmatprep.subr.msk.bf16.mxu1 %vm10068_vm7, %v2258_v48  ;;  %v2374_v4 = vsel %vm10069_vm14, %v2255_v49, 0  ;;  %v2380_v54 = vsel %vm10070_vm0, %v2257_v32, 0  ;;  %vm10072_vm12 = vmmov %vm10071_vm1 }
 0x3ee   :  { %2398 = vmatpush1.bf16.msra.mxu0 %v2374_v4  ;;  %2569 = vmatpush1.bf16.msra.mxu1 %v2380_v54  ;;  %v2214_v7 = vadd.f32 %v2213_v15, %v2211_v34  ;;  %vm10074_vm0 = vmmov %vm10071_vm1  ;;  %v4634_v54 = vld [vmem:[#allocation2 + $0x50] sm:$0xff] }
 0x3ef   :  { %vm10075_vm14 = vmmov %vm10074_vm0 }
 0x3f0   :  { %2215 = vadd.xlane.f32.xlu0 %v2214_v7  ;;  %vm10077_vm7 = vmmov %vm10074_vm0  ;;  %v4635_v7 = vld [vmem:[#allocation2 + $0x58] sm:$0xff] }
 0x3f1   :  { %4502 = vmatmul.mubr.msk.bf16.vlgmr.msra.gmra.mrb[112].mxu0 %vm10071_vm1, %v7261_v20  ;;  %4517 = vmatmul.mubr.msk.bf16.vlgmr.msra.gmra.mrb[112].mxu1 %vm10072_vm12, %v7261_v20  ;;  %vm10076_vm1 = vmmov %vm10074_vm0 }
 0x3f2   :  { %2439 = vmatprep.mubr.bf16.mxu0 %v10073_v13  ;;  %2610 = vmatprep.mubr.bf16.mxu1 %v10073_v13  ;;  %vm10078_vm12 = vmmov %vm10074_vm0 }
 0x3f3   :  { %vm10099_vm15 = vmmov %vm10074_vm0 }
 0x3f9   :  { %4503 = vmatmul.mubr.msk.bf16.gmra.mrb[116].mxu0 %vm10074_vm0, %v7272_v63  ;;  %4518 = vmatmul.mubr.msk.bf16.gmra.mrb[116].mxu1 %vm10075_vm14, %v7272_v63  ;;  %vm10079_vm14 = vmmov %vm10074_vm0 }
 0x3fa   :  { %2449 = vmatprep.mubr.bf16.mxu0 %v10073_v13  ;;  %2620 = vmatprep.mubr.bf16.mxu1 %v10073_v13 }
 0x401   :  { %4504 = vmatmul.mubr.msk.bf16.gmra.mrb[120].mxu0 %vm10076_vm1, %v7283_v9  ;;  %4519 = vmatmul.mubr.msk.bf16.gmra.mrb[120].mxu1 %vm10077_vm7, %v7283_v9  ;;  %vm10080_vm1 = vmmov %vm10074_vm0 }
 0x402   :  { %2630 = vmatprep.mubr.bf16.mxu1 %v10073_v13  ;;  %2459 = vmatprep.mubr.bf16.mxu0 %v10073_v13  ;;  %vm10081_vm7 = vmmov %vm10074_vm0 }
 0x409   :  { %4520 = vmatmul.mubr.msk.bf16.gmra.mrb[124].mxu1 %vm10078_vm12, %v7294_v38  ;;  %4505 = vmatmul.mubr.msk.bf16.gmra.mrb[124].mxu0 %vm10074_vm0, %v7294_v38  ;;  %vm10082_vm12 = vmmov %vm10074_vm0 }
 0x40a   :  { %2640 = vmatprep.mubr.bf16.mxu1 %v10073_v13  ;;  %2469 = vmatprep.mubr.bf16.mxu0 %v10073_v13 }
 0x411   :  { %4521 = vmatmul.mubr.msk.bf16.gmra.mrb[128].mxu1 %vm10079_vm14, %v7305_v60  ;;  %4506 = vmatmul.mubr.msk.bf16.gmra.mrb[128].mxu0 %vm10080_vm1, %v7305_v60  ;;  %vm10083_vm14 = vmmov %vm10074_vm0 }
 0x412   :  { %2650 = vmatprep.mubr.bf16.mxu1 %v10073_v13  ;;  %2479 = vmatprep.mubr.bf16.mxu0 %v10073_v13  ;;  %vm10084_vm1 = vmmov %vm10074_vm0 }
 0x419   :  { %4522 = vmatmul.mubr.msk.bf16.gmra.mrb[132].mxu1 %vm10081_vm7, %v7316_v43  ;;  %4507 = vmatmul.mubr.msk.bf16.gmra.mrb[132].mxu0 %vm10082_vm12, %v7316_v43  ;;  %vm10085_vm7 = vmmov %vm10074_vm0 }
 0x41a   :  { %2660 = vmatprep.mubr.bf16.mxu1 %v10073_v13  ;;  %2489 = vmatprep.mubr.bf16.mxu0 %v10073_v13  ;;  %vm10086_vm12 = vmmov %vm10074_vm0 }
 0x421   :  { %4523 = vmatmul.mubr.msk.bf16.gmra.mrb[136].mxu1 %vm10074_vm0, %v7327_v25  ;;  %4508 = vmatmul.mubr.msk.bf16.gmra.mrb[136].mxu0 %vm10083_vm14, %v7327_v25  ;;  %vm10087_vm14 = vmmov %vm10074_vm0 }
 0x422   :  { %2499 = vmatprep.mubr.bf16.mxu0 %v10073_v13  ;;  %2670 = vmatprep.mubr.bf16.mxu1 %v10073_v13 }
 0x429   :  { %4509 = vmatmul.mubr.msk.bf16.gmra.mrb[140].mxu0 %vm10084_vm1, %v7338_v61  ;;  %4524 = vmatmul.mubr.msk.bf16.gmra.mrb[140].mxu1 %vm10085_vm7, %v7338_v61  ;;  %vm10088_vm1 = vmmov %vm10074_vm0 }
 0x42a   :  { %2509 = vmatprep.mubr.bf16.mxu0 %v10073_v13  ;;  %2680 = vmatprep.mubr.bf16.mxu1 %v10073_v13  ;;  %vm10089_vm7 = vmmov %vm10074_vm0 }
 0x431   :  { %4510 = vmatmul.mubr.msk.bf16.gmra.mrb[144].mxu0 %vm10086_vm12, %v7349_v42  ;;  %4525 = vmatmul.mubr.msk.bf16.gmra.mrb[144].mxu1 %vm10074_vm0, %v7349_v42  ;;  %vm10090_vm12 = vmmov %vm10074_vm0 }
 0x432   :  { %2519 = vmatprep.mubr.bf16.mxu0 %v10073_v13  ;;  %2690 = vmatprep.mubr.bf16.mxu1 %v10073_v13 }
 0x439   :  { %4511 = vmatmul.mubr.msk.bf16.gmra.mrb[148].mxu0 %vm10087_vm14, %v7360_v12  ;;  %4526 = vmatmul.mubr.msk.bf16.gmra.mrb[148].mxu1 %vm10088_vm1, %v7360_v12  ;;  %vm10091_vm14 = vmmov %vm10074_vm0 }
 0x43a   :  { %2529 = vmatprep.mubr.bf16.mxu0 %v10073_v13  ;;  %2700 = vmatprep.mubr.bf16.mxu1 %v10073_v13  ;;  %vm10092_vm1 = vmmov %vm10074_vm0 }
 0x441   :  { %4512 = vmatmul.mubr.msk.bf16.gmra.mrb[152].mxu0 %vm10089_vm7, %v7371_v1  ;;  %4527 = vmatmul.mubr.msk.bf16.gmra.mrb[152].mxu1 %vm10090_vm12, %v7371_v1  ;;  %vm10093_vm7 = vmmov %vm10074_vm0 }
 0x442   :  { %2539 = vmatprep.mubr.bf16.mxu0 %v10073_v13  ;;  %2710 = vmatprep.mubr.bf16.mxu1 %v10073_v13  ;;  %vm10094_vm12 = vmmov %vm10074_vm0 }
 0x449   :  { %4513 = vmatmul.mubr.msk.bf16.gmra.mrb[156].mxu0 %vm10074_vm0, %v7382_v30  ;;  %4528 = vmatmul.mubr.msk.bf16.gmra.mrb[156].mxu1 %vm10091_vm14, %v7382_v30  ;;  %vm10095_vm14 = vcmask 1043456  }
 0x44a   :  { %2549 = vmatprep.mubr.bf16.mxu0 %v10073_v13  ;;  %2720 = vmatprep.mubr.bf16.mxu1 %v10073_v13 }
 0x451   :  { %4514 = vmatmul.mubr.msk.bf16.gmra.mrb[160].mxu0 %vm10092_vm1, %v7393_v17  ;;  %4529 = vmatmul.mubr.msk.bf16.gmra.mrb[160].mxu1 %vm10093_vm7, %v7393_v17  ;;  %vm10096_vm1 = vmmov %vm10095_vm14 }
 0x452   :  { %2559 = vmatprep.mubr.bf16.mxu0 %v10073_v13  ;;  %2730 = vmatprep.mubr.bf16.mxu1 %v10073_v13  ;;  %vm10097_vm7 = vmmov %vm10096_vm1 }
 0x459   :  { %4515 = vmatmul.mubr.msk.bf16.gmra.mrb[164].mxu0 %vm10094_vm12, %v7404_v47  ;;  %4530 = vmatmul.mubr.msk.bf16.gmra.mrb[164].mxu1 %vm10074_vm0, %v7404_v47  ;;  %vm10098_vm12 = vmmov %vm10096_vm1 }
 0x45a   :  { %2771 = vmatprep.mubr.bf16.mxu0 %v10073_v13  ;;  %2942 = vmatprep.mubr.bf16.mxu1 %v10073_v13 }
 0x47d   :  { %v2216_v14 = vpop.xlane.xlu0 %2215 }
 0x47e   :  { %v2217_v50 = vmul.f32 0.001953125, %v2216_v14 }
 0x480   :  { %v2218_v58 = vadd.f32 1e-05, %v2217_v50 }
 0x482   :  { %4622 = vrsqrt.f32 %v2218_v58 }
 0x48c   :  { %v4623_v5 = vpop.eup %4622 }
 0x48d   :  { %v2221_v18 = vmul.f32 %v4623_v5, %v7236_v8  ;;  %v2223_v3 = vmul.f32 %v4623_v5, %v7244_v36  ;;  %v2220_v39 = vmul.f32 %v4623_v5, %v7234_v22  ;;  %v2222_v37 = vmul.f32 %v4623_v5, %v7238_v44  ;;  %v4629_v22 = vld [vmem:[#allocation2 + $0x10] sm:$0xff]  ;;  %v4630_v36 = vld [vmem:[#allocation2 + $0x8] sm:$0xff] }
 0x48f   :  { %v2225_v62 = vmax.f32 %v2221_v18, 0.0  ;;  %v2227_v59 = vmax.f32 %v2223_v3, 0.0  ;;  %v2224_v24 = vmax.f32 %v2220_v39, 0.0  ;;  %v2226_v2 = vmax.f32 %v2222_v37, 0.0  ;;  %v4638_v39 = vld [vmem:[#allocation2 + $0x88] sm:$0xff] }
 0x491   :  { %v2260_v6 = vpack.c.bf16 %v2225_v62, %v2225_v62  ;;  %v2262_v29 = vpack.c.bf16 %v2227_v59, %v2227_v59  ;;  %v2259_v26 = vpack.c.bf16 %v2224_v24, %v2224_v24  ;;  %v2261_v27 = vpack.c.bf16 %v2226_v2, %v2226_v2  ;;  %v4639_v62 = vld [vmem:[#allocation2 + $0xc0] sm:$0xff] }
 0x493   :  { %4531 = vmatprep.subr.msk.bf16.mxu0 %vm10095_vm14, %v2260_v6  ;;  %4546 = vmatprep.subr.msk.bf16.mxu1 %vm10096_vm1, %v2262_v29  ;;  %v2386_v0 = vsel %vm10097_vm7, %v2259_v26, 0  ;;  %v2392_v21 = vsel %vm10098_vm12, %v2261_v27, 0  ;;  %vm10100_vm14 = vmmov %vm10074_vm0  ;;  %v4640_v6 = vld [vmem:[#allocation2 + $0x98] sm:$0xff]  ;;  %v4641_v26 = vld [vmem:[#allocation2 + $0xd0] sm:$0xff] }
 0x494   :  { %2740 = vmatpush1.bf16.msra.mxu0 %v2386_v0  ;;  %2911 = vmatpush1.bf16.msra.mxu1 %v2392_v21  ;;  %vm10101_vm1 = vmmov %vm10074_vm0 }
 0x495   :  { %vm10102_vm7 = vmmov %vm10074_vm0 }
 0x496   :  { %vm10103_vm12 = vmmov %vm10074_vm0 }
 0x497   :  { %4532 = vmatmul.mubr.msk.bf16.vlgmr.msra.gmra.mrb[168].mxu0 %vm10074_vm0, %v7261_v20  ;;  %4547 = vmatmul.mubr.msk.bf16.vlgmr.msra.gmra.mrb[168].mxu1 %vm10099_vm15, %v7261_v20  ;;  %vm10104_vm15 = vmmov %vm10074_vm0 }
 0x498   :  { %2952 = vmatprep.mubr.bf16.mxu1 %v10073_v13  ;;  %2781 = vmatprep.mubr.bf16.mxu0 %v10073_v13 }
 0x49f   :  { %4548 = vmatmul.mubr.msk.bf16.gmra.mrb[172].mxu1 %vm10100_vm14, %v7272_v63  ;;  %4533 = vmatmul.mubr.msk.bf16.gmra.mrb[172].mxu0 %vm10101_vm1, %v7272_v63  ;;  %vm10105_vm14 = vmmov %vm10074_vm0 }
 0x4a0   :  { %2791 = vmatprep.mubr.bf16.mxu0 %v10073_v13  ;;  %2962 = vmatprep.mubr.bf16.mxu1 %v10073_v13  ;;  %vm10106_vm1 = vmmov %vm10074_vm0 }
 0x4a7   :  { %4534 = vmatmul.mubr.msk.bf16.gmra.mrb[176].mxu0 %vm10102_vm7, %v7283_v9  ;;  %4549 = vmatmul.mubr.msk.bf16.gmra.mrb[176].mxu1 %vm10103_vm12, %v7283_v9  ;;  %vm10107_vm7 = vmmov %vm10074_vm0  ;;  %v4636_v9 = vld [vmem:[#allocation2 + $0x80] sm:$0xff] }
 0x4a8   :  { %2801 = vmatprep.mubr.bf16.mxu0 %v10073_v13  ;;  %2972 = vmatprep.mubr.bf16.mxu1 %v10073_v13  ;;  %vm10108_vm12 = vmmov %vm10074_vm0 }
 0x4af   :  { %4535 = vmatmul.mubr.msk.bf16.gmra.mrb[180].mxu0 %vm10104_vm15, %v7294_v38  ;;  %4550 = vmatmul.mubr.msk.bf16.gmra.mrb[180].mxu1 %vm10074_vm0, %v7294_v38  ;;  %vm10109_vm15 = vmmov %vm10074_vm0 }
 0x4b0   :  { %2811 = vmatprep.mubr.bf16.mxu0 %v10073_v13  ;;  %2982 = vmatprep.mubr.bf16.mxu1 %v10073_v13 }
 0x4b7   :  { %4536 = vmatmul.mubr.msk.bf16.gmra.mrb[184].mxu0 %vm10105_vm14, %v7305_v60  ;;  %4551 = vmatmul.mubr.msk.bf16.gmra.mrb[184].mxu1 %vm10106_vm1, %v7305_v60  ;;  %vm10110_vm14 = vmmov %vm10074_vm0  ;;  %v4637_v60 = vld [vmem:[#allocation2 + $0x90] sm:$0xff] }
 0x4b8   :  { %2992 = vmatprep.mubr.bf16.mxu1 %v10073_v13  ;;  %2821 = vmatprep.mubr.bf16.mxu0 %v10073_v13  ;;  %vm10111_vm1 = vmmov %vm10074_vm0 }
 0x4bf   :  { %4552 = vmatmul.mubr.msk.bf16.gmra.mrb[188].mxu1 %vm10107_vm7, %v7316_v43  ;;  %4537 = vmatmul.mubr.msk.bf16.gmra.mrb[188].mxu0 %vm10108_vm12, %v7316_v43  ;;  %vm10112_vm7 = vmmov %vm10074_vm0 }
 0x4c0   :  { %3002 = vmatprep.mubr.bf16.mxu1 %v10073_v13  ;;  %2831 = vmatprep.mubr.bf16.mxu0 %v10073_v13  ;;  %vm10113_vm12 = vmmov %vm10074_vm0 }
 0x4c4   :  { %v2431_v41 = vpop.f32.mrb[112].mxu0  ;;  %v2602_v55 = vpop.f32.mrb[112].mxu1 }
 0x4c5   :  { %v3081_v57 = vmul.f32 %v4628_v23, %v2431_v41  ;;  %v3083_v8 = vmul.f32 %v4629_v22, %v2602_v55  ;;  %v2433_v53 = vpop.f32.mrb[113].mxu0  ;;  %v2604_v44 = vpop.f32.mrb[113].mxu1 }
 0x4c6   :  { %v2435_v16 = vpop.f32.mrb[114].mxu0  ;;  %v2606_v51 = vpop.f32.mrb[114].mxu1  ;;  %v3082_v31 = vmul.f32 %v4630_v36, %v2433_v53  ;;  %v3084_v46 = vmul.f32 %v4631_v40, %v2604_v44  ;;  %v4644_v44 = vld [vmem:[#allocation2 + $0x100] sm:$0xff] }
 0x4c7   :  { %v2608_v56 = vpop.f32.mrb[115].mxu1  ;;  %3093 = vrot.lane.b32.xlu1 %v3083_v8, %s4864_s1  ;;  %3089 = vrot.lane.b32.xlu0 %v3081_v57, %s4864_s1  ;;  %v2437_v52 = vpop.f32.mrb[115].mxu0  ;;  %v3113_v35 = vmul.f32 %v4632_v19, %v2435_v16  ;;  %v3115_v20 = vmul.f32 %v4634_v54, %v2606_v51  ;;  %v4642_v57 = vld [vmem:[#allocation2 + $0xc8] sm:$0xff]  ;;  %v4643_v8 = vld [vmem:[#allocation2 + $0xd8] sm:$0xff] }
 0x4c8   :  { %4553 = vmatmul.mubr.msk.bf16.gmra.mrb[192].mxu1 %vm10109_vm15, %v7327_v25  ;;  %4538 = vmatmul.mubr.msk.bf16.gmra.mrb[192].mxu0 %vm10074_vm0, %v7327_v25  ;;  %v3114_v28 = vmul.f32 %v4633_v10, %v2437_v52  ;;  %v3116_v63 = vmul.f32 %v4635_v7, %v2608_v56  ;;  %vm10114_vm15 = vmmov %vm10074_vm0  ;;  %v4645_v51 = vld [vmem:[#allocation2 + $0x108] sm:$0xff]  ;;  %v4647_v10 = vld [vmem:[#allocation2 + $0x140] sm:$0xff] }
 0x4c9   :  { %2841 = vmatprep.mubr.bf16.mxu0 %v10073_v13  ;;  %3012 = vmatprep.mubr.bf16.mxu1 %v10073_v13 }
 0x4cb   :  { %3095 = vrot.lane.b32.xlu0 %v3084_v46, %s4864_s1  ;;  %3091 = vrot.lane.b32.xlu1 %v3082_v31, %s4864_s1 }
 0x4cc   :  { %v2441_v33 = vpop.f32.mrb[116].mxu0  ;;  %v2612_v45 = vpop.f32.mrb[116].mxu1 }
 0x4cd   :  { %v2443_v48 = vpop.f32.mrb[117].mxu0  ;;  %v2614_v49 = vpop.f32.mrb[117].mxu1  ;;  %v3153_v38 = vmul.f32 %v4636_v9, %v2441_v33  ;;  %v3155_v43 = vmul.f32 %v4637_v60, %v2612_v45  ;;  %v4646_v33 = vld [vmem:[#allocation2 + $0x110] sm:$0xff] }
 0x4ce   :  { %v2445_v32 = vpop.f32.mrb[118].mxu0  ;;  %v2616_v34 = vpop.f32.mrb[118].mxu1  ;;  %v3154_v37 = vmul.f32 %v4638_v39, %v2443_v48  ;;  %v3156_v29 = vmul.f32 %v4640_v6, %v2614_v49 }
 0x4cf   :  { %3121 = vrot.lane.b32.xlu0 %v3113_v35, %s4865_s29  ;;  %3123 = vrot.lane.b32.xlu1 %v3114_v28, %s4865_s29  ;;  %v2447_v15 = vpop.f32.mrb[119].mxu0  ;;  %v2618_v4 = vpop.f32.mrb[119].mxu1  ;;  %v3193_v59 = vmul.f32 %v4639_v62, %v2445_v32  ;;  %v3195_v27 = vmul.f32 %v4641_v26, %v2616_v34  ;;  %v4648_v32 = vld [vmem:[#allocation2 + $0x118] sm:$0xff] }
 0x4d0   :  { %4539 = vmatmul.mubr.msk.bf16.gmra.mrb[196].mxu0 %vm10110_vm14, %v7338_v61  ;;  %4554 = vmatmul.mubr.msk.bf16.gmra.mrb[196].mxu1 %vm10111_vm1, %v7338_v61  ;;  %v3194_v22 = vmul.f32 %v4642_v57, %v2447_v15  ;;  %v3196_v53 = vmul.f32 %v4643_v8, %v2618_v4  ;;  %vm10115_vm14 = vmmov %vm10074_vm0  ;;  %v4649_v15 = vld [vmem:[#allocation2 + $0x150] sm:$0xff]  ;;  %v4656_v57 = vld [vmem:[#allocation2 + $0x198] sm:$0xff] }
 0x4d1   :  { %2851 = vmatprep.mubr.bf16.mxu0 %v10073_v13  ;;  %3022 = vmatprep.mubr.bf16.mxu1 %v10073_v13  ;;  %vm10116_vm1 = vmmov %vm10074_vm0 }
 0x4d3   :  { %3125 = vrot.lane.b32.xlu0 %v3115_v20, %s4865_s29  ;;  %3127 = vrot.lane.b32.xlu1 %v3116_v63, %s4865_s29  ;;  %v4650_v63 = vld [vmem:[#allocation2 + $0x190] sm:$0xff] }
 0x4d4   :  { %v2451_v25 = vpop.f32.mrb[120].mxu0  ;;  %v2622_v14 = vpop.f32.mrb[120].mxu1 }
 0x4d5   :  { %v2453_v50 = vpop.f32.mrb[121].mxu0  ;;  %v7476_v61 = vpop.f32.mrb[121].mxu1  ;;  %v3233_v16 = vmul.f32 %v4644_v44, %v2451_v25  ;;  %v3235_v45 = vmul.f32 %v4646_v33, %v2622_v14  ;;  %v4652_v14 = vld [vmem:[#allocation2 + $0x188] sm:$0xff] }
 0x4d6   :  { %v2455_v58 = vpop.f32.mrb[122].mxu0  ;;  %v7478_v5 = vpop.f32.mrb[122].mxu1  ;;  %v3234_v56 = vmul.f32 %v4645_v51, %v2453_v50  ;;  %v3236_v34 = vmul.f32 %v4648_v32, %v7476_v61  ;;  %v4661_v32 = vld [vmem:[#allocation2 + $0x1d8] sm:$0xff] }
 0x4d7   :  { %3165 = vrot.lane.b32.xlu0 %v3155_v43, %s4866_s30  ;;  %3161 = vrot.lane.b32.xlu1 %v3153_v38, %s4866_s30  ;;  %v7482_v18 = vpop.f32.mrb[123].mxu0  ;;  %v7484_v3 = vpop.f32.mrb[123].mxu1  ;;  %v3273_v28 = vmul.f32 %v4647_v10, %v2455_v58  ;;  %v4651_v43 = vld [vmem:[#allocation2 + $0x148] sm:$0xff] }
 0x4d8   :  { %4540 = vmatmul.mubr.msk.bf16.gmra.mrb[200].mxu0 %vm10112_vm7, %v7349_v42  ;;  %4555 = vmatmul.mubr.msk.bf16.gmra.mrb[200].mxu1 %vm10113_vm12, %v7349_v42  ;;  %vm10117_vm7 = vmmov %vm10074_vm0  ;;  %v3274_v25 = vmul.f32 %v4651_v43, %v7482_v18 }
 0x4d9   :  { %2861 = vmatprep.mubr.bf16.mxu0 %v10073_v13  ;;  %3032 = vmatprep.mubr.bf16.mxu1 %v10073_v13  ;;  %vm10118_vm12 = vmmov %vm10074_vm0 }
 0x4db   :  { %3163 = vrot.lane.b32.xlu0 %v3154_v37, %s4866_s30  ;;  %3201 = vrot.lane.b32.xlu1 %v3193_v59, %s4867_s7 }
 0x4dc   :  { %v2632_v24 = vpop.f32.mrb[124].mxu1  ;;  %v7494_v2 = vpop.f32.mrb[124].mxu0 }
 0x4dd   :  { %v7496_v42 = vpop.f32.mrb[125].mxu1  ;;  %v7498_v0 = vpop.f32.mrb[125].mxu0  ;;  %v3315_v9 = vmul.f32 %v4650_v63, %v2632_v24 }
 0x4de   :  { %v7500_v21 = vpop.f32.mrb[126].mxu1  ;;  %v7502_v41 = vpop.f32.mrb[126].mxu0  ;;  %v3314_v50 = vmul.f32 %v4652_v14, %v7498_v0 }
 0x4df   :  { %3167 = vrot.lane.b32.xlu0 %v3156_v29, %s4866_s30  ;;  %3205 = vrot.lane.b32.xlu1 %v3195_v27, %s4867_s7  ;;  %v7506_v55 = vpop.f32.mrb[127].mxu1  ;;  %v7508_v23 = vpop.f32.mrb[127].mxu0  ;;  %v4655_v29 = vld [vmem:[#allocation2 + $0x180] sm:$0xff] }
 0x4e0   :  { %4541 = vmatmul.mubr.msk.bf16.gmra.mrb[204].mxu0 %vm10114_vm15, %v7360_v12  ;;  %4556 = vmatmul.mubr.msk.bf16.gmra.mrb[204].mxu1 %vm10074_vm0, %v7360_v12  ;;  %vm10123_vm15 = vmmov %vm10074_vm0  ;;  %v3313_v26 = vmul.f32 %v4655_v29, %v7494_v2 }
 0x4e1   :  { %2871 = vmatprep.mubr.bf16.mxu0 %v10073_v13  ;;  %3042 = vmatprep.mubr.bf16.mxu1 %v10073_v13 }
 0x4e3   :  { %3207 = vrot.lane.b32.xlu1 %v3196_v53, %s4867_s7  ;;  %3203 = vrot.lane.b32.xlu0 %v3194_v22, %s4867_s7  ;;  %v4657_v22 = vld [vmem:[#allocation2 + $0x1c8] sm:$0xff] }
 0x4e4   :  { %v7518_v52 = vpop.f32.mrb[128].mxu1  ;;  %v7520_v36 = vpop.f32.mrb[128].mxu0 }
 0x4e5   :  { %v7522_v12 = vpop.f32.mrb[129].mxu1  ;;  %v7524_v31 = vpop.f32.mrb[129].mxu0 }
 0x4e6   :  { %v7526_v40 = vpop.f32.mrb[130].mxu1  ;;  %v7528_v46 = vpop.f32.mrb[130].mxu0 }
 0x4e7   :  { %3241 = vrot.lane.b32.xlu0 %v3233_v16, %s4862_s8  ;;  %3243 = vrot.lane.b32.xlu1 %v3234_v56, %s4862_s8  ;;  %v7532_v19 = vpop.f32.mrb[131].mxu1  ;;  %v7534_v35 = vpop.f32.mrb[131].mxu0  ;;  %v4658_v16 = vld [vmem:[#allocation2 + $0x210] sm:$0xff] }
 0x4e8   :  { %4542 = vmatmul.mubr.msk.bf16.gmra.mrb[208].mxu0 %vm10115_vm14, %v7371_v1  ;;  %4557 = vmatmul.mubr.msk.bf16.gmra.mrb[208].mxu1 %vm10116_vm1, %v7371_v1  ;;  %v3275_v1 = vmul.f32 %v4649_v15, %v7478_v5  ;;  %v4653_v5 = vld [vmem:[#allocation2 + $0x158] sm:$0xff]  ;;  %v3395_v51 = vmul.f32 %v4658_v16, %v7518_v52  ;;  %vm10124_vm14 = vmmov %vm10074_vm0  ;;  %v4660_v52 = vld [vmem:[#allocation2 + $0x208] sm:$0xff] }
 0x4e9   :  { %2881 = vmatprep.mubr.bf16.mxu0 %v10073_v13  ;;  %3052 = vmatprep.mubr.bf16.mxu1 %v10073_v13  ;;  %vm10125_vm1 = vmmov %vm10074_vm0  ;;  %v4668_v16 = vld [vmem:[#allocation2 + $0x288] sm:$0xff] }
 0x4eb   :  { %3245 = vrot.lane.b32.xlu0 %v3235_v45, %s4862_s8  ;;  %3281 = vrot.lane.b32.xlu1 %v3273_v28, %s4868_s0  ;;  %v3394_v45 = vmul.f32 %v4660_v52, %v7524_v31 }
 0x4ec   :  { %v7544_v48 = vpop.f32.mrb[132].mxu1  ;;  %v7546_v49 = vpop.f32.mrb[132].mxu0 }
 0x4ed   :  { %v7550_v4 = vpop.f32.mrb[133].mxu1  ;;  %v7552_v54 = vpop.f32.mrb[133].mxu0 }
 0x4ee   :  { %v7554_v20 = vpop.f32.mrb[134].mxu1  ;;  %v7556_v7 = vpop.f32.mrb[134].mxu0 }
 0x4ef   :  { %3247 = vrot.lane.b32.xlu0 %v3236_v34, %s4862_s8  ;;  %3285 = vrot.lane.b32.xlu1 %v3275_v1, %s4868_s0  ;;  %v7560_v38 = vpop.f32.mrb[135].mxu1  ;;  %v7562_v60 = vpop.f32.mrb[135].mxu0 }
 0x4f0   :  { %4543 = vmatmul.mubr.msk.bf16.gmra.mrb[212].mxu0 %vm10117_vm7, %v7382_v30  ;;  %4558 = vmatmul.mubr.msk.bf16.gmra.mrb[212].mxu1 %vm10118_vm12, %v7382_v30  ;;  %v3276_v30 = vmul.f32 %v4653_v5, %v7484_v3  ;;  %v4654_v3 = vld [vmem:[#allocation2 + $0x1d0] sm:$0xff]  ;;  %v4664_v5 = vld [vmem:[#allocation2 + $0x218] sm:$0xff] }
 0x4f1   :  { %2891 = vmatprep.mubr.bf16.mxu0 %v10073_v13  ;;  %3062 = vmatprep.mubr.bf16.mxu1 %v10073_v13  ;;  %v3355_v6 = vmul.f32 %v4654_v3, %v7500_v21  ;;  %v3354_v21 = vmul.f32 %v4657_v22, %v7508_v23  ;;  %v4659_v23 = vld [vmem:[#allocation2 + $0x1c0] sm:$0xff]  ;;  %v4665_v3 = vld [vmem:[#allocation2 + $0x248] sm:$0xff] }
 0x4f2   :  { %v3353_v33 = vmul.f32 %v4659_v23, %v7502_v41 }
 0x4f3   :  { %3325 = vrot.lane.b32.xlu1 %v3315_v9, %s4869_s9  ;;  %3283 = vrot.lane.b32.xlu0 %v3274_v25, %s4868_s0  ;;  %v4662_v9 = vld [vmem:[#allocation2 + $0x250] sm:$0xff] }
 0x4f4   :  { %v7574_v61 = vpop.f32.mrb[136].mxu1  ;;  %v7576_v58 = vpop.f32.mrb[136].mxu0  ;;  %v3435_v43 = vmul.f32 %v4662_v9, %v7526_v40 }
 0x4f5   :  { %v7579_v39 = vpop.f32.mrb[137].mxu1  ;;  %v7581_v18 = vpop.f32.mrb[137].mxu0 }
 0x4f6   :  { %v7583_v37 = vpop.f32.mrb[138].mxu1  ;;  %v7585_v62 = vpop.f32.mrb[138].mxu0 }
 0x4f7   :  { %10119 = vst [vmem:[#allocation76_spill] sm:$0xff] %v7583_v37  ;;  %10120 = vst [vmem:[#allocation78_spill] sm:$0xff] %v7585_v62  ;;  %3287 = vrot.lane.b32.xlu0 %v3276_v30, %s4868_s0  ;;  %3323 = vrot.lane.b32.xlu1 %v3314_v50, %s4869_s9  ;;  %v7589_v59 = vpop.f32.mrb[139].mxu1  ;;  %v7591_v24 = vpop.f32.mrb[139].mxu0  ;;  %v3396_v30 = vmul.f32 %v4664_v5, %v7522_v12  ;;  %v4719_v62 = vld [vmem:[#allocation2 + $0x5d8] sm:$0xff] }
 0x4f8   :  { %10121 = vst [vmem:[#allocation84_spill] sm:$0xff] %v7589_v59  ;;  %10122 = vst [vmem:[#allocation79_spill] sm:$0xff] %v7591_v24  ;;  %4544 = vmatmul.mubr.msk.bf16.gmra.mrb[216].mxu0 %vm10123_vm15, %v7393_v17  ;;  %4559 = vmatmul.mubr.msk.bf16.gmra.mrb[216].mxu1 %vm10074_vm0, %v7393_v17  ;;  %v3316_v17 = vmul.f32 %v4656_v57, %v7496_v42  ;;  %v4666_v57 = vld [vmem:[#allocation2 + $0x290] sm:$0xff] }
 0x4f9   :  { %2901 = vmatprep.mubr.bf16.mxu0 %v10073_v13  ;;  %3072 = vmatprep.mubr.bf16.mxu1 %v10073_v13 }
 0x4fb   :  { %3321 = vrot.lane.b32.xlu0 %v3313_v26, %s4869_s9  ;;  %3365 = vrot.lane.b32.xlu1 %v3355_v6, %s4870_s10  ;;  %v3434_v6 = vmul.f32 %v4665_v3, %v7534_v35  ;;  %v4667_v35 = vld [vmem:[#allocation2 + $0x240] sm:$0xff]  ;;  %v4672_v3 = vld [vmem:[#allocation2 + $0x298] sm:$0xff] }
 0x4fc   :  { %v7603_v27 = vpop.f32.mrb[140].mxu0  ;;  %v7605_v0 = vpop.f32.mrb[140].mxu1 }
 0x4fd   :  { %v7609_v8 = vpop.f32.mrb[141].mxu0  ;;  %v7611_v2 = vpop.f32.mrb[141].mxu1 }
 0x4fe   :  { %v7613_v53 = vpop.f32.mrb[142].mxu0  ;;  %v7615_v44 = vpop.f32.mrb[142].mxu1 }
 0x4ff   :  { %3327 = vrot.lane.b32.xlu0 %v3316_v17, %s4869_s9  ;;  %3363 = vrot.lane.b32.xlu1 %v3354_v21, %s4870_s10  ;;  %v7620_v56 = vpop.f32.mrb[143].mxu0  ;;  %v7622_v42 = vpop.f32.mrb[143].mxu1  ;;  %v3475_v17 = vmul.f32 %v4666_v57, %v7544_v48  ;;  %v3433_v21 = vmul.f32 %v4667_v35, %v7528_v46  ;;  %v4673_v57 = vld [vmem:[#allocation2 + $0x2c8] sm:$0xff] }
 0x500   :  { %4545 = vmatmul.mubr.msk.bf16.gmra.mrb[220].mxu0 %vm10124_vm14, %v7404_v47  ;;  %4560 = vmatmul.mubr.msk.bf16.gmra.mrb[220].mxu1 %vm10125_vm1, %v7404_v47  ;;  %v3356_v47 = vmul.f32 %v4661_v32, %v7506_v55  ;;  %v4663_v55 = vld [vmem:[#allocation2 + $0x200] sm:$0xff] }
 0x501   :  { %4255 = vmatprep.mubr.bf16.mxu0 %v10073_v13  ;;  %4296 = vmatprep.mubr.bf16.mxu1 %v10073_v13  ;;  %v3393_v25 = vmul.f32 %v4663_v55, %v7520_v36  ;;  %v4681_v13 = vld [vmem:[#allocation2 + $0x388] sm:$0xff] }
 0x502   :  { %v3602_v37 = vmul.f32 %v4681_v13, %v7609_v8 }
 0x503   :  { %3361 = vrot.lane.b32.xlu0 %v3353_v33, %s4870_s10  ;;  %3405 = vrot.lane.b32.xlu1 %v3395_v51, %s4871_s11  ;;  %v3474_v51 = vmul.f32 %v4668_v16, %v7552_v54  ;;  %v4669_v33 = vld [vmem:[#allocation2 + $0x258] sm:$0xff]  ;;  %v4674_v16 = vld [vmem:[#allocation2 + $0x310] sm:$0xff] }
 0x504   :  { %v7634_v10 = vpop.f32.mrb[144].mxu0  ;;  %v7636_v28 = vpop.f32.mrb[144].mxu1  ;;  %v3436_v52 = vmul.f32 %v4669_v33, %v7532_v19  ;;  %v4671_v19 = vld [vmem:[#allocation2 + $0x280] sm:$0xff] }
 0x505   :  { %v7639_v34 = vpop.f32.mrb[145].mxu0  ;;  %v7641_v41 = vpop.f32.mrb[145].mxu1 }
 0x506   :  { %v7643_v15 = vpop.f32.mrb[146].mxu0  ;;  %v7645_v1 = vpop.f32.mrb[146].mxu1 }
 0x507   :  { %3367 = vrot.lane.b32.xlu0 %v3356_v47, %s4870_s10  ;;  %3403 = vrot.lane.b32.xlu1 %v3394_v45, %s4871_s11  ;;  %v7649_v31 = vpop.f32.mrb[147].mxu0  ;;  %v7651_v63 = vpop.f32.mrb[147].mxu1 }
 0x50b   :  { %3401 = vrot.lane.b32.xlu0 %v3393_v25, %s4871_s11  ;;  %3445 = vrot.lane.b32.xlu1 %v3435_v43, %s4872_s12  ;;  %v4670_v43 = vld [vmem:[#allocation2 + $0x2d0] sm:$0xff]  ;;  %v3473_v25 = vmul.f32 %v4671_v19, %v7546_v49 }
 0x50c   :  { %v7657_v14 = vpop.f32.mrb[148].mxu0  ;;  %v7659_v50 = vpop.f32.mrb[148].mxu1  ;;  %v3515_v55 = vmul.f32 %v4670_v43, %v7554_v20  ;;  %v4676_v43 = vld [vmem:[#allocation2 + $0x308] sm:$0xff] }
 0x50d   :  { %v7663_v29 = vpop.f32.mrb[149].mxu0  ;;  %v7665_v40 = vpop.f32.mrb[149].mxu1 }
 0x50e   :  { %v7667_v26 = vpop.f32.mrb[150].mxu0  ;;  %v7669_v36 = vpop.f32.mrb[150].mxu1 }
 0x50f   :  { %3407 = vrot.lane.b32.xlu0 %v3396_v30, %s4871_s11  ;;  %3443 = vrot.lane.b32.xlu1 %v3434_v6, %s4872_s12  ;;  %v7674_v22 = vpop.f32.mrb[151].mxu0  ;;  %v7676_v12 = vpop.f32.mrb[151].mxu1  ;;  %v3476_v6 = vmul.f32 %v4672_v3, %v7550_v4 }
 0x513   :  { %3441 = vrot.lane.b32.xlu0 %v3433_v21, %s4872_s12  ;;  %3485 = vrot.lane.b32.xlu1 %v3475_v17, %s4873_s13  ;;  %v3514_v17 = vmul.f32 %v4673_v57, %v7562_v60  ;;  %v4675_v60 = vld [vmem:[#allocation2 + $0x2c0] sm:$0xff] }
 0x514   :  { %v7682_v23 = vpop.f32.mrb[152].mxu0  ;;  %v7684_v48 = vpop.f32.mrb[152].mxu1 }
 0x515   :  { %v7687_v45 = vpop.f32.mrb[153].mxu0  ;;  %v7689_v32 = vpop.f32.mrb[153].mxu1 }
 0x516   :  { %v7691_v47 = vpop.f32.mrb[154].mxu0  ;;  %v7693_v46 = vpop.f32.mrb[154].mxu1 }
 0x517   :  { %3447 = vrot.lane.b32.xlu0 %v3436_v52, %s4872_s12  ;;  %3483 = vrot.lane.b32.xlu1 %v3474_v51, %s4873_s13  ;;  %v7697_v54 = vpop.f32.mrb[155].mxu0  ;;  %v7699_v9 = vpop.f32.mrb[155].mxu1  ;;  %v3555_v51 = vmul.f32 %v4674_v16, %v7574_v61  ;;  %v3513_v52 = vmul.f32 %v4675_v60, %v7556_v7 }
 0x51b   :  { %3481 = vrot.lane.b32.xlu0 %v3473_v25, %s4873_s13  ;;  %3525 = vrot.lane.b32.xlu1 %v3515_v55, %s4874_s14  ;;  %v3554_v55 = vmul.f32 %v4676_v43, %v7581_v18  ;;  %v4677_v25 = vld [vmem:[#allocation2 + $0x2d8] sm:$0xff]  ;;  %v4680_v43 = vld [vmem:[#allocation2 + $0x380] sm:$0xff] }
 0x51c   :  { %v7705_v5 = vpop.f32.mrb[156].mxu0  ;;  %v7707_v30 = vpop.f32.mrb[156].mxu1  ;;  %v3516_v3 = vmul.f32 %v4677_v25, %v7560_v38  ;;  %v4679_v38 = vld [vmem:[#allocation2 + $0x300] sm:$0xff]  ;;  %v3601_v25 = vmul.f32 %v4680_v43, %v7603_v27  ;;  %v4684_v43 = vld [vmem:[#allocation2 + $0x398] sm:$0xff] }
 0x51d   :  { %v7711_v35 = vpop.f32.mrb[157].mxu0  ;;  %v7713_v20 = vpop.f32.mrb[157].mxu1 }
 0x51e   :  { %v7715_v21 = vpop.f32.mrb[158].mxu0  ;;  %v7717_v49 = vpop.f32.mrb[158].mxu1 }
 0x51f   :  { %3487 = vrot.lane.b32.xlu0 %v3476_v6, %s4873_s13  ;;  %3523 = vrot.lane.b32.xlu1 %v3514_v17, %s4874_s14  ;;  %v7722_v33 = vpop.f32.mrb[159].mxu0  ;;  %v7724_v4 = vpop.f32.mrb[159].mxu1 }
 0x523   :  { %3521 = vrot.lane.b32.xlu0 %v3513_v52, %s4874_s14  ;;  %3565 = vrot.lane.b32.xlu1 %v3555_v51, %s4875_s15  ;;  %v4678_v51 = vld [vmem:[#allocation2 + $0x318] sm:$0xff]  ;;  %v3553_v52 = vmul.f32 %v4679_v38, %v7576_v58  ;;  %v4682_v38 = vld [vmem:[#allocation2 + $0x390] sm:$0xff] }
 0x524   :  { %v7730_v19 = vpop.f32.mrb[160].mxu0  ;;  %v7732_v61 = vpop.f32.mrb[160].mxu1  ;;  %v3556_v60 = vmul.f32 %v4678_v51, %v7579_v39  ;;  %v3603_v27 = vmul.f32 %v4682_v38, %v7605_v0  ;;  %v4686_v0 = vld [vmem:[#allocation2 + $0x400] sm:$0xff] }
 0x525   :  { %v7735_v6 = vpop.f32.mrb[161].mxu0  ;;  %v7737_v57 = vpop.f32.mrb[161].mxu1 }
 0x526   :  { %v7739_v17 = vpop.f32.mrb[162].mxu0  ;;  %v7741_v7 = vpop.f32.mrb[162].mxu1 }
 0x527   :  { %3527 = vrot.lane.b32.xlu0 %v3516_v3, %s4874_s14  ;;  %3563 = vrot.lane.b32.xlu1 %v3554_v55, %s4875_s15  ;;  %v7745_v18 = vpop.f32.mrb[163].mxu0  ;;  %v7747_v16 = vpop.f32.mrb[163].mxu1 }
 0x52b   :  { %3561 = vrot.lane.b32.xlu0 %v3553_v52, %s4875_s15  ;;  %3567 = vrot.lane.b32.xlu1 %v3556_v60, %s4875_s15  ;;  %v4683_v60 = vld [vmem:[#allocation2 + $0x3c0] sm:$0xff] }
 0x52c   :  { %v7755_v55 = vpop.f32.mrb[164].mxu0  ;;  %v7757_v3 = vpop.f32.mrb[164].mxu1  ;;  %v3641_v52 = vmul.f32 %v4683_v60, %v7613_v53 }
 0x52d   :  { %v7759_v24 = vpop.f32.mrb[165].mxu0  ;;  %v7761_v39 = vpop.f32.mrb[165].mxu1 }
 0x52e   :  { %v2565_v51 = vpop.f32.mrb[166].mxu0  ;;  %v2736_v58 = vpop.f32.mrb[166].mxu1 }
 0x52f   :  { %3609 = vrot.lane.b32.xlu0 %v3601_v25, %s4876_s5  ;;  %3611 = vrot.lane.b32.xlu1 %v3602_v37, %s4876_s5  ;;  %v2566_v13 = vpop.f32.mrb[167].mxu0  ;;  %v2737_v8 = vpop.f32.mrb[167].mxu1  ;;  %v3604_v51 = vmul.f32 %v4684_v43, %v7611_v2  ;;  %v4685_v58 = vld [vmem:[#allocation2 + $0x3d0] sm:$0xff]  ;;  %v3681_v25 = vmul.f32 %v4686_v0, %v7634_v10  ;;  %v4687_v37 = vld [vmem:[#allocation2 + $0x3c8] sm:$0xff] }
 0x530   :  { %v3643_v59 = vmul.f32 %v4685_v58, %v7615_v44  ;;  %v3642_v53 = vmul.f32 %v4687_v37, %v7620_v56  ;;  %v4688_v13 = vld [vmem:[#allocation2 + $0x410] sm:$0xff]  ;;  %v4689_v44 = vld [vmem:[#allocation2 + $0x3d8] sm:$0xff]  ;;  %v4690_v56 = vld [vmem:[#allocation2 + $0x408] sm:$0xff] }
 0x531   :  { %v3683_v2 = vmul.f32 %v4688_v13, %v7636_v28  ;;  %v3644_v10 = vmul.f32 %v4689_v44, %v7622_v42  ;;  %v3682_v60 = vmul.f32 %v4690_v56, %v7639_v34  ;;  %v4692_v42 = vld [vmem:[#allocation2 + $0x418] sm:$0xff]  ;;  %v4693_v0 = vld [vmem:[#allocation2 + $0x450] sm:$0xff]  ;;  %v4697_v56 = vld [vmem:[#allocation2 + $0x488] sm:$0xff] }
 0x532   :  { %v3684_v58 = vmul.f32 %v4692_v42, %v7641_v41  ;;  %v4695_v13 = vld [vmem:[#allocation2 + $0x458] sm:$0xff] }
 0x533   :  { %3613 = vrot.lane.b32.xlu0 %v3603_v27, %s4876_s5  ;;  %3649 = vrot.lane.b32.xlu1 %v3641_v52, %s4877_s16  ;;  %v4691_v52 = vld [vmem:[#allocation2 + $0x440] sm:$0xff]  ;;  %v4699_v42 = vld [vmem:[#allocation2 + $0x498] sm:$0xff] }
 0x534   :  { %v3721_v28 = vmul.f32 %v4691_v52, %v7643_v15  ;;  %v4694_v15 = vld [vmem:[#allocation2 + $0x448] sm:$0xff] }
 0x537   :  { %3615 = vrot.lane.b32.xlu0 %v3604_v51, %s4876_s5  ;;  %3653 = vrot.lane.b32.xlu1 %v3643_v59, %s4877_s16 }
 0x539   :  { %v7775_v38 = vpop.permute.xlu1 %3093  ;;  %v7777_v27 = vpop.permute.xlu0 %3089 }
 0x53a   :  { %10126 = vst [vmem:[#allocation82_spill] sm:$0xff] %v7775_v38  ;;  %10127 = vst [vmem:[#allocation88_spill] sm:$0xff] %v7777_v27 }
 0x53b   :  { %3651 = vrot.lane.b32.xlu0 %v3642_v53, %s4877_s16  ;;  %3689 = vrot.lane.b32.xlu1 %v3681_v25, %s4878_s17  ;;  %v3723_v25 = vmul.f32 %v4693_v0, %v7645_v1  ;;  %v3722_v53 = vmul.f32 %v4694_v15, %v7649_v31  ;;  %v4700_v0 = vld [vmem:[#allocation2 + $0x4c0] sm:$0xff]  ;;  %v4701_v15 = vld [vmem:[#allocation2 + $0x4c8] sm:$0xff] }
 0x53d   :  { %v7783_v8 = vpop.permute.xlu0 %3095  ;;  %v7785_v59 = vpop.permute.xlu1 %3091 }
 0x53e   :  { %10128 = vst [vmem:[#allocation87_spill] sm:$0xff] %v7783_v8  ;;  %10129 = vst [vmem:[#allocation80_spill] sm:$0xff] %v7785_v59  ;;  %v4718_v59 = vld [vmem:[#allocation2 + $0x5d0] sm:$0xff] }
 0x53f   :  { %3655 = vrot.lane.b32.xlu0 %v3644_v10, %s4877_s16  ;;  %3693 = vrot.lane.b32.xlu1 %v3683_v2, %s4878_s17  ;;  %v3724_v2 = vmul.f32 %v4695_v13, %v7651_v63  ;;  %v4696_v10 = vld [vmem:[#allocation2 + $0x480] sm:$0xff]  ;;  %v4702_v13 = vld [vmem:[#allocation2 + $0x4d0] sm:$0xff] }
 0x540   :  { %v3761_v1 = vmul.f32 %v4696_v10, %v7657_v14  ;;  %v4703_v10 = vld [vmem:[#allocation2 + $0x4d8] sm:$0xff] }
 0x541   :  { %v7791_v43 = vpop.permute.xlu0 %3121  ;;  %v7793_v51 = vpop.permute.xlu1 %3123 }
 0x542   :  { %10130 = vst [vmem:[#allocation89_spill] sm:$0xff] %v7791_v43  ;;  %10131 = vst [vmem:[#allocation81_spill] sm:$0xff] %v7793_v51  ;;  %v3963_v51 = vmul.f32 %v4718_v59, %v7717_v49 }
 0x543   :  { %3691 = vrot.lane.b32.xlu0 %v3682_v60, %s4878_s17  ;;  %3729 = vrot.lane.b32.xlu1 %v3721_v28, %s4879_s18  ;;  %v3762_v60 = vmul.f32 %v4697_v56, %v7663_v29  ;;  %v4698_v28 = vld [vmem:[#allocation2 + $0x490] sm:$0xff] }
 0x544   :  { %v3763_v63 = vmul.f32 %v4698_v28, %v7659_v50  ;;  %v3802_v50 = vmul.f32 %v4701_v15, %v7674_v22  ;;  %v4705_v28 = vld [vmem:[#allocation2 + $0x508] sm:$0xff]  ;;  %v4708_v15 = vld [vmem:[#allocation2 + $0x540] sm:$0xff] }
 0x545   :  { %v7799_v37 = vpop.permute.xlu0 %3125  ;;  %v7801_v34 = vpop.permute.xlu1 %3127 }
 0x546   :  { %10132 = vst [vmem:[#allocation97_spill] sm:$0xff] %v7799_v37  ;;  %10133 = vst [vmem:[#allocation91_spill] sm:$0xff] %v7801_v34 }
 0x547   :  { %3695 = vrot.lane.b32.xlu0 %v3684_v58, %s4878_s17  ;;  %3733 = vrot.lane.b32.xlu1 %v3723_v25, %s4879_s18  ;;  %v3764_v58 = vmul.f32 %v4699_v42, %v7665_v40  ;;  %v3801_v25 = vmul.f32 %v4700_v0, %v7667_v26  ;;  %v4707_v0 = vld [vmem:[#allocation2 + $0x518] sm:$0xff] }
 0x549   :  { %v7807_v44 = vpop.permute.xlu0 %3165  ;;  %v7809_v41 = vpop.permute.xlu1 %3161 }
 0x54a   :  { %10134 = vst [vmem:[#allocation96_spill] sm:$0xff] %v7807_v44  ;;  %10135 = vst [vmem:[#allocation85_spill] sm:$0xff] %v7809_v41 }
 0x54b   :  { %3735 = vrot.lane.b32.xlu1 %v3724_v2, %s4879_s18  ;;  %3731 = vrot.lane.b32.xlu0 %v3722_v53, %s4879_s18  ;;  %v3803_v2 = vmul.f32 %v4702_v13, %v7669_v36  ;;  %v4709_v13 = vld [vmem:[#allocation2 + $0x548] sm:$0xff] }
 0x54d   :  { %v7815_v52 = vpop.permute.xlu0 %3163  ;;  %v7817_v31 = vpop.permute.xlu1 %3201 }
 0x54e   :  { %10136 = vst [vmem:[#allocation94_spill] sm:$0xff] %v7815_v52  ;;  %10137 = vst [vmem:[#allocation9_spill] sm:$0xff] %v7817_v31 }
 0x54f   :  { %3769 = vrot.lane.b32.xlu0 %v3761_v1, %s4864_s1  ;;  %3771 = vrot.lane.b32.xlu1 %v3762_v60, %s4864_s1  ;;  %v3804_v1 = vmul.f32 %v4703_v10, %v7676_v12  ;;  %v4704_v60 = vld [vmem:[#allocation2 + $0x500] sm:$0xff]  ;;  %v4710_v10 = vld [vmem:[#allocation2 + $0x550] sm:$0xff] }
 0x550   :  { %v3841_v22 = vmul.f32 %v4704_v60, %v7682_v23  ;;  %v4711_v60 = vld [vmem:[#allocation2 + $0x558] sm:$0xff] }
 0x551   :  { %v7823_v14 = vpop.permute.xlu0 %3167  ;;  %v7825_v29 = vpop.permute.xlu1 %3205 }
 0x552   :  { %10138 = vst [vmem:[#allocation10_spill] sm:$0xff] %v7823_v14  ;;  %10139 = vst [vmem:[#allocation6_spill] sm:$0xff] %v7825_v29 }
 0x553   :  { %3773 = vrot.lane.b32.xlu0 %v3763_v63, %s4864_s1  ;;  %3775 = vrot.lane.b32.xlu1 %v3764_v58, %s4864_s1  ;;  %v3842_v63 = vmul.f32 %v4705_v28, %v7687_v45  ;;  %v4706_v58 = vld [vmem:[#allocation2 + $0x510] sm:$0xff] }
 0x554   :  { %v3843_v12 = vmul.f32 %v4706_v58, %v7684_v48  ;;  %v3882_v48 = vmul.f32 %v4709_v13, %v7697_v54  ;;  %v4712_v58 = vld [vmem:[#allocation2 + $0x580] sm:$0xff] }
 0x555   :  { %v7831_v53 = vpop.permute.xlu1 %3207  ;;  %v7833_v40 = vpop.permute.xlu0 %3203 }
 0x556   :  { %10140 = vst [vmem:[#allocation7_spill] sm:$0xff] %v7831_v53  ;;  %10141 = vst [vmem:[#allocation100_spill] sm:$0xff] %v7833_v40 }
 0x557   :  { %3809 = vrot.lane.b32.xlu0 %v3801_v25, %s4865_s29  ;;  %3811 = vrot.lane.b32.xlu1 %v3802_v50, %s4865_s29  ;;  %v3844_v25 = vmul.f32 %v4707_v0, %v7689_v32  ;;  %v3881_v50 = vmul.f32 %v4708_v15, %v7691_v47  ;;  %v4713_v0 = vld [vmem:[#allocation2 + $0x588] sm:$0xff] }
 0x559   :  { %v7839_v56 = vpop.permute.xlu0 %3241  ;;  %v7841_v26 = vpop.permute.xlu1 %3243 }
 0x55a   :  { %10142 = vst [vmem:[#allocation101_spill] sm:$0xff] %v7839_v56  ;;  %10143 = vst [vmem:[#allocation5_spill] sm:$0xff] %v7841_v26  ;;  %v4732_v56 = vld [vmem:[#allocation2 + $0x20] sm:$0xff] }
 0x55b   :  { %3813 = vrot.lane.b32.xlu0 %v3803_v2, %s4865_s29  ;;  %3815 = vrot.lane.b32.xlu1 %v3804_v1, %s4865_s29  ;;  %v3883_v1 = vmul.f32 %v4710_v10, %v7693_v46 }
 0x55d   :  { %v7847_v42 = vpop.permute.xlu0 %3245  ;;  %v7849_v36 = vpop.permute.xlu1 %3281 }
 0x55e   :  { %10144 = vst [vmem:[#allocation102_spill] sm:$0xff] %v7847_v42  ;;  %10145 = vst [vmem:[#allocation18_spill] sm:$0xff] %v7849_v36 }
 0x55f   :  { %3849 = vrot.lane.b32.xlu0 %v3841_v22, %s4866_s30  ;;  %3851 = vrot.lane.b32.xlu1 %v3842_v63, %s4866_s30  ;;  %v3884_v22 = vmul.f32 %v4711_v60, %v7699_v9  ;;  %v4715_v60 = vld [vmem:[#allocation2 + $0x598] sm:$0xff] }
 0x561   :  { %v7855_v23 = vpop.permute.xlu0 %3247  ;;  %v7857_v45 = vpop.permute.xlu1 %3285 }
 0x562   :  { %10146 = vst [vmem:[#allocation104_spill] sm:$0xff] %v7855_v23  ;;  %10147 = vst [vmem:[#allocation86_spill] sm:$0xff] %v7857_v45 }
 0x563   :  { %3853 = vrot.lane.b32.xlu0 %v3843_v12, %s4866_s30  ;;  %3855 = vrot.lane.b32.xlu1 %v3844_v25, %s4866_s30  ;;  %v3921_v12 = vmul.f32 %v4712_v58, %v7705_v5  ;;  %v3922_v25 = vmul.f32 %v4713_v0, %v7711_v35  ;;  %v4714_v35 = vld [vmem:[#allocation2 + $0x590] sm:$0xff] }
 0x565   :  { %v7863_v2 = vpop.permute.xlu1 %3325  ;;  %v7865_v32 = vpop.permute.xlu0 %3283 }
 0x566   :  { %10148 = vst [vmem:[#allocation16_spill] sm:$0xff] %v7863_v2  ;;  %10149 = vst [vmem:[#allocation20_spill] sm:$0xff] %v7865_v32 }
 0x567   :  { %3889 = vrot.lane.b32.xlu0 %v3881_v50, %s4867_s7  ;;  %3891 = vrot.lane.b32.xlu1 %v3882_v48, %s4867_s7 }
 0x569   :  { %v7871_v28 = vpop.permute.xlu0 %3287  ;;  %v7873_v47 = vpop.permute.xlu1 %3323 }
 0x56a   :  { %10150 = vst [vmem:[#allocation103_spill] sm:$0xff] %v7871_v28  ;;  %10151 = vst [vmem:[#allocation8_spill] sm:$0xff] %v7873_v47  ;;  %v7875_v63 = vpop.f32.mrb[168].mxu0  ;;  %v7877_v54 = vpop.f32.mrb[168].mxu1 }
 0x56b   :  { %3893 = vrot.lane.b32.xlu0 %v3883_v1, %s4867_s7  ;;  %3895 = vrot.lane.b32.xlu1 %v3884_v22, %s4867_s7  ;;  %v7883_v46 = vpop.f32.mrb[169].mxu0  ;;  %v7885_v9 = vpop.f32.mrb[169].mxu1  ;;  %v3923_v1 = vmul.f32 %v4714_v35, %v7707_v30  ;;  %v3924_v22 = vmul.f32 %v4715_v60, %v7713_v20  ;;  %v3085_v28 = vmul.f32 %v4732_v56, %v7875_v63 }
 0x56c   :  { %v7887_v15 = vpop.f32.mrb[170].mxu0  ;;  %v7889_v50 = vpop.f32.mrb[170].mxu1 }
 0x56d   :  { %v7891_v13 = vpop.permute.xlu0 %3321  ;;  %v7893_v48 = vpop.permute.xlu1 %3365 }
 0x56e   :  { %10152 = vst [vmem:[#allocation106_spill] sm:$0xff] %v7891_v13  ;;  %10153 = vst [vmem:[#allocation107_spill] sm:$0xff] %v7893_v48  ;;  %v7895_v5 = vpop.f32.mrb[171].mxu0  ;;  %v7897_v10 = vpop.f32.mrb[171].mxu1  ;;  %v4720_v48 = vld [vmem:[#allocation2 + $0x600] sm:$0xff] }
 0x56f   :  { %3929 = vrot.lane.b32.xlu0 %v3921_v12, %s4862_s8  ;;  %3931 = vrot.lane.b32.xlu1 %v3922_v25, %s4862_s8  ;;  %v4716_v25 = vld [vmem:[#allocation2 + $0x5c0] sm:$0xff]  ;;  %v4001_v2 = vmul.f32 %v4720_v48, %v7730_v19 }
 0x570   :  { %v3961_v60 = vmul.f32 %v4716_v25, %v7715_v21  ;;  %v3964_v21 = vmul.f32 %v4719_v62, %v7724_v4 }
 0x571   :  { %v7903_v58 = vpop.permute.xlu0 %3327  ;;  %v7905_v0 = vpop.permute.xlu1 %3363 }
 0x572   :  { %10154 = vst [vmem:[#allocation92_spill] sm:$0xff] %v7903_v58  ;;  %10155 = vst [vmem:[#allocation109_spill] sm:$0xff] %v7905_v0  ;;  %v7907_v47 = vpop.f32.mrb[172].mxu1  ;;  %v7909_v32 = vpop.f32.mrb[172].mxu0  ;;  %v4717_v0 = vld [vmem:[#allocation2 + $0x5c8] sm:$0xff] }
 0x573   :  { %3933 = vrot.lane.b32.xlu0 %v3923_v1, %s4862_s8  ;;  %3935 = vrot.lane.b32.xlu1 %v3924_v22, %s4862_s8  ;;  %v7913_v30 = vpop.f32.mrb[173].mxu1  ;;  %v7915_v35 = vpop.f32.mrb[173].mxu0  ;;  %v3962_v26 = vmul.f32 %v4717_v0, %v7722_v33 }
 0x574   :  { %v7917_v20 = vpop.f32.mrb[174].mxu1  ;;  %v7919_v12 = vpop.f32.mrb[174].mxu0 }
 0x575   :  { %v7923_v40 = vpop.permute.xlu0 %3361  ;;  %v7925_v52 = vpop.permute.xlu1 %3405 }
 0x576   :  { %10156 = vst [vmem:[#allocation30_spill] sm:$0xff] %v7923_v40  ;;  %10157 = vst [vmem:[#allocation108_spill] sm:$0xff] %v7925_v52  ;;  %v7927_v1 = vpop.f32.mrb[175].mxu1  ;;  %v7929_v22 = vpop.f32.mrb[175].mxu0  ;;  %v4726_v40 = vld [vmem:[#allocation2 + $0x650] sm:$0xff] }
 0x577   :  { %3969 = vrot.lane.b32.xlu0 %v3961_v60, %s4868_s0  ;;  %3971 = vrot.lane.b32.xlu1 %v3962_v26, %s4868_s0  ;;  %v4721_v60 = vld [vmem:[#allocation2 + $0x608] sm:$0xff]  ;;  %v4043_v13 = vmul.f32 %v4726_v40, %v7741_v7 }
 0x578   :  { %v4002_v26 = vmul.f32 %v4721_v60, %v7735_v6  ;;  %v4722_v6 = vld [vmem:[#allocation2 + $0x610] sm:$0xff] }
 0x579   :  { %v7935_v25 = vpop.permute.xlu0 %3367  ;;  %v7937_v33 = vpop.permute.xlu1 %3403 }
 0x57a   :  { %10158 = vst [vmem:[#allocation132_spill] sm:$0xff] %v7935_v25  ;;  %10159 = vst [vmem:[#allocation51_spill] sm:$0xff] %v7937_v33  ;;  %v7939_v0 = vpop.f32.mrb[176].mxu0  ;;  %v7941_v52 = vpop.f32.mrb[176].mxu1 }
 0x57b   :  { %3973 = vrot.lane.b32.xlu0 %v3963_v51, %s4868_s0  ;;  %3975 = vrot.lane.b32.xlu1 %v3964_v21, %s4868_s0  ;;  %v7947_v49 = vpop.f32.mrb[177].mxu0  ;;  %v7949_v62 = vpop.f32.mrb[177].mxu1  ;;  %v4003_v51 = vmul.f32 %v4722_v6, %v7732_v61  ;;  %v4723_v21 = vld [vmem:[#allocation2 + $0x618] sm:$0xff] }
 0x57c   :  { %v7951_v4 = vpop.f32.mrb[178].mxu0  ;;  %v7953_v59 = vpop.f32.mrb[178].mxu1  ;;  %v4004_v60 = vmul.f32 %v4723_v21, %v7737_v57 }
 0x57d   :  { %v7955_v33 = vpop.permute.xlu0 %3401  ;;  %v7957_v45 = vpop.permute.xlu1 %3445 }
 0x57e   :  { %10160 = vst [vmem:[#allocation114_spill] sm:$0xff] %v7955_v33  ;;  %10161 = vst [vmem:[#allocation115_spill] sm:$0xff] %v7957_v45  ;;  %v7959_v19 = vpop.f32.mrb[179].mxu0  ;;  %v7961_v48 = vpop.f32.mrb[179].mxu1 }
 0x57f   :  { %4009 = vrot.lane.b32.xlu0 %v4001_v2, %s4869_s9  ;;  %4011 = vrot.lane.b32.xlu1 %v4002_v26, %s4869_s9  ;;  %v4724_v26 = vld [vmem:[#allocation2 + $0x640] sm:$0xff] }
 0x580   :  { %v4041_v21 = vmul.f32 %v4724_v26, %v7739_v17 }
 0x581   :  { %v7967_v42 = vpop.permute.xlu0 %3407  ;;  %v7969_v29 = vpop.permute.xlu1 %3443 }
 0x582   :  { %10162 = vst [vmem:[#allocation113_spill] sm:$0xff] %v7967_v42  ;;  %10163 = vst [vmem:[#allocation119_spill] sm:$0xff] %v7969_v29  ;;  %v7971_v44 = vpop.f32.mrb[180].mxu0  ;;  %v7973_v45 = vpop.f32.mrb[180].mxu1  ;;  %v4725_v29 = vld [vmem:[#allocation2 + $0x648] sm:$0xff]  ;;  %v4727_v42 = vld [vmem:[#allocation2 + $0x658] sm:$0xff] }
 0x583   :  { %4013 = vrot.lane.b32.xlu0 %v4003_v51, %s4869_s9  ;;  %4015 = vrot.lane.b32.xlu1 %v4004_v60, %s4869_s9  ;;  %v7977_v61 = vpop.f32.mrb[181].mxu0  ;;  %v7979_v6 = vpop.f32.mrb[181].mxu1  ;;  %v4042_v38 = vmul.f32 %v4725_v29, %v7745_v18  ;;  %v4044_v17 = vmul.f32 %v4727_v42, %v7747_v16 }
 0x584   :  { %v7981_v57 = vpop.f32.mrb[182].mxu0  ;;  %v7983_v2 = vpop.f32.mrb[182].mxu1 }
 0x585   :  { %v7987_v37 = vpop.permute.xlu0 %3441  ;;  %v7989_v33 = vpop.permute.xlu1 %3485 }
 0x586   :  { %10164 = vst [vmem:[#allocation118_spill] sm:$0xff] %v7987_v37  ;;  %10165 = vst [vmem:[#allocation116_spill] sm:$0xff] %v7989_v33  ;;  %v7991_v51 = vpop.f32.mrb[183].mxu0  ;;  %v7993_v60 = vpop.f32.mrb[183].mxu1  ;;  %v4728_v37 = vld [vmem:[#allocation2 + $0x680] sm:$0xff] }
 0x587   :  { %4049 = vrot.lane.b32.xlu0 %v4041_v21, %s4870_s10  ;;  %4051 = vrot.lane.b32.xlu1 %v4042_v38, %s4870_s10  ;;  %v4081_v36 = vmul.f32 %v4728_v37, %v7755_v55  ;;  %v4729_v21 = vld [vmem:[#allocation2 + $0x688] sm:$0xff] }
 0x588   :  { %v4082_v38 = vmul.f32 %v4729_v21, %v7759_v24  ;;  %v4730_v24 = vld [vmem:[#allocation2 + $0x690] sm:$0xff] }
 0x589   :  { %v7999_v26 = vpop.permute.xlu0 %3447  ;;  %v8001_v18 = vpop.permute.xlu1 %3483 }
 0x58a   :  { %10166 = vst [vmem:[#allocation121_spill] sm:$0xff] %v7999_v26  ;;  %10167 = vst [vmem:[#allocation110_spill] sm:$0xff] %v8001_v18  ;;  %v8003_v29 = vpop.f32.mrb[184].mxu0  ;;  %v8005_v33 = vpop.f32.mrb[184].mxu1 }
 0x58b   :  { %4053 = vrot.lane.b32.xlu0 %v4043_v13, %s4870_s10  ;;  %4055 = vrot.lane.b32.xlu1 %v4044_v17, %s4870_s10  ;;  %v8011_v7 = vpop.f32.mrb[185].mxu0  ;;  %v8013_v16 = vpop.f32.mrb[185].mxu1  ;;  %v4083_v13 = vmul.f32 %v4730_v24, %v7757_v3  ;;  %v4731_v17 = vld [vmem:[#allocation2 + $0x698] sm:$0xff] }
 0x58c   :  { %v8015_v40 = vpop.f32.mrb[186].mxu0  ;;  %v8017_v42 = vpop.f32.mrb[186].mxu1  ;;  %v4084_v21 = vmul.f32 %v4731_v17, %v7761_v39 }
 0x58d   :  { %v8019_v18 = vpop.permute.xlu0 %3481  ;;  %v8021_v26 = vpop.permute.xlu1 %3525 }
 0x58e   :  { %10168 = vst [vmem:[#allocation111_spill] sm:$0xff] %v8019_v18  ;;  %10169 = vst [vmem:[#allocation98_spill] sm:$0xff] %v8021_v26  ;;  %v8023_v55 = vpop.f32.mrb[187].mxu0  ;;  %v8025_v37 = vpop.f32.mrb[187].mxu1 }
 0x58f   :  { %4089 = vrot.lane.b32.xlu0 %v4081_v36, %s4871_s11  ;;  %4091 = vrot.lane.b32.xlu1 %v4082_v38, %s4871_s11  ;;  %v4733_v36 = vld [vmem:[#allocation2 + $0x30] sm:$0xff] }
 0x590   :  { %v3087_v3 = vmul.f32 %v4733_v36, %v7877_v54  ;;  %v4734_v54 = vld [vmem:[#allocation2 + $0x28] sm:$0xff] }
 0x591   :  { %v8031_v25 = vpop.permute.xlu0 %3487  ;;  %v8033_v58 = vpop.permute.xlu1 %3523 }
 0x592   :  { %10170 = vst [vmem:[#allocation133_spill] sm:$0xff] %v8031_v25  ;;  %10171 = vst [vmem:[#allocation40_spill] sm:$0xff] %v8033_v58  ;;  %v8035_v18 = vpop.f32.mrb[188].mxu1  ;;  %v8037_v26 = vpop.f32.mrb[188].mxu0 }
 0x593   :  { %4093 = vrot.lane.b32.xlu0 %v4083_v13, %s4871_s11  ;;  %4095 = vrot.lane.b32.xlu1 %v4084_v21, %s4871_s11  ;;  %v8043_v38 = vpop.f32.mrb[189].mxu1  ;;  %v8045_v39 = vpop.f32.mrb[189].mxu0  ;;  %v3086_v13 = vmul.f32 %v4734_v54, %v7883_v46  ;;  %v4735_v21 = vld [vmem:[#allocation2 + $0x38] sm:$0xff]  ;;  %v4736_v46 = vld [vmem:[#allocation2 + $0x60] sm:$0xff] }
 0x594   :  { %v8047_v24 = vpop.f32.mrb[190].mxu1  ;;  %v8049_v17 = vpop.f32.mrb[190].mxu0  ;;  %v3088_v36 = vmul.f32 %v4735_v21, %v7885_v9  ;;  %v3117_v54 = vmul.f32 %v4736_v46, %v7887_v15  ;;  %v4737_v9 = vld [vmem:[#allocation2 + $0x78] sm:$0xff]  ;;  %v4738_v15 = vld [vmem:[#allocation2 + $0x68] sm:$0xff] }
 0x595   :  { %v8051_v58 = vpop.permute.xlu0 %3521  ;;  %v8053_v25 = vpop.permute.xlu1 %3565  ;;  %v3120_v21 = vmul.f32 %v4737_v9, %v7897_v10  ;;  %v3118_v46 = vmul.f32 %v4738_v15, %v7895_v5  ;;  %v4739_v10 = vld [vmem:[#allocation2 + $0x70] sm:$0xff] }
 0x596   :  { %10172 = vst [vmem:[#allocation27_spill] sm:$0xff] %v8051_v58  ;;  %10173 = vst [vmem:[#allocation34_spill] sm:$0xff] %v8053_v25  ;;  %v8055_v56 = vpop.f32.mrb[191].mxu1  ;;  %v8057_v63 = vpop.f32.mrb[191].mxu0  ;;  %v3119_v9 = vmul.f32 %v4739_v10, %v7889_v50 }
 0x597   :  { %3101 = vrot.lane.b32.xlu0 %v3087_v3, %s4864_s1  ;;  %3097 = vrot.lane.b32.xlu1 %v3085_v28, %s4864_s1 }
 0x599   :  { %v8063_v31 = vpop.permute.xlu0 %3527  ;;  %v8065_v23 = vpop.permute.xlu1 %3563 }
 0x59a   :  { %10174 = vst [vmem:[#allocation13_spill] sm:$0xff] %v8063_v31  ;;  %10175 = vst [vmem:[#allocation42_spill] sm:$0xff] %v8065_v23 }
 0x59b   :  { %3103 = vrot.lane.b32.xlu1 %v3088_v36, %s4864_s1  ;;  %3099 = vrot.lane.b32.xlu0 %v3086_v13, %s4864_s1  ;;  %v8069_v25 = vpop.f32.mrb[192].mxu1  ;;  %v8071_v58 = vpop.f32.mrb[192].mxu0 }
 0x59c   :  { %v8073_v3 = vpop.f32.mrb[193].mxu0  ;;  %v8075_v28 = vpop.f32.mrb[193].mxu1 }
 0x59d   :  { %v8079_v31 = vpop.permute.xlu0 %3561  ;;  %v8081_v23 = vpop.permute.xlu1 %3567 }
 0x59e   :  { %10176 = vst [vmem:[#allocation31_spill] sm:$0xff] %v8079_v31  ;;  %10177 = vst [vmem:[#allocation120_spill] sm:$0xff] %v8081_v23  ;;  %v8083_v36 = vpop.f32.mrb[194].mxu0  ;;  %v8085_v13 = vpop.f32.mrb[194].mxu1 }
 0x59f   :  { %10178 = vst [vmem:[#allocation37_spill] sm:$0xff] %v8083_v36  ;;  %10179 = vst [vmem:[#allocation124_spill] sm:$0xff] %v8085_v13  ;;  %3135 = vrot.lane.b32.xlu0 %v3120_v21, %s4865_s29  ;;  %3129 = vrot.lane.b32.xlu1 %v3117_v54, %s4865_s29  ;;  %v8089_v41 = vpop.f32.mrb[195].mxu0  ;;  %v8091_v53 = vpop.f32.mrb[195].mxu1  ;;  %v4740_v36 = vld [vmem:[#allocation2 + $0xb0] sm:$0xff]  ;;  %v4741_v54 = vld [vmem:[#allocation2 + $0xa0] sm:$0xff] }
 0x5a0   :  { %10180 = vst [vmem:[#allocation123_spill] sm:$0xff] %v8089_v41  ;;  %10181 = vst [vmem:[#allocation127_spill] sm:$0xff] %v8091_v53  ;;  %v3159_v13 = vmul.f32 %v4740_v36, %v7907_v47  ;;  %v3157_v21 = vmul.f32 %v4741_v54, %v7909_v32 }
 0x5a1   :  { %v8095_v31 = vpop.permute.xlu0 %3609  ;;  %v8097_v23 = vpop.permute.xlu1 %3611 }
 0x5a2   :  { %10182 = vst [vmem:[#allocation47_spill] sm:$0xff] %v8095_v31  ;;  %10183 = vst [vmem:[#allocation45_spill] sm:$0xff] %v8097_v23  ;;  %v4743_v31 = vld [vmem:[#allocation2 + $0xe0] sm:$0xff] }
 0x5a3   :  { %3133 = vrot.lane.b32.xlu1 %v3119_v9, %s4865_s29  ;;  %3131 = vrot.lane.b32.xlu0 %v3118_v46, %s4865_s29  ;;  %v8103_v41 = vpop.f32.mrb[196].mxu0  ;;  %v8105_v5 = vpop.f32.mrb[196].mxu1  ;;  %v4742_v9 = vld [vmem:[#allocation2 + $0xb8] sm:$0xff] }
 0x5a4   :  { %v8107_v15 = vpop.f32.mrb[197].mxu0  ;;  %v8109_v50 = vpop.f32.mrb[197].mxu1  ;;  %v3160_v54 = vmul.f32 %v4742_v9, %v7913_v30 }
 0x5a5   :  { %v8111_v10 = vpop.permute.xlu0 %3613  ;;  %v8113_v23 = vpop.permute.xlu1 %3649 }
 0x5a6   :  { %10184 = vst [vmem:[#allocation134_spill] sm:$0xff] %v8111_v10  ;;  %10185 = vst [vmem:[#allocation48_spill] sm:$0xff] %v8113_v23  ;;  %v8115_v47 = vpop.f32.mrb[198].mxu0  ;;  %v8117_v36 = vpop.f32.mrb[198].mxu1  ;;  %v3197_v10 = vmul.f32 %v4743_v31, %v7919_v12  ;;  %v4745_v31 = vld [vmem:[#allocation2 + $0xa8] sm:$0xff] }
 0x5a7   :  { %3173 = vrot.lane.b32.xlu1 %v3159_v13, %s4866_s30  ;;  %3169 = vrot.lane.b32.xlu0 %v3157_v21, %s4866_s30  ;;  %v8121_v32 = vpop.f32.mrb[199].mxu0  ;;  %v8123_v46 = vpop.f32.mrb[199].mxu1  ;;  %v4744_v13 = vld [vmem:[#allocation2 + $0x120] sm:$0xff]  ;;  %v3158_v12 = vmul.f32 %v4745_v31, %v7915_v35  ;;  %v4747_v35 = vld [vmem:[#allocation2 + $0xf0] sm:$0xff] }
 0x5a8   :  { %v3237_v21 = vmul.f32 %v4744_v13, %v7939_v0  ;;  %v4746_v0 = vld [vmem:[#allocation2 + $0x138] sm:$0xff]  ;;  %v3199_v31 = vmul.f32 %v4747_v35, %v7917_v20  ;;  %v4749_v20 = vld [vmem:[#allocation2 + $0x160] sm:$0xff] }
 0x5a9   :  { %v8127_v53 = vpop.permute.xlu0 %3615  ;;  %v8129_v23 = vpop.permute.xlu1 %3653  ;;  %v3240_v13 = vmul.f32 %v4746_v0, %v7949_v62  ;;  %v3277_v35 = vmul.f32 %v4749_v20, %v7951_v4 }
 0x5aa   :  { %10186 = vst [vmem:[#allocation130_spill] sm:$0xff] %v8127_v53  ;;  %10187 = vst [vmem:[#allocation49_spill] sm:$0xff] %v8129_v23 }
 0x5ab   :  { %3175 = vrot.lane.b32.xlu1 %v3160_v54, %s4866_s30  ;;  %3209 = vrot.lane.b32.xlu0 %v3197_v10, %s4867_s7  ;;  %v8134_v43 = vpop.f32.mrb[200].mxu0  ;;  %v8136_v27 = vpop.f32.mrb[200].mxu1 }
 0x5ac   :  { %v8138_v14 = vpop.f32.mrb[201].mxu0  ;;  %v8140_v30 = vpop.f32.mrb[201].mxu1 }
 0x5ad   :  { %v8143_v9 = vpop.permute.xlu0 %3651  ;;  %v8145_v23 = vpop.permute.xlu1 %3689 }
 0x5ae   :  { %10188 = vst [vmem:[#allocation90_spill] sm:$0xff] %v8143_v9  ;;  %10189 = vst [vmem:[#allocation128_spill] sm:$0xff] %v8145_v23  ;;  %v8147_v54 = vpop.f32.mrb[202].mxu0  ;;  %v8149_v10 = vpop.f32.mrb[202].mxu1 }
 0x5af   :  { %3171 = vrot.lane.b32.xlu1 %v3158_v12, %s4866_s30  ;;  %3249 = vrot.lane.b32.xlu0 %v3237_v21, %s4862_s8  ;;  %v8154_v53 = vpop.f32.mrb[203].mxu0  ;;  %v8156_v8 = vpop.f32.mrb[203].mxu1 }
 0x5b0   :  { %10190 = vst [vmem:[#allocation64_spill] sm:$0xff] %v8156_v8  ;;  %v4748_v8 = vld [vmem:[#allocation2 + $0xf8] sm:$0xff] }
 0x5b1   :  { %v8159_v9 = vpop.permute.xlu0 %3655  ;;  %v8161_v23 = vpop.permute.xlu1 %3693  ;;  %v3200_v11 = vmul.f32 %v4748_v8, %v7927_v1  ;;  %v4751_v1 = vld [vmem:[#allocation2 + $0xe8] sm:$0xff] }
 0x5b2   :  { %10191 = vst [vmem:[#allocation93_spill] sm:$0xff] %v8159_v9  ;;  %10192 = vst [vmem:[#allocation63_spill] sm:$0xff] %v8161_v23  ;;  %v3198_v4 = vmul.f32 %v4751_v1, %v7929_v22  ;;  %v4753_v22 = vld [vmem:[#allocation2 + $0x130] sm:$0xff] }
 0x5b3   :  { %3213 = vrot.lane.b32.xlu1 %v3199_v31, %s4867_s7  ;;  %3255 = vrot.lane.b32.xlu0 %v3240_v13, %s4862_s8  ;;  %v8165_v12 = vpop.f32.mrb[204].mxu0  ;;  %v8167_v21 = vpop.f32.mrb[204].mxu1  ;;  %v3239_v1 = vmul.f32 %v4753_v22, %v7941_v52  ;;  %v4755_v52 = vld [vmem:[#allocation2 + $0x1e0] sm:$0xff] }
 0x5b4   :  { %10193 = vst [vmem:[#allocation15_spill] sm:$0xff] %v8167_v21  ;;  %v8169_v62 = vpop.f32.mrb[205].mxu0  ;;  %v8171_v0 = vpop.f32.mrb[205].mxu1  ;;  %v4750_v21 = vld [vmem:[#allocation2 + $0x1a0] sm:$0xff]  ;;  %v3357_v22 = vmul.f32 %v4755_v52, %v7981_v57  ;;  %v4757_v57 = vld [vmem:[#allocation2 + $0x1f8] sm:$0xff] }
 0x5b5   :  { %10194 = vst [vmem:[#allocation69_spill] sm:$0xff] %v8171_v0  ;;  %v8175_v9 = vpop.permute.xlu0 %3691  ;;  %v8177_v23 = vpop.permute.xlu1 %3729  ;;  %v3317_v0 = vmul.f32 %v4750_v21, %v7971_v44  ;;  %v3360_v52 = vmul.f32 %v4757_v57, %v7993_v60  ;;  %v4759_v60 = vld [vmem:[#allocation2 + $0x178] sm:$0xff] }
 0x5b6   :  { %10195 = vst [vmem:[#allocation70_spill] sm:$0xff] %v8175_v9  ;;  %10196 = vst [vmem:[#allocation125_spill] sm:$0xff] %v8177_v23  ;;  %v8179_v31 = vpop.f32.mrb[206].mxu0  ;;  %v8181_v13 = vpop.f32.mrb[206].mxu1 }
 0x5b7   :  { %3215 = vrot.lane.b32.xlu1 %v3200_v11, %s4867_s7  ;;  %3289 = vrot.lane.b32.xlu0 %v3277_v35, %s4868_s0  ;;  %v8186_v34 = vpop.f32.mrb[207].mxu0  ;;  %v8188_v8 = vpop.f32.mrb[207].mxu1  ;;  %v4752_v11 = vld [vmem:[#allocation2 + $0x1b8] sm:$0xff] }
 0x5b8   :  { %10197 = vst [vmem:[#allocation74_spill] sm:$0xff] %v8188_v8  ;;  %v3320_v35 = vmul.f32 %v4752_v11, %v7979_v6 }
 0x5b9   :  { %v8191_v20 = vpop.permute.xlu0 %3695  ;;  %v8193_v23 = vpop.permute.xlu1 %3733 }
 0x5ba   :  { %10198 = vst [vmem:[#allocation122_spill] sm:$0xff] %v8191_v20  ;;  %10199 = vst [vmem:[#allocation126_spill] sm:$0xff] %v8193_v23 }
 0x5bb   :  { %3211 = vrot.lane.b32.xlu1 %v3198_v4, %s4867_s7  ;;  %3329 = vrot.lane.b32.xlu0 %v3317_v0, %s4869_s9  ;;  %v8198_v9 = vpop.f32.mrb[208].mxu0  ;;  %v8200_v44 = vpop.f32.mrb[208].mxu1 }
 0x5bc   :  { %10200 = vst [vmem:[#allocation131_spill] sm:$0xff] %v8200_v44  ;;  %v8202_v21 = vpop.f32.mrb[209].mxu0  ;;  %v8204_v8 = vpop.f32.mrb[209].mxu1 }
 0x5bd   :  { %10201 = vst [vmem:[#allocation129_spill] sm:$0xff] %v8204_v8  ;;  %v8207_v20 = vpop.permute.xlu1 %3735  ;;  %v8209_v23 = vpop.permute.xlu0 %3731  ;;  %v4754_v8 = vld [vmem:[#allocation2 + $0x128] sm:$0xff] }
 0x5be   :  { %10202 = vst [vmem:[#allocation55_spill] sm:$0xff] %v8207_v20  ;;  %10203 = vst [vmem:[#allocation25_spill] sm:$0xff] %v8209_v23  ;;  %v8211_v4 = vpop.f32.mrb[210].mxu0  ;;  %v8213_v0 = vpop.f32.mrb[210].mxu1  ;;  %v3238_v44 = vmul.f32 %v4754_v8, %v7947_v49  ;;  %v4756_v49 = vld [vmem:[#allocation2 + $0x170] sm:$0xff] }
 0x5bf   :  { %10204 = vst [vmem:[#allocation72_spill] sm:$0xff] %v8213_v0  ;;  %3253 = vrot.lane.b32.xlu1 %v3239_v1, %s4862_s8  ;;  %3335 = vrot.lane.b32.xlu0 %v3320_v35, %s4869_s9  ;;  %v8217_v6 = vpop.f32.mrb[211].mxu0  ;;  %v8219_v11 = vpop.f32.mrb[211].mxu1  ;;  %v3279_v8 = vmul.f32 %v4756_v49, %v7953_v59  ;;  %v3280_v49 = vmul.f32 %v4759_v60, %v7961_v48 }
 0x5c0   :  { %10205 = vst [vmem:[#allocation29_spill] sm:$0xff] %v8219_v11 }
 0x5c1   :  { %v8223_v20 = vpop.permute.xlu0 %3769  ;;  %v8225_v23 = vpop.permute.xlu1 %3771 }
 0x5c2   :  { %10206 = vst [vmem:[#allocation19_spill] sm:$0xff] %v8223_v20  ;;  %10207 = vst [vmem:[#allocation12_spill] sm:$0xff] %v8225_v23 }
 0x5c3   :  { %3251 = vrot.lane.b32.xlu1 %v3238_v44, %s4862_s8  ;;  %3369 = vrot.lane.b32.xlu0 %v3357_v22, %s4870_s10  ;;  %v8229_v1 = vpop.f32.mrb[212].mxu0  ;;  %v8231_v35 = vpop.f32.mrb[212].mxu1 }
 0x5c4   :  { %10208 = vst [vmem:[#allocation28_spill] sm:$0xff] %v8231_v35  ;;  %v8233_v0 = vpop.f32.mrb[213].mxu0  ;;  %v8235_v11 = vpop.f32.mrb[213].mxu1  ;;  %v4758_v35 = vld [vmem:[#allocation2 + $0x220] sm:$0xff] }
 0x5c5   :  { %10209 = vst [vmem:[#allocation17_spill] sm:$0xff] %v8233_v0  ;;  %10210 = vst [vmem:[#allocation36_spill] sm:$0xff] %v8235_v11  ;;  %v8239_v20 = vpop.permute.xlu0 %3773  ;;  %v8241_v23 = vpop.permute.xlu1 %3775  ;;  %v3397_v11 = vmul.f32 %v4758_v35, %v8003_v29 }
 0x5c6   :  { %10211 = vst [vmem:[#allocation38_spill] sm:$0xff] %v8239_v20  ;;  %10212 = vst [vmem:[#allocation135_spill] sm:$0xff] %v8241_v23  ;;  %v8243_v44 = vpop.f32.mrb[214].mxu0  ;;  %v8245_v22 = vpop.f32.mrb[214].mxu1 }
 0x5c7   :  { %10213 = vst [vmem:[#allocation33_spill] sm:$0xff] %v8245_v22  ;;  %3293 = vrot.lane.b32.xlu1 %v3279_v8, %s4868_s0  ;;  %3375 = vrot.lane.b32.xlu0 %v3360_v52, %s4870_s10  ;;  %v8250_v0 = vpop.f32.mrb[215].mxu0  ;;  %v8252_v59 = vpop.f32.mrb[215].mxu1  ;;  %v4760_v8 = vld [vmem:[#allocation2 + $0x238] sm:$0xff]  ;;  %v4761_v22 = vld [vmem:[#allocation2 + $0x168] sm:$0xff] }
 0x5c8   :  { %v3400_v52 = vmul.f32 %v4760_v8, %v8013_v16  ;;  %v3278_v48 = vmul.f32 %v4761_v22, %v7959_v19  ;;  %v4763_v22 = vld [vmem:[#allocation2 + $0x260] sm:$0xff] }
 0x5c9   :  { %v8255_v57 = vpop.permute.xlu0 %3809  ;;  %v8257_v23 = vpop.permute.xlu1 %3811 }
 0x5ca   :  { %10214 = vst [vmem:[#allocation54_spill] sm:$0xff] %v8255_v57  ;;  %10215 = vst [vmem:[#allocation95_spill] sm:$0xff] %v8257_v23 }
 0x5cb   :  { %3295 = vrot.lane.b32.xlu1 %v3280_v49, %s4868_s0  ;;  %3409 = vrot.lane.b32.xlu0 %v3397_v11, %s4871_s11  ;;  %v8262_v20 = vpop.f32.mrb[216].mxu0  ;;  %v8264_v29 = vpop.f32.mrb[216].mxu1 }
 0x5cc   :  { %v8266_v35 = vpop.f32.mrb[217].mxu0  ;;  %v8275_v49 = vpop.f32.mrb[217].mxu1 }
 0x5cd   :  { %10216 = vst [vmem:[#allocation60_spill] sm:$0xff] %v8266_v35  ;;  %v8269_v60 = vpop.permute.xlu0 %3813  ;;  %v8271_v57 = vpop.permute.xlu1 %3815  ;;  %v4762_v35 = vld [vmem:[#allocation2 + $0x1b0] sm:$0xff] }
 0x5ce   :  { %10217 = vst [vmem:[#allocation11_spill] sm:$0xff] %v8269_v60  ;;  %10218 = vst [vmem:[#allocation99_spill] sm:$0xff] %v8271_v57  ;;  %v8273_v23 = vpop.f32.mrb[218].mxu0  ;;  %v8281_v11 = vpop.f32.mrb[218].mxu1  ;;  %v3319_v19 = vmul.f32 %v4762_v35, %v7973_v45  ;;  %v3437_v57 = vmul.f32 %v4763_v22, %v8015_v40  ;;  %v4766_v40 = vld [vmem:[#allocation2 + $0x1f0] sm:$0xff] }
 0x5cf   :  { %10219 = vst [vmem:[#allocation59_spill] sm:$0xff] %v8273_v23  ;;  %3291 = vrot.lane.b32.xlu1 %v3278_v48, %s4868_s0  ;;  %3415 = vrot.lane.b32.xlu0 %v3400_v52, %s4871_s11  ;;  %v8279_v16 = vpop.f32.mrb[219].mxu0  ;;  %10221 = vst [vmem:[#allocation67_spill] sm:$0xff] %v8281_v11  ;;  %v8283_v8 = vpop.f32.mrb[219].mxu1  ;;  %v4764_v52 = vld [vmem:[#allocation2 + $0x1a8] sm:$0xff]  ;;  %v4765_v11 = vld [vmem:[#allocation2 + $0x270] sm:$0xff]  ;;  %v3359_v35 = vmul.f32 %v4766_v40, %v7983_v2 }
 0x5d0   :  { %10220 = vst [vmem:[#allocation57_spill] sm:$0xff] %v8279_v16  ;;  %10222 = vst [vmem:[#allocation44_spill] sm:$0xff] %v8283_v8  ;;  %v3318_v48 = vmul.f32 %v4764_v52, %v7977_v61  ;;  %v3439_v8 = vmul.f32 %v4765_v11, %v8017_v42  ;;  %v4768_v42 = vld [vmem:[#allocation2 + $0x2b8] sm:$0xff]  ;;  %v4769_v2 = vld [vmem:[#allocation2 + $0x1e8] sm:$0xff] }
 0x5d1   :  { %v8287_v60 = vpop.permute.xlu0 %3849  ;;  %v8289_v23 = vpop.permute.xlu1 %3851  ;;  %v3480_v11 = vmul.f32 %v4768_v42, %v8043_v38  ;;  %v3358_v40 = vmul.f32 %v4769_v2, %v7991_v51 }
 0x5d3   :  { %3333 = vrot.lane.b32.xlu1 %v3319_v19, %s4869_s9  ;;  %3449 = vrot.lane.b32.xlu0 %v3437_v57, %s4872_s12  ;;  %v4767_v19 = vld [vmem:[#allocation2 + $0x278] sm:$0xff]  ;;  %v8307_v52 = vpop.f32.mrb[220].mxu0 }
 0x5d4   :  { %v3440_v57 = vmul.f32 %v4767_v19, %v8025_v37 }
 0x5d5   :  { %v8295_v16 = vpop.permute.xlu0 %3853  ;;  %v8297_v45 = vpop.permute.xlu1 %3855 }
 0x5d6   :  { %10223 = vst [vmem:[#allocation61_spill] sm:$0xff] %v8295_v16  ;;  %10224 = vst [vmem:[#allocation105_spill] sm:$0xff] %v8297_v45  ;;  %v8319_v16 = vpop.f32.mrb[220].mxu1 }
 0x5d7   :  { %3331 = vrot.lane.b32.xlu1 %v3318_v48, %s4869_s9  ;;  %3453 = vrot.lane.b32.xlu0 %v3439_v8, %s4872_s12  ;;  %v8312_v8 = vpop.f32.mrb[221].mxu0 }
 0x5d8   :  { %v2907_v48 = vpop.f32.mrb[222].mxu0 }
 0x5d9   :  { %v8303_v22 = vpop.permute.xlu0 %3889  ;;  %v8305_v61 = vpop.permute.xlu1 %3891  ;;  %v4771_v48 = vld [vmem:[#allocation2 + $0x230] sm:$0xff] }
 0x5da   :  { %10225 = vst [vmem:[#allocation58_spill] sm:$0xff] %v8303_v22  ;;  %v2908_v45 = vpop.f32.mrb[223].mxu0  ;;  %v3399_v51 = vmul.f32 %v4771_v48, %v8005_v33  ;;  %v4774_v33 = vld [vmem:[#allocation2 + $0x268] sm:$0xff] }
 0x5db   :  { %3373 = vrot.lane.b32.xlu1 %v3359_v35, %s4870_s10  ;;  %3455 = vrot.lane.b32.xlu0 %v3440_v57, %s4872_s12  ;;  %v4770_v35 = vld [vmem:[#allocation2 + $0x2a8] sm:$0xff]  ;;  %v8324_v57 = vpop.f32.mrb[221].mxu1  ;;  %v3438_v48 = vmul.f32 %v4774_v33, %v8023_v55 }
 0x5dc   :  { %v3478_v38 = vmul.f32 %v4770_v35, %v8045_v39  ;;  %v3078_v42 = vpop.f32.mrb[222].mxu1 }
 0x5dd   :  { %v8315_v37 = vpop.permute.xlu0 %3893  ;;  %v8317_v19 = vpop.permute.xlu1 %3895 }
 0x5de   :  { %10226 = vst [vmem:[#allocation73_spill] sm:$0xff] %v8315_v37  ;;  %10227 = vst [vmem:[#allocation136_spill] sm:$0xff] %v8317_v19  ;;  %v3079_v45 = vpop.f32.mrb[223].mxu1  ;;  %v4773_v19 = vld [vmem:[#allocation2 + $0x2e0] sm:$0xff] }
 0x5df   :  { %3371 = vrot.lane.b32.xlu1 %v3358_v40, %s4870_s10  ;;  %3495 = vrot.lane.b32.xlu0 %v3480_v11, %s4873_s13  ;;  %v4772_v40 = vld [vmem:[#allocation2 + $0x228] sm:$0xff]  ;;  %v3517_v39 = vmul.f32 %v4773_v19, %v8049_v17  ;;  %v4776_v17 = vld [vmem:[#allocation2 + $0x2a0] sm:$0xff] }
 0x5e0   :  { %v3398_v11 = vmul.f32 %v4772_v40, %v8011_v7  ;;  %v3477_v19 = vmul.f32 %v4776_v17, %v8037_v26  ;;  %v4777_v40 = vld [vmem:[#allocation2 + $0x2f8] sm:$0xff] }
 0x5e1   :  { %v8327_v2 = vpop.permute.xlu0 %3929  ;;  %v8329_v37 = vpop.permute.xlu1 %3931 }
 0x5e2   :  { %10228 = vst [vmem:[#allocation66_spill] sm:$0xff] %v8327_v2 }
 0x5e3   :  { %3413 = vrot.lane.b32.xlu1 %v3399_v51, %s4871_s11  ;;  %3491 = vrot.lane.b32.xlu0 %v3478_v38, %s4873_s13  ;;  %v4775_v51 = vld [vmem:[#allocation2 + $0x2f0] sm:$0xff] }
 0x5e4   :  { %v3519_v38 = vmul.f32 %v4775_v51, %v8047_v24  ;;  %v4778_v24 = vld [vmem:[#allocation2 + $0x330] sm:$0xff] }
 0x5e5   :  { %v8335_v35 = vpop.permute.xlu0 %3933  ;;  %v8337_v42 = vpop.permute.xlu1 %3935  ;;  %v3559_v33 = vmul.f32 %v4778_v24, %v8069_v25 }
 0x5e6   :  { %10229 = vst [vmem:[#allocation65_spill] sm:$0xff] %v8335_v35  ;;  %10230 = vst [vmem:[#allocation24_spill] sm:$0xff] %v8337_v42  ;;  %v10256_v42 = vld [vmem:[#allocation85_spill] sm:$0xff]  ;;  %v4807_v35 = vld [vmem:[#allocation2 + $0x528] sm:$0xff] }
 0x5e7   :  { %3411 = vrot.lane.b32.xlu1 %v3398_v11, %s4871_s11  ;;  %3529 = vrot.lane.b32.xlu0 %v3517_v39, %s4874_s14  ;;  %v3520_v11 = vmul.f32 %v4777_v40, %v8055_v56  ;;  %v4780_v56 = vld [vmem:[#allocation2 + $0x2e8] sm:$0xff] }
 0x5e8   :  { %v3518_v17 = vmul.f32 %v4780_v56, %v8057_v63  ;;  %v4784_v56 = vld [vmem:[#allocation2 + $0x3a0] sm:$0xff] }
 0x5e9   :  { %v8343_v45 = vpop.permute.xlu0 %3969  ;;  %v8345_v7 = vpop.permute.xlu1 %3971 }
 0x5ea   :  { %10231 = vst [vmem:[#allocation68_spill] sm:$0xff] %v8343_v45  ;;  %10232 = vst [vmem:[#allocation46_spill] sm:$0xff] %v8345_v7 }
 0x5eb   :  { %3451 = vrot.lane.b32.xlu1 %v3438_v48, %s4872_s12  ;;  %3533 = vrot.lane.b32.xlu0 %v3519_v38, %s4874_s14  ;;  %v4779_v48 = vld [vmem:[#allocation2 + $0x2b0] sm:$0xff] }
 0x5ec   :  { %v3479_v51 = vmul.f32 %v4779_v48, %v8035_v18  ;;  %v4782_v18 = vld [vmem:[#allocation2 + $0x320] sm:$0xff]  ;;  %v4783_v48 = vld [vmem:[#allocation2 + $0x328] sm:$0xff] }
 0x5ed   :  { %v8351_v39 = vpop.permute.xlu0 %3973  ;;  %v8353_v55 = vpop.permute.xlu1 %3975  ;;  %v3557_v24 = vmul.f32 %v4782_v18, %v8071_v58  ;;  %v4787_v18 = vld [vmem:[#allocation2 + $0x3e8] sm:$0xff] }
 0x5ee   :  { %10233 = vst [vmem:[#allocation77_spill] sm:$0xff] %v8351_v39  ;;  %10234 = vst [vmem:[#allocation22_spill] sm:$0xff] %v8353_v55  ;;  %v4806_v39 = vld [vmem:[#allocation2 + $0x4b8] sm:$0xff] }
 0x5ef   :  { %3489 = vrot.lane.b32.xlu1 %v3477_v19, %s4873_s13  ;;  %3535 = vrot.lane.b32.xlu0 %v3520_v11, %s4874_s14  ;;  %v4781_v19 = vld [vmem:[#allocation2 + $0x338] sm:$0xff] }
 0x5f0   :  { %v3560_v40 = vmul.f32 %v4781_v19, %v8075_v28  ;;  %v3605_v28 = vmul.f32 %v4784_v56, %v8103_v41  ;;  %v4785_v19 = vld [vmem:[#allocation2 + $0x3a8] sm:$0xff]  ;;  %v3646_v41 = vmul.f32 %v4787_v18, %v8121_v32  ;;  %v4789_v56 = vld [vmem:[#allocation2 + $0x3b8] sm:$0xff]  ;;  %v4790_v32 = vld [vmem:[#allocation2 + $0x3e0] sm:$0xff] }
 0x5f1   :  { %v8359_v38 = vpop.permute.xlu0 %4009  ;;  %v8361_v26 = vpop.permute.xlu1 %4011 }
 0x5f2   :  { %10235 = vst [vmem:[#allocation71_spill] sm:$0xff] %v8359_v38  ;;  %10236 = vst [vmem:[#allocation14_spill] sm:$0xff] %v8361_v26  ;;  %v10258_v38 = vld [vmem:[#allocation69_spill] sm:$0xff] }
 0x5f3   :  { %3493 = vrot.lane.b32.xlu1 %v3479_v51, %s4873_s13  ;;  %3573 = vrot.lane.b32.xlu0 %v3559_v33, %s4875_s15  ;;  %v3558_v33 = vmul.f32 %v4783_v48, %v8073_v3  ;;  %v3768_v26 = vmul.f32 %v4806_v39, %v10258_v38 }
 0x5f5   :  { %v8367_v11 = vpop.permute.xlu0 %4013  ;;  %v8369_v25 = vpop.permute.xlu1 %4015 }
 0x5f6   :  { %10237 = vst [vmem:[#allocation23_spill] sm:$0xff] %v8367_v11  ;;  %10238 = vst [vmem:[#allocation41_spill] sm:$0xff] %v8369_v25  ;;  %v3606_v25 = vmul.f32 %v4785_v19, %v8107_v15  ;;  %v3645_v19 = vmul.f32 %v4790_v32, %v8115_v47  ;;  %v4795_v32 = vld [vmem:[#allocation2 + $0x468] sm:$0xff] }
 0x5f7   :  { %3575 = vrot.lane.b32.xlu0 %v3560_v40, %s4875_s15  ;;  %3531 = vrot.lane.b32.xlu1 %v3518_v17, %s4874_s14  ;;  %v4786_v40 = vld [vmem:[#allocation2 + $0x3b0] sm:$0xff] }
 0x5f8   :  { %v3607_v3 = vmul.f32 %v4786_v40, %v8105_v5  ;;  %v3608_v5 = vmul.f32 %v4789_v56, %v8109_v50  ;;  %v4791_v40 = vld [vmem:[#allocation2 + $0x428] sm:$0xff]  ;;  %v4792_v50 = vld [vmem:[#allocation2 + $0x3f0] sm:$0xff] }
 0x5f9   :  { %v8375_v51 = vpop.permute.xlu0 %4049  ;;  %v8377_v63 = vpop.permute.xlu1 %4051 }
 0x5fa   :  { %10239 = vst [vmem:[#allocation39_spill] sm:$0xff] %v8375_v51  ;;  %10240 = vst [vmem:[#allocation50_spill] sm:$0xff] %v8377_v63  ;;  %v10254_v51 = vld [vmem:[#allocation89_spill] sm:$0xff] }
 0x5fb   :  { %3569 = vrot.lane.b32.xlu1 %v3557_v24, %s4875_s15  ;;  %3571 = vrot.lane.b32.xlu0 %v3558_v33, %s4875_s15  ;;  %v4788_v24 = vld [vmem:[#allocation2 + $0x420] sm:$0xff] }
 0x5fc   :  { %v3685_v33 = vmul.f32 %v4788_v24, %v8134_v43  ;;  %v4793_v24 = vld [vmem:[#allocation2 + $0x460] sm:$0xff] }
 0x5fd   :  { %v8383_v17 = vpop.permute.xlu0 %4053  ;;  %v8385_v58 = vpop.permute.xlu1 %4055 }
 0x5fe   :  { %10241 = vst [vmem:[#allocation26_spill] sm:$0xff] %v8383_v17  ;;  %10242 = vst [vmem:[#allocation21_spill] sm:$0xff] %v8385_v58  ;;  %v10253_v17 = vld [vmem:[#allocation88_spill] sm:$0xff] }
 0x5ff   :  { %3617 = vrot.lane.b32.xlu1 %v3605_v28, %s4876_s5  ;;  %3619 = vrot.lane.b32.xlu0 %v3606_v25, %s4876_s5 }
 0x601   :  { %v8391_v48 = vpop.permute.xlu0 %4089  ;;  %v8393_v15 = vpop.permute.xlu1 %4091 }
 0x602   :  { %10243 = vst [vmem:[#allocation53_spill] sm:$0xff] %v8391_v48  ;;  %10244 = vst [vmem:[#allocation52_spill] sm:$0xff] %v8393_v15  ;;  %v10252_v48 = vld [vmem:[#allocation15_spill] sm:$0xff] }
 0x603   :  { %3621 = vrot.lane.b32.xlu1 %v3607_v3, %s4876_s5  ;;  %3659 = vrot.lane.b32.xlu0 %v3646_v41, %s4877_s16  ;;  %v3686_v3 = vmul.f32 %v4791_v40, %v8138_v14  ;;  %v3647_v41 = vmul.f32 %v4792_v50, %v8117_v36  ;;  %v4794_v14 = vld [vmem:[#allocation2 + $0x3f8] sm:$0xff] }
 0x604   :  { %v3648_v47 = vmul.f32 %v4794_v14, %v8123_v46  ;;  %v4798_v46 = vld [vmem:[#allocation2 + $0x438] sm:$0xff] }
 0x605   :  { %v8399_v28 = vpop.permute.xlu0 %4093  ;;  %v8401_v25 = vpop.permute.xlu1 %4095 }
 0x606   :  { %10245 = vst [vmem:[#allocation62_spill] sm:$0xff] %v8399_v28  ;;  %10246 = vst [vmem:[#allocation56_spill] sm:$0xff] %v8401_v25  ;;  %v4796_v25 = vld [vmem:[#allocation2 + $0x430] sm:$0xff] }
 0x607   :  { %3623 = vrot.lane.b32.xlu1 %v3608_v5, %s4876_s5  ;;  %3697 = vrot.lane.b32.xlu0 %v3685_v33, %s4878_s17  ;;  %v3725_v33 = vmul.f32 %v4793_v24, %v8147_v54  ;;  %v3687_v36 = vmul.f32 %v4796_v25, %v8136_v27  ;;  %v4797_v54 = vld [vmem:[#allocation2 + $0x4a0] sm:$0xff]  ;;  %v4804_v28 = vld [vmem:[#allocation2 + $0x4b0] sm:$0xff] }
 0x608   :  { %v3765_v50 = vmul.f32 %v4797_v54, %v8165_v12  ;;  %v3767_v15 = vmul.f32 %v4804_v28, %v10252_v48 }
 0x609   :  { %v8407_v18 = vpop.permute.xlu0 %3101  ;;  %v8409_v43 = vpop.permute.xlu1 %3097 }
 0x60b   :  { %3657 = vrot.lane.b32.xlu1 %v3645_v19, %s4877_s16  ;;  %3699 = vrot.lane.b32.xlu0 %v3686_v3, %s4878_s17  ;;  %v3726_v19 = vmul.f32 %v4795_v32, %v8154_v53  ;;  %v3688_v53 = vmul.f32 %v4798_v46, %v8140_v30  ;;  %v4801_v32 = vld [vmem:[#allocation2 + $0x4e0] sm:$0xff]  ;;  %v10247_v30 = vld [vmem:[#allocation91_spill] sm:$0xff]  ;;  %v4802_v46 = vld [vmem:[#allocation2 + $0x478] sm:$0xff] }
 0x60d   :  { %v3104_v56 = vpop.permute.xlu1 %3103  ;;  %v8415_v5 = vpop.permute.xlu0 %3099 }
 0x60e   :  { %v3112_v55 = vsel %vm935_vm2, %v3104_v56, %v10253_v17 }
 0x60f   :  { %3661 = vrot.lane.b32.xlu1 %v3647_v41, %s4877_s16  ;;  %3737 = vrot.lane.b32.xlu0 %v3725_v33, %s4879_s18  ;;  %v4799_v33 = vld [vmem:[#allocation2 + $0x4a8] sm:$0xff] }
 0x610   :  { %v3766_v14 = vmul.f32 %v4799_v33, %v8169_v62  ;;  %v10248_v62 = vld [vmem:[#allocation83_spill] sm:$0xff] }
 0x611   :  { %v3136_v40 = vpop.permute.xlu0 %3135  ;;  %v3130_v3 = vpop.permute.xlu1 %3129  ;;  %vm10261_vm7 = vcmp.lt.s32.totalorder %v10248_v62, 63  ;;  %vm10292_vm1 = vcmp.lt.s32.totalorder %v10248_v62, 8 }
 0x612   :  { %v3144_v48 = vsel %vm976_vm3, %v3136_v40, %v10254_v51  ;;  %vm10270_vm12 = vmmov %vm10261_vm7 }
 0x613   :  { %3663 = vrot.lane.b32.xlu1 %v3648_v47, %s4877_s16  ;;  %3739 = vrot.lane.b32.xlu0 %v3726_v19, %s4879_s18  ;;  %v4800_v47 = vld [vmem:[#allocation2 + $0x470] sm:$0xff]  ;;  %v3805_v19 = vmul.f32 %v4801_v32, %v8179_v31  ;;  %v10251_v32 = vld [vmem:[#allocation10_spill] sm:$0xff]  ;;  %vm10272_vm15 = vmmov %vm10261_vm7 }
 0x614   :  { %v3727_v12 = vmul.f32 %v4800_v47, %v8149_v10  ;;  %v10250_v31 = vld [vmem:[#allocation87_spill] sm:$0xff]  ;;  %vm10278_vm0 = vmmov %vm10261_vm7 }
 0x615   :  { %v3134_v41 = vpop.permute.xlu1 %3133  ;;  %v3132_v24 = vpop.permute.xlu0 %3131  ;;  %vm10279_vm14 = vmmov %vm10278_vm0 }
 0x616   :  { %v3137_v28 = vsel %vm976_vm3, %v3134_v41, %v3136_v40  ;;  %v3107_v40 = vsel %vm935_vm2, %v8409_v43, %v8415_v5 }
 0x617   :  { %3701 = vrot.lane.b32.xlu1 %v3687_v36, %s4878_s17  ;;  %3777 = vrot.lane.b32.xlu0 %v3765_v50, %s4864_s1  ;;  %v3140_v50 = vsel %vm976_vm3, %v10247_v30, %v3130_v3 }
 0x619   :  { %v3174_v27 = vpop.permute.xlu1 %3173  ;;  %v3170_v25 = vpop.permute.xlu0 %3169 }
 0x61b   :  { %3703 = vrot.lane.b32.xlu1 %v3688_v53, %s4878_s17  ;;  %3779 = vrot.lane.b32.xlu0 %v3766_v14, %s4864_s1  ;;  %v10249_v53 = vld [vmem:[#allocation64_spill] sm:$0xff]  ;;  %v4803_v14 = vld [vmem:[#allocation2 + $0x4e8] sm:$0xff] }
 0x61c   :  { %v3728_v33 = vmul.f32 %v4802_v46, %v10249_v53  ;;  %v3806_v10 = vmul.f32 %v4803_v14, %v8186_v34  ;;  %v3105_v46 = vsel %vm935_vm2, %v8407_v18, %v3104_v56  ;;  %v4805_v53 = vld [vmem:[#allocation2 + $0x520] sm:$0xff]  ;;  %v3138_v56 = vsel %vm976_vm3, %v3132_v24, %v3134_v41  ;;  %v10257_v41 = vld [vmem:[#allocation104_spill] sm:$0xff] }
 0x61d   :  { %v3176_v36 = vpop.permute.xlu1 %3175  ;;  %v8433_v54 = vpop.permute.xlu0 %3209  ;;  %v3845_v14 = vmul.f32 %v4805_v53, %v8198_v9  ;;  %v3106_v9 = vsel %vm935_vm2, %v8415_v5, %v8407_v18 }
 0x61e   :  { %v3177_v11 = vsel %vm1025_vm4, %v3174_v27, %v3176_v36  ;;  %v3184_v18 = vsel %vm1025_vm4, %v3176_v36, %v10256_v42  ;;  %v3151_v5 = vadd.f32 %v3138_v56, %v3106_v9  ;;  %v3846_v36 = vmul.f32 %v4807_v35, %v8202_v21  ;;  %v10260_v21 = vld [vmem:[#allocation103_spill] sm:$0xff] }
 0x61f   :  { %3741 = vrot.lane.b32.xlu1 %v3727_v12, %s4879_s18  ;;  %3817 = vrot.lane.b32.xlu0 %v3805_v19, %s4865_s29  ;;  %v3108_v12 = vsel %vm935_vm2, %v10250_v31, %v8409_v43  ;;  %v3180_v19 = vsel %vm1025_vm4, %v10251_v32, %v3170_v25 }
 0x620   :  { %v3149_v34 = vadd.f32 %v3140_v50, %v3108_v12  ;;  %v10255_v50 = vld [vmem:[#allocation7_spill] sm:$0xff] }
 0x621   :  { %v3172_v47 = vpop.permute.xlu1 %3171  ;;  %v8442_v58 = vpop.permute.xlu0 %3249 }
 0x622   :  { %v3189_v12 = vadd.f32 %v3180_v19, %v3149_v34  ;;  %v3152_v19 = vadd.f32 %v3137_v28, %v3105_v46  ;;  %v3178_v2 = vsel %vm1025_vm4, %v3172_v47, %v3174_v27  ;;  %v10259_v28 = vld [vmem:[#allocation9_spill] sm:$0xff] }
 0x623   :  { %3743 = vrot.lane.b32.xlu1 %v3728_v33, %s4879_s18  ;;  %3819 = vrot.lane.b32.xlu0 %v3806_v10, %s4865_s29  ;;  %v3220_v33 = vsel %vm1074_vm5, %v10255_v50, %v8433_v54  ;;  %v3139_v10 = vsel %vm976_vm3, %v3130_v3, %v3132_v24  ;;  %v3260_v3 = vsel %vm1123_vm6, %v10257_v41, %v8442_v58 }
 0x624   :  { %v3145_v24 = vadd.f32 %v3144_v48, %v3112_v55  ;;  %v3229_v34 = vadd.f32 %v3220_v33, %v3189_v12  ;;  %v3150_v43 = vadd.f32 %v3139_v10, %v3107_v40  ;;  %v3192_v7 = vadd.f32 %v3177_v11, %v3152_v19  ;;  %v10262_v33 = vld [vmem:[#allocation101_spill] sm:$0xff] }
 0x625   :  { %v3214_v53 = vpop.permute.xlu1 %3213  ;;  %v3256_v63 = vpop.permute.xlu0 %3255  ;;  %v3191_v10 = vadd.f32 %v3178_v2, %v3151_v5  ;;  %v4809_v12 = vld [vmem:[#allocation2 + $0x560] sm:$0xff] }
 0x626   :  { %v3185_v45 = vadd.f32 %v3184_v18, %v3145_v24  ;;  %v3269_v55 = vadd.f32 %v3260_v3, %v3229_v34  ;;  %v3264_v9 = vsel %vm1123_vm6, %v3256_v63, %v10262_v33  ;;  %v3885_v40 = vmul.f32 %v4809_v12, %v8211_v4  ;;  %v10263_v3 = vld [vmem:[#allocation92_spill] sm:$0xff] }
 0x627   :  { %3781 = vrot.lane.b32.xlu1 %v3767_v15, %s4864_s1  ;;  %3857 = vrot.lane.b32.xlu0 %v3845_v14, %s4866_s30  ;;  %v3179_v15 = vsel %vm1025_vm4, %v3170_v25, %v3172_v47  ;;  %v4808_v25 = vld [vmem:[#allocation2 + $0x4f0] sm:$0xff]  ;;  %v4810_v4 = vld [vmem:[#allocation2 + $0x4f8] sm:$0xff] }
 0x628   :  { %v3807_v47 = vmul.f32 %v4808_v25, %v8181_v13  ;;  %v3190_v56 = vadd.f32 %v3179_v15, %v3150_v43  ;;  %v10264_v43 = vld [vmem:[#allocation74_spill] sm:$0xff]  ;;  %v4812_v15 = vld [vmem:[#allocation2 + $0x530] sm:$0xff] }
 0x629   :  { %v3216_v46 = vpop.permute.xlu1 %3215  ;;  %v8497_v48 = vpop.permute.xlu0 %3289  ;;  %v3808_v5 = vmul.f32 %v4810_v4, %v10264_v43  ;;  %v4817_v43 = vld [vmem:[#allocation2 + $0x5e0] sm:$0xff] }
 0x62a   :  { %v3217_v14 = vsel %vm1074_vm5, %v3214_v53, %v3216_v46  ;;  %v3224_v39 = vsel %vm1074_vm5, %v3216_v46, %v10259_v28  ;;  %v3300_v35 = vsel %vm10261_vm7, %v10260_v21, %v8497_v48  ;;  %vm10294_vm7 = vmmov %vm10278_vm0 }
 0x62b   :  { %v3225_v38 = vadd.f32 %v3224_v39, %v3185_v45  ;;  %v3232_v11 = vadd.f32 %v3217_v14, %v3192_v7  ;;  %v3309_v27 = vadd.f32 %v3300_v35, %v3269_v55  ;;  %3783 = vrot.lane.b32.xlu1 %v3768_v26, %s4864_s1  ;;  %3859 = vrot.lane.b32.xlu0 %v3846_v36, %s4866_s30  ;;  %v10265_v14 = vld [vmem:[#allocation131_spill] sm:$0xff] }
 0x62c   :  { %v3847_v39 = vmul.f32 %v4812_v15, %v10265_v14  ;;  %v10273_v14 = vld [vmem:[#allocation113_spill] sm:$0xff] }
 0x62d   :  { %v3212_v18 = vpop.permute.xlu1 %3211  ;;  %v8517_v45 = vpop.permute.xlu0 %3329  ;;  %v3265_v7 = vadd.f32 %v3264_v9, %v3225_v38  ;;  %v4813_v38 = vld [vmem:[#allocation2 + $0x5a0] sm:$0xff]  ;;  %v10266_v9 = vld [vmem:[#allocation132_spill] sm:$0xff] }
 0x62e   :  { %v3218_v26 = vsel %vm1074_vm5, %v3212_v18, %v3214_v53  ;;  %v3219_v13 = vsel %vm1074_vm5, %v8433_v54, %v3212_v18  ;;  %v3340_v24 = vsel %vm1221_vm8, %v10263_v3, %v8517_v45  ;;  %v4811_v53 = vld [vmem:[#allocation2 + $0x568] sm:$0xff] }
 0x62f   :  { %v3230_v2 = vadd.f32 %v3219_v13, %v3190_v56  ;;  %v3231_v19 = vadd.f32 %v3218_v26, %v3191_v10  ;;  %v3349_v34 = vadd.f32 %v3340_v24, %v3309_v27  ;;  %3821 = vrot.lane.b32.xlu1 %v3807_v47, %s4865_s29  ;;  %3897 = vrot.lane.b32.xlu0 %v3885_v40, %s4867_s7  ;;  %v10267_v40 = vld [vmem:[#allocation129_spill] sm:$0xff]  ;;  %v4815_v26 = vld [vmem:[#allocation2 + $0x5a8] sm:$0xff] }
 0x630   :  { %v3886_v36 = vmul.f32 %v4811_v53, %v8217_v6  ;;  %v3925_v27 = vmul.f32 %v4813_v38, %v8229_v1  ;;  %v4814_v1 = vld [vmem:[#allocation2 + $0x538] sm:$0xff]  ;;  %v10268_v13 = vld [vmem:[#allocation17_spill] sm:$0xff] }
 0x631   :  { %v3254_v55 = vpop.permute.xlu1 %3253  ;;  %v8532_v54 = vpop.permute.xlu0 %3335  ;;  %v3848_v18 = vmul.f32 %v4814_v1, %v10267_v40  ;;  %v3926_v24 = vmul.f32 %v4815_v26, %v10268_v13  ;;  %v4819_v40 = vld [vmem:[#allocation2 + $0x5e8] sm:$0xff]  ;;  %v4820_v13 = vld [vmem:[#allocation2 + $0x5b0] sm:$0xff] }
 0x632   :  { %v3257_v46 = vsel %vm1123_vm6, %v3254_v55, %v3256_v63 }
 0x633   :  { %v3272_v35 = vadd.f32 %v3257_v46, %v3232_v11  ;;  %3823 = vrot.lane.b32.xlu1 %v3808_v5, %s4865_s29  ;;  %3899 = vrot.lane.b32.xlu0 %v3886_v36, %s4867_s7  ;;  %v3965_v5 = vmul.f32 %v4817_v43, %v8243_v44  ;;  %v10271_v46 = vld [vmem:[#allocation18_spill] sm:$0xff] }
 0x634   :  { %v10274_v44 = vld [vmem:[#allocation106_spill] sm:$0xff] }
 0x635   :  { %v3252_v25 = vpop.permute.xlu1 %3251  ;;  %v8540_v47 = vpop.permute.xlu0 %3369 }
 0x636   :  { %v3258_v6 = vsel %vm1123_vm6, %v3252_v25, %v3254_v55  ;;  %v3259_v63 = vsel %vm1123_vm6, %v8442_v58, %v3252_v25  ;;  %v3380_v11 = vsel %vm1270_vm9, %v10266_v9, %v8540_v47 }
 0x637   :  { %v3270_v56 = vadd.f32 %v3259_v63, %v3230_v2  ;;  %v3271_v10 = vadd.f32 %v3258_v6, %v3231_v19  ;;  %v3389_v12 = vadd.f32 %v3380_v11, %v3349_v34  ;;  %3861 = vrot.lane.b32.xlu1 %v3847_v39, %s4866_s30  ;;  %3937 = vrot.lane.b32.xlu0 %v3925_v27, %s4862_s8  ;;  %v4816_v2 = vld [vmem:[#allocation2 + $0x570] sm:$0xff]  ;;  %v10269_v19 = vld [vmem:[#allocation72_spill] sm:$0xff]  ;;  %v10275_v11 = vld [vmem:[#allocation29_spill] sm:$0xff] }
 0x638   :  { %v3887_v34 = vmul.f32 %v4816_v2, %v10269_v19  ;;  %v3344_v6 = vsel %vm1221_vm8, %v8532_v54, %v10274_v44  ;;  %v4818_v63 = vld [vmem:[#allocation2 + $0x578] sm:$0xff]  ;;  %v10277_v2 = vld [vmem:[#allocation30_spill] sm:$0xff] }
 0x639   :  { %v3294_v4 = vpop.permute.xlu1 %3293  ;;  %v8555_v58 = vpop.permute.xlu0 %3375  ;;  %v3888_v1 = vmul.f32 %v4818_v63, %v10275_v11 }
 0x63a   :  { %v3384_v19 = vsel %vm1270_vm9, %v8555_v58, %v10277_v2 }
 0x63b   :  { %3863 = vrot.lane.b32.xlu1 %v3848_v18, %s4866_s30  ;;  %3939 = vrot.lane.b32.xlu0 %v3926_v24, %s4862_s8  ;;  %v3966_v18 = vmul.f32 %v4819_v40, %v8250_v0  ;;  %v4821_v0 = vld [vmem:[#allocation2 + $0x5f8] sm:$0xff] }
 0x63d   :  { %v3296_v53 = vpop.permute.xlu1 %3295  ;;  %v8561_v36 = vpop.permute.xlu0 %3409 }
 0x63e   :  { %v3297_v55 = vsel %vm10270_vm12, %v3294_v4, %v3296_v53  ;;  %v3304_v15 = vsel %vm10272_vm15, %v3296_v53, %v10271_v46  ;;  %v3420_v39 = vsel %vm1319_vm10, %v10273_v14, %v8561_v36  ;;  %vm10303_vm12 = vmmov %vm10292_vm1 }
 0x63f   :  { %v3305_v38 = vadd.f32 %v3304_v15, %v3265_v7  ;;  %v3312_v27 = vadd.f32 %v3297_v55, %v3272_v35  ;;  %v3429_v25 = vadd.f32 %v3420_v39, %v3389_v12  ;;  %3901 = vrot.lane.b32.xlu1 %v3887_v34, %s4867_s7  ;;  %3977 = vrot.lane.b32.xlu0 %v3965_v5, %s4868_s0  ;;  %v10276_v7 = vld [vmem:[#allocation28_spill] sm:$0xff]  ;;  %v10280_v39 = vld [vmem:[#allocation114_spill] sm:$0xff]  ;;  %vm10305_vm15 = vmmov %vm10292_vm1 }
 0x640   :  { %v3927_v35 = vmul.f32 %v4820_v13, %v10276_v7  ;;  %v3968_v5 = vmul.f32 %v4821_v0, %v8252_v59  ;;  %v10284_v0 = vld [vmem:[#allocation82_spill] sm:$0xff] }
 0x641   :  { %v3345_v26 = vadd.f32 %v3344_v6, %v3305_v38  ;;  %v3292_v12 = vpop.permute.xlu1 %3291  ;;  %v8581_v24 = vpop.permute.xlu0 %3415 }
 0x642   :  { %v3298_v34 = vsel %vm10278_vm0, %v3292_v12, %v3294_v4  ;;  %v3299_v43 = vsel %vm10279_vm14, %v8497_v48, %v3292_v12  ;;  %v3424_v38 = vsel %vm1319_vm10, %v8581_v24, %v10280_v39  ;;  %v10281_v48 = vld [vmem:[#allocation121_spill] sm:$0xff]  ;;  %vm10308_vm0 = vmmov %vm10292_vm1 }
 0x643   :  { %v3310_v53 = vadd.f32 %v3299_v43, %v3270_v56  ;;  %v3311_v55 = vadd.f32 %v3298_v34, %v3271_v10  ;;  %v3385_v15 = vadd.f32 %v3384_v19, %v3345_v26  ;;  %3903 = vrot.lane.b32.xlu1 %v3888_v1, %s4867_s7  ;;  %3979 = vrot.lane.b32.xlu0 %v3966_v18, %s4868_s0  ;;  %v4822_v1 = vld [vmem:[#allocation2 + $0x620] sm:$0xff]  ;;  %v4823_v18 = vld [vmem:[#allocation2 + $0x5b8] sm:$0xff]  ;;  %v4824_v34 = vld [vmem:[#allocation2 + $0x630] sm:$0xff] }
 0x644   :  { %v4005_v40 = vmul.f32 %v4822_v1, %v8262_v20  ;;  %v10282_v26 = vld [vmem:[#allocation36_spill] sm:$0xff]  ;;  %v10283_v12 = vld [vmem:[#allocation97_spill] sm:$0xff]  ;;  %v4007_v43 = vmul.f32 %v4824_v34, %v8264_v29  ;;  %vm10311_vm14 = vmmov %vm10308_vm0 }
 0x645   :  { %v3425_v4 = vadd.f32 %v3424_v38, %v3385_v15  ;;  %v3334_v6 = vpop.permute.xlu1 %3333  ;;  %v8599_v63 = vpop.permute.xlu0 %3449  ;;  %v3928_v13 = vmul.f32 %v4823_v18, %v10282_v26 }
 0x646   :  { %v3337_v59 = vsel %vm1221_vm8, %v3334_v6, %v8532_v54  ;;  %v3460_v56 = vsel %vm1368_vm11, %v10281_v48, %v8599_v63 }
 0x647   :  { %v3352_v10 = vadd.f32 %v3337_v59, %v3312_v27  ;;  %v8608_v11 = vadd.f32 %v3460_v56, %v3429_v25  ;;  %3941 = vrot.lane.b32.xlu1 %v3927_v35, %s4862_s8  ;;  %3983 = vrot.lane.b32.xlu0 %v3968_v5, %s4868_s0  ;;  %v3141_v27 = vsel %vm976_vm3, %v10283_v12, %v10247_v30  ;;  %v10285_v5 = vld [vmem:[#allocation96_spill] sm:$0xff]  ;;  %v10287_v56 = vld [vmem:[#allocation6_spill] sm:$0xff] }
 0x648   :  { %v3109_v30 = vsel %vm935_vm2, %v10284_v0, %v10250_v31  ;;  %v3181_v15 = vsel %vm1025_vm4, %v10285_v5, %v10251_v32  ;;  %v3221_v29 = vsel %vm1074_vm5, %v10287_v56, %v10255_v50  ;;  %v10288_v32 = vld [vmem:[#allocation118_spill] sm:$0xff] }
 0x649   :  { %v3332_v7 = vpop.permute.xlu1 %3331  ;;  %v8614_v54 = vpop.permute.xlu0 %3453 }
 0x64a   :  { %v3338_v25 = vsel %vm1221_vm8, %v3332_v7, %v3334_v6  ;;  %v3339_v35 = vsel %vm1221_vm8, %v8517_v45, %v3332_v7  ;;  %v3148_v45 = vadd.f32 %v3141_v27, %v3109_v30  ;;  %v4826_v7 = vld [vmem:[#allocation2 + $0x628] sm:$0xff]  ;;  %v10289_v27 = vld [vmem:[#allocation60_spill] sm:$0xff] }
 0x64b   :  { %v3350_v19 = vadd.f32 %v3339_v35, %v3310_v53  ;;  %v3351_v20 = vadd.f32 %v3338_v25, %v3311_v55  ;;  %3943 = vrot.lane.b32.xlu1 %v3928_v13, %s4862_s8  ;;  %4017 = vrot.lane.b32.xlu0 %v4005_v40, %s4869_s9  ;;  %v4825_v53 = vld [vmem:[#allocation2 + $0x5f0] sm:$0xff]  ;;  %v10286_v55 = vld [vmem:[#allocation33_spill] sm:$0xff]  ;;  %v4006_v25 = vmul.f32 %v4826_v7, %v10289_v27 }
 0x64c   :  { %v3967_v38 = vmul.f32 %v4825_v53, %v10286_v55  ;;  %v3188_v18 = vadd.f32 %v3181_v15, %v3148_v45  ;;  %v10290_v53 = vld [vmem:[#allocation102_spill] sm:$0xff]  ;;  %v10291_v15 = vld [vmem:[#allocation111_spill] sm:$0xff] }
 0x64d   :  { %v3374_v6 = vpop.permute.xlu1 %3373  ;;  %v3456_v59 = vpop.permute.xlu0 %3455 }
 0x64e   :  { %v3377_v31 = vsel %vm1270_vm9, %v3374_v6, %v8555_v58  ;;  %v3457_v1 = vsel %vm1368_vm11, %v8614_v54, %v3456_v59  ;;  %v3464_v40 = vsel %vm1368_vm11, %v3456_v59, %v10288_v32  ;;  %v3228_v50 = vadd.f32 %v3221_v29, %v3188_v18  ;;  %v4827_v58 = vld [vmem:[#allocation2 + $0x638] sm:$0xff]  ;;  %v4828_v29 = vld [vmem:[#allocation2 + $0x660] sm:$0xff] }
 0x64f   :  { %v3392_v26 = vadd.f32 %v3377_v31, %v3352_v10  ;;  %v3465_v13 = vadd.f32 %v3464_v40, %v3425_v4  ;;  %3981 = vrot.lane.b32.xlu1 %v3967_v38, %s4868_s0  ;;  %4021 = vrot.lane.b32.xlu0 %v4007_v43, %s4869_s9  ;;  %v4008_v35 = vmul.f32 %v4827_v58, %v8275_v49  ;;  %v4829_v40 = vld [vmem:[#allocation2 + $0x668] sm:$0xff]  ;;  %v10296_v18 = vld [vmem:[#allocation57_spill] sm:$0xff] }
 0x650   :  { %v3261_v10 = vsel %vm1123_vm6, %v10290_v53, %v10257_v41  ;;  %v10293_v41 = vld [vmem:[#allocation86_spill] sm:$0xff]  ;;  %v4046_v7 = vmul.f32 %v4829_v40, %v10296_v18  ;;  %v10300_v40 = vld [vmem:[#allocation107_spill] sm:$0xff] }
 0x651   :  { %v3372_v34 = vpop.permute.xlu1 %3371  ;;  %v8654_v30 = vpop.permute.xlu0 %3495  ;;  %v3268_v59 = vadd.f32 %v3261_v10, %v3228_v50 }
 0x652   :  { %v3378_v4 = vsel %vm1270_vm9, %v3372_v34, %v3374_v6  ;;  %v3379_v43 = vsel %vm1270_vm9, %v8540_v47, %v3372_v34  ;;  %v3504_v49 = vsel %vm10292_vm1, %v8654_v30, %v10291_v15  ;;  %v3301_v6 = vsel %vm10294_vm7, %v10293_v41, %v10260_v21  ;;  %v10295_v47 = vld [vmem:[#allocation59_spill] sm:$0xff]  ;;  %vm10312_vm1 = vmmov %vm10308_vm0 }
 0x653   :  { %v3390_v45 = vadd.f32 %v3379_v43, %v3350_v19  ;;  %v3391_v55 = vadd.f32 %v3378_v4, %v3351_v20  ;;  %v3505_v38 = vadd.f32 %v3504_v49, %v3465_v13  ;;  %4023 = vrot.lane.b32.xlu0 %v4008_v35, %s4869_s9  ;;  %4019 = vrot.lane.b32.xlu1 %v4006_v25, %s4869_s9  ;;  %v10297_v20 = vld [vmem:[#allocation16_spill] sm:$0xff]  ;;  %v4830_v35 = vld [vmem:[#allocation2 + $0x670] sm:$0xff]  ;;  %vm10315_vm7 = vcmp.lt.s32.totalorder %v10248_v62, 1 }
 0x654   :  { %v4045_v31 = vmul.f32 %v4828_v29, %v10295_v47  ;;  %v3341_v13 = vsel %vm1221_vm8, %v10297_v20, %v10263_v3  ;;  %v3308_v58 = vadd.f32 %v3301_v6, %v3268_v59  ;;  %v10298_v34 = vld [vmem:[#allocation67_spill] sm:$0xff]  ;;  %v4831_v4 = vld [vmem:[#allocation2 + $0x678] sm:$0xff]  ;;  %v4832_v59 = vld [vmem:[#allocation2 + $0x6a0] sm:$0xff] }
 0x655   :  { %v3414_v27 = vpop.permute.xlu1 %3413  ;;  %v3492_v19 = vpop.permute.xlu0 %3491  ;;  %v4047_v10 = vmul.f32 %v4830_v35, %v10298_v34  ;;  %v10299_v43 = vld [vmem:[#allocation44_spill] sm:$0xff] }
 0x656   :  { %v3417_v25 = vsel %vm1319_vm10, %v3414_v27, %v8581_v24  ;;  %v3348_v50 = vadd.f32 %v3341_v13, %v3308_v58  ;;  %v4048_v49 = vmul.f32 %v4831_v4, %v10299_v43  ;;  %v3381_v24 = vsel %vm1270_vm9, %v10300_v40, %v10266_v9  ;;  %v4833_v13 = vld [vmem:[#allocation2 + $0x6a8] sm:$0xff]  ;;  %v4835_v35 = vld [vmem:[#allocation2 + $0x6b8] sm:$0xff]  ;;  %v10304_v43 = vld [vmem:[#allocation133_spill] sm:$0xff] }
 0x657   :  { %v3432_v21 = vadd.f32 %v3417_v25, %v3392_v26  ;;  %4057 = vrot.lane.b32.xlu0 %v4045_v31, %s4870_s10  ;;  %4059 = vrot.lane.b32.xlu1 %v4046_v7, %s4870_s10  ;;  %v4085_v31 = vmul.f32 %v4832_v59, %v8307_v52  ;;  %v10307_v59 = vld [vmem:[#allocation116_spill] sm:$0xff] }
 0x658   :  { %v3388_v9 = vadd.f32 %v3381_v24, %v3348_v50  ;;  %v10306_v24 = vld [vmem:[#allocation27_spill] sm:$0xff] }
 0x659   :  { %v3412_v29 = vpop.permute.xlu1 %3411  ;;  %v3530_v47 = vpop.permute.xlu0 %3529  ;;  %v3472_v3 = vadd.f32 %v3457_v1, %v3432_v21  ;;  %v4086_v1 = vmul.f32 %v4833_v13, %v8312_v8 }
 0x65a   :  { %v3418_v26 = vsel %vm1319_vm10, %v3412_v29, %v3414_v27  ;;  %v3419_v6 = vsel %vm1319_vm10, %v8561_v36, %v3412_v29  ;;  %v10301_v27 = vld [vmem:[#allocation108_spill] sm:$0xff] }
 0x65b   :  { %v3430_v18 = vadd.f32 %v3419_v6, %v3390_v45  ;;  %v3431_v7 = vadd.f32 %v3418_v26, %v3391_v55  ;;  %4061 = vrot.lane.b32.xlu0 %v4047_v10, %s4870_s10  ;;  %4063 = vrot.lane.b32.xlu1 %v4048_v49, %s4870_s10  ;;  %v3421_v36 = vsel %vm1319_vm10, %v10301_v27, %v10273_v14  ;;  %v4834_v45 = vld [vmem:[#allocation2 + $0x6b0] sm:$0xff] }
 0x65c   :  { %v4087_v55 = vmul.f32 %v4834_v45, %v8319_v16  ;;  %v4088_v14 = vmul.f32 %v4835_v35, %v8324_v57  ;;  %v3428_v34 = vadd.f32 %v3421_v36, %v3388_v9  ;;  %v10302_v10 = vld [vmem:[#allocation115_spill] sm:$0xff]  ;;  %v10313_v35 = vld [vmem:[#allocation120_spill] sm:$0xff] }
 0x65d   :  { %v3452_v25 = vpop.permute.xlu1 %3451  ;;  %v3534_v58 = vpop.permute.xlu0 %3533 }
 0x65e   :  { %v3458_v52 = vsel %vm1368_vm11, %v3452_v25, %v8614_v54  ;;  %v3459_v8 = vsel %vm1368_vm11, %v8599_v63, %v3452_v25  ;;  %v3461_v54 = vsel %vm1368_vm11, %v10302_v10, %v10281_v48 }
 0x65f   :  { %v3470_v21 = vadd.f32 %v3459_v8, %v3430_v18  ;;  %v3471_v50 = vadd.f32 %v3458_v52, %v3431_v7  ;;  %4097 = vrot.lane.b32.xlu1 %v4085_v31, %s4871_s11  ;;  %4099 = vrot.lane.b32.xlu0 %v4086_v1, %s4871_s11  ;;  %v3501_v31 = vsel %vm10308_vm0, %v10307_v59, %v10304_v43  ;;  %v10309_v18 = vld [vmem:[#allocation13_spill] sm:$0xff]  ;;  %vm10321_vm0 = vmmov %vm10315_vm7 }
 0x660   :  { %v3540_v7 = vsel %vm1466_vm13, %v10309_v18, %v3530_v47  ;;  %v3468_v13 = vadd.f32 %v3461_v54, %v3428_v34 }
 0x661   :  { %v3490_v4 = vpop.permute.xlu1 %3489  ;;  %v3536_v63 = vpop.permute.xlu0 %3535 }
 0x662   :  { %v3499_v16 = vsel %vm10303_vm12, %v3490_v4, %v3492_v19  ;;  %v3500_v49 = vsel %vm10305_vm15, %v10304_v43, %v3490_v4  ;;  %v3537_v29 = vsel %vm1466_vm13, %v3534_v58, %v3536_v63  ;;  %v3544_v57 = vsel %vm1466_vm13, %v3536_v63, %v10306_v24  ;;  %vm10316_vm12 = vmmov %vm10315_vm7  ;;  %v10317_v43 = vld [vmem:[#allocation31_spill] sm:$0xff] }
 0x663   :  { %v3509_v26 = vadd.f32 %v3500_v49, %v8608_v11  ;;  %v3510_v6 = vadd.f32 %v3499_v16, %v3470_v21  ;;  %v3545_v48 = vadd.f32 %v3544_v57, %v3505_v38  ;;  %4101 = vrot.lane.b32.xlu1 %v4087_v55, %s4871_s11  ;;  %4103 = vrot.lane.b32.xlu0 %v4088_v14, %s4871_s11  ;;  %v10310_v11 = vld [vmem:[#allocation98_spill] sm:$0xff]  ;;  %vm10318_vm15 = vmmov %vm10315_vm7 }
 0x664   :  { %v3541_v38 = vsel %vm1466_vm13, %v10310_v11, %v10309_v18  ;;  %v3508_v8 = vadd.f32 %v3501_v31, %v3468_v13  ;;  %v10314_v14 = vld [vmem:[#allocation34_spill] sm:$0xff] }
 0x665   :  { %v3494_v1 = vpop.permute.xlu1 %3493  ;;  %v3574_v9 = vpop.permute.xlu0 %3573  ;;  %v3549_v25 = vadd.f32 %v3540_v7, %v3509_v26  ;;  %v3581_v34 = vsel %vm10315_vm7, %v10314_v14, %v10313_v35  ;;  %v10319_v31 = vld [vmem:[#allocation78_spill] sm:$0xff]  ;;  %vm10329_vm7 = vcmp.lt.s32.totalorder %v10248_v62, 127 }
 0x666   :  { %v3497_v36 = vsel %vm10311_vm14, %v3494_v1, %v8654_v30  ;;  %v3498_v52 = vsel %vm10312_vm1, %v3492_v19, %v3494_v1  ;;  %v3548_v21 = vadd.f32 %v3541_v38, %v3508_v8  ;;  %v10320_v1 = vld [vmem:[#allocation127_spill] sm:$0xff]  ;;  %vm10322_vm14 = vmmov %vm10321_vm0  ;;  %v10324_v8 = vld [vmem:[#allocation84_spill] sm:$0xff] }
 0x667   :  { %v3511_v45 = vadd.f32 %v3498_v52, %v3471_v50  ;;  %v3512_v55 = vadd.f32 %v3497_v36, %v3472_v3  ;;  %vm10323_vm1 = vmmov %vm10321_vm0 }
 0x669   :  { %v3552_v54 = vadd.f32 %v3537_v29, %v3512_v55  ;;  %v3576_v4 = vpop.permute.xlu0 %3575  ;;  %v3532_v63 = vpop.permute.xlu1 %3531  ;;  %v3588_v29 = vadd.f32 %v3581_v34, %v3548_v21  ;;  %v10325_v21 = vld [vmem:[#allocation37_spill] sm:$0xff] }
 0x66a   :  { %v3577_v16 = vsel %vm10316_vm12, %v3574_v9, %v3576_v4  ;;  %v3584_v30 = vsel %vm10318_vm15, %v3576_v4, %v10317_v43  ;;  %v3538_v19 = vsel %vm1466_vm13, %v3532_v63, %v3534_v58  ;;  %v3539_v3 = vsel %vm1466_vm13, %v3530_v47, %v3532_v63  ;;  %v10326_v4 = vld [vmem:[#allocation123_spill] sm:$0xff]  ;;  %vm10330_vm12 = vmmov %vm10329_vm7 }
 0x66b   :  { %v3585_v50 = vadd.f32 %v3584_v30, %v3545_v48  ;;  %v3592_v49 = vadd.f32 %v3577_v16, %v3552_v54  ;;  %v3550_v57 = vadd.f32 %v3539_v3, %v3510_v6  ;;  %v3551_v26 = vadd.f32 %v3538_v19, %v3511_v45  ;;  %v10327_v16 = vld [vmem:[#allocation124_spill] sm:$0xff]  ;;  %vm10331_vm15 = vmmov %vm10329_vm7 }
 0x66c   :  { %v3596_v45 = vadd.f32 %v3588_v29, %v10324_v8 }
 0x66d   :  { %v3593_v18 = vadd.f32 %v3585_v50, %v10319_v31  ;;  %v3570_v7 = vpop.permute.xlu1 %3569  ;;  %v3572_v13 = vpop.permute.xlu0 %3571  ;;  %v3600_v38 = vadd.f32 %v3592_v49, %v10320_v1 }
 0x66e   :  { %v3580_v36 = vsel %vm10321_vm0, %v10313_v35, %v3570_v7  ;;  %v3578_v58 = vsel %vm10322_vm14, %v3572_v13, %v3574_v9  ;;  %v3579_v47 = vsel %vm10323_vm1, %v3570_v7, %v3572_v13  ;;  %v10328_v35 = vld [vmem:[#allocation130_spill] sm:$0xff]  ;;  %vm10332_vm0 = vmmov %vm10329_vm7  ;;  %v10333_v13 = vld [vmem:[#allocation47_spill] sm:$0xff]  ;;  %vm10335_vm1 = vcmp.lt.s32.totalorder %v10248_v62, 121 }
 0x66f   :  { %v3589_v48 = vadd.f32 %v3580_v36, %v3549_v25  ;;  %v3590_v6 = vadd.f32 %v3579_v47, %v3550_v57  ;;  %v3591_v52 = vadd.f32 %v3578_v58, %v3551_v26  ;;  %vm10334_vm14 = vmmov %vm10332_vm0 }
 0x671   :  { %v3618_v55 = vpop.permute.xlu1 %3617  ;;  %v3597_v34 = vadd.f32 %v3589_v48, %v10325_v21  ;;  %v3620_v54 = vpop.permute.xlu0 %3619  ;;  %v3598_v63 = vadd.f32 %v3590_v6, %v10326_v4  ;;  %v3599_v30 = vadd.f32 %v3591_v52, %v10327_v16  ;;  %v10336_v52 = vld [vmem:[#allocation93_spill] sm:$0xff] }
 0x672   :  { %v3628_v9 = vsel %vm10329_vm7, %v10328_v35, %v3618_v55  ;;  %v3627_v19 = vsel %vm10330_vm12, %v3618_v55, %v3620_v54  ;;  %vm10337_vm7 = vmmov %vm10335_vm1  ;;  %vm10338_vm12 = vcmp.lt.s32.totalorder %v10248_v62, 120 }
 0x673   :  { %v3636_v25 = vadd.f32 %v3628_v9, %v3596_v45  ;;  %v3637_v3 = vadd.f32 %v3627_v19, %v3597_v34  ;;  %v10339_v34 = vld [vmem:[#allocation122_spill] sm:$0xff]  ;;  %v10342_v19 = vld [vmem:[#allocation81_spill] sm:$0xff] }
 0x675   :  { %v3622_v50 = vpop.permute.xlu1 %3621  ;;  %v3660_v49 = vpop.permute.xlu0 %3659 }
 0x676   :  { %v3626_v57 = vsel %vm10331_vm15, %v3620_v54, %v3622_v50  ;;  %vm10340_vm15 = vmmov %vm10338_vm12 }
 0x677   :  { %v3638_v26 = vadd.f32 %v3626_v57, %v3598_v63  ;;  %v10343_v57 = vld [vmem:[#allocation80_spill] sm:$0xff] }
 0x679   :  { %v3624_v29 = vpop.permute.xlu1 %3623  ;;  %v3698_v31 = vpop.permute.xlu0 %3697 }
 0x67a   :  { %v3625_v7 = vsel %vm10332_vm0, %v3622_v50, %v3624_v29  ;;  %v3632_v1 = vsel %vm10334_vm14, %v3624_v29, %v10333_v13  ;;  %v3708_v54 = vsel %vm10340_vm15, %v10339_v34, %v3698_v31  ;;  %vm10341_vm0 = vmmov %vm10335_vm1  ;;  %v3111_v29 = vsel %vm935_vm2, %v10253_v17, %v10343_v57 }
 0x67b   :  { %v3639_v36 = vadd.f32 %v3625_v7, %v3599_v30  ;;  %v8786_v58 = vadd.f32 %v3632_v1, %v3600_v38  ;;  %vm10345_vm14 = vmmov %vm10341_vm0  ;;  %v3142_v17 = vsel %vm976_vm3, %v10342_v19, %v10283_v12  ;;  %v3110_v12 = vsel %vm935_vm2, %v10343_v57, %v10284_v0  ;;  %v10353_v57 = vld [vmem:[#allocation90_spill] sm:$0xff] }
 0x67c   :  { %vm10352_vm15 = vcmp.lt.s32.totalorder %v10248_v62, 63 }
 0x67d   :  { %v3658_v47 = vpop.permute.xlu1 %3657  ;;  %v3700_v48 = vpop.permute.xlu0 %3699 }
 0x67e   :  { %v3667_v6 = vsel %vm10335_vm1, %v3658_v47, %v3660_v49  ;;  %v3668_v8 = vsel %vm10337_vm7, %v10336_v52, %v3658_v47  ;;  %v3707_v45 = vsel %vm10338_vm12, %v3698_v31, %v3700_v48  ;;  %v10344_v31 = vld [vmem:[#allocation94_spill] sm:$0xff]  ;;  %vm10346_vm1 = vcmp.lt.s32.totalorder %v10248_v62, 119 }
 0x67f   :  { %v3676_v55 = vadd.f32 %v3668_v8, %v3636_v25  ;;  %v3677_v21 = vadd.f32 %v3667_v6, %v3637_v3  ;;  %v3143_v25 = vsel %vm976_vm3, %v10254_v51, %v10342_v19  ;;  %v10348_v8 = vld [vmem:[#allocation45_spill] sm:$0xff]  ;;  %vm10349_vm7 = vcmp.lt.s32.totalorder %v10248_v62, 127 }
 0x680   :  { %v3146_v7 = vadd.f32 %v3143_v25, %v3111_v29  ;;  %v10351_v25 = vld [vmem:[#allocation20_spill] sm:$0xff] }
 0x681   :  { %v3717_v38 = vadd.f32 %v3707_v45, %v3677_v21  ;;  %v3662_v4 = vpop.permute.xlu1 %3661  ;;  %v8798_v63 = vadd.f32 %v3708_v54, %v3676_v55  ;;  %v8800_v16 = vpop.permute.xlu0 %3737  ;;  %v3631_v45 = vsel %vm10349_vm7, %v10333_v13, %v10348_v8  ;;  %vm10365_vm7 = vcmp.lt.s32.totalorder %v10248_v62, 119 }
 0x682   :  { %v3666_v30 = vsel %vm10341_vm0, %v3660_v49, %v3662_v4  ;;  %v3183_v49 = vsel %vm1025_vm4, %v10256_v42, %v10344_v31  ;;  %v10347_v42 = vld [vmem:[#allocation100_spill] sm:$0xff] }
 0x683   :  { %v3678_v9 = vadd.f32 %v3666_v30, %v3638_v26  ;;  %v3223_v6 = vsel %vm1074_vm5, %v10259_v28, %v10347_v42  ;;  %v3186_v55 = vadd.f32 %v3183_v49, %v3146_v7  ;;  %v3182_v28 = vsel %vm1025_vm4, %v10344_v31, %v10285_v5 }
 0x684   :  { %v3222_v0 = vsel %vm1074_vm5, %v10347_v42, %v10287_v56  ;;  %v3303_v5 = vsel %vm10352_vm15, %v10271_v46, %v10351_v25 }
 0x685   :  { %v8808_v3 = vpop.permute.xlu1 %3663  ;;  %v8810_v50 = vpop.permute.xlu0 %3739  ;;  %v3226_v30 = vadd.f32 %v3223_v6, %v3186_v55  ;;  %v10357_v6 = vld [vmem:[#allocation109_spill] sm:$0xff]  ;;  %v10358_v55 = vld [vmem:[#allocation70_spill] sm:$0xff] }
 0x686   :  { %v3665_v26 = vsel %vm10345_vm14, %v3662_v4, %v8808_v3  ;;  %v3747_v51 = vsel %vm10346_vm1, %v8800_v16, %v8810_v50  ;;  %v3147_v4 = vadd.f32 %v3142_v17, %v3110_v12  ;;  %vm10356_vm14 = vmmov %vm10352_vm15  ;;  %vm10373_vm15 = vcmp.lt.s32.totalorder %v10248_v62, 1 }
 0x687   :  { %v8827_v1 = vadd.f32 %v3665_v26, %v3639_v36  ;;  %v8829_v47 = vadd.f32 %v3747_v51, %v3717_v38  ;;  %v3633_v36 = vadd.f32 %v3631_v45, %v3593_v18  ;;  %v10350_v38 = vld [vmem:[#allocation5_spill] sm:$0xff]  ;;  %v10355_v51 = vld [vmem:[#allocation8_spill] sm:$0xff]  ;;  %v3302_v42 = vsel %vm10356_vm14, %v10351_v25, %v10293_v41  ;;  %vm10360_vm1 = vmmov %vm10338_vm12 }
 0x688   :  { %v3263_v13 = vsel %vm1123_vm6, %v10262_v33, %v10350_v38  ;;  %v10354_v33 = vld [vmem:[#allocation48_spill] sm:$0xff]  ;;  %v3262_v56 = vsel %vm1123_vm6, %v10350_v38, %v10290_v53  ;;  %v3343_v46 = vsel %vm1221_vm8, %v10274_v44, %v10355_v51  ;;  %v3383_v45 = vsel %vm1270_vm9, %v10277_v2, %v10357_v6  ;;  %v10362_v25 = vld [vmem:[#allocation119_spill] sm:$0xff] }
 0x689   :  { %v8843_v21 = vpop.permute.xlu1 %3701  ;;  %v8845_v54 = vpop.permute.xlu0 %3777  ;;  %v3671_v29 = vsel %vm10341_vm0, %v10354_v33, %v10353_v57  ;;  %v3266_v31 = vadd.f32 %v3263_v13, %v3226_v30  ;;  %v3342_v41 = vsel %vm1221_vm8, %v10355_v51, %v10297_v20  ;;  %vm10376_vm0 = vmmov %vm10373_vm15  ;;  %vm10381_vm14 = vcmp.lt.s32.totalorder %v10248_v62, 121 }
 0x68a   :  { %v3706_v18 = vsel %vm10338_vm12, %v3700_v48, %v8843_v21  ;;  %v3187_v48 = vadd.f32 %v3182_v28, %v3147_v4  ;;  %v3673_v49 = vadd.f32 %v3671_v29, %v3633_v36  ;;  %v10359_v36 = vld [vmem:[#allocation128_spill] sm:$0xff]  ;;  %v10363_v29 = vld [vmem:[#allocation25_spill] sm:$0xff]  ;;  %vm10367_vm12 = vcmp.lt.s32.totalorder %v10248_v62, 8 }
 0x68b   :  { %v8862_v19 = vadd.f32 %v3706_v18, %v3678_v9  ;;  %v3306_v17 = vadd.f32 %v3303_v5, %v3266_v31  ;;  %v3711_v53 = vsel %vm10360_vm1, %v10359_v36, %v10358_v55  ;;  %v10361_v18 = vld [vmem:[#allocation51_spill] sm:$0xff]  ;;  %v3463_v5 = vsel %vm1368_vm11, %v10288_v32, %v10362_v25 }
 0x68c   :  { %v3227_v7 = vadd.f32 %v3222_v0, %v3187_v48  ;;  %v3713_v44 = vadd.f32 %v3711_v53, %v3673_v49  ;;  %v3423_v2 = vsel %vm1319_vm10, %v10280_v39, %v10361_v18  ;;  %v3382_v0 = vsel %vm1270_vm9, %v10357_v6, %v10300_v40  ;;  %v10364_v48 = vld [vmem:[#allocation125_spill] sm:$0xff]  ;;  %v10368_v6 = vld [vmem:[#allocation40_spill] sm:$0xff] }
 0x68d   :  { %v8876_v9 = vpop.permute.xlu1 %3703  ;;  %v8878_v26 = vpop.permute.xlu0 %3779  ;;  %v3346_v28 = vadd.f32 %v3343_v46, %v3306_v17  ;;  %v3751_v20 = vsel %vm10365_vm7, %v10364_v48, %v10363_v29  ;;  %v3422_v40 = vsel %vm1319_vm10, %v10361_v18, %v10301_v27  ;;  %v10366_v46 = vld [vmem:[#allocation110_spill] sm:$0xff]  ;;  %v10369_v53 = vld [vmem:[#allocation12_spill] sm:$0xff]  ;;  %vm10384_vm7 = vcmp.lt.s32.totalorder %v10248_v62, 120 }
 0x68e   :  { %v3267_v12 = vadd.f32 %v3262_v56, %v3227_v7  ;;  %v3753_v39 = vadd.f32 %v3751_v20, %v3713_v44  ;;  %v3503_v32 = vsel %vm10367_vm12, %v10291_v15, %v10366_v46 }
 0x68f   :  { %v3386_v30 = vadd.f32 %v3383_v45, %v3346_v28  ;;  %v3543_v45 = vsel %vm1466_vm13, %v10306_v24, %v10368_v6 }
 0x690   :  { %v3307_v4 = vadd.f32 %v3302_v42, %v3267_v12  ;;  %v3462_v42 = vsel %vm1368_vm11, %v10362_v25, %v10302_v10  ;;  %v10370_v12 = vld [vmem:[#allocation19_spill] sm:$0xff]  ;;  %vm10371_vm11 = vmmov %vm10367_vm12 }
 0x691   :  { %v8900_v38 = vpop.permute.xlu1 %3741  ;;  %v8902_v13 = vpop.permute.xlu0 %3817  ;;  %v3426_v49 = vadd.f32 %v3423_v2, %v3386_v30  ;;  %v3791_v27 = vsel %vm935_vm2, %v10370_v12, %v10369_v53  ;;  %v3502_v10 = vsel %vm10371_vm11, %v10366_v46, %v10307_v59  ;;  %v10372_v2 = vld [vmem:[#allocation42_spill] sm:$0xff]  ;;  %v10374_v25 = vld [vmem:[#allocation95_spill] sm:$0xff]  ;;  %vm10386_vm12 = vmmov %vm10381_vm14  ;;  %vm10388_vm11 = vcmp.lt.s32.totalorder %v10248_v62, 119 }
 0x692   :  { %v3347_v31 = vadd.f32 %v3342_v41, %v3307_v4  ;;  %v3793_v15 = vadd.f32 %v3791_v27, %v3753_v39  ;;  %v3583_v24 = vsel %vm10373_vm15, %v10317_v43, %v10372_v2  ;;  %v3582_v43 = vsel %vm10376_vm0, %v10372_v2, %v10314_v14  ;;  %v10380_v14 = vld [vmem:[#allocation49_spill] sm:$0xff]  ;;  %vm10389_vm15 = vmmov %vm10384_vm7 }
 0x693   :  { %v3466_v17 = vadd.f32 %v3463_v5, %v3426_v49  ;;  %v10375_v5 = vld [vmem:[#allocation54_spill] sm:$0xff]  ;;  %vm10393_vm0 = vmmov %vm10388_vm11 }
 0x694   :  { %v3387_v7 = vadd.f32 %v3382_v0, %v3347_v31  ;;  %v3542_v0 = vsel %vm1466_vm13, %v10368_v6, %v10310_v11  ;;  %v3831_v20 = vsel %vm976_vm3, %v10375_v5, %v10374_v25  ;;  %vm10378_vm13 = vcmp.lt.s32.totalorder %v10248_v62, 127 }
 0x695   :  { %v8924_v56 = vpop.permute.xlu1 %3743  ;;  %v8926_v51 = vpop.permute.xlu0 %3819  ;;  %v3506_v44 = vadd.f32 %v3503_v32, %v3466_v17  ;;  %v3833_v59 = vadd.f32 %v3831_v20, %v3793_v15  ;;  %v10377_v32 = vld [vmem:[#allocation134_spill] sm:$0xff]  ;;  %vm10382_vm1 = vmmov %vm10378_vm13 }
 0x696   :  { %v3427_v28 = vadd.f32 %v3422_v40, %v3387_v7  ;;  %v3630_v11 = vsel %vm10378_vm13, %v10348_v8, %v10377_v32  ;;  %v3871_v7 = vsel %vm1025_vm4, %v8287_v60, %v8289_v23  ;;  %v3629_v8 = vsel %vm10382_vm1, %v10377_v32, %v10328_v35  ;;  %v10390_v32 = vld [vmem:[#allocation38_spill] sm:$0xff] }
 0x697   :  { %v3546_v30 = vadd.f32 %v3543_v45, %v3506_v44  ;;  %v3873_v45 = vadd.f32 %v3871_v7, %v3833_v59  ;;  %v3670_v44 = vsel %vm10381_vm14, %v10353_v57, %v10380_v14  ;;  %v3669_v35 = vsel %vm10386_vm12, %v10380_v14, %v10336_v52  ;;  %v10391_v7 = vld [vmem:[#allocation66_spill] sm:$0xff]  ;;  %v10392_v14 = vld [vmem:[#allocation55_spill] sm:$0xff] }
 0x698   :  { %v3467_v4 = vadd.f32 %v3462_v42, %v3427_v28  ;;  %v10379_v42 = vld [vmem:[#allocation79_spill] sm:$0xff]  ;;  %v3951_v52 = vsel %vm1123_vm6, %v10391_v7, %v8329_v37  ;;  %vm10399_vm13 = vcmp.lt.s32.totalorder %v10248_v62, 63 }
 0x699   :  { %v8948_v41 = vpop.permute.xlu1 %3781  ;;  %v8950_v18 = vpop.permute.xlu0 %3857  ;;  %v3586_v49 = vadd.f32 %v3583_v24, %v3546_v30  ;;  %v3911_v24 = vsel %vm1074_vm5, %v8303_v22, %v8305_v61  ;;  %vm10410_vm14 = vmmov %vm10399_vm13 }
 0x69a   :  { %v3507_v31 = vadd.f32 %v3502_v10, %v3467_v4  ;;  %v10383_v10 = vld [vmem:[#allocation63_spill] sm:$0xff]  ;;  %v10385_v4 = vld [vmem:[#allocation76_spill] sm:$0xff]  ;;  %vm10417_vm1 = vmmov %vm10399_vm13 }
 0x69b   :  { %v3594_v6 = vadd.f32 %v3586_v49, %v10379_v42  ;;  %v3710_v2 = vsel %vm10384_vm7, %v10358_v55, %v10383_v10  ;;  %v10387_v49 = vld [vmem:[#allocation126_spill] sm:$0xff]  ;;  %vm10425_vm7 = vmmov %vm10393_vm0 }
 0x69c   :  { %v3547_v46 = vadd.f32 %v3542_v0, %v3507_v31  ;;  %v3913_v31 = vadd.f32 %v3911_v24, %v3873_v45  ;;  %v3750_v55 = vsel %vm10388_vm11, %v10363_v29, %v10387_v49  ;;  %v10396_v24 = vld [vmem:[#allocation61_spill] sm:$0xff]  ;;  %vm10426_vm11 = vmmov %vm10389_vm15 }
 0x69d   :  { %v8968_v39 = vpop.permute.xlu1 %3783  ;;  %v8970_v40 = vpop.permute.xlu0 %3859  ;;  %v3634_v15 = vadd.f32 %v3630_v11, %v3594_v6  ;;  %v3790_v11 = vsel %vm935_vm2, %v10369_v53, %v10390_v32 }
 0x69e   :  { %v3587_v17 = vadd.f32 %v3582_v43, %v3547_v46  ;;  %v3709_v46 = vsel %vm10389_vm15, %v10383_v10, %v10339_v34  ;;  %v3953_v45 = vadd.f32 %v3951_v52, %v3913_v31  ;;  %v3749_v34 = vsel %vm10393_vm0, %v10387_v49, %v10392_v14  ;;  %v10395_v10 = vld [vmem:[#allocation135_spill] sm:$0xff]  ;;  %vm10427_vm15 = vmmov %vm10426_vm11 }
 0x69f   :  { %v3674_v0 = vadd.f32 %v3670_v44, %v3634_v15  ;;  %v10394_v44 = vld [vmem:[#allocation11_spill] sm:$0xff] }
 0x6a0   :  { %v3595_v30 = vadd.f32 %v3587_v17, %v10385_v4  ;;  %v3830_v53 = vsel %vm976_vm3, %v10374_v25, %v10394_v44  ;;  %v3870_v4 = vsel %vm1025_vm4, %v8289_v23, %v10396_v24 }
 0x6a1   :  { %v8985_v27 = vpop.permute.xlu1 %3821  ;;  %v8987_v28 = vpop.permute.xlu0 %3897  ;;  %v3714_v43 = vadd.f32 %v3710_v2, %v3674_v0  ;;  %v3789_v2 = vsel %vm935_vm2, %v10390_v32, %v10395_v10  ;;  %v10398_v0 = vld [vmem:[#allocation68_spill] sm:$0xff]  ;;  %v10401_v32 = vld [vmem:[#allocation73_spill] sm:$0xff] }
 0x6a2   :  { %v3635_v59 = vadd.f32 %v3629_v8, %v3595_v30  ;;  %v10397_v30 = vld [vmem:[#allocation46_spill] sm:$0xff]  ;;  %v3910_v23 = vsel %vm1074_vm5, %v8305_v61, %v10401_v32 }
 0x6a3   :  { %v3754_v42 = vadd.f32 %v3750_v55, %v3714_v43  ;;  %v3991_v31 = vsel %vm10399_vm13, %v10398_v0, %v10397_v30  ;;  %v10400_v43 = vld [vmem:[#allocation99_spill] sm:$0xff]  ;;  %vm10428_vm13 = vmmov %vm10393_vm0 }
 0x6a4   :  { %v3675_v17 = vadd.f32 %v3669_v35, %v3635_v59  ;;  %v3993_v59 = vadd.f32 %v3991_v31, %v3953_v45 }
 0x6a5   :  { %v9006_v57 = vpop.permute.xlu1 %3823  ;;  %v9008_v20 = vpop.permute.xlu0 %3899  ;;  %v3794_v8 = vadd.f32 %v3790_v11, %v3754_v42 }
 0x6a6   :  { %v3715_v15 = vadd.f32 %v3709_v46, %v3675_v17  ;;  %v3829_v46 = vsel %vm976_vm3, %v10394_v44, %v10400_v43  ;;  %v10402_v17 = vld [vmem:[#allocation105_spill] sm:$0xff] }
 0x6a7   :  { %v3834_v49 = vadd.f32 %v3830_v53, %v3794_v8  ;;  %v3869_v42 = vsel %vm1025_vm4, %v10396_v24, %v10402_v17  ;;  %v10404_v53 = vld [vmem:[#allocation14_spill] sm:$0xff] }
 0x6a8   :  { %v3755_v35 = vadd.f32 %v3749_v34, %v3715_v15  ;;  %v10403_v34 = vld [vmem:[#allocation65_spill] sm:$0xff]  ;;  %v10405_v15 = vld [vmem:[#allocation71_spill] sm:$0xff] }
 0x6a9   :  { %v9030_v29 = vpop.permute.xlu1 %3861  ;;  %v9032_v6 = vpop.permute.xlu0 %3937  ;;  %v3874_v52 = vadd.f32 %v3870_v4, %v3834_v49  ;;  %v3950_v45 = vsel %vm1123_vm6, %v8329_v37, %v10403_v34  ;;  %v4031_v44 = vsel %vm1221_vm8, %v10405_v15, %v10404_v53  ;;  %v10409_v49 = vld [vmem:[#allocation77_spill] sm:$0xff]  ;;  %v10411_v15 = vld [vmem:[#allocation24_spill] sm:$0xff] }
 0x6aa   :  { %v3795_v11 = vadd.f32 %v3789_v2, %v3755_v35  ;;  %v4033_v4 = vadd.f32 %v4031_v44, %v3993_v59  ;;  %v10408_v35 = vld [vmem:[#allocation136_spill] sm:$0xff]  ;;  %v3990_v37 = vsel %vm10410_vm14, %v10397_v30, %v10409_v49  ;;  %vm10429_vm14 = vmmov %vm10393_vm0 }
 0x6ab   :  { %v3914_v31 = vadd.f32 %v3910_v23, %v3874_v52  ;;  %v3909_v24 = vsel %vm1074_vm5, %v10401_v32, %v10408_v35  ;;  %v10412_v23 = vld [vmem:[#allocation23_spill] sm:$0xff] }
 0x6ac   :  { %v3835_v8 = vadd.f32 %v3829_v46, %v3795_v11  ;;  %v3949_v46 = vsel %vm1123_vm6, %v10403_v34, %v10411_v15  ;;  %v4030_v59 = vsel %vm1221_vm8, %v10404_v53, %v10412_v23  ;;  %v10413_v11 = vld [vmem:[#allocation50_spill] sm:$0xff]  ;;  %v10414_v52 = vld [vmem:[#allocation39_spill] sm:$0xff] }
 0x6ad   :  { %v9054_v25 = vpop.permute.xlu1 %3863  ;;  %v9056_v55 = vpop.permute.xlu0 %3939  ;;  %v3954_v7 = vadd.f32 %v3950_v45, %v3914_v31  ;;  %v4071_v32 = vsel %vm1270_vm9, %v10414_v52, %v10413_v11  ;;  %v10418_v31 = vld [vmem:[#allocation26_spill] sm:$0xff]  ;;  %v10419_v52 = vld [vmem:[#allocation41_spill] sm:$0xff] }
 0x6ae   :  { %v3875_v0 = vadd.f32 %v3869_v42, %v3835_v8  ;;  %v4073_v45 = vadd.f32 %v4071_v32, %v4033_v4  ;;  %v10416_v8 = vld [vmem:[#allocation22_spill] sm:$0xff]  ;;  %v4070_v53 = vsel %vm1270_vm9, %v10413_v11, %v10418_v31 }
 0x6af   :  { %v3994_v22 = vadd.f32 %v3990_v37, %v3954_v7  ;;  %v3989_v34 = vsel %vm10417_vm1, %v10409_v49, %v10416_v8  ;;  %v4029_v7 = vsel %vm1221_vm8, %v10412_v23, %v10419_v52  ;;  %v10422_v37 = vld [vmem:[#allocation62_spill] sm:$0xff]  ;;  %v10424_v52 = vld [vmem:[#allocation56_spill] sm:$0xff] }
 0x6b0   :  { %v3915_v44 = vadd.f32 %v3909_v24, %v3875_v0  ;;  %v10420_v0 = vld [vmem:[#allocation52_spill] sm:$0xff]  ;;  %v10421_v24 = vld [vmem:[#allocation53_spill] sm:$0xff] }
 0x6b1   :  { %v9078_v61 = vpop.permute.xlu1 %3901  ;;  %v9080_v2 = vpop.permute.xlu0 %3977  ;;  %v4111_v4 = vsel %vm1319_vm10, %v10421_v24, %v10420_v0  ;;  %v4110_v49 = vsel %vm1319_vm10, %v10420_v0, %v10422_v37  ;;  %v3712_v0 = vsel %vm10427_vm15, %v8876_v9, %v10359_v36 }
 0x6b2   :  { %10406 = vst [vmem:[#allocation35_spill] sm:$0xff] %v9078_v61  ;;  %10407 = vst [vmem:[#allocation43_spill] sm:$0xff] %v9080_v2  ;;  %v3955_v2 = vadd.f32 %v3949_v46, %v3915_v44  ;;  %v4034_v61 = vadd.f32 %v4030_v59, %v3994_v22  ;;  %v9130_v46 = vadd.f32 %v4111_v4, %v4073_v45  ;;  %v10423_v59 = vld [vmem:[#allocation21_spill] sm:$0xff] }
 0x6b3   :  { %v4069_v23 = vsel %vm1270_vm9, %v10418_v31, %v10423_v59  ;;  %v3672_v45 = vsel %vm10386_vm12, %v8808_v3, %v10354_v33 }
 0x6b4   :  { %v3995_v32 = vadd.f32 %v3989_v34, %v3955_v2  ;;  %v4109_v2 = vsel %vm1319_vm10, %v10422_v37, %v10424_v52  ;;  %v3680_v33 = vadd.f32 %v3672_v45, %v8786_v58  ;;  %v3828_v58 = vsel %vm976_vm3, %v10400_v43, %v8902_v13 }
 0x6b5   :  { %v9102_v30 = vpop.permute.xlu1 %3903  ;;  %v9104_v42 = vpop.permute.xlu0 %3979 }
 0x6b6   :  { %10415 = vst [vmem:[#allocation32_spill] sm:$0xff] %v9104_v42  ;;  %v4074_v42 = vadd.f32 %v4070_v53, %v4034_v61  ;;  %v4035_v44 = vadd.f32 %v4029_v7, %v3995_v32  ;;  %v3748_v61 = vsel %vm10425_vm7, %v10392_v14, %v8800_v16  ;;  %v3788_v7 = vsel %vm935_vm2, %v10395_v10, %v8845_v54 }
 0x6b7   :  { %v3705_v16 = vsel %vm10426_vm11, %v8843_v21, %v8876_v9  ;;  %v3756_v3 = vadd.f32 %v3748_v61, %v8798_v63  ;;  %v3787_v10 = vsel %vm935_vm2, %v8845_v54, %v8878_v26  ;;  %v3746_v21 = vsel %vm10393_vm0, %v8810_v50, %v8900_v38 }
 0x6b8   :  { %v9136_v24 = vadd.f32 %v4110_v49, %v4074_v42  ;;  %v4075_v34 = vadd.f32 %v4069_v23, %v4035_v44  ;;  %v3745_v63 = vsel %vm10428_vm13, %v8900_v38, %v8924_v56  ;;  %v3719_v36 = vadd.f32 %v3705_v16, %v8827_v1 }
 0x6b9   :  { %v9126_v11 = vpop.permute.xlu1 %3941  ;;  %v9128_v22 = vpop.permute.xlu0 %3983  ;;  %v3796_v9 = vadd.f32 %v3788_v7, %v3756_v3  ;;  %v3752_v54 = vsel %vm10429_vm14, %v8924_v56, %v10364_v48  ;;  %v3720_v43 = vadd.f32 %v3712_v0, %v3680_v33  ;;  %v3827_v38 = vsel %vm976_vm3, %v8902_v13, %v8926_v51 }
 0x6ba   :  { %v4121_v53 = vadd.f32 %v9136_v24, %v9130_v46  ;;  %v9164_v14 = vadd.f32 %v4109_v2, %v4075_v34  ;;  %v3786_v1 = vsel %vm935_vm2, %v8878_v26, %v8948_v41  ;;  %v3868_v48 = vsel %vm1025_vm4, %v10402_v17, %v8950_v18 }
 0x6bb   :  { %v3797_v56 = vadd.f32 %v3787_v10, %v8829_v47  ;;  %v3758_v49 = vadd.f32 %v3746_v21, %v8862_v19  ;;  %v3836_v32 = vadd.f32 %v3828_v58, %v3796_v9  ;;  %v3759_v23 = vadd.f32 %v3745_v63, %v3719_v36  ;;  %v10430_v58 = vld [vmem:[#allocation35_spill] sm:$0xff] }
 0x6bc   :  { %v9198_v37 = vadd.f32 %v4121_v53, %v9164_v14  ;;  %v3760_v44 = vadd.f32 %v3752_v54, %v3720_v43  ;;  %v3785_v13 = vsel %vm935_vm2, %v8948_v41, %v8968_v39  ;;  %v3792_v26 = vsel %vm935_vm2, %v8968_v39, %v10370_v12  ;;  %v10431_v63 = vld [vmem:[#allocation43_spill] sm:$0xff]  ;;  %vm10432_vm2 = vmmov %vm10417_vm1  ;;  %v10433_v54 = vld [vmem:[#allocation58_spill] sm:$0xff] }
 0x6bd   :  { %v9150_v31 = vpop.permute.xlu1 %3943  ;;  %v9152_v42 = vpop.permute.xlu0 %4017  ;;  %v3867_v47 = vsel %vm1025_vm4, %v8950_v18, %v8970_v40  ;;  %v3837_v17 = vadd.f32 %v3827_v38, %v3797_v56  ;;  %v3798_v19 = vadd.f32 %v3786_v1, %v3758_v49  ;;  %v3876_v2 = vadd.f32 %v3868_v48, %v3836_v32  ;;  %v10434_v38 = vld [vmem:[#allocation32_spill] sm:$0xff]  ;;  %v10436_v1 = vld [vmem:[#allocation41_spill] sm:$0xff] }
 0x6be   :  { %v3826_v61 = vsel %vm976_vm3, %v8926_v51, %v8985_v27  ;;  %v3908_v12 = vsel %vm1074_vm5, %v10408_v35, %v8987_v28  ;;  %v3825_v18 = vsel %vm976_vm3, %v8985_v27, %v9006_v57  ;;  %v3832_v39 = vsel %vm976_vm3, %v9006_v57, %v10375_v5  ;;  %vm10435_vm3 = vmmov %vm10417_vm1 }
 0x6bf   :  { %v3907_v51 = vsel %vm1074_vm5, %v8987_v28, %v9008_v20  ;;  %v3799_v34 = vadd.f32 %v3785_v13, %v3759_v23  ;;  %v3800_v53 = vadd.f32 %v3792_v26, %v3760_v44  ;;  %v3877_v7 = vadd.f32 %v3867_v47, %v3837_v17  ;;  %v10437_v23 = vld [vmem:[#allocation66_spill] sm:$0xff] }
 0x6c0   :  { %v3866_v35 = vsel %vm1025_vm4, %v8970_v40, %v9030_v29  ;;  %v3838_v16 = vadd.f32 %v3826_v61, %v3798_v19  ;;  %v3948_v27 = vsel %vm1123_vm6, %v10411_v15, %v9032_v6  ;;  %v3865_v5 = vsel %vm1025_vm4, %v9030_v29, %v9054_v25 }
 0x6c1   :  { %v9193_v4 = vpop.permute.xlu1 %3981  ;;  %v9195_v50 = vpop.permute.xlu0 %4021  ;;  %v3872_v28 = vsel %vm1025_vm4, %v9054_v25, %v8287_v60  ;;  %v3916_v57 = vadd.f32 %v3908_v12, %v3876_v2  ;;  %v3839_v3 = vadd.f32 %v3825_v18, %v3799_v34  ;;  %v3840_v33 = vadd.f32 %v3832_v39, %v3800_v53  ;;  %vm10438_vm4 = vmmov %vm10417_vm1 }
 0x6c2   :  { %v3917_v40 = vadd.f32 %v3907_v51, %v3877_v7  ;;  %v3878_v21 = vadd.f32 %v3866_v35, %v3838_v16  ;;  %v3947_v15 = vsel %vm1123_vm6, %v9032_v6, %v9056_v55  ;;  %v3906_v29 = vsel %vm1074_vm5, %v9008_v20, %v10430_v58  ;;  %v10440_v51 = vld [vmem:[#allocation68_spill] sm:$0xff] }
 0x6c3   :  { %v3988_v60 = vsel %vm10432_vm2, %v10416_v8, %v10431_v63  ;;  %v3956_v25 = vadd.f32 %v3948_v27, %v3916_v57  ;;  %v3879_v9 = vadd.f32 %v3865_v5, %v3839_v3  ;;  %v3880_v36 = vadd.f32 %v3872_v28, %v3840_v33  ;;  %v10442_v33 = vld [vmem:[#allocation71_spill] sm:$0xff] }
 0x6c4   :  { %v3912_v43 = vsel %vm1074_vm5, %v9102_v30, %v10433_v54  ;;  %v3905_v6 = vsel %vm1074_vm5, %v10430_v58, %v9102_v30  ;;  %v3987_v20 = vsel %vm10435_vm3, %v10431_v63, %v10434_v38  ;;  %v3946_v8 = vsel %vm1123_vm6, %v9056_v55, %v9126_v11  ;;  %vm10439_vm5 = vmmov %vm10417_vm1  ;;  %v10443_v63 = vld [vmem:[#allocation39_spill] sm:$0xff] }
 0x6c5   :  { %v9230_v45 = vpop.permute.xlu0 %4023  ;;  %v4020_v41 = vpop.permute.xlu1 %4019  ;;  %v4028_v48 = vsel %vm1221_vm8, %v10436_v1, %v9152_v42  ;;  %v3957_v56 = vadd.f32 %v3947_v15, %v3917_v40  ;;  %v3918_v49 = vadd.f32 %v3906_v29, %v3878_v21  ;;  %v3996_v32 = vadd.f32 %v3988_v60, %v3956_v25 }
 0x6c6   :  { %v3952_v30 = vsel %vm1123_vm6, %v9150_v31, %v10437_v23  ;;  %v3920_v26 = vadd.f32 %v3912_v43, %v3880_v36  ;;  %v3945_v55 = vsel %vm1123_vm6, %v9126_v11, %v9150_v31  ;;  %v3986_v47 = vsel %vm10438_vm4, %v10434_v38, %v9193_v4  ;;  %vm10441_vm6 = vmmov %vm10417_vm1 }
 0x6c7   :  { %v3919_v19 = vadd.f32 %v3905_v6, %v3879_v9  ;;  %v3997_v2 = vadd.f32 %v3987_v20, %v3957_v56  ;;  %v3958_v61 = vadd.f32 %v3946_v8, %v3918_v49  ;;  %v4036_v12 = vadd.f32 %v4028_v48, %v3996_v32  ;;  %v10444_v6 = vld [vmem:[#allocation53_spill] sm:$0xff] }
 0x6c8   :  { %v3960_v18 = vadd.f32 %v3952_v30, %v3920_v26  ;;  %v3985_v39 = vsel %vm10439_vm5, %v9193_v4, %v9128_v22  ;;  %v4026_v11 = vsel %vm1221_vm8, %v4020_v41, %v9195_v50  ;;  %v4027_v31 = vsel %vm1221_vm8, %v9152_v42, %v4020_v41 }
 0x6c9   :  { %v4058_v0 = vpop.permute.xlu0 %4057  ;;  %v4060_v10 = vpop.permute.xlu1 %4059  ;;  %v3959_v34 = vadd.f32 %v3945_v55, %v3919_v19  ;;  %v3998_v53 = vadd.f32 %v3986_v47, %v3958_v61  ;;  %v4025_v4 = vsel %vm1221_vm8, %v9195_v50, %v9230_v45  ;;  %v4037_v5 = vadd.f32 %v4027_v31, %v3997_v2 }
 0x6ca   :  { %v4068_v17 = vsel %vm1270_vm9, %v10423_v59, %v4058_v0  ;;  %v3992_v59 = vsel %vm10441_vm6, %v9128_v22, %v10440_v51  ;;  %v4067_v27 = vsel %vm1270_vm9, %v4058_v0, %v4060_v10  ;;  %v4032_v50 = vsel %vm1221_vm8, %v9230_v45, %v10442_v33 }
 0x6cb   :  { %v4076_v7 = vadd.f32 %v4068_v17, %v4036_v12  ;;  %v3999_v41 = vadd.f32 %v3985_v39, %v3959_v34  ;;  %v4038_v28 = vadd.f32 %v4026_v11, %v3998_v53  ;;  %v4000_v3 = vadd.f32 %v3992_v59, %v3960_v18 }
 0x6cc   :  { %v4077_v21 = vadd.f32 %v4067_v27, %v4037_v5  ;;  %vm10445_vm8 = vcmask 1043456   ;;  %vm10449_vm7 = vcmask 64512  }
 0x6cd   :  { %v4062_v44 = vpop.permute.xlu0 %4061  ;;  %v4064_v13 = vpop.permute.xlu1 %4063  ;;  %v4040_v9 = vadd.f32 %v4032_v50, %v4000_v3  ;;  %vm10448_vm1 = vmmov %vm10445_vm8 }
 0x6ce   :  { %v4066_v42 = vsel %vm1270_vm9, %v4060_v10, %v4062_v44  ;;  %v4065_v40 = vsel %vm1270_vm9, %v4062_v44, %v4064_v13  ;;  %v4039_v10 = vadd.f32 %v4025_v4, %v3999_v41  ;;  %v4072_v60 = vsel %vm1270_vm9, %v4064_v13, %v10443_v63  ;;  %vm10446_vm9 = vmmov %vm10445_vm8 }
 0x6cf   :  { %v4078_v15 = vadd.f32 %v4066_v42, %v4038_v28  ;;  %vm10450_vm12 = vmmov %vm10449_vm7 }
 0x6d0   :  { %v4079_v36 = vadd.f32 %v4065_v40, %v4039_v10  ;;  %vm10452_vm11 = vmmov %vm10448_vm1 }
 0x6d1   :  { %v4098_v35 = vpop.permute.xlu1 %4097  ;;  %v4100_v16 = vpop.permute.xlu0 %4099  ;;  %vm10453_vm15 = vmmov %vm10448_vm1 }
 0x6d2   :  { %v4108_v22 = vsel %vm1319_vm10, %v10424_v52, %v4098_v35  ;;  %v4107_v0 = vsel %vm1319_vm10, %v4098_v35, %v4100_v16  ;;  %vm10454_vm0 = vmmov %vm10448_vm1 }
 0x6d3   :  { %v4116_v57 = vadd.f32 %v4108_v22, %v4076_v7  ;;  %v4117_v54 = vadd.f32 %v4107_v0, %v4077_v21  ;;  %v4190_v7 = vld [vmem:[%s9394_s4] sm:$0x7]  ;;  %vm10455_vm13 = vmmov %vm10454_vm0 }
 0x6d4   :  { %vm10456_vm14 = vmmov %vm10449_vm7 }
 0x6d5   :  { %v4102_v52 = vpop.permute.xlu1 %4101  ;;  %v4104_v58 = vpop.permute.xlu0 %4103  ;;  %v4123_v29 = vadd.f32 %v9198_v37, %v4116_v57  ;;  %v4080_v37 = vadd.f32 %v4072_v60, %v4040_v9  ;;  %v4181_v60 = vld [vmem:[%s9393_s3] sm:$0x3]  ;;  %vm10457_vm2 = vmmov %vm10449_vm7 }
 0x6d6   :  { %v4106_v45 = vsel %vm1319_vm10, %v4100_v16, %v4102_v52  ;;  %v4105_v25 = vsel %vm1319_vm10, %v4102_v52, %v4104_v58  ;;  %v4112_v38 = vsel %vm1319_vm10, %v4104_v58, %v10444_v6  ;;  %vm10447_vm10 = vmmov %vm10445_vm8 }
 0x6d7   :  { %v4118_v43 = vadd.f32 %v4106_v45, %v4078_v15  ;;  %4124 = vadd.xlane.f32.xlu1 %v4123_v29  ;;  %v4119_v8 = vadd.f32 %v4105_v25, %v4079_v36  ;;  %v4120_v1 = vadd.f32 %v4112_v38, %v4080_v37  ;;  %v10451_v37 = vmov 0  }
 0x6d9   :  { %v4151_v20 = vadd.f32 %v4118_v43, %v4117_v54 }
 0x6db   :  { %v4152_v48 = vadd.f32 %v4151_v20, %v4119_v8 }
 0x6dd   :  { %v4153_v56 = vadd.f32 %v4152_v48, %v4120_v1 }
 0x6df   :  { %4154 = vadd.xlane.f32.xlu0 %v4153_v56 }
 0x764   :  { %v4125_v49 = vpop.xlane.xlu1 %4124 }
 0x765   :  { %v4126_v32 = vmul.f32 0.001953125, %v4125_v49 }
 0x767   :  { %v4127_v23 = vsub.f32 %v9130_v46, %v4126_v32  ;;  %v4128_v30 = vsub.f32 %v9136_v24, %v4126_v32  ;;  %v4129_v44 = vsub.f32 %v9164_v14, %v4126_v32  ;;  %v4130_v13 = vsub.f32 %v4116_v57, %v4126_v32 }
 0x769   :  { %v4131_v26 = vmul.f32 %v4127_v23, %v4127_v23  ;;  %v4132_v55 = vmul.f32 %v4128_v30, %v4128_v30  ;;  %v4133_v62 = vmul.f32 %v4129_v44, %v4129_v44  ;;  %v4134_v2 = vmul.f32 %v4130_v13, %v4130_v13 }
 0x76b   :  { %v4135_v47 = vadd.f32 %v4132_v55, %v4131_v26 }
 0x76c   :  { %v4155_v17 = vpop.xlane.xlu0 %4154 }
 0x76d   :  { %v4156_v19 = vmul.f32 0.001953125, %v4155_v17  ;;  %v4136_v61 = vadd.f32 %v4135_v47, %v4133_v62 }
 0x76f   :  { %v4157_v12 = vsub.f32 %v4117_v54, %v4156_v19  ;;  %v4158_v18 = vsub.f32 %v4118_v43, %v4156_v19  ;;  %v4159_v39 = vsub.f32 %v4119_v8, %v4156_v19  ;;  %v4137_v11 = vadd.f32 %v4136_v61, %v4134_v2 }
 0x770   :  { %v4160_v31 = vsub.f32 %v4120_v1, %v4156_v19 }
 0x771   :  { %4138 = vadd.xlane.f32.xlu0 %v4137_v11  ;;  %v4161_v46 = vmul.f32 %v4157_v12, %v4157_v12  ;;  %v4162_v51 = vmul.f32 %v4158_v18, %v4158_v18  ;;  %v4163_v24 = vmul.f32 %v4159_v39, %v4159_v39 }
 0x772   :  { %v4164_v14 = vmul.f32 %v4160_v31, %v4160_v31 }
 0x773   :  { %v4165_v59 = vadd.f32 %v4162_v51, %v4161_v46 }
 0x775   :  { %v4166_v34 = vadd.f32 %v4165_v59, %v4163_v24 }
 0x777   :  { %v4167_v53 = vadd.f32 %v4166_v34, %v4164_v14 }
 0x779   :  { %4168 = vadd.xlane.f32.xlu1 %v4167_v53 }
 0x787   :  { %4193 = vperm.xlu0 %4591, %v4190_v7  }
 0x7fe   :  { %v4139_v35 = vpop.xlane.xlu0 %4138 }
 0x7ff   :  { %v4140_v16 = vmul.f32 0.001953125, %v4139_v35 }
 0x801   :  { %v4141_v4 = vadd.f32 1e-05, %v4140_v16 }
 0x803   :  { %4624 = vrsqrt.f32 %v4141_v4 }
 0x806   :  { %v4169_v27 = vpop.xlane.xlu1 %4168  ;;  %v4194_v32 = vpop.permute.xlu0 %4193 }
 0x807   :  { %v4170_v42 = vmul.f32 0.001953125, %v4169_v27 }
 0x809   :  { %v4171_v22 = vadd.f32 1e-05, %v4170_v42 }
 0x80b   :  { %4626 = vrsqrt.f32 %v4171_v22 }
 0x80d   :  { %v4625_v41 = vpop.eup %4624 }
 0x80e   :  { %v4144_v5 = vmul.f32 %v4625_v41, %v4128_v30  ;;  %v4146_v28 = vmul.f32 %v4625_v41, %v4130_v13  ;;  %v4143_v57 = vmul.f32 %v4625_v41, %v4127_v23  ;;  %v4145_v3 = vmul.f32 %v4625_v41, %v4129_v44 }
 0x810   :  { %v4148_v33 = vmax.f32 %v4144_v5, 0.0  ;;  %v4150_v50 = vmax.f32 %v4146_v28, 0.0  ;;  %v4147_v40 = vmax.f32 %v4143_v57, 0.0  ;;  %v4149_v0 = vmax.f32 %v4145_v3, 0.0 }
 0x812   :  { %v4183_v10 = vpack.c.bf16 %v4148_v33, %v4148_v33  ;;  %v4185_v21 = vpack.c.bf16 %v4150_v50, %v4150_v50  ;;  %v4182_v15 = vpack.c.bf16 %v4147_v40, %v4147_v40  ;;  %v4184_v52 = vpack.c.bf16 %v4149_v0, %v4149_v0 }
 0x814   :  { %4561 = vmatprep.subr.msk.bf16.mxu0 %vm10445_vm8, %v4183_v10  ;;  %4563 = vmatprep.subr.msk.bf16.mxu1 %vm10446_vm9, %v4185_v21  ;;  %v4200_v58 = vsel %vm10447_vm10, %v4182_v15, 0  ;;  %v4206_v29 = vsel %vm10448_vm1, %v4184_v52, 0 }
 0x815   :  { %v4627_v63 = vpop.eup %4626  ;;  %4224 = vmatpush1.bf16.msra.mxu0 %v4200_v58  ;;  %4265 = vmatpush1.bf16.msra.mxu1 %v4206_v29 }
 0x816   :  { %v4174_v45 = vmul.f32 %v4627_v63, %v4158_v18  ;;  %v4176_v25 = vmul.f32 %v4627_v63, %v4160_v31  ;;  %v4173_v9 = vmul.f32 %v4627_v63, %v4157_v12  ;;  %v4175_v36 = vmul.f32 %v4627_v63, %v4159_v39 }
 0x818   :  { %v4178_v54 = vmax.f32 %v4174_v45, 0.0  ;;  %v4180_v43 = vmax.f32 %v4176_v25, 0.0  ;;  %4562 = vmatmul.mubr.msk.bf16.vlgmr.msra.gmra.mrb[224].mxu0 %vm10449_vm7, %v4181_v60  ;;  %4564 = vmatmul.mubr.msk.bf16.vlgmr.msra.gmra.mrb[224].mxu1 %vm10450_vm12, %v4181_v60  ;;  %v4177_v6 = vmax.f32 %v4173_v9, 0.0  ;;  %v4179_v38 = vmax.f32 %v4175_v36, 0.0 }
 0x819   :  { %4337 = vmatprep.mubr.bf16.mxu0 %v10451_v37  ;;  %4378 = vmatprep.mubr.bf16.mxu1 %v10451_v37 }
 0x81a   :  { %v4187_v20 = vpack.c.bf16 %v4178_v54, %v4178_v54  ;;  %v4189_v8 = vpack.c.bf16 %v4180_v43, %v4180_v43  ;;  %v4186_v1 = vpack.c.bf16 %v4177_v6, %v4177_v6  ;;  %v4188_v48 = vpack.c.bf16 %v4179_v38, %v4179_v38 }
 0x81c   :  { %4565 = vmatprep.subr.msk.bf16.mxu0 %vm10452_vm11, %v4187_v20  ;;  %4567 = vmatprep.subr.msk.bf16.mxu1 %vm10453_vm15, %v4189_v8  ;;  %v4212_v56 = vsel %vm10454_vm0, %v4186_v1, 0  ;;  %v4218_v49 = vsel %vm10455_vm13, %v4188_v48, 0 }
 0x81d   :  { %4306 = vmatpush1.bf16.msra.mxu0 %v4212_v56  ;;  %4347 = vmatpush1.bf16.msra.mxu1 %v4218_v49 }
 0x820   :  { %4566 = vmatmul.mubr.msk.bf16.vlgmr.msra.gmra.mrb[228].mxu0 %vm10456_vm14, %v4181_v60  ;;  %4568 = vmatmul.mubr.msk.bf16.vlgmr.msra.gmra.mrb[228].mxu1 %vm10457_vm2, %v4181_v60 }
 0x8eb   :  { %v4257_v23 = vpop.f32.mrb[224].mxu0  ;;  %v4298_v30 = vpop.f32.mrb[224].mxu1 }
 0x8ec   :  { %v4259_v44 = vpop.f32.mrb[225].mxu0  ;;  %v4300_v13 = vpop.f32.mrb[225].mxu1  ;;  %v4258_v26 = vadd.f32 %v4257_v23, %v4194_v32  ;;  %v4299_v55 = vadd.f32 %v4298_v30, %v4194_v32 }
 0x8ed   :  { %v4261_v62 = vpop.f32.mrb[226].mxu0  ;;  %v4302_v47 = vpop.f32.mrb[226].mxu1  ;;  %v4260_v17 = vadd.f32 %v4259_v44, %v4194_v32  ;;  %v4301_v19 = vadd.f32 %v4300_v13, %v4194_v32 }
 0x8ee   :  { %v4303_v2 = vpop.f32.mrb[227].mxu1  ;;  %v4262_v61 = vpop.f32.mrb[227].mxu0 }
 0x8ef   :  { %v4391_v12 = vcombine.low %v4258_v26, %v4260_v17  ;;  %v4392_v18 = vcombine.low %v4299_v55, %v4301_v19 }
 0x8f1   :  { %4395 = vst [vmem:[%s9396_s6] sm:$0x77] %v4391_v12  ;;  %4396 = vst [vmem:[%s9396_s6 + $0x8] sm:$0x77] %v4392_v18 }
 0x8f3   :  { %v4339_v39 = vpop.f32.mrb[228].mxu0  ;;  %v4380_v11 = vpop.f32.mrb[228].mxu1 }
 0x8f4   :  { %v4340_v31 = vadd.f32 %v4339_v39, %v4194_v32  ;;  %v4381_v46 = vadd.f32 %v4380_v11, %v4194_v32  ;;  %v4341_v51 = vpop.f32.mrb[229].mxu0  ;;  %v4382_v24 = vpop.f32.mrb[229].mxu1 }
 0x8f5   :  { %v4342_v59 = vadd.f32 %v4341_v51, %v4194_v32  ;;  %v4383_v14 = vadd.f32 %v4382_v24, %v4194_v32  ;;  %v4343_v34 = vpop.f32.mrb[230].mxu0  ;;  %v4384_v53 = vpop.f32.mrb[230].mxu1 }
 0x8f6   :  { %v4344_v7 = vpop.f32.mrb[231].mxu0  ;;  %v4385_v35 = vpop.f32.mrb[231].mxu1 }
 0x8f7   :  { %v4401_v16 = vcombine.low %v4340_v31, %v4342_v59  ;;  %v4402_v4 = vcombine.low %v4381_v46, %v4383_v14 }
 0x8f9   :  { %4569 = vst [vmem:[%s9396_s6 + $0x10] sm:$0x77] %v4401_v16  ;;  %4570 = vst [vmem:[%s9396_s6 + $0x18] sm:$0x77] %v4402_v4 }
 0x8fa   :  { %4412 = vsyncpa [#allocation3], 1 }

</bundles_post_ra>
